<compile_context>
chip_gen: v7x
topology: tpu7x:2x2x1
jax: 0.10.0
libtpu: 0.0.40
codegen_flags: <defaults>
</compile_context>

<pallas_src>
import functools

import jax
import jax.numpy as jnp
from jax import lax
from jax.experimental import pallas as pl
from jax.experimental.pallas import tpu as pltpu


# ---------------------------------------------------------------------------
# tiling helpers
# ---------------------------------------------------------------------------
def _batch_tile(n, target):
    """Largest divisor of n <= target; split once more if it would give a single grid step
    (so both v7x TensorCores get work whenever n > 1)."""
    b = min(target, n)
    while n % b:
        b -= 1
    if n // b < 2 and b > 1:
        for cand in range(b - 1, 0, -1):
            if n % cand == 0:
                return cand
    return b


def _fc_batch_tile(n, target):
    """Batch tile for the FC kernel: == n, or a multiple of 8 dividing n."""
    if n <= target:
        return n
    b = (target // 8) * 8
    while b >= 8:
        if n % b == 0:
            return b
        b -= 8
    return n


# ---------------------------------------------------------------------------
# Stage 1: conv1(5x5, pad 2) + bias + ReLU + MaxPool(3, s=3, p=1), fused.
#
# Input rows are a pool-window-ordered im2col (built by XLA; Cin=1 so it is tiny):
#   row (b, j, r) with j = dh*3+dw in [0,9), r = ho*10+wo in [0,100)
#   holds the 25 (K->32) input taps of conv-output pixel (clamp(3ho-1+dh), clamp(3wo-1+dw)).
# The kernel does ONE (900,32)x(32,128) matmul per image, takes the 9-way max over the
# contiguous j-groups (== the 3x3 pool, edge clamping just duplicates entries), adds bias,
# applies ReLU, and scatters the pooled 10x10 map into conv2's zero-padded (15,14) layout.
# ---------------------------------------------------------------------------
def _conv1_pool1_kernel(p_ref, w_ref, b_ref, o_ref, *, n_img):
    # p_ref: (n_img, 900, 32) bf16 ; w_ref: (32, 128) bf16 ; b_ref: (1, 128) f32
    # o_ref: (n_img, 210, 128) bf16  -- rows = hp*14 + wp of the zero-padded pool1 map
    o_ref[...] = jnp.zeros_like(o_ref)          # conv2's zero padding (and unused border)
    for b in range(n_img):
        # all 25 conv taps folded into a single MXU matmul
        y = jnp.dot(p_ref[b], w_ref[...], preferred_element_type=jnp.float32)   # (900,128)
        m = y[0:100, :]
        for j in range(1, 9):                    # 3x3/s3 pool = max over 9 contiguous groups
            m = jnp.maximum(m, y[j * 100:(j + 1) * 100, :])
        # bias + ReLU commute with max (same bias for every window entry, ReLU monotone)
        m = jnp.maximum(m + b_ref[...], 0.0).astype(o_ref.dtype)                # (100,128)
        for ho in range(10):                     # scatter row ho -> padded rows (ho+2, wo+2)
            o_ref[b, pl.ds((ho + 2) * 14 + 2, 10), :] = m[ho * 10:(ho + 1) * 10, :]


def conv1_pool1(x_nhwc, w1, b1, *, img_tile=8):
    """x_nhwc: (N, 28, 28, 1) bf16 -> zero-padded pool1 maps (N, 210, 128) bf16."""
    N = x_nhwc.shape[0]
    xp = jnp.pad(x_nhwc, ((0, 0), (2, 2), (2, 2), (0, 0)))                      # (N,32,32,1)
    # standard im2col via 25 static shifted slices (Cin=1 -> ~40 KiB / image)
    taps = [xp[:, kh:kh + 28, kw:kw + 28, 0] for kh in range(5) for kw in range(5)]
    pstd = jnp.stack(taps, axis=-1)                                              # (N,28,28,25)
    # reorder rows by pool window (dh, dw, ho, wo); clamped indices duplicate edge pixels
    o = jnp.arange(10)
    d = jnp.arange(3)
    cc = jnp.clip(3 * o[None, :] - 1 + d[:, None], 0, 27).reshape(30)            # (d*10+o,)
    g = jnp.take(jnp.take(pstd, cc, axis=1), cc, axis=2)                         # (N,30,30,25)
    g = g.reshape(N, 3, 10, 3, 10, 25).transpose(0, 1, 3, 2, 4, 5).reshape(N, 900, 25)
    lhs = jnp.pad(g, ((0, 0), (0, 0), (0, 7)))                                   # K 25 -> 32
    B = _batch_tile(N, img_tile)
    return pl.pallas_call(
        functools.partial(_conv1_pool1_kernel, n_img=B),
        out_shape=jax.ShapeDtypeStruct((N, 210, 128), jnp.bfloat16),
        grid=(N // B,),
        in_specs=[
            pl.BlockSpec((B, 900, 32), lambda i: (i, 0, 0)),
            pl.BlockSpec((32, 128), lambda i: (0, 0)),
            pl.BlockSpec((1, 128), lambda i: (0, 0)),
        ],
        out_specs=pl.BlockSpec((B, 210, 128), lambda i: (i, 0, 0)),
        compiler_params=pltpu.CompilerParams(dimension_semantics=("parallel",)),
    )(lhs, w1, b1)


# ---------------------------------------------------------------------------
# Stage 2: conv2(5x5, pad 2) + bias + ReLU + MaxPool(3, s=3, p=1), fused.
#
# The 25-tap im2col is built inside the kernel (VMEM scratch) from the resident zero-padded
# (15,14,128) input block — no XLA patch materialization in HBM.  Conv is computed on the
# "wide" 10x14 row grid (garbage columns wp>=10 are never read) so every tap is a contiguous
# row slice; one K=3200 matmul per image.  The 3x3/s3/p1 pool runs in the epilogue on the
# VMEM-resident result using contiguous-row groups (2,3,3,2) — exact, no padding values.
# ---------------------------------------------------------------------------
_POOL_GROUPS = ((0, 2), (2, 3), (5, 3), (8, 2))   # 3x3/s3/p1 windows over a length-10 axis


def _conv2_pool2_kernel(x_ref, w_ref, b_ref, o_ref, lhs_ref, acc_ref, *, n_img):
    # x_ref : (n_img, 210, 128) bf16   zero-padded pool1 maps (rows hp*14+wp, 15x14 grid)
    # w_ref : (3200, 256) bf16         rows = (kh*5+kw)*128 + cin
    # b_ref : (1, 256) f32
    # o_ref : (n_img, 16, 256) bf16    pool2 output, rows = ho*4+wo
    # lhs_ref: (n_img, 140, 3200) bf16 scratch im2col (built from VMEM, never touches HBM)
    # acc_ref: (n_img, 140, 256) f32   scratch relu(conv2+bias) on the wide 10x14 grid
    for kh in range(5):
        for kw in range(5):
            tap = kh * 5 + kw
            lhs_ref[:, :, pl.ds(tap * 128, 128)] = x_ref[:, pl.ds(kh * 14 + kw, 140), :]
    for b in range(n_img):
        y = jnp.dot(lhs_ref[b], w_ref[...], preferred_element_type=jnp.float32)  # (140,256)
        acc_ref[b] = jnp.maximum(y + b_ref[...], 0.0)
    # fused max-pool: height groups are contiguous 14-row blocks, then width within the row
    for ho, (h0, hl) in enumerate(_POOL_GROUPS):
        blk = acc_ref[:, pl.ds(h0 * 14, 14), :]
        for dh in range(1, hl):
            blk = jnp.maximum(blk, acc_ref[:, pl.ds((h0 + dh) * 14, 14), :])
        for wo, (w0, wl) in enumerate(_POOL_GROUPS):
            v = blk[:, w0:w0 + 1, :]
            for dw in range(1, wl):
                v = jnp.maximum(v, blk[:, w0 + dw:w0 + dw + 1, :])
            o_ref[:, pl.ds(ho * 4 + wo, 1), :] = v.astype(o_ref.dtype)


def conv2_pool2(xpad, w2, b2, *, img_tile=4):
    """xpad: (N, 210, 128) bf16 -> pool2 output (N, 16, 256) bf16 (rows = ho*4+wo)."""
    N = xpad.shape[0]
    B = _batch_tile(N, img_tile)
    return pl.pallas_call(
        functools.partial(_conv2_pool2_kernel, n_img=B),
        out_shape=jax.ShapeDtypeStruct((N, 16, 256), jnp.bfloat16),
        grid=(N // B,),
        in_specs=[
            pl.BlockSpec((B, 210, 128), lambda i: (i, 0, 0)),
            pl.BlockSpec((3200, 256), lambda i: (0, 0)),
            pl.BlockSpec((1, 256), lambda i: (0, 0)),
        ],
        out_specs=pl.BlockSpec((B, 16, 256), lambda i: (i, 0, 0)),
        scratch_shapes=[
            pltpu.VMEM((B, 140, 3200), jnp.bfloat16),
            pltpu.VMEM((B, 140, 256), jnp.float32),
        ],
        compiler_params=pltpu.CompilerParams(dimension_semantics=("parallel",)),
    )(xpad, w2, b2)


# ---------------------------------------------------------------------------
# Stage 3: fc1 -> ReLU -> fc2 -> ReLU -> fc3 fused, with fc1's K=4096 axis tiled so the
# fc1 weight stream is double-buffered behind the MXU.  Output padded to 128 lanes.
# ---------------------------------------------------------------------------
def _fc_kernel(x_ref, w1_ref, w2_ref, w3_ref, o_ref, acc_ref):
    k = pl.program_id(1)

    @pl.when(k == 0)
    def _():
        acc_ref[...] = jnp.zeros_like(acc_ref)

    acc_ref[...] += jnp.dot(x_ref[...], w1_ref[...], preferred_element_type=jnp.float32)

    @pl.when(k == pl.num_programs(1) - 1)
    def _():
        h = jnp.maximum(acc_ref[...], 0.0).astype(jnp.bfloat16)
        h = jnp.dot(h, w2_ref[...], preferred_element_type=jnp.float32)
        h = jnp.maximum(h, 0.0).astype(jnp.bfloat16)
        o_ref[...] = jnp.dot(h, w3_ref[...], preferred_element_type=jnp.float32)


def fc_fused(x, w1, w2, w3, *, k_tile=512, batch_tile=128):
    """x: (N, 4096) bf16 ; w1: (4096, 384) ; w2: (384, 192) ; w3: (192, 128) -> (N, 128) f32."""
    N, K = x.shape
    H1, H2, NO = w1.shape[1], w2.shape[1], w3.shape[1]
    bn = _fc_batch_tile(N, batch_tile)
    return pl.pallas_call(
        _fc_kernel,
        out_shape=jax.ShapeDtypeStruct((N, NO), jnp.float32),
        grid=(N // bn, K // k_tile),
        in_specs=[
            pl.BlockSpec((bn, k_tile), lambda i, k: (i, k)),
            pl.BlockSpec((k_tile, H1), lambda i, k: (k, 0)),
            pl.BlockSpec((H1, H2), lambda i, k: (0, 0)),
            pl.BlockSpec((H2, NO), lambda i, k: (0, 0)),
        ],
        out_specs=pl.BlockSpec((bn, NO), lambda i, k: (i, 0)),
        scratch_shapes=[pltpu.VMEM((bn, H1), jnp.float32)],
        compiler_params=pltpu.CompilerParams(
            dimension_semantics=("parallel", "arbitrary")),
    )(x, w1, w2, w3)


# ---------------------------------------------------------------------------
# Parameters: deterministic synthetic weights in PyTorch layout, then a one-time
# (outside jit) preparation pass (transpose / permute / pad / bf16).
# ---------------------------------------------------------------------------
def init_params(key):
    ks = jax.random.split(key, 7)
    return {
        "conv1_w": 0.10 * jax.random.normal(ks[0], (96, 1, 5, 5), jnp.float32),
        "conv1_b": 0.10 * jax.random.normal(ks[1], (96,), jnp.float32),
        "conv2_w": 0.02 * jax.random.normal(ks[2], (256, 96, 5, 5), jnp.float32),
        "conv2_b": 0.02 * jax.random.normal(ks[3], (256,), jnp.float32),
        "fc1_w": 0.02 * jax.random.normal(ks[4], (384, 4096), jnp.float32),  # bias=False
        "fc2_w": 0.05 * jax.random.normal(ks[5], (192, 384), jnp.float32),   # bias=False
        "fc3_w": 0.05 * jax.random.normal(ks[6], (10, 192), jnp.float32),    # bias=False
    }


def prepare_params(p):
    # conv1: Cout 96->128 (lane-dense), rows = kh*5+kw (K 25->32 zero-padded).
    w1 = jnp.pad(p["conv1_w"], ((0, 32), (0, 0), (0, 0), (0, 0)))                 # (128,1,5,5)
    w1 = jnp.transpose(w1, (2, 3, 1, 0)).reshape(25, 128)
    w1 = jnp.pad(w1, ((0, 7), (0, 0))).astype(jnp.bfloat16)                       # (32,128)
    b1 = jnp.pad(p["conv1_b"], ((0, 32),)).reshape(1, 128).astype(jnp.float32)

    # conv2: Cin 96->128 zero-padded (matches conv1's zero channels); rows = (kh*5+kw)*128+cin.
    w2 = jnp.pad(p["conv2_w"], ((0, 0), (0, 32), (0, 0), (0, 0)))                 # (256,128,5,5)
    w2 = jnp.transpose(w2, (2, 3, 1, 0)).reshape(3200, 256).astype(jnp.bfloat16)
    b2 = p["conv2_b"].reshape(1, 256).astype(jnp.float32)

    # fc1: permute columns from torch's NCHW flatten (c*16+h*4+w) to our NHWC flatten.
    f1 = p["fc1_w"].reshape(384, 256, 4, 4)
    f1 = jnp.transpose(f1, (2, 3, 1, 0)).reshape(4096, 384).astype(jnp.bfloat16)
    f2 = p["fc2_w"].T.astype(jnp.bfloat16)                                        # (384,192)
    f3 = jnp.pad(p["fc3_w"].T, ((0, 0), (0, 118))).astype(jnp.bfloat16)           # (192,128)
    return {"conv1_w": w1, "conv1_b": b1, "conv2_w": w2, "conv2_b": b2,
            "fc1_w": f1, "fc2_w": f2, "fc3_w": f3}


@jax.jit
def net_forward(x_nchw, params):
    N = x_nchw.shape[0]
    x = jnp.transpose(x_nchw, (0, 2, 3, 1)).astype(jnp.bfloat16)                  # (N,28,28,1)
    x = conv1_pool1(x, params["conv1_w"], params["conv1_b"])                      # (N,210,128)
    x = conv2_pool2(x, params["conv2_w"], params["conv2_b"])                      # (N,16,256)
    logits = fc_fused(x.reshape(N, 4096),
                      params["fc1_w"], params["fc2_w"], params["fc3_w"])          # (N,128)
    return logits[:, :10]                                                          # real logits


# ---------------------------------------------------------------------------
# Pure-JAX reference (f32, torch-layout weights) for a correctness check.
# ---------------------------------------------------------------------------
def _maxpool_ref(x):
    return lax.reduce_window(x, -jnp.inf, lax.max, (1, 1, 3, 3), (1, 1, 3, 3),
                             ((0, 0), (0, 0), (1, 1), (1, 1)))


def reference_forward(x_nchw, raw):
    x = x_nchw.astype(jnp.float32)
    dn = ("NCHW", "OIHW", "NCHW")
    y = lax.conv_general_dilated(x, raw["conv1_w"], (1, 1), ((2, 2), (2, 2)),
                                 dimension_numbers=dn)
    y = _maxpool_ref(jax.nn.relu(y + raw["conv1_b"][None, :, None, None]))
    y = lax.conv_general_dilated(y, raw["conv2_w"], (1, 1), ((2, 2), (2, 2)),
                                 dimension_numbers=dn)
    y = _maxpool_ref(jax.nn.relu(y + raw["conv2_b"][None, :, None, None]))
    y = y.reshape(y.shape[0], -1)
    y = jax.nn.relu(y @ raw["fc1_w"].T)
    y = jax.nn.relu(y @ raw["fc2_w"].T)
    return y @ raw["fc3_w"].T


if __name__ == "__main__":
    key = jax.random.PRNGKey(0)
    kx, kp = jax.random.split(key)
    raw = init_params(kp)
    params = prepare_params(raw)
    x = jax.random.normal(kx, (2, 1, 28, 28), jnp.float32)   # MNIST-shaped input, batch=2
    y = net_forward(x, params)
    jax.block_until_ready(y)
    assert y.shape == (2, 10)
    y_ref = reference_forward(x, raw)
    err = float(jnp.max(jnp.abs(y.astype(jnp.float32) - y_ref)))
    assert err < 0.1, f"max |kernel - reference| = {err}"
    print("KERNEL_OK")
</pallas_src>

<mosaic_0001>
module attributes {stable_mosaic.version = 11 : i64} {
  func.func @_conv1_pool1_kernel(%arg0: i32, %arg1: memref<1x900x32xbf16, #tpu.memory_space<vmem>>, %arg2: memref<32x128xbf16, #tpu.memory_space<vmem>>, %arg3: memref<1x128xf32, #tpu.memory_space<vmem>>, %arg4: memref<1x210x128xbf16, #tpu.memory_space<vmem>>) attributes {dimension_semantics = [#tpu.dimension_semantics<parallel>], iteration_bounds = array<i64: 2>, scalar_prefetch = 0 : i64, scratch_operands = 0 : i64, tpu.core_type = #tpu.core_type<tc>, window_params = [{transform_indices = @transform_0, window_bounds = array<i64: 1, 900, 32>}, {pipeline_mode = #tpu.pipeline_mode<synchronous>, transform_indices = @transform_1, window_bounds = array<i64: 32, 128>}, {pipeline_mode = #tpu.pipeline_mode<synchronous>, transform_indices = @transform_2, window_bounds = array<i64: 1, 128>}, {transform_indices = @transform_3, window_bounds = array<i64: 1, 210, 128>}]} {
    %cst = arith.constant 0.000000e+00 : bf16
    %0 = vector.broadcast %cst : bf16 to vector<1x210x128xbf16>
    %c0 = arith.constant 0 : index
    %c0_0 = arith.constant 0 : index
    %c0_1 = arith.constant 0 : index
    %1 = vector.load %arg4[%c0, %c0_0, %c0_1] : memref<1x210x128xbf16, #tpu.memory_space<vmem>>, vector<1x210x128xbf16>
    tpu.vector_store %arg4[%c0, %c0_0, %c0_1], %0 {strides = array<i32>} : memref<1x210x128xbf16, #tpu.memory_space<vmem>>, vector<1x210x128xbf16>,
    %c0_2 = arith.constant 0 : index
    %c0_3 = arith.constant 0 : index
    %c0_4 = arith.constant 0 : index
    %2 = vector.load %arg1[%c0_2, %c0_3, %c0_4] : memref<1x900x32xbf16, #tpu.memory_space<vmem>>, vector<1x900x32xbf16>
    %3 = vector.shape_cast %2 : vector<1x900x32xbf16> to vector<900x32xbf16>
    %c0_5 = arith.constant 0 : index
    %c0_6 = arith.constant 0 : index
    %4 = vector.load %arg2[%c0_5, %c0_6] : memref<32x128xbf16, #tpu.memory_space<vmem>>, vector<32x128xbf16>
    %cst_7 = arith.constant dense<0.000000e+00> : vector<900x128xf32>
    %5 = tpu.matmul %3, %4, %cst_7 {dimension_numbers = #tpu.dot_dimension_numbers<[1], [0], [0], [1], [0, 0, 1, 1], [], []>} : vector<900x32xbf16>, vector<32x128xbf16>, vector<900x128xf32> -> vector<900x128xf32>
    %6 = vector.extract_strided_slice %5 {offsets = [0, 0], sizes = [100, 128], strides = [1, 1]} : vector<900x128xf32> to vector<100x128xf32>
    %7 = vector.extract_strided_slice %5 {offsets = [100, 0], sizes = [100, 128], strides = [1, 1]} : vector<900x128xf32> to vector<100x128xf32>
    %8 = arith.maximumf %6, %7 : vector<100x128xf32>
    %9 = vector.extract_strided_slice %5 {offsets = [200, 0], sizes = [100, 128], strides = [1, 1]} : vector<900x128xf32> to vector<100x128xf32>
    %10 = arith.maximumf %8, %9 : vector<100x128xf32>
    %11 = vector.extract_strided_slice %5 {offsets = [300, 0], sizes = [100, 128], strides = [1, 1]} : vector<900x128xf32> to vector<100x128xf32>
    %12 = arith.maximumf %10, %11 : vector<100x128xf32>
    %13 = vector.extract_strided_slice %5 {offsets = [400, 0], sizes = [100, 128], strides = [1, 1]} : vector<900x128xf32> to vector<100x128xf32>
    %14 = arith.maximumf %12, %13 : vector<100x128xf32>
    %15 = vector.extract_strided_slice %5 {offsets = [500, 0], sizes = [100, 128], strides = [1, 1]} : vector<900x128xf32> to vector<100x128xf32>
    %16 = arith.maximumf %14, %15 : vector<100x128xf32>
    %17 = vector.extract_strided_slice %5 {offsets = [600, 0], sizes = [100, 128], strides = [1, 1]} : vector<900x128xf32> to vector<100x128xf32>
    %18 = arith.maximumf %16, %17 : vector<100x128xf32>
    %19 = vector.extract_strided_slice %5 {offsets = [700, 0], sizes = [100, 128], strides = [1, 1]} : vector<900x128xf32> to vector<100x128xf32>
    %20 = arith.maximumf %18, %19 : vector<100x128xf32>
    %21 = vector.extract_strided_slice %5 {offsets = [800, 0], sizes = [100, 128], strides = [1, 1]} : vector<900x128xf32> to vector<100x128xf32>
    %22 = arith.maximumf %20, %21 : vector<100x128xf32>
    %c0_8 = arith.constant 0 : index
    %c0_9 = arith.constant 0 : index
    %23 = vector.load %arg3[%c0_8, %c0_9] : memref<1x128xf32, #tpu.memory_space<vmem>>, vector<1x128xf32>
    %24 = vector.broadcast %23 : vector<1x128xf32> to vector<100x128xf32>
    %25 = arith.addf %22, %24 : vector<100x128xf32>
    %cst_10 = arith.constant 0.000000e+00 : f32
    %26 = vector.broadcast %cst_10 : f32 to vector<100x128xf32>
    %27 = arith.maximumf %25, %26 : vector<100x128xf32>
    %28 = arith.truncf %27 : vector<100x128xf32> to vector<100x128xbf16>
    %29 = vector.extract_strided_slice %28 {offsets = [0, 0], sizes = [10, 128], strides = [1, 1]} : vector<100x128xbf16> to vector<10x128xbf16>
    %c0_11 = arith.constant 0 : index
    %c30 = arith.constant 30 : index
    %c0_12 = arith.constant 0 : index
    %30 = vector.load %arg4[%c0_11, %c30, %c0_12] : memref<1x210x128xbf16, #tpu.memory_space<vmem>>, vector<1x10x128xbf16>
    %31 = vector.shape_cast %30 : vector<1x10x128xbf16> to vector<10x128xbf16>
    %32 = vector.shape_cast %29 : vector<10x128xbf16> to vector<1x10x128xbf16>
    tpu.vector_store %arg4[%c0_11, %c30, %c0_12], %32 {strides = array<i32>} : memref<1x210x128xbf16, #tpu.memory_space<vmem>>, vector<1x10x128xbf16>,
    %33 = vector.extract_strided_slice %28 {offsets = [10, 0], sizes = [10, 128], strides = [1, 1]} : vector<100x128xbf16> to vector<10x128xbf16>
    %c0_13 = arith.constant 0 : index
    %c44 = arith.constant 44 : index
    %c0_14 = arith.constant 0 : index
    %34 = vector.load %arg4[%c0_13, %c44, %c0_14] : memref<1x210x128xbf16, #tpu.memory_space<vmem>>, vector<1x10x128xbf16>
    %35 = vector.shape_cast %34 : vector<1x10x128xbf16> to vector<10x128xbf16>
    %36 = vector.shape_cast %33 : vector<10x128xbf16> to vector<1x10x128xbf16>
    tpu.vector_store %arg4[%c0_13, %c44, %c0_14], %36 {strides = array<i32>} : memref<1x210x128xbf16, #tpu.memory_space<vmem>>, vector<1x10x128xbf16>,
    %37 = vector.extract_strided_slice %28 {offsets = [20, 0], sizes = [10, 128], strides = [1, 1]} : vector<100x128xbf16> to vector<10x128xbf16>
    %c0_15 = arith.constant 0 : index
    %c58 = arith.constant 58 : index
    %c0_16 = arith.constant 0 : index
    %38 = vector.load %arg4[%c0_15, %c58, %c0_16] : memref<1x210x128xbf16, #tpu.memory_space<vmem>>, vector<1x10x128xbf16>
    %39 = vector.shape_cast %38 : vector<1x10x128xbf16> to vector<10x128xbf16>
    %40 = vector.shape_cast %37 : vector<10x128xbf16> to vector<1x10x128xbf16>
    tpu.vector_store %arg4[%c0_15, %c58, %c0_16], %40 {strides = array<i32>} : memref<1x210x128xbf16, #tpu.memory_space<vmem>>, vector<1x10x128xbf16>,
    %41 = vector.extract_strided_slice %28 {offsets = [30, 0], sizes = [10, 128], strides = [1, 1]} : vector<100x128xbf16> to vector<10x128xbf16>
    %c0_17 = arith.constant 0 : index
    %c72 = arith.constant 72 : index
    %c0_18 = arith.constant 0 : index
    %42 = vector.load %arg4[%c0_17, %c72, %c0_18] : memref<1x210x128xbf16, #tpu.memory_space<vmem>>, vector<1x10x128xbf16>
    %43 = vector.shape_cast %42 : vector<1x10x128xbf16> to vector<10x128xbf16>
    %44 = vector.shape_cast %41 : vector<10x128xbf16> to vector<1x10x128xbf16>
    tpu.vector_store %arg4[%c0_17, %c72, %c0_18], %44 {strides = array<i32>} : memref<1x210x128xbf16, #tpu.memory_space<vmem>>, vector<1x10x128xbf16>,
    %45 = vector.extract_strided_slice %28 {offsets = [40, 0], sizes = [10, 128], strides = [1, 1]} : vector<100x128xbf16> to vector<10x128xbf16>
    %c0_19 = arith.constant 0 : index
    %c86 = arith.constant 86 : index
    %c0_20 = arith.constant 0 : index
    %46 = vector.load %arg4[%c0_19, %c86, %c0_20] : memref<1x210x128xbf16, #tpu.memory_space<vmem>>, vector<1x10x128xbf16>
    %47 = vector.shape_cast %46 : vector<1x10x128xbf16> to vector<10x128xbf16>
    %48 = vector.shape_cast %45 : vector<10x128xbf16> to vector<1x10x128xbf16>
    tpu.vector_store %arg4[%c0_19, %c86, %c0_20], %48 {strides = array<i32>} : memref<1x210x128xbf16, #tpu.memory_space<vmem>>, vector<1x10x128xbf16>,
    %49 = vector.extract_strided_slice %28 {offsets = [50, 0], sizes = [10, 128], strides = [1, 1]} : vector<100x128xbf16> to vector<10x128xbf16>
    %c0_21 = arith.constant 0 : index
    %c100 = arith.constant 100 : index
    %c0_22 = arith.constant 0 : index
    %50 = vector.load %arg4[%c0_21, %c100, %c0_22] : memref<1x210x128xbf16, #tpu.memory_space<vmem>>, vector<1x10x128xbf16>
    %51 = vector.shape_cast %50 : vector<1x10x128xbf16> to vector<10x128xbf16>
    %52 = vector.shape_cast %49 : vector<10x128xbf16> to vector<1x10x128xbf16>
    tpu.vector_store %arg4[%c0_21, %c100, %c0_22], %52 {strides = array<i32>} : memref<1x210x128xbf16, #tpu.memory_space<vmem>>, vector<1x10x128xbf16>,
    %53 = vector.extract_strided_slice %28 {offsets = [60, 0], sizes = [10, 128], strides = [1, 1]} : vector<100x128xbf16> to vector<10x128xbf16>
    %c0_23 = arith.constant 0 : index
    %c114 = arith.constant 114 : index
    %c0_24 = arith.constant 0 : index
    %54 = vector.load %arg4[%c0_23, %c114, %c0_24] : memref<1x210x128xbf16, #tpu.memory_space<vmem>>, vector<1x10x128xbf16>
    %55 = vector.shape_cast %54 : vector<1x10x128xbf16> to vector<10x128xbf16>
    %56 = vector.shape_cast %53 : vector<10x128xbf16> to vector<1x10x128xbf16>
    tpu.vector_store %arg4[%c0_23, %c114, %c0_24], %56 {strides = array<i32>} : memref<1x210x128xbf16, #tpu.memory_space<vmem>>, vector<1x10x128xbf16>,
    %57 = vector.extract_strided_slice %28 {offsets = [70, 0], sizes = [10, 128], strides = [1, 1]} : vector<100x128xbf16> to vector<10x128xbf16>
    %c0_25 = arith.constant 0 : index
    %c128 = arith.constant 128 : index
    %c0_26 = arith.constant 0 : index
    %58 = vector.load %arg4[%c0_25, %c128, %c0_26] : memref<1x210x128xbf16, #tpu.memory_space<vmem>>, vector<1x10x128xbf16>
    %59 = vector.shape_cast %58 : vector<1x10x128xbf16> to vector<10x128xbf16>
    %60 = vector.shape_cast %57 : vector<10x128xbf16> to vector<1x10x128xbf16>
    tpu.vector_store %arg4[%c0_25, %c128, %c0_26], %60 {strides = array<i32>} : memref<1x210x128xbf16, #tpu.memory_space<vmem>>, vector<1x10x128xbf16>,
    %61 = vector.extract_strided_slice %28 {offsets = [80, 0], sizes = [10, 128], strides = [1, 1]} : vector<100x128xbf16> to vector<10x128xbf16>
    %c0_27 = arith.constant 0 : index
    %c142 = arith.constant 142 : index
    %c0_28 = arith.constant 0 : index
    %62 = vector.load %arg4[%c0_27, %c142, %c0_28] : memref<1x210x128xbf16, #tpu.memory_space<vmem>>, vector<1x10x128xbf16>
    %63 = vector.shape_cast %62 : vector<1x10x128xbf16> to vector<10x128xbf16>
    %64 = vector.shape_cast %61 : vector<10x128xbf16> to vector<1x10x128xbf16>
    tpu.vector_store %arg4[%c0_27, %c142, %c0_28], %64 {strides = array<i32>} : memref<1x210x128xbf16, #tpu.memory_space<vmem>>, vector<1x10x128xbf16>,
    %65 = vector.extract_strided_slice %28 {offsets = [90, 0], sizes = [10, 128], strides = [1, 1]} : vector<100x128xbf16> to vector<10x128xbf16>
    %c0_29 = arith.constant 0 : index
    %c156 = arith.constant 156 : index
    %c0_30 = arith.constant 0 : index
    %66 = vector.load %arg4[%c0_29, %c156, %c0_30] : memref<1x210x128xbf16, #tpu.memory_space<vmem>>, vector<1x10x128xbf16>
    %67 = vector.shape_cast %66 : vector<1x10x128xbf16> to vector<10x128xbf16>
    %68 = vector.shape_cast %65 : vector<10x128xbf16> to vector<1x10x128xbf16>
    tpu.vector_store %arg4[%c0_29, %c156, %c0_30], %68 {strides = array<i32>} : memref<1x210x128xbf16, #tpu.memory_space<vmem>>, vector<1x10x128xbf16>,
    return
  }
  func.func @transform_0(%arg0: i32) -> (i32, i32, i32) {
    %c0_i32 = arith.constant 0 : i32
    %c0_i32_0 = arith.constant 0 : i32
    %c0_i32_1 = arith.constant 0 : i32
    return %arg0, %c0_i32, %c0_i32_0 : i32, i32, i32
  }
  func.func @transform_1(%arg0: i32) -> (i32, i32) {
    %c0_i32 = arith.constant 0 : i32
    %c0_i32_0 = arith.constant 0 : i32
    %c0_i32_1 = arith.constant 0 : i32
    return %c0_i32, %c0_i32_0 : i32, i32
  }
  func.func @transform_2(%arg0: i32) -> (i32, i32) {
    %c0_i32 = arith.constant 0 : i32
    %c0_i32_0 = arith.constant 0 : i32
    %c0_i32_1 = arith.constant 0 : i32
    return %c0_i32, %c0_i32_0 : i32, i32
  }
  func.func @transform_3(%arg0: i32) -> (i32, i32, i32) {
    %c0_i32 = arith.constant 0 : i32
    %c0_i32_0 = arith.constant 0 : i32
    %c0_i32_1 = arith.constant 0 : i32
    return %arg0, %c0_i32, %c0_i32_0 : i32, i32, i32
  }
}

module attributes {stable_mosaic.version = 11 : i64} {
  func.func @_conv2_pool2_kernel(%arg0: i32, %arg1: memref<1x210x128xbf16, #tpu.memory_space<vmem>>, %arg2: memref<3200x256xbf16, #tpu.memory_space<vmem>>, %arg3: memref<1x256xf32, #tpu.memory_space<vmem>>, %arg4: memref<1x16x256xbf16, #tpu.memory_space<vmem>>, %arg5: memref<1x140x3200xbf16, #tpu.memory_space<vmem>>, %arg6: memref<1x140x256xf32, #tpu.memory_space<vmem>>) attributes {dimension_semantics = [#tpu.dimension_semantics<parallel>], iteration_bounds = array<i64: 2>, scalar_prefetch = 0 : i64, scratch_operands = 2 : i64, tpu.core_type = #tpu.core_type<tc>, window_params = [{transform_indices = @transform_0, window_bounds = array<i64: 1, 210, 128>}, {pipeline_mode = #tpu.pipeline_mode<synchronous>, transform_indices = @transform_1, window_bounds = array<i64: 3200, 256>}, {pipeline_mode = #tpu.pipeline_mode<synchronous>, transform_indices = @transform_2, window_bounds = array<i64: 1, 256>}, {transform_indices = @transform_3, window_bounds = array<i64: 1, 16, 256>}]} {
    %c0 = arith.constant 0 : index
    %c0_0 = arith.constant 0 : index
    %c0_1 = arith.constant 0 : index
    %0 = vector.load %arg1[%c0, %c0_0, %c0_1] : memref<1x210x128xbf16, #tpu.memory_space<vmem>>, vector<1x140x128xbf16>
    %c0_2 = arith.constant 0 : index
    %c0_3 = arith.constant 0 : index
    %c0_4 = arith.constant 0 : index
    %1 = vector.load %arg5[%c0_2, %c0_3, %c0_4] : memref<1x140x3200xbf16, #tpu.memory_space<vmem>>, vector<1x140x128xbf16>
    tpu.vector_store %arg5[%c0_2, %c0_3, %c0_4], %0 {strides = array<i32>} : memref<1x140x3200xbf16, #tpu.memory_space<vmem>>, vector<1x140x128xbf16>,
    %c0_5 = arith.constant 0 : index
    %c1 = arith.constant 1 : index
    %c0_6 = arith.constant 0 : index
    %2 = vector.load %arg1[%c0_5, %c1, %c0_6] : memref<1x210x128xbf16, #tpu.memory_space<vmem>>, vector<1x140x128xbf16>
    %c0_7 = arith.constant 0 : index
    %c0_8 = arith.constant 0 : index
    %c128 = arith.constant 128 : index
    %3 = vector.load %arg5[%c0_7, %c0_8, %c128] : memref<1x140x3200xbf16, #tpu.memory_space<vmem>>, vector<1x140x128xbf16>
    tpu.vector_store %arg5[%c0_7, %c0_8, %c128], %2 {strides = array<i32>} : memref<1x140x3200xbf16, #tpu.memory_space<vmem>>, vector<1x140x128xbf16>,
    %c0_9 = arith.constant 0 : index
    %c2 = arith.constant 2 : index
    %c0_10 = arith.constant 0 : index
    %4 = vector.load %arg1[%c0_9, %c2, %c0_10] : memref<1x210x128xbf16, #tpu.memory_space<vmem>>, vector<1x140x128xbf16>
    %c0_11 = arith.constant 0 : index
    %c0_12 = arith.constant 0 : index
    %c256 = arith.constant 256 : index
    %5 = vector.load %arg5[%c0_11, %c0_12, %c256] : memref<1x140x3200xbf16, #tpu.memory_space<vmem>>, vector<1x140x128xbf16>
    tpu.vector_store %arg5[%c0_11, %c0_12, %c256], %4 {strides = array<i32>} : memref<1x140x3200xbf16, #tpu.memory_space<vmem>>, vector<1x140x128xbf16>,
    %c0_13 = arith.constant 0 : index
    %c3 = arith.constant 3 : index
    %c0_14 = arith.constant 0 : index
    %6 = vector.load %arg1[%c0_13, %c3, %c0_14] : memref<1x210x128xbf16, #tpu.memory_space<vmem>>, vector<1x140x128xbf16>
    %c0_15 = arith.constant 0 : index
    %c0_16 = arith.constant 0 : index
    %c384 = arith.constant 384 : index
    %7 = vector.load %arg5[%c0_15, %c0_16, %c384] : memref<1x140x3200xbf16, #tpu.memory_space<vmem>>, vector<1x140x128xbf16>
    tpu.vector_store %arg5[%c0_15, %c0_16, %c384], %6 {strides = array<i32>} : memref<1x140x3200xbf16, #tpu.memory_space<vmem>>, vector<1x140x128xbf16>,
    %c0_17 = arith.constant 0 : index
    %c4 = arith.constant 4 : index
    %c0_18 = arith.constant 0 : index
    %8 = vector.load %arg1[%c0_17, %c4, %c0_18] : memref<1x210x128xbf16, #tpu.memory_space<vmem>>, vector<1x140x128xbf16>
    %c0_19 = arith.constant 0 : index
    %c0_20 = arith.constant 0 : index
    %c512 = arith.constant 512 : index
    %9 = vector.load %arg5[%c0_19, %c0_20, %c512] : memref<1x140x3200xbf16, #tpu.memory_space<vmem>>, vector<1x140x128xbf16>
    tpu.vector_store %arg5[%c0_19, %c0_20, %c512], %8 {strides = array<i32>} : memref<1x140x3200xbf16, #tpu.memory_space<vmem>>, vector<1x140x128xbf16>,
    %c0_21 = arith.constant 0 : index
    %c14 = arith.constant 14 : index
    %c0_22 = arith.constant 0 : index
    %10 = vector.load %arg1[%c0_21, %c14, %c0_22] : memref<1x210x128xbf16, #tpu.memory_space<vmem>>, vector<1x140x128xbf16>
    %c0_23 = arith.constant 0 : index
    %c0_24 = arith.constant 0 : index
    %c640 = arith.constant 640 : index
    %11 = vector.load %arg5[%c0_23, %c0_24, %c640] : memref<1x140x3200xbf16, #tpu.memory_space<vmem>>, vector<1x140x128xbf16>
    tpu.vector_store %arg5[%c0_23, %c0_24, %c640], %10 {strides = array<i32>} : memref<1x140x3200xbf16, #tpu.memory_space<vmem>>, vector<1x140x128xbf16>,
    %c0_25 = arith.constant 0 : index
    %c15 = arith.constant 15 : index
    %c0_26 = arith.constant 0 : index
    %12 = vector.load %arg1[%c0_25, %c15, %c0_26] : memref<1x210x128xbf16, #tpu.memory_space<vmem>>, vector<1x140x128xbf16>
    %c0_27 = arith.constant 0 : index
    %c0_28 = arith.constant 0 : index
    %c768 = arith.constant 768 : index
    %13 = vector.load %arg5[%c0_27, %c0_28, %c768] : memref<1x140x3200xbf16, #tpu.memory_space<vmem>>, vector<1x140x128xbf16>
    tpu.vector_store %arg5[%c0_27, %c0_28, %c768], %12 {strides = array<i32>} : memref<1x140x3200xbf16, #tpu.memory_space<vmem>>, vector<1x140x128xbf16>,
    %c0_29 = arith.constant 0 : index
    %c16 = arith.constant 16 : index
    %c0_30 = arith.constant 0 : index
    %14 = vector.load %arg1[%c0_29, %c16, %c0_30] : memref<1x210x128xbf16, #tpu.memory_space<vmem>>, vector<1x140x128xbf16>
    %c0_31 = arith.constant 0 : index
    %c0_32 = arith.constant 0 : index
    %c896 = arith.constant 896 : index
    %15 = vector.load %arg5[%c0_31, %c0_32, %c896] : memref<1x140x3200xbf16, #tpu.memory_space<vmem>>, vector<1x140x128xbf16>
    tpu.vector_store %arg5[%c0_31, %c0_32, %c896], %14 {strides = array<i32>} : memref<1x140x3200xbf16, #tpu.memory_space<vmem>>, vector<1x140x128xbf16>,
    %c0_33 = arith.constant 0 : index
    %c17 = arith.constant 17 : index
    %c0_34 = arith.constant 0 : index
    %16 = vector.load %arg1[%c0_33, %c17, %c0_34] : memref<1x210x128xbf16, #tpu.memory_space<vmem>>, vector<1x140x128xbf16>
    %c0_35 = arith.constant 0 : index
    %c0_36 = arith.constant 0 : index
    %c1024 = arith.constant 1024 : index
    %17 = vector.load %arg5[%c0_35, %c0_36, %c1024] : memref<1x140x3200xbf16, #tpu.memory_space<vmem>>, vector<1x140x128xbf16>
    tpu.vector_store %arg5[%c0_35, %c0_36, %c1024], %16 {strides = array<i32>} : memref<1x140x3200xbf16, #tpu.memory_space<vmem>>, vector<1x140x128xbf16>,
    %c0_37 = arith.constant 0 : index
    %c18 = arith.constant 18 : index
    %c0_38 = arith.constant 0 : index
    %18 = vector.load %arg1[%c0_37, %c18, %c0_38] : memref<1x210x128xbf16, #tpu.memory_space<vmem>>, vector<1x140x128xbf16>
    %c0_39 = arith.constant 0 : index
    %c0_40 = arith.constant 0 : index
    %c1152 = arith.constant 1152 : index
    %19 = vector.load %arg5[%c0_39, %c0_40, %c1152] : memref<1x140x3200xbf16, #tpu.memory_space<vmem>>, vector<1x140x128xbf16>
    tpu.vector_store %arg5[%c0_39, %c0_40, %c1152], %18 {strides = array<i32>} : memref<1x140x3200xbf16, #tpu.memory_space<vmem>>, vector<1x140x128xbf16>,
    %c0_41 = arith.constant 0 : index
    %c28 = arith.constant 28 : index
    %c0_42 = arith.constant 0 : index
    %20 = vector.load %arg1[%c0_41, %c28, %c0_42] : memref<1x210x128xbf16, #tpu.memory_space<vmem>>, vector<1x140x128xbf16>
    %c0_43 = arith.constant 0 : index
    %c0_44 = arith.constant 0 : index
    %c1280 = arith.constant 1280 : index
    %21 = vector.load %arg5[%c0_43, %c0_44, %c1280] : memref<1x140x3200xbf16, #tpu.memory_space<vmem>>, vector<1x140x128xbf16>
    tpu.vector_store %arg5[%c0_43, %c0_44, %c1280], %20 {strides = array<i32>} : memref<1x140x3200xbf16, #tpu.memory_space<vmem>>, vector<1x140x128xbf16>,
    %c0_45 = arith.constant 0 : index
    %c29 = arith.constant 29 : index
    %c0_46 = arith.constant 0 : index
    %22 = vector.load %arg1[%c0_45, %c29, %c0_46] : memref<1x210x128xbf16, #tpu.memory_space<vmem>>, vector<1x140x128xbf16>
    %c0_47 = arith.constant 0 : index
    %c0_48 = arith.constant 0 : index
    %c1408 = arith.constant 1408 : index
    %23 = vector.load %arg5[%c0_47, %c0_48, %c1408] : memref<1x140x3200xbf16, #tpu.memory_space<vmem>>, vector<1x140x128xbf16>
    tpu.vector_store %arg5[%c0_47, %c0_48, %c1408], %22 {strides = array<i32>} : memref<1x140x3200xbf16, #tpu.memory_space<vmem>>, vector<1x140x128xbf16>,
    %c0_49 = arith.constant 0 : index
    %c30 = arith.constant 30 : index
    %c0_50 = arith.constant 0 : index
    %24 = vector.load %arg1[%c0_49, %c30, %c0_50] : memref<1x210x128xbf16, #tpu.memory_space<vmem>>, vector<1x140x128xbf16>
    %c0_51 = arith.constant 0 : index
    %c0_52 = arith.constant 0 : index
    %c1536 = arith.constant 1536 : index
    %25 = vector.load %arg5[%c0_51, %c0_52, %c1536] : memref<1x140x3200xbf16, #tpu.memory_space<vmem>>, vector<1x140x128xbf16>
    tpu.vector_store %arg5[%c0_51, %c0_52, %c1536], %24 {strides = array<i32>} : memref<1x140x3200xbf16, #tpu.memory_space<vmem>>, vector<1x140x128xbf16>,
    %c0_53 = arith.constant 0 : index
    %c31 = arith.constant 31 : index
    %c0_54 = arith.constant 0 : index
    %26 = vector.load %arg1[%c0_53, %c31, %c0_54] : memref<1x210x128xbf16, #tpu.memory_space<vmem>>, vector<1x140x128xbf16>
    %c0_55 = arith.constant 0 : index
    %c0_56 = arith.constant 0 : index
    %c1664 = arith.constant 1664 : index
    %27 = vector.load %arg5[%c0_55, %c0_56, %c1664] : memref<1x140x3200xbf16, #tpu.memory_space<vmem>>, vector<1x140x128xbf16>
    tpu.vector_store %arg5[%c0_55, %c0_56, %c1664], %26 {strides = array<i32>} : memref<1x140x3200xbf16, #tpu.memory_space<vmem>>, vector<1x140x128xbf16>,
    %c0_57 = arith.constant 0 : index
    %c32 = arith.constant 32 : index
    %c0_58 = arith.constant 0 : index
    %28 = vector.load %arg1[%c0_57, %c32, %c0_58] : memref<1x210x128xbf16, #tpu.memory_space<vmem>>, vector<1x140x128xbf16>
    %c0_59 = arith.constant 0 : index
    %c0_60 = arith.constant 0 : index
    %c1792 = arith.constant 1792 : index
    %29 = vector.load %arg5[%c0_59, %c0_60, %c1792] : memref<1x140x3200xbf16, #tpu.memory_space<vmem>>, vector<1x140x128xbf16>
    tpu.vector_store %arg5[%c0_59, %c0_60, %c1792], %28 {strides = array<i32>} : memref<1x140x3200xbf16, #tpu.memory_space<vmem>>, vector<1x140x128xbf16>,
    %c0_61 = arith.constant 0 : index
    %c42 = arith.constant 42 : index
    %c0_62 = arith.constant 0 : index
    %30 = vector.load %arg1[%c0_61, %c42, %c0_62] : memref<1x210x128xbf16, #tpu.memory_space<vmem>>, vector<1x140x128xbf16>
    %c0_63 = arith.constant 0 : index
    %c0_64 = arith.constant 0 : index
    %c1920 = arith.constant 1920 : index
    %31 = vector.load %arg5[%c0_63, %c0_64, %c1920] : memref<1x140x3200xbf16, #tpu.memory_space<vmem>>, vector<1x140x128xbf16>
    tpu.vector_store %arg5[%c0_63, %c0_64, %c1920], %30 {strides = array<i32>} : memref<1x140x3200xbf16, #tpu.memory_space<vmem>>, vector<1x140x128xbf16>,
    %c0_65 = arith.constant 0 : index
    %c43 = arith.constant 43 : index
    %c0_66 = arith.constant 0 : index
    %32 = vector.load %arg1[%c0_65, %c43, %c0_66] : memref<1x210x128xbf16, #tpu.memory_space<vmem>>, vector<1x140x128xbf16>
    %c0_67 = arith.constant 0 : index
    %c0_68 = arith.constant 0 : index
    %c2048 = arith.constant 2048 : index
    %33 = vector.load %arg5[%c0_67, %c0_68, %c2048] : memref<1x140x3200xbf16, #tpu.memory_space<vmem>>, vector<1x140x128xbf16>
    tpu.vector_store %arg5[%c0_67, %c0_68, %c2048], %32 {strides = array<i32>} : memref<1x140x3200xbf16, #tpu.memory_space<vmem>>, vector<1x140x128xbf16>,
    %c0_69 = arith.constant 0 : index
    %c44 = arith.constant 44 : index
    %c0_70 = arith.constant 0 : index
    %34 = vector.load %arg1[%c0_69, %c44, %c0_70] : memref<1x210x128xbf16, #tpu.memory_space<vmem>>, vector<1x140x128xbf16>
    %c0_71 = arith.constant 0 : index
    %c0_72 = arith.constant 0 : index
    %c2176 = arith.constant 2176 : index
    %35 = vector.load %arg5[%c0_71, %c0_72, %c2176] : memref<1x140x3200xbf16, #tpu.memory_space<vmem>>, vector<1x140x128xbf16>
    tpu.vector_store %arg5[%c0_71, %c0_72, %c2176], %34 {strides = array<i32>} : memref<1x140x3200xbf16, #tpu.memory_space<vmem>>, vector<1x140x128xbf16>,
    %c0_73 = arith.constant 0 : index
    %c45 = arith.constant 45 : index
    %c0_74 = arith.constant 0 : index
    %36 = vector.load %arg1[%c0_73, %c45, %c0_74] : memref<1x210x128xbf16, #tpu.memory_space<vmem>>, vector<1x140x128xbf16>
    %c0_75 = arith.constant 0 : index
    %c0_76 = arith.constant 0 : index
    %c2304 = arith.constant 2304 : index
    %37 = vector.load %arg5[%c0_75, %c0_76, %c2304] : memref<1x140x3200xbf16, #tpu.memory_space<vmem>>, vector<1x140x128xbf16>
    tpu.vector_store %arg5[%c0_75, %c0_76, %c2304], %36 {strides = array<i32>} : memref<1x140x3200xbf16, #tpu.memory_space<vmem>>, vector<1x140x128xbf16>,
    %c0_77 = arith.constant 0 : index
    %c46 = arith.constant 46 : index
    %c0_78 = arith.constant 0 : index
    %38 = vector.load %arg1[%c0_77, %c46, %c0_78] : memref<1x210x128xbf16, #tpu.memory_space<vmem>>, vector<1x140x128xbf16>
    %c0_79 = arith.constant 0 : index
    %c0_80 = arith.constant 0 : index
    %c2432 = arith.constant 2432 : index
    %39 = vector.load %arg5[%c0_79, %c0_80, %c2432] : memref<1x140x3200xbf16, #tpu.memory_space<vmem>>, vector<1x140x128xbf16>
    tpu.vector_store %arg5[%c0_79, %c0_80, %c2432], %38 {strides = array<i32>} : memref<1x140x3200xbf16, #tpu.memory_space<vmem>>, vector<1x140x128xbf16>,
    %c0_81 = arith.constant 0 : index
    %c56 = arith.constant 56 : index
    %c0_82 = arith.constant 0 : index
    %40 = vector.load %arg1[%c0_81, %c56, %c0_82] : memref<1x210x128xbf16, #tpu.memory_space<vmem>>, vector<1x140x128xbf16>
    %c0_83 = arith.constant 0 : index
    %c0_84 = arith.constant 0 : index
    %c2560 = arith.constant 2560 : index
    %41 = vector.load %arg5[%c0_83, %c0_84, %c2560] : memref<1x140x3200xbf16, #tpu.memory_space<vmem>>, vector<1x140x128xbf16>
    tpu.vector_store %arg5[%c0_83, %c0_84, %c2560], %40 {strides = array<i32>} : memref<1x140x3200xbf16, #tpu.memory_space<vmem>>, vector<1x140x128xbf16>,
    %c0_85 = arith.constant 0 : index
    %c57 = arith.constant 57 : index
    %c0_86 = arith.constant 0 : index
    %42 = vector.load %arg1[%c0_85, %c57, %c0_86] : memref<1x210x128xbf16, #tpu.memory_space<vmem>>, vector<1x140x128xbf16>
    %c0_87 = arith.constant 0 : index
    %c0_88 = arith.constant 0 : index
    %c2688 = arith.constant 2688 : index
    %43 = vector.load %arg5[%c0_87, %c0_88, %c2688] : memref<1x140x3200xbf16, #tpu.memory_space<vmem>>, vector<1x140x128xbf16>
    tpu.vector_store %arg5[%c0_87, %c0_88, %c2688], %42 {strides = array<i32>} : memref<1x140x3200xbf16, #tpu.memory_space<vmem>>, vector<1x140x128xbf16>,
    %c0_89 = arith.constant 0 : index
    %c58 = arith.constant 58 : index
    %c0_90 = arith.constant 0 : index
    %44 = vector.load %arg1[%c0_89, %c58, %c0_90] : memref<1x210x128xbf16, #tpu.memory_space<vmem>>, vector<1x140x128xbf16>
    %c0_91 = arith.constant 0 : index
    %c0_92 = arith.constant 0 : index
    %c2816 = arith.constant 2816 : index
    %45 = vector.load %arg5[%c0_91, %c0_92, %c2816] : memref<1x140x3200xbf16, #tpu.memory_space<vmem>>, vector<1x140x128xbf16>
    tpu.vector_store %arg5[%c0_91, %c0_92, %c2816], %44 {strides = array<i32>} : memref<1x140x3200xbf16, #tpu.memory_space<vmem>>, vector<1x140x128xbf16>,
    %c0_93 = arith.constant 0 : index
    %c59 = arith.constant 59 : index
    %c0_94 = arith.constant 0 : index
    %46 = vector.load %arg1[%c0_93, %c59, %c0_94] : memref<1x210x128xbf16, #tpu.memory_space<vmem>>, vector<1x140x128xbf16>
    %c0_95 = arith.constant 0 : index
    %c0_96 = arith.constant 0 : index
    %c2944 = arith.constant 2944 : index
    %47 = vector.load %arg5[%c0_95, %c0_96, %c2944] : memref<1x140x3200xbf16, #tpu.memory_space<vmem>>, vector<1x140x128xbf16>
    tpu.vector_store %arg5[%c0_95, %c0_96, %c2944], %46 {strides = array<i32>} : memref<1x140x3200xbf16, #tpu.memory_space<vmem>>, vector<1x140x128xbf16>,
    %c0_97 = arith.constant 0 : index
    %c60 = arith.constant 60 : index
    %c0_98 = arith.constant 0 : index
    %48 = vector.load %arg1[%c0_97, %c60, %c0_98] : memref<1x210x128xbf16, #tpu.memory_space<vmem>>, vector<1x140x128xbf16>
    %c0_99 = arith.constant 0 : index
    %c0_100 = arith.constant 0 : index
    %c3072 = arith.constant 3072 : index
    %49 = vector.load %arg5[%c0_99, %c0_100, %c3072] : memref<1x140x3200xbf16, #tpu.memory_space<vmem>>, vector<1x140x128xbf16>
    tpu.vector_store %arg5[%c0_99, %c0_100, %c3072], %48 {strides = array<i32>} : memref<1x140x3200xbf16, #tpu.memory_space<vmem>>, vector<1x140x128xbf16>,
    %c0_101 = arith.constant 0 : index
    %c0_102 = arith.constant 0 : index
    %c0_103 = arith.constant 0 : index
    %50 = vector.load %arg5[%c0_101, %c0_102, %c0_103] : memref<1x140x3200xbf16, #tpu.memory_space<vmem>>, vector<1x140x3200xbf16>
    %51 = vector.shape_cast %50 : vector<1x140x3200xbf16> to vector<140x3200xbf16>
    %c0_104 = arith.constant 0 : index
    %c0_105 = arith.constant 0 : index
    %52 = vector.load %arg2[%c0_104, %c0_105] : memref<3200x256xbf16, #tpu.memory_space<vmem>>, vector<3200x256xbf16>
    %cst = arith.constant dense<0.000000e+00> : vector<140x256xf32>
    %53 = tpu.matmul %51, %52, %cst {dimension_numbers = #tpu.dot_dimension_numbers<[1], [0], [0], [1], [0, 0, 1, 1], [], []>} : vector<140x3200xbf16>, vector<3200x256xbf16>, vector<140x256xf32> -> vector<140x256xf32>
    %c0_106 = arith.constant 0 : index
    %c0_107 = arith.constant 0 : index
    %54 = vector.load %arg3[%c0_106, %c0_107] : memref<1x256xf32, #tpu.memory_space<vmem>>, vector<1x256xf32>
    %55 = vector.broadcast %54 : vector<1x256xf32> to vector<140x256xf32>
    %56 = arith.addf %53, %55 : vector<140x256xf32>
    %cst_108 = arith.constant 0.000000e+00 : f32
    %57 = vector.broadcast %cst_108 : f32 to vector<140x256xf32>
    %58 = arith.maximumf %56, %57 : vector<140x256xf32>
    %c0_109 = arith.constant 0 : index
    %c0_110 = arith.constant 0 : index
    %c0_111 = arith.constant 0 : index
    %59 = vector.load %arg6[%c0_109, %c0_110, %c0_111] : memref<1x140x256xf32, #tpu.memory_space<vmem>>, vector<1x140x256xf32>
    %60 = vector.shape_cast %59 : vector<1x140x256xf32> to vector<140x256xf32>
    %61 = vector.shape_cast %58 : vector<140x256xf32> to vector<1x140x256xf32>
    tpu.vector_store %arg6[%c0_109, %c0_110, %c0_111], %61 {strides = array<i32>} : memref<1x140x256xf32, #tpu.memory_space<vmem>>, vector<1x140x256xf32>,
    %c0_112 = arith.constant 0 : index
    %c0_113 = arith.constant 0 : index
    %c0_114 = arith.constant 0 : index
    %62 = vector.load %arg6[%c0_112, %c0_113, %c0_114] : memref<1x140x256xf32, #tpu.memory_space<vmem>>, vector<1x14x256xf32>
    %c0_115 = arith.constant 0 : index
    %c14_116 = arith.constant 14 : index
    %c0_117 = arith.constant 0 : index
    %63 = vector.load %arg6[%c0_115, %c14_116, %c0_117] : memref<1x140x256xf32, #tpu.memory_space<vmem>>, vector<1x14x256xf32>
    %64 = arith.maximumf %62, %63 : vector<1x14x256xf32>
    %65 = vector.extract_strided_slice %64 {offsets = [0, 0, 0], sizes = [1, 1, 256], strides = [1, 1, 1]} : vector<1x14x256xf32> to vector<1x1x256xf32>
    %66 = vector.extract_strided_slice %64 {offsets = [0, 1, 0], sizes = [1, 1, 256], strides = [1, 1, 1]} : vector<1x14x256xf32> to vector<1x1x256xf32>
    %67 = arith.maximumf %65, %66 : vector<1x1x256xf32>
    %68 = arith.truncf %67 : vector<1x1x256xf32> to vector<1x1x256xbf16>
    %c0_118 = arith.constant 0 : index
    %c0_119 = arith.constant 0 : index
    %c0_120 = arith.constant 0 : index
    %69 = vector.load %arg4[%c0_118, %c0_119, %c0_120] : memref<1x16x256xbf16, #tpu.memory_space<vmem>>, vector<1x1x256xbf16>
    tpu.vector_store %arg4[%c0_118, %c0_119, %c0_120], %68 {strides = array<i32>} : memref<1x16x256xbf16, #tpu.memory_space<vmem>>, vector<1x1x256xbf16>,
    %70 = vector.extract_strided_slice %64 {offsets = [0, 2, 0], sizes = [1, 1, 256], strides = [1, 1, 1]} : vector<1x14x256xf32> to vector<1x1x256xf32>
    %71 = vector.extract_strided_slice %64 {offsets = [0, 3, 0], sizes = [1, 1, 256], strides = [1, 1, 1]} : vector<1x14x256xf32> to vector<1x1x256xf32>
    %72 = arith.maximumf %70, %71 : vector<1x1x256xf32>
    %73 = vector.extract_strided_slice %64 {offsets = [0, 4, 0], sizes = [1, 1, 256], strides = [1, 1, 1]} : vector<1x14x256xf32> to vector<1x1x256xf32>
    %74 = arith.maximumf %72, %73 : vector<1x1x256xf32>
    %75 = arith.truncf %74 : vector<1x1x256xf32> to vector<1x1x256xbf16>
    %c0_121 = arith.constant 0 : index
    %c1_122 = arith.constant 1 : index
    %c0_123 = arith.constant 0 : index
    %76 = vector.load %arg4[%c0_121, %c1_122, %c0_123] : memref<1x16x256xbf16, #tpu.memory_space<vmem>>, vector<1x1x256xbf16>
    tpu.vector_store %arg4[%c0_121, %c1_122, %c0_123], %75 {strides = array<i32>} : memref<1x16x256xbf16, #tpu.memory_space<vmem>>, vector<1x1x256xbf16>,
    %77 = vector.extract_strided_slice %64 {offsets = [0, 5, 0], sizes = [1, 1, 256], strides = [1, 1, 1]} : vector<1x14x256xf32> to vector<1x1x256xf32>
    %78 = vector.extract_strided_slice %64 {offsets = [0, 6, 0], sizes = [1, 1, 256], strides = [1, 1, 1]} : vector<1x14x256xf32> to vector<1x1x256xf32>
    %79 = arith.maximumf %77, %78 : vector<1x1x256xf32>
    %80 = vector.extract_strided_slice %64 {offsets = [0, 7, 0], sizes = [1, 1, 256], strides = [1, 1, 1]} : vector<1x14x256xf32> to vector<1x1x256xf32>
    %81 = arith.maximumf %79, %80 : vector<1x1x256xf32>
    %82 = arith.truncf %81 : vector<1x1x256xf32> to vector<1x1x256xbf16>
    %c0_124 = arith.constant 0 : index
    %c2_125 = arith.constant 2 : index
    %c0_126 = arith.constant 0 : index
    %83 = vector.load %arg4[%c0_124, %c2_125, %c0_126] : memref<1x16x256xbf16, #tpu.memory_space<vmem>>, vector<1x1x256xbf16>
    tpu.vector_store %arg4[%c0_124, %c2_125, %c0_126], %82 {strides = array<i32>} : memref<1x16x256xbf16, #tpu.memory_space<vmem>>, vector<1x1x256xbf16>,
    %84 = vector.extract_strided_slice %64 {offsets = [0, 8, 0], sizes = [1, 1, 256], strides = [1, 1, 1]} : vector<1x14x256xf32> to vector<1x1x256xf32>
    %85 = vector.extract_strided_slice %64 {offsets = [0, 9, 0], sizes = [1, 1, 256], strides = [1, 1, 1]} : vector<1x14x256xf32> to vector<1x1x256xf32>
    %86 = arith.maximumf %84, %85 : vector<1x1x256xf32>
    %87 = arith.truncf %86 : vector<1x1x256xf32> to vector<1x1x256xbf16>
    %c0_127 = arith.constant 0 : index
    %c3_128 = arith.constant 3 : index
    %c0_129 = arith.constant 0 : index
    %88 = vector.load %arg4[%c0_127, %c3_128, %c0_129] : memref<1x16x256xbf16, #tpu.memory_space<vmem>>, vector<1x1x256xbf16>
    tpu.vector_store %arg4[%c0_127, %c3_128, %c0_129], %87 {strides = array<i32>} : memref<1x16x256xbf16, #tpu.memory_space<vmem>>, vector<1x1x256xbf16>,
    %c0_130 = arith.constant 0 : index
    %c28_131 = arith.constant 28 : index
    %c0_132 = arith.constant 0 : index
    %89 = vector.load %arg6[%c0_130, %c28_131, %c0_132] : memref<1x140x256xf32, #tpu.memory_space<vmem>>, vector<1x14x256xf32>
    %c0_133 = arith.constant 0 : index
    %c42_134 = arith.constant 42 : index
    %c0_135 = arith.constant 0 : index
    %90 = vector.load %arg6[%c0_133, %c42_134, %c0_135] : memref<1x140x256xf32, #tpu.memory_space<vmem>>, vector<1x14x256xf32>
    %91 = arith.maximumf %89, %90 : vector<1x14x256xf32>
    %c0_136 = arith.constant 0 : index
    %c56_137 = arith.constant 56 : index
    %c0_138 = arith.constant 0 : index
    %92 = vector.load %arg6[%c0_136, %c56_137, %c0_138] : memref<1x140x256xf32, #tpu.memory_space<vmem>>, vector<1x14x256xf32>
    %93 = arith.maximumf %91, %92 : vector<1x14x256xf32>
    %94 = vector.extract_strided_slice %93 {offsets = [0, 0, 0], sizes = [1, 1, 256], strides = [1, 1, 1]} : vector<1x14x256xf32> to vector<1x1x256xf32>
    %95 = vector.extract_strided_slice %93 {offsets = [0, 1, 0], sizes = [1, 1, 256], strides = [1, 1, 1]} : vector<1x14x256xf32> to vector<1x1x256xf32>
    %96 = arith.maximumf %94, %95 : vector<1x1x256xf32>
    %97 = arith.truncf %96 : vector<1x1x256xf32> to vector<1x1x256xbf16>
    %c0_139 = arith.constant 0 : index
    %c4_140 = arith.constant 4 : index
    %c0_141 = arith.constant 0 : index
    %98 = vector.load %arg4[%c0_139, %c4_140, %c0_141] : memref<1x16x256xbf16, #tpu.memory_space<vmem>>, vector<1x1x256xbf16>
    tpu.vector_store %arg4[%c0_139, %c4_140, %c0_141], %97 {strides = array<i32>} : memref<1x16x256xbf16, #tpu.memory_space<vmem>>, vector<1x1x256xbf16>,
    %99 = vector.extract_strided_slice %93 {offsets = [0, 2, 0], sizes = [1, 1, 256], strides = [1, 1, 1]} : vector<1x14x256xf32> to vector<1x1x256xf32>
    %100 = vector.extract_strided_slice %93 {offsets = [0, 3, 0], sizes = [1, 1, 256], strides = [1, 1, 1]} : vector<1x14x256xf32> to vector<1x1x256xf32>
    %101 = arith.maximumf %99, %100 : vector<1x1x256xf32>
    %102 = vector.extract_strided_slice %93 {offsets = [0, 4, 0], sizes = [1, 1, 256], strides = [1, 1, 1]} : vector<1x14x256xf32> to vector<1x1x256xf32>
    %103 = arith.maximumf %101, %102 : vector<1x1x256xf32>
    %104 = arith.truncf %103 : vector<1x1x256xf32> to vector<1x1x256xbf16>
    %c0_142 = arith.constant 0 : index
    %c5 = arith.constant 5 : index
    %c0_143 = arith.constant 0 : index
    %105 = vector.load %arg4[%c0_142, %c5, %c0_143] : memref<1x16x256xbf16, #tpu.memory_space<vmem>>, vector<1x1x256xbf16>
    tpu.vector_store %arg4[%c0_142, %c5, %c0_143], %104 {strides = array<i32>} : memref<1x16x256xbf16, #tpu.memory_space<vmem>>, vector<1x1x256xbf16>,
    %106 = vector.extract_strided_slice %93 {offsets = [0, 5, 0], sizes = [1, 1, 256], strides = [1, 1, 1]} : vector<1x14x256xf32> to vector<1x1x256xf32>
    %107 = vector.extract_strided_slice %93 {offsets = [0, 6, 0], sizes = [1, 1, 256], strides = [1, 1, 1]} : vector<1x14x256xf32> to vector<1x1x256xf32>
    %108 = arith.maximumf %106, %107 : vector<1x1x256xf32>
    %109 = vector.extract_strided_slice %93 {offsets = [0, 7, 0], sizes = [1, 1, 256], strides = [1, 1, 1]} : vector<1x14x256xf32> to vector<1x1x256xf32>
    %110 = arith.maximumf %108, %109 : vector<1x1x256xf32>
    %111 = arith.truncf %110 : vector<1x1x256xf32> to vector<1x1x256xbf16>
    %c0_144 = arith.constant 0 : index
    %c6 = arith.constant 6 : index
    %c0_145 = arith.constant 0 : index
    %112 = vector.load %arg4[%c0_144, %c6, %c0_145] : memref<1x16x256xbf16, #tpu.memory_space<vmem>>, vector<1x1x256xbf16>
    tpu.vector_store %arg4[%c0_144, %c6, %c0_145], %111 {strides = array<i32>} : memref<1x16x256xbf16, #tpu.memory_space<vmem>>, vector<1x1x256xbf16>,
    %113 = vector.extract_strided_slice %93 {offsets = [0, 8, 0], sizes = [1, 1, 256], strides = [1, 1, 1]} : vector<1x14x256xf32> to vector<1x1x256xf32>
    %114 = vector.extract_strided_slice %93 {offsets = [0, 9, 0], sizes = [1, 1, 256], strides = [1, 1, 1]} : vector<1x14x256xf32> to vector<1x1x256xf32>
    %115 = arith.maximumf %113, %114 : vector<1x1x256xf32>
    %116 = arith.truncf %115 : vector<1x1x256xf32> to vector<1x1x256xbf16>
    %c0_146 = arith.constant 0 : index
    %c7 = arith.constant 7 : index
    %c0_147 = arith.constant 0 : index
    %117 = vector.load %arg4[%c0_146, %c7, %c0_147] : memref<1x16x256xbf16, #tpu.memory_space<vmem>>, vector<1x1x256xbf16>
    tpu.vector_store %arg4[%c0_146, %c7, %c0_147], %116 {strides = array<i32>} : memref<1x16x256xbf16, #tpu.memory_space<vmem>>, vector<1x1x256xbf16>,
    %c0_148 = arith.constant 0 : index
    %c70 = arith.constant 70 : index
    %c0_149 = arith.constant 0 : index
    %118 = vector.load %arg6[%c0_148, %c70, %c0_149] : memref<1x140x256xf32, #tpu.memory_space<vmem>>, vector<1x14x256xf32>
    %c0_150 = arith.constant 0 : index
    %c84 = arith.constant 84 : index
    %c0_151 = arith.constant 0 : index
    %119 = vector.load %arg6[%c0_150, %c84, %c0_151] : memref<1x140x256xf32, #tpu.memory_space<vmem>>, vector<1x14x256xf32>
    %120 = arith.maximumf %118, %119 : vector<1x14x256xf32>
    %c0_152 = arith.constant 0 : index
    %c98 = arith.constant 98 : index
    %c0_153 = arith.constant 0 : index
    %121 = vector.load %arg6[%c0_152, %c98, %c0_153] : memref<1x140x256xf32, #tpu.memory_space<vmem>>, vector<1x14x256xf32>
    %122 = arith.maximumf %120, %121 : vector<1x14x256xf32>
    %123 = vector.extract_strided_slice %122 {offsets = [0, 0, 0], sizes = [1, 1, 256], strides = [1, 1, 1]} : vector<1x14x256xf32> to vector<1x1x256xf32>
    %124 = vector.extract_strided_slice %122 {offsets = [0, 1, 0], sizes = [1, 1, 256], strides = [1, 1, 1]} : vector<1x14x256xf32> to vector<1x1x256xf32>
    %125 = arith.maximumf %123, %124 : vector<1x1x256xf32>
    %126 = arith.truncf %125 : vector<1x1x256xf32> to vector<1x1x256xbf16>
    %c0_154 = arith.constant 0 : index
    %c8 = arith.constant 8 : index
    %c0_155 = arith.constant 0 : index
    %127 = vector.load %arg4[%c0_154, %c8, %c0_155] : memref<1x16x256xbf16, #tpu.memory_space<vmem>>, vector<1x1x256xbf16>
    tpu.vector_store %arg4[%c0_154, %c8, %c0_155], %126 {strides = array<i32>} : memref<1x16x256xbf16, #tpu.memory_space<vmem>>, vector<1x1x256xbf16>,
    %128 = vector.extract_strided_slice %122 {offsets = [0, 2, 0], sizes = [1, 1, 256], strides = [1, 1, 1]} : vector<1x14x256xf32> to vector<1x1x256xf32>
    %129 = vector.extract_strided_slice %122 {offsets = [0, 3, 0], sizes = [1, 1, 256], strides = [1, 1, 1]} : vector<1x14x256xf32> to vector<1x1x256xf32>
    %130 = arith.maximumf %128, %129 : vector<1x1x256xf32>
    %131 = vector.extract_strided_slice %122 {offsets = [0, 4, 0], sizes = [1, 1, 256], strides = [1, 1, 1]} : vector<1x14x256xf32> to vector<1x1x256xf32>
    %132 = arith.maximumf %130, %131 : vector<1x1x256xf32>
    %133 = arith.truncf %132 : vector<1x1x256xf32> to vector<1x1x256xbf16>
    %c0_156 = arith.constant 0 : index
    %c9 = arith.constant 9 : index
    %c0_157 = arith.constant 0 : index
    %134 = vector.load %arg4[%c0_156, %c9, %c0_157] : memref<1x16x256xbf16, #tpu.memory_space<vmem>>, vector<1x1x256xbf16>
    tpu.vector_store %arg4[%c0_156, %c9, %c0_157], %133 {strides = array<i32>} : memref<1x16x256xbf16, #tpu.memory_space<vmem>>, vector<1x1x256xbf16>,
    %135 = vector.extract_strided_slice %122 {offsets = [0, 5, 0], sizes = [1, 1, 256], strides = [1, 1, 1]} : vector<1x14x256xf32> to vector<1x1x256xf32>
    %136 = vector.extract_strided_slice %122 {offsets = [0, 6, 0], sizes = [1, 1, 256], strides = [1, 1, 1]} : vector<1x14x256xf32> to vector<1x1x256xf32>
    %137 = arith.maximumf %135, %136 : vector<1x1x256xf32>
    %138 = vector.extract_strided_slice %122 {offsets = [0, 7, 0], sizes = [1, 1, 256], strides = [1, 1, 1]} : vector<1x14x256xf32> to vector<1x1x256xf32>
    %139 = arith.maximumf %137, %138 : vector<1x1x256xf32>
    %140 = arith.truncf %139 : vector<1x1x256xf32> to vector<1x1x256xbf16>
    %c0_158 = arith.constant 0 : index
    %c10 = arith.constant 10 : index
    %c0_159 = arith.constant 0 : index
    %141 = vector.load %arg4[%c0_158, %c10, %c0_159] : memref<1x16x256xbf16, #tpu.memory_space<vmem>>, vector<1x1x256xbf16>
    tpu.vector_store %arg4[%c0_158, %c10, %c0_159], %140 {strides = array<i32>} : memref<1x16x256xbf16, #tpu.memory_space<vmem>>, vector<1x1x256xbf16>,
    %142 = vector.extract_strided_slice %122 {offsets = [0, 8, 0], sizes = [1, 1, 256], strides = [1, 1, 1]} : vector<1x14x256xf32> to vector<1x1x256xf32>
    %143 = vector.extract_strided_slice %122 {offsets = [0, 9, 0], sizes = [1, 1, 256], strides = [1, 1, 1]} : vector<1x14x256xf32> to vector<1x1x256xf32>
    %144 = arith.maximumf %142, %143 : vector<1x1x256xf32>
    %145 = arith.truncf %144 : vector<1x1x256xf32> to vector<1x1x256xbf16>
    %c0_160 = arith.constant 0 : index
    %c11 = arith.constant 11 : index
    %c0_161 = arith.constant 0 : index
    %146 = vector.load %arg4[%c0_160, %c11, %c0_161] : memref<1x16x256xbf16, #tpu.memory_space<vmem>>, vector<1x1x256xbf16>
    tpu.vector_store %arg4[%c0_160, %c11, %c0_161], %145 {strides = array<i32>} : memref<1x16x256xbf16, #tpu.memory_space<vmem>>, vector<1x1x256xbf16>,
    %c0_162 = arith.constant 0 : index
    %c112 = arith.constant 112 : index
    %c0_163 = arith.constant 0 : index
    %147 = vector.load %arg6[%c0_162, %c112, %c0_163] : memref<1x140x256xf32, #tpu.memory_space<vmem>>, vector<1x14x256xf32>
    %c0_164 = arith.constant 0 : index
    %c126 = arith.constant 126 : index
    %c0_165 = arith.constant 0 : index
    %148 = vector.load %arg6[%c0_164, %c126, %c0_165] : memref<1x140x256xf32, #tpu.memory_space<vmem>>, vector<1x14x256xf32>
    %149 = arith.maximumf %147, %148 : vector<1x14x256xf32>
    %150 = vector.extract_strided_slice %149 {offsets = [0, 0, 0], sizes = [1, 1, 256], strides = [1, 1, 1]} : vector<1x14x256xf32> to vector<1x1x256xf32>
    %151 = vector.extract_strided_slice %149 {offsets = [0, 1, 0], sizes = [1, 1, 256], strides = [1, 1, 1]} : vector<1x14x256xf32> to vector<1x1x256xf32>
    %152 = arith.maximumf %150, %151 : vector<1x1x256xf32>
    %153 = arith.truncf %152 : vector<1x1x256xf32> to vector<1x1x256xbf16>
    %c0_166 = arith.constant 0 : index
    %c12 = arith.constant 12 : index
    %c0_167 = arith.constant 0 : index
    %154 = vector.load %arg4[%c0_166, %c12, %c0_167] : memref<1x16x256xbf16, #tpu.memory_space<vmem>>, vector<1x1x256xbf16>
    tpu.vector_store %arg4[%c0_166, %c12, %c0_167], %153 {strides = array<i32>} : memref<1x16x256xbf16, #tpu.memory_space<vmem>>, vector<1x1x256xbf16>,
    %155 = vector.extract_strided_slice %149 {offsets = [0, 2, 0], sizes = [1, 1, 256], strides = [1, 1, 1]} : vector<1x14x256xf32> to vector<1x1x256xf32>
    %156 = vector.extract_strided_slice %149 {offsets = [0, 3, 0], sizes = [1, 1, 256], strides = [1, 1, 1]} : vector<1x14x256xf32> to vector<1x1x256xf32>
    %157 = arith.maximumf %155, %156 : vector<1x1x256xf32>
    %158 = vector.extract_strided_slice %149 {offsets = [0, 4, 0], sizes = [1, 1, 256], strides = [1, 1, 1]} : vector<1x14x256xf32> to vector<1x1x256xf32>
    %159 = arith.maximumf %157, %158 : vector<1x1x256xf32>
    %160 = arith.truncf %159 : vector<1x1x256xf32> to vector<1x1x256xbf16>
    %c0_168 = arith.constant 0 : index
    %c13 = arith.constant 13 : index
    %c0_169 = arith.constant 0 : index
    %161 = vector.load %arg4[%c0_168, %c13, %c0_169] : memref<1x16x256xbf16, #tpu.memory_space<vmem>>, vector<1x1x256xbf16>
    tpu.vector_store %arg4[%c0_168, %c13, %c0_169], %160 {strides = array<i32>} : memref<1x16x256xbf16, #tpu.memory_space<vmem>>, vector<1x1x256xbf16>,
    %162 = vector.extract_strided_slice %149 {offsets = [0, 5, 0], sizes = [1, 1, 256], strides = [1, 1, 1]} : vector<1x14x256xf32> to vector<1x1x256xf32>
    %163 = vector.extract_strided_slice %149 {offsets = [0, 6, 0], sizes = [1, 1, 256], strides = [1, 1, 1]} : vector<1x14x256xf32> to vector<1x1x256xf32>
    %164 = arith.maximumf %162, %163 : vector<1x1x256xf32>
    %165 = vector.extract_strided_slice %149 {offsets = [0, 7, 0], sizes = [1, 1, 256], strides = [1, 1, 1]} : vector<1x14x256xf32> to vector<1x1x256xf32>
    %166 = arith.maximumf %164, %165 : vector<1x1x256xf32>
    %167 = arith.truncf %166 : vector<1x1x256xf32> to vector<1x1x256xbf16>
    %c0_170 = arith.constant 0 : index
    %c14_171 = arith.constant 14 : index
    %c0_172 = arith.constant 0 : index
    %168 = vector.load %arg4[%c0_170, %c14_171, %c0_172] : memref<1x16x256xbf16, #tpu.memory_space<vmem>>, vector<1x1x256xbf16>
    tpu.vector_store %arg4[%c0_170, %c14_171, %c0_172], %167 {strides = array<i32>} : memref<1x16x256xbf16, #tpu.memory_space<vmem>>, vector<1x1x256xbf16>,
    %169 = vector.extract_strided_slice %149 {offsets = [0, 8, 0], sizes = [1, 1, 256], strides = [1, 1, 1]} : vector<1x14x256xf32> to vector<1x1x256xf32>
    %170 = vector.extract_strided_slice %149 {offsets = [0, 9, 0], sizes = [1, 1, 256], strides = [1, 1, 1]} : vector<1x14x256xf32> to vector<1x1x256xf32>
    %171 = arith.maximumf %169, %170 : vector<1x1x256xf32>
    %172 = arith.truncf %171 : vector<1x1x256xf32> to vector<1x1x256xbf16>
    %c0_173 = arith.constant 0 : index
    %c15_174 = arith.constant 15 : index
    %c0_175 = arith.constant 0 : index
    %173 = vector.load %arg4[%c0_173, %c15_174, %c0_175] : memref<1x16x256xbf16, #tpu.memory_space<vmem>>, vector<1x1x256xbf16>
    tpu.vector_store %arg4[%c0_173, %c15_174, %c0_175], %172 {strides = array<i32>} : memref<1x16x256xbf16, #tpu.memory_space<vmem>>, vector<1x1x256xbf16>,
    return
  }
  func.func @transform_0(%arg0: i32) -> (i32, i32, i32) {
    %c0_i32 = arith.constant 0 : i32
    %c0_i32_0 = arith.constant 0 : i32
    %c0_i32_1 = arith.constant 0 : i32
    return %arg0, %c0_i32, %c0_i32_0 : i32, i32, i32
  }
  func.func @transform_1(%arg0: i32) -> (i32, i32) {
    %c0_i32 = arith.constant 0 : i32
    %c0_i32_0 = arith.constant 0 : i32
    %c0_i32_1 = arith.constant 0 : i32
    return %c0_i32, %c0_i32_0 : i32, i32
  }
  func.func @transform_2(%arg0: i32) -> (i32, i32) {
    %c0_i32 = arith.constant 0 : i32
    %c0_i32_0 = arith.constant 0 : i32
    %c0_i32_1 = arith.constant 0 : i32
    return %c0_i32, %c0_i32_0 : i32, i32
  }
  func.func @transform_3(%arg0: i32) -> (i32, i32, i32) {
    %c0_i32 = arith.constant 0 : i32
    %c0_i32_0 = arith.constant 0 : i32
    %c0_i32_1 = arith.constant 0 : i32
    return %arg0, %c0_i32, %c0_i32_0 : i32, i32, i32
  }
}

module attributes {stable_mosaic.version = 11 : i64} {
  func.func @_fc_kernel(%arg0: i32, %arg1: i32, %arg2: memref<2x512xbf16, #tpu.memory_space<vmem>>, %arg3: memref<512x384xbf16, #tpu.memory_space<vmem>>, %arg4: memref<384x192xbf16, #tpu.memory_space<vmem>>, %arg5: memref<192x128xbf16, #tpu.memory_space<vmem>>, %arg6: memref<2x128xf32, #tpu.memory_space<vmem>>, %arg7: memref<2x384xf32, #tpu.memory_space<vmem>>) attributes {dimension_semantics = [#tpu.dimension_semantics<parallel>, #tpu.dimension_semantics<arbitrary>], iteration_bounds = array<i64: 1, 8>, scalar_prefetch = 0 : i64, scratch_operands = 1 : i64, tpu.core_type = #tpu.core_type<tc>, window_params = [{transform_indices = @transform_0, window_bounds = array<i64: 2, 512>}, {transform_indices = @transform_1, window_bounds = array<i64: 512, 384>}, {pipeline_mode = #tpu.pipeline_mode<synchronous>, transform_indices = @transform_2, window_bounds = array<i64: 384, 192>}, {pipeline_mode = #tpu.pipeline_mode<synchronous>, transform_indices = @transform_3, window_bounds = array<i64: 192, 128>}, {transform_indices = @transform_4, window_bounds = array<i64: 2, 128>}]} {
    %c0_i32 = arith.constant 0 : i32
    %0 = arith.cmpi eq, %arg1, %c0_i32 : i32
    %1 = arith.extui %0 : i1 to i32
    %c0_i32_0 = arith.constant 0 : i32
    %2 = arith.cmpi ne, %1, %c0_i32_0 : i32
    scf.if %2 {
      %cst_9 = arith.constant 0.000000e+00 : f32
      %12 = vector.broadcast %cst_9 : f32 to vector<2x384xf32>
      %c0_10 = arith.constant 0 : index
      %c0_11 = arith.constant 0 : index
      %13 = vector.load %arg7[%c0_10, %c0_11] : memref<2x384xf32, #tpu.memory_space<vmem>>, vector<2x384xf32>
      tpu.vector_store %arg7[%c0_10, %c0_11], %12 {strides = array<i32>} : memref<2x384xf32, #tpu.memory_space<vmem>>, vector<2x384xf32>,
    } else {
    }
    %c0 = arith.constant 0 : index
    %c0_1 = arith.constant 0 : index
    %3 = vector.load %arg7[%c0, %c0_1] : memref<2x384xf32, #tpu.memory_space<vmem>>, vector<2x384xf32>
    %c0_2 = arith.constant 0 : index
    %c0_3 = arith.constant 0 : index
    %4 = vector.load %arg2[%c0_2, %c0_3] : memref<2x512xbf16, #tpu.memory_space<vmem>>, vector<2x512xbf16>
    %c0_4 = arith.constant 0 : index
    %c0_5 = arith.constant 0 : index
    %5 = vector.load %arg3[%c0_4, %c0_5] : memref<512x384xbf16, #tpu.memory_space<vmem>>, vector<512x384xbf16>
    %cst = arith.constant dense<0.000000e+00> : vector<2x384xf32>
    %6 = tpu.matmul %4, %5, %cst {dimension_numbers = #tpu.dot_dimension_numbers<[1], [0], [0], [1], [0, 0, 1, 1], [], []>} : vector<2x512xbf16>, vector<512x384xbf16>, vector<2x384xf32> -> vector<2x384xf32>
    %7 = arith.addf %3, %6 : vector<2x384xf32>
    %c0_6 = arith.constant 0 : index
    %c0_7 = arith.constant 0 : index
    %8 = vector.load %arg7[%c0_6, %c0_7] : memref<2x384xf32, #tpu.memory_space<vmem>>, vector<2x384xf32>
    tpu.vector_store %arg7[%c0_6, %c0_7], %7 {strides = array<i32>} : memref<2x384xf32, #tpu.memory_space<vmem>>, vector<2x384xf32>,
    %c7_i32 = arith.constant 7 : i32
    %9 = arith.cmpi eq, %arg1, %c7_i32 : i32
    %10 = arith.extui %9 : i1 to i32
    %c0_i32_8 = arith.constant 0 : i32
    %11 = arith.cmpi ne, %10, %c0_i32_8 : i32
    scf.if %11 {
      %c0_9 = arith.constant 0 : index
      %c0_10 = arith.constant 0 : index
      %12 = vector.load %arg7[%c0_9, %c0_10] : memref<2x384xf32, #tpu.memory_space<vmem>>, vector<2x384xf32>
      %cst_11 = arith.constant 0.000000e+00 : f32
      %13 = vector.broadcast %cst_11 : f32 to vector<2x384xf32>
      %14 = arith.maximumf %12, %13 : vector<2x384xf32>
      %15 = arith.truncf %14 : vector<2x384xf32> to vector<2x384xbf16>
      %c0_12 = arith.constant 0 : index
      %c0_13 = arith.constant 0 : index
      %16 = vector.load %arg4[%c0_12, %c0_13] : memref<384x192xbf16, #tpu.memory_space<vmem>>, vector<384x192xbf16>
      %cst_14 = arith.constant dense<0.000000e+00> : vector<2x192xf32>
      %17 = tpu.matmul %15, %16, %cst_14 {dimension_numbers = #tpu.dot_dimension_numbers<[1], [0], [0], [1], [0, 0, 1, 1], [], []>} : vector<2x384xbf16>, vector<384x192xbf16>, vector<2x192xf32> -> vector<2x192xf32>
      %cst_15 = arith.constant 0.000000e+00 : f32
      %18 = vector.broadcast %cst_15 : f32 to vector<2x192xf32>
      %19 = arith.maximumf %17, %18 : vector<2x192xf32>
      %20 = arith.truncf %19 : vector<2x192xf32> to vector<2x192xbf16>
      %c0_16 = arith.constant 0 : index
      %c0_17 = arith.constant 0 : index
      %21 = vector.load %arg5[%c0_16, %c0_17] : memref<192x128xbf16, #tpu.memory_space<vmem>>, vector<192x128xbf16>
      %cst_18 = arith.constant dense<0.000000e+00> : vector<2x128xf32>
      %22 = tpu.matmul %20, %21, %cst_18 {dimension_numbers = #tpu.dot_dimension_numbers<[1], [0], [0], [1], [0, 0, 1, 1], [], []>} : vector<2x192xbf16>, vector<192x128xbf16>, vector<2x128xf32> -> vector<2x128xf32>
      %c0_19 = arith.constant 0 : index
      %c0_20 = arith.constant 0 : index
      %23 = vector.load %arg6[%c0_19, %c0_20] : memref<2x128xf32, #tpu.memory_space<vmem>>, vector<2x128xf32>
      tpu.vector_store %arg6[%c0_19, %c0_20], %22 {strides = array<i32>} : memref<2x128xf32, #tpu.memory_space<vmem>>, vector<2x128xf32>,
    } else {
    }
    return
  }
  func.func @transform_0(%arg0: i32, %arg1: i32) -> (i32, i32) {
    %c0_i32 = arith.constant 0 : i32
    return %arg0, %arg1 : i32, i32
  }
  func.func @transform_1(%arg0: i32, %arg1: i32) -> (i32, i32) {
    %c0_i32 = arith.constant 0 : i32
    %c0_i32_0 = arith.constant 0 : i32
    return %arg1, %c0_i32 : i32, i32
  }
  func.func @transform_2(%arg0: i32, %arg1: i32) -> (i32, i32) {
    %c0_i32 = arith.constant 0 : i32
    %c0_i32_0 = arith.constant 0 : i32
    %c0_i32_1 = arith.constant 0 : i32
    return %c0_i32, %c0_i32_0 : i32, i32
  }
  func.func @transform_3(%arg0: i32, %arg1: i32) -> (i32, i32) {
    %c0_i32 = arith.constant 0 : i32
    %c0_i32_0 = arith.constant 0 : i32
    %c0_i32_1 = arith.constant 0 : i32
    return %c0_i32, %c0_i32_0 : i32, i32
  }
  func.func @transform_4(%arg0: i32, %arg1: i32) -> (i32, i32) {
    %c0_i32 = arith.constant 0 : i32
    %c0_i32_0 = arith.constant 0 : i32
    return %arg0, %c0_i32 : i32, i32
  }
}

</mosaic_0001>

<bundles_post_ra>
// kernel: net_forward.3
= control target key start
LH: loop header
LB: loop body
LE: loop exit
PB: predicated region body
PF: predicated region fallthrough
CT: control target
= control target key end

     0   :  { %s2352_s12 = smov 0   ;;  %s3143_s0 = inlined_call_operand.vmem [shape: bf16[2,900,32], index: 0, kind: input, shape index: {}]   ;;  %s3144_s1 = inlined_call_operand.vmem [shape: bf16[32,128], index: 1, kind: input, shape index: {}]   ;;  %s3145_s2 = inlined_call_operand.vmem [shape: f32[1,128], index: 2, kind: input, shape index: {}]   ;;  %s3146_s3 = inlined_call_operand.vmem [shape: bf16[2,210,128], index: 3, kind: output, shape index: {}]  }
   0x1 LB: > { %s1798_s13 = sadd.s32 4294967295, %s2327_s12   ;;  %p1802_p0 = scmp.ge.s32.totalorder %s2327_s12, 1  ;;  %s2327_s12 = sphi %s2352_s12, %s13_s12  }
   0x2   : > { %p137_p1 = scmp.lt.s32.totalorder %s2327_s12, 3 }
   0x4   : > { %p138_p2 = pnand %p1802_p0, %p137_p1 }
   0x6   : > { %141 = sbr.rel (%p138_p2) target bundleno = 482 (0x1e2), region = 32 }
   0xd   : > { %v2262_v0 = vld [vmem:[%s3144_s1] sm:$0xff]   ;;  %v2329_v1 = vmov 0.0   ;;  %v2263_v2 = vld [vmem:[%s3144_s1 + $0x8] sm:$0xff]   ;;  %p161_p3 = scmp.lt.s32.totalorder %s1798_s13, 1  ;;  %vm2330_vm0 = vmmov 0   ;;  %vm611_vm1 = vcmask 261120  }
   0xe   : > { %2013 = vmatprep.subr.bf16.mxu0 %v2329_v1  ;;  %2245 = vmatprep.subr.bf16.mxu1 %v2329_v1  ;;  %vm1284_vm2 = vcmask 1043456   ;;  %vm1639_vm3 = vcmask 1040384   ;;  %vm1640_vm4 = vcmask 1044484   ;;  %vm1625_vm5 = vcmask 1042432  }
   0xf   : > { %2014 = vmatpush3.bf16.msra.mxu0 %v2262_v0  ;;  %2247 = vmatpush3.bf16.msra.mxu1 %v2262_v0  ;;  %s3229_s13 = smov (!%p161_p3, %s1798_s13), 1  ;;  %vm1626_vm6 = vcmask 1046532   ;;  %vm3036_vm7 = vmor %vm1639_vm3, %vm1640_vm4 }
  0x10   : > { %2015 = vmatprep.subr.bf16.mxu0 %v2329_v1  ;;  %2246 = vmatprep.subr.bf16.mxu1 %v2329_v1  ;;  %s2249_s18 = smul.u32 452, %s3229_s13  ;;  %vm3062_vm8 = vmor %vm1625_vm5, %vm1626_vm6 }
  0x11   : > { %2017 = vmatprep.mubr.msk.bf16.mxu0 %vm2330_vm0, %v2329_v1  ;;  %2133 = vmatprep.mubr.msk.bf16.mxu1 %vm2330_vm0, %v2329_v1  ;;  %s2250_s22 = smul.u32 108, %s3229_s13 }
  0x12   : > { %s2380_s21 = scalar_lea.vmem %s3143_s0, %s2249_s18 }
  0x13   : > { %2016 = vmatpush3.bf16.msra.mxu0 %v2263_v2  ;;  %2248 = vmatpush3.bf16.msra.mxu1 %v2263_v2  ;;  %v2264_v3 = vld [vmem:[%s2380_s21] sm:$0xff]   ;;  %v2265_v4 = vld [vmem:[%s2380_s21 + $0xe8] sm:$0xff]   ;;  %v2267_v6 = vld [vmem:[%s2380_s21 + $0xf0] sm:$0xff]   ;;  %s2718_s25 = scalar_lea.vmem %s3146_s3, %s2250_s22 }
  0x14   : > { %v2266_v5 = vld [vmem:[%s2380_s21 + $0x8] sm:$0xff]   ;;  %v2268_v7 = vld [vmem:[%s2380_s21 + $0x10] sm:$0xff]   ;;  %v2269_v8 = vld [vmem:[%s2380_s21 + $0xf8] sm:$0xff]  }
  0x15   : > { %v2270_v9 = vld [vmem:[%s2380_s21 + $0x18] sm:$0xff]   ;;  %v2271_v10 = vld [vmem:[%s2380_s21 + $0x100] sm:$0xff]   ;;  %v2273_v12 = vld [vmem:[%s2380_s21 + $0x108] sm:$0xff]  }
  0x16   : > { %2018 = vmatmul.mubr.msk.bf16.vlgmr.msra.gmra.mrb[0].mxu0 %vm611_vm1, %v2264_v3  ;;  %2134 = vmatmul.mubr.msk.bf16.vlgmr.msra.gmra.mrb[0].mxu1 %vm611_vm1, %v2265_v4  ;;  %v2272_v11 = vld [vmem:[%s2380_s21 + $0x20] sm:$0xff]   ;;  %v2274_v13 = vld [vmem:[%s2380_s21 + $0x28] sm:$0xff]   ;;  %v2275_v14 = vld [vmem:[%s2380_s21 + $0x110] sm:$0xff]  }
  0x17   : > { %2021 = vmatprep.mubr.msk.bf16.mxu0 %vm2330_vm0, %v2329_v1  ;;  %2137 = vmatprep.mubr.msk.bf16.mxu1 %vm2330_vm0, %v2329_v1  ;;  %v2276_v15 = vld [vmem:[%s2380_s21 + $0x30] sm:$0xff]   ;;  %v2277_v16 = vld [vmem:[%s2380_s21 + $0x118] sm:$0xff]   ;;  %v2279_v18 = vld [vmem:[%s2380_s21 + $0x120] sm:$0xff]  }
  0x18   : > { %v2278_v17 = vld [vmem:[%s2380_s21 + $0x38] sm:$0xff]   ;;  %v2280_v19 = vld [vmem:[%s2380_s21 + $0x40] sm:$0xff]   ;;  %v2281_v20 = vld [vmem:[%s2380_s21 + $0x128] sm:$0xff]  }
  0x19   : > { %v2282_v21 = vld [vmem:[%s2380_s21 + $0x48] sm:$0xff]   ;;  %v2283_v22 = vld [vmem:[%s2380_s21 + $0x130] sm:$0xff]   ;;  %v2285_v24 = vld [vmem:[%s2380_s21 + $0x138] sm:$0xff]  }
  0x1a   : > { %v2284_v23 = vld [vmem:[%s2380_s21 + $0x50] sm:$0xff]   ;;  %v2286_v25 = vld [vmem:[%s2380_s21 + $0x58] sm:$0xff]   ;;  %v2287_v26 = vld [vmem:[%s2380_s21 + $0x140] sm:$0xff]  }
  0x1b   : > { %v2288_v27 = vld [vmem:[%s2380_s21 + $0x60] sm:$0xff]   ;;  %v2289_v28 = vld [vmem:[%s2380_s21 + $0x148] sm:$0xff]   ;;  %v2291_v30 = vld [vmem:[%s2380_s21 + $0x150] sm:$0xff]  }
  0x1c   : > { %v2290_v29 = vld [vmem:[%s2380_s21 + $0x68] sm:$0xff]   ;;  %v2292_v31 = vld [vmem:[%s2380_s21 + $0x70] sm:$0xff]   ;;  %v2293_v32 = vld [vmem:[%s2380_s21 + $0x158] sm:$0xff]  }
  0x1d   : > { %v2294_v33 = vld [vmem:[%s2380_s21 + $0x78] sm:$0xff]   ;;  %v2295_v34 = vld [vmem:[%s2380_s21 + $0x160] sm:$0xff]   ;;  %v2297_v36 = vld [vmem:[%s2380_s21 + $0x168] sm:$0xff]  }
  0x1e   : > { %2022 = vmatmul.mubr.msk.bf16.gmra.mrb[4].mxu0 %vm611_vm1, %v2266_v5  ;;  %2138 = vmatmul.mubr.msk.bf16.gmra.mrb[4].mxu1 %vm611_vm1, %v2267_v6  ;;  %v2296_v35 = vld [vmem:[%s2380_s21 + $0x80] sm:$0xff]   ;;  %v2298_v37 = vld [vmem:[%s2380_s21 + $0x88] sm:$0xff]   ;;  %v2299_v38 = vld [vmem:[%s2380_s21 + $0x170] sm:$0xff]  }
  0x1f   : > { %2025 = vmatprep.mubr.msk.bf16.mxu0 %vm2330_vm0, %v2329_v1  ;;  %2141 = vmatprep.mubr.msk.bf16.mxu1 %vm2330_vm0, %v2329_v1  ;;  %v2300_v39 = vld [vmem:[%s2380_s21 + $0x90] sm:$0xff]   ;;  %v2301_v40 = vld [vmem:[%s2380_s21 + $0x178] sm:$0xff]   ;;  %v2303_v42 = vld [vmem:[%s2380_s21 + $0x180] sm:$0xff]  }
  0x20   : > { %v2302_v41 = vld [vmem:[%s2380_s21 + $0x98] sm:$0xff]   ;;  %v2304_v43 = vld [vmem:[%s2380_s21 + $0xa0] sm:$0xff]   ;;  %v2305_v44 = vld [vmem:[%s2380_s21 + $0x188] sm:$0xff]  }
  0x21   : > { %v2306_v45 = vld [vmem:[%s2380_s21 + $0xa8] sm:$0xff]   ;;  %v2307_v46 = vld [vmem:[%s2380_s21 + $0x190] sm:$0xff]   ;;  %v2309_v48 = vld [vmem:[%s2380_s21 + $0x198] sm:$0xff]  }
  0x22   : > { %v2308_v47 = vld [vmem:[%s2380_s21 + $0xb0] sm:$0xff]   ;;  %v2310_v49 = vld [vmem:[%s2380_s21 + $0xb8] sm:$0xff]   ;;  %v2311_v50 = vld [vmem:[%s2380_s21 + $0x1a0] sm:$0xff]  }
  0x23   : > { %v2312_v51 = vld [vmem:[%s2380_s21 + $0xc0] sm:$0xff]   ;;  %v2313_v52 = vld [vmem:[%s2380_s21 + $0x1a8] sm:$0xff]   ;;  %v2315_v54 = vld [vmem:[%s2380_s21 + $0x1b0] sm:$0xff]  }
  0x24   : > { %v2314_v53 = vld [vmem:[%s2380_s21 + $0xc8] sm:$0xff]   ;;  %v2316_v55 = vld [vmem:[%s2380_s21 + $0xd0] sm:$0xff]   ;;  %v2317_v56 = vld [vmem:[%s2380_s21 + $0x1b8] sm:$0xff]  }
  0x25   : > { %v2318_v59 = vld [vmem:[%s2380_s21 + $0xd8] sm:$0xff]   ;;  %v2319_v62 = vld [vmem:[%s2380_s21 + $0x1c0] ss:$0 sps:$4 sm:$0x33]  }
  0x26   : > { %2026 = vmatmul.mubr.msk.bf16.gmra.mrb[8].mxu0 %vm611_vm1, %v2268_v7  ;;  %2142 = vmatmul.mubr.msk.bf16.gmra.mrb[8].mxu1 %vm611_vm1, %v2269_v8  ;;  %v2320_v6 = vld [vmem:[%s2380_s21 + $0xe0] sm:$0xff]  }
  0x27   : > { %2029 = vmatprep.mubr.msk.bf16.mxu0 %vm2330_vm0, %v2329_v1  ;;  %2145 = vmatprep.mubr.msk.bf16.mxu1 %vm2330_vm0, %v2329_v1 }
  0x2e   : > { %2030 = vmatmul.mubr.msk.bf16.gmra.mrb[12].mxu0 %vm611_vm1, %v2270_v9  ;;  %2146 = vmatmul.mubr.msk.bf16.gmra.mrb[12].mxu1 %vm611_vm1, %v2271_v10 }
  0x2f   : > { %2033 = vmatprep.mubr.msk.bf16.mxu0 %vm2330_vm0, %v2329_v1  ;;  %2149 = vmatprep.mubr.msk.bf16.mxu1 %vm2330_vm0, %v2329_v1 }
  0x36   : > { %2034 = vmatmul.mubr.msk.bf16.gmra.mrb[16].mxu0 %vm611_vm1, %v2272_v11  ;;  %2150 = vmatmul.mubr.msk.bf16.gmra.mrb[16].mxu1 %vm611_vm1, %v2273_v12 }
  0x37   : > { %2037 = vmatprep.mubr.msk.bf16.mxu0 %vm2330_vm0, %v2329_v1  ;;  %2153 = vmatprep.mubr.msk.bf16.mxu1 %vm2330_vm0, %v2329_v1 }
  0x3e   : > { %2038 = vmatmul.mubr.msk.bf16.gmra.mrb[20].mxu0 %vm611_vm1, %v2274_v13  ;;  %2154 = vmatmul.mubr.msk.bf16.gmra.mrb[20].mxu1 %vm611_vm1, %v2275_v14 }
  0x3f   : > { %2041 = vmatprep.mubr.msk.bf16.mxu0 %vm2330_vm0, %v2329_v1  ;;  %2157 = vmatprep.mubr.msk.bf16.mxu1 %vm2330_vm0, %v2329_v1 }
  0x46   : > { %2042 = vmatmul.mubr.msk.bf16.gmra.mrb[24].mxu0 %vm611_vm1, %v2276_v15  ;;  %2158 = vmatmul.mubr.msk.bf16.gmra.mrb[24].mxu1 %vm611_vm1, %v2277_v16 }
  0x47   : > { %2045 = vmatprep.mubr.msk.bf16.mxu0 %vm2330_vm0, %v2329_v1  ;;  %2161 = vmatprep.mubr.msk.bf16.mxu1 %vm2330_vm0, %v2329_v1 }
  0x4e   : > { %2046 = vmatmul.mubr.msk.bf16.gmra.mrb[28].mxu0 %vm611_vm1, %v2278_v17  ;;  %2162 = vmatmul.mubr.msk.bf16.gmra.mrb[28].mxu1 %vm611_vm1, %v2279_v18 }
  0x4f   : > { %2049 = vmatprep.mubr.msk.bf16.mxu0 %vm2330_vm0, %v2329_v1  ;;  %2165 = vmatprep.mubr.msk.bf16.mxu1 %vm2330_vm0, %v2329_v1 }
  0x56   : > { %2050 = vmatmul.mubr.msk.bf16.gmra.mrb[32].mxu0 %vm611_vm1, %v2280_v19  ;;  %2166 = vmatmul.mubr.msk.bf16.gmra.mrb[32].mxu1 %vm611_vm1, %v2281_v20 }
  0x57   : > { %2053 = vmatprep.mubr.msk.bf16.mxu0 %vm2330_vm0, %v2329_v1  ;;  %2169 = vmatprep.mubr.msk.bf16.mxu1 %vm2330_vm0, %v2329_v1 }
  0x5e   : > { %2054 = vmatmul.mubr.msk.bf16.gmra.mrb[36].mxu0 %vm611_vm1, %v2282_v21  ;;  %2170 = vmatmul.mubr.msk.bf16.gmra.mrb[36].mxu1 %vm611_vm1, %v2283_v22 }
  0x5f   : > { %2057 = vmatprep.mubr.msk.bf16.mxu0 %vm2330_vm0, %v2329_v1  ;;  %2173 = vmatprep.mubr.msk.bf16.mxu1 %vm2330_vm0, %v2329_v1 }
  0x66   : > { %2058 = vmatmul.mubr.msk.bf16.gmra.mrb[40].mxu0 %vm611_vm1, %v2284_v23  ;;  %2174 = vmatmul.mubr.msk.bf16.gmra.mrb[40].mxu1 %vm611_vm1, %v2285_v24 }
  0x67   : > { %2061 = vmatprep.mubr.msk.bf16.mxu0 %vm2330_vm0, %v2329_v1  ;;  %2177 = vmatprep.mubr.msk.bf16.mxu1 %vm2330_vm0, %v2329_v1 }
  0x6e   : > { %2062 = vmatmul.mubr.msk.bf16.gmra.mrb[44].mxu0 %vm611_vm1, %v2286_v25  ;;  %2178 = vmatmul.mubr.msk.bf16.gmra.mrb[44].mxu1 %vm611_vm1, %v2287_v26 }
  0x6f   : > { %2065 = vmatprep.mubr.msk.bf16.mxu0 %vm2330_vm0, %v2329_v1  ;;  %2181 = vmatprep.mubr.msk.bf16.mxu1 %vm2330_vm0, %v2329_v1 }
  0x76   : > { %2066 = vmatmul.mubr.msk.bf16.gmra.mrb[48].mxu0 %vm611_vm1, %v2288_v27  ;;  %2182 = vmatmul.mubr.msk.bf16.gmra.mrb[48].mxu1 %vm611_vm1, %v2289_v28 }
  0x77   : > { %2069 = vmatprep.mubr.msk.bf16.mxu0 %vm2330_vm0, %v2329_v1  ;;  %2185 = vmatprep.mubr.msk.bf16.mxu1 %vm2330_vm0, %v2329_v1 }
  0x7e   : > { %2070 = vmatmul.mubr.msk.bf16.gmra.mrb[52].mxu0 %vm611_vm1, %v2290_v29  ;;  %2186 = vmatmul.mubr.msk.bf16.gmra.mrb[52].mxu1 %vm611_vm1, %v2291_v30 }
  0x7f   : > { %2073 = vmatprep.mubr.msk.bf16.mxu0 %vm2330_vm0, %v2329_v1  ;;  %2189 = vmatprep.mubr.msk.bf16.mxu1 %vm2330_vm0, %v2329_v1 }
  0x86   : > { %2074 = vmatmul.mubr.msk.bf16.gmra.mrb[56].mxu0 %vm611_vm1, %v2292_v31  ;;  %2190 = vmatmul.mubr.msk.bf16.gmra.mrb[56].mxu1 %vm611_vm1, %v2293_v32 }
  0x87   : > { %2077 = vmatprep.mubr.msk.bf16.mxu0 %vm2330_vm0, %v2329_v1  ;;  %2193 = vmatprep.mubr.msk.bf16.mxu1 %vm2330_vm0, %v2329_v1 }
  0x8e   : > { %2078 = vmatmul.mubr.msk.bf16.gmra.mrb[60].mxu0 %vm611_vm1, %v2294_v33  ;;  %2194 = vmatmul.mubr.msk.bf16.gmra.mrb[60].mxu1 %vm611_vm1, %v2295_v34 }
  0x8f   : > { %2081 = vmatprep.mubr.msk.bf16.mxu0 %vm2330_vm0, %v2329_v1  ;;  %2197 = vmatprep.mubr.msk.bf16.mxu1 %vm2330_vm0, %v2329_v1 }
  0x96   : > { %2082 = vmatmul.mubr.msk.bf16.gmra.mrb[64].mxu0 %vm611_vm1, %v2296_v35  ;;  %2198 = vmatmul.mubr.msk.bf16.gmra.mrb[64].mxu1 %vm611_vm1, %v2297_v36 }
  0x97   : > { %2085 = vmatprep.mubr.msk.bf16.mxu0 %vm2330_vm0, %v2329_v1  ;;  %2201 = vmatprep.mubr.msk.bf16.mxu1 %vm2330_vm0, %v2329_v1 }
  0x9e   : > { %2086 = vmatmul.mubr.msk.bf16.gmra.mrb[68].mxu0 %vm611_vm1, %v2298_v37  ;;  %2202 = vmatmul.mubr.msk.bf16.gmra.mrb[68].mxu1 %vm611_vm1, %v2299_v38 }
  0x9f   : > { %2089 = vmatprep.mubr.msk.bf16.mxu0 %vm2330_vm0, %v2329_v1  ;;  %2205 = vmatprep.mubr.msk.bf16.mxu1 %vm2330_vm0, %v2329_v1 }
  0xa6   : > { %2090 = vmatmul.mubr.msk.bf16.gmra.mrb[72].mxu0 %vm611_vm1, %v2300_v39  ;;  %2206 = vmatmul.mubr.msk.bf16.gmra.mrb[72].mxu1 %vm611_vm1, %v2301_v40 }
  0xa7   : > { %2093 = vmatprep.mubr.msk.bf16.mxu0 %vm2330_vm0, %v2329_v1  ;;  %2209 = vmatprep.mubr.msk.bf16.mxu1 %vm2330_vm0, %v2329_v1 }
  0xae   : > { %2094 = vmatmul.mubr.msk.bf16.gmra.mrb[76].mxu0 %vm611_vm1, %v2302_v41  ;;  %2210 = vmatmul.mubr.msk.bf16.gmra.mrb[76].mxu1 %vm611_vm1, %v2303_v42 }
  0xaf   : > { %2097 = vmatprep.mubr.msk.bf16.mxu0 %vm2330_vm0, %v2329_v1  ;;  %2213 = vmatprep.mubr.msk.bf16.mxu1 %vm2330_vm0, %v2329_v1 }
  0xb6   : > { %2098 = vmatmul.mubr.msk.bf16.gmra.mrb[80].mxu0 %vm611_vm1, %v2304_v43  ;;  %2214 = vmatmul.mubr.msk.bf16.gmra.mrb[80].mxu1 %vm611_vm1, %v2305_v44 }
  0xb7   : > { %2101 = vmatprep.mubr.msk.bf16.mxu0 %vm2330_vm0, %v2329_v1  ;;  %2217 = vmatprep.mubr.msk.bf16.mxu1 %vm2330_vm0, %v2329_v1 }
  0xbe   : > { %2102 = vmatmul.mubr.msk.bf16.gmra.mrb[84].mxu0 %vm611_vm1, %v2306_v45  ;;  %2218 = vmatmul.mubr.msk.bf16.gmra.mrb[84].mxu1 %vm611_vm1, %v2307_v46 }
  0xbf   : > { %2105 = vmatprep.mubr.msk.bf16.mxu0 %vm2330_vm0, %v2329_v1  ;;  %2221 = vmatprep.mubr.msk.bf16.mxu1 %vm2330_vm0, %v2329_v1 }
  0xc6   : > { %2106 = vmatmul.mubr.msk.bf16.gmra.mrb[88].mxu0 %vm611_vm1, %v2308_v47  ;;  %2222 = vmatmul.mubr.msk.bf16.gmra.mrb[88].mxu1 %vm611_vm1, %v2309_v48 }
  0xc7   : > { %2109 = vmatprep.mubr.msk.bf16.mxu0 %vm2330_vm0, %v2329_v1  ;;  %2225 = vmatprep.mubr.msk.bf16.mxu1 %vm2330_vm0, %v2329_v1 }
  0xce   : > { %2110 = vmatmul.mubr.msk.bf16.gmra.mrb[92].mxu0 %vm611_vm1, %v2310_v49  ;;  %2226 = vmatmul.mubr.msk.bf16.gmra.mrb[92].mxu1 %vm611_vm1, %v2311_v50 }
  0xcf   : > { %2113 = vmatprep.mubr.msk.bf16.mxu0 %vm2330_vm0, %v2329_v1  ;;  %2229 = vmatprep.mubr.msk.bf16.mxu1 %vm2330_vm0, %v2329_v1 }
  0xd6   : > { %2114 = vmatmul.mubr.msk.bf16.gmra.mrb[96].mxu0 %vm611_vm1, %v2312_v51  ;;  %2230 = vmatmul.mubr.msk.bf16.gmra.mrb[96].mxu1 %vm611_vm1, %v2313_v52 }
  0xd7   : > { %2117 = vmatprep.mubr.msk.bf16.mxu0 %vm2330_vm0, %v2329_v1  ;;  %2233 = vmatprep.mubr.msk.bf16.mxu1 %vm2330_vm0, %v2329_v1 }
  0xde   : > { %2118 = vmatmul.mubr.msk.bf16.gmra.mrb[100].mxu0 %vm611_vm1, %v2314_v53  ;;  %2234 = vmatmul.mubr.msk.bf16.gmra.mrb[100].mxu1 %vm611_vm1, %v2315_v54 }
  0xdf   : > { %2121 = vmatprep.mubr.msk.bf16.mxu0 %vm2330_vm0, %v2329_v1  ;;  %2237 = vmatprep.mubr.msk.bf16.mxu1 %vm2330_vm0, %v2329_v1 }
  0xe6   : > { %2122 = vmatmul.mubr.msk.bf16.gmra.mrb[104].mxu0 %vm611_vm1, %v2316_v55  ;;  %2238 = vmatmul.mubr.msk.bf16.gmra.mrb[104].mxu1 %vm611_vm1, %v2317_v56 }
  0xe7   : > { %2125 = vmatprep.mubr.msk.bf16.mxu0 %vm2330_vm0, %v2329_v1  ;;  %2241 = vmatprep.mubr.msk.bf16.mxu1 %vm2330_vm0, %v2329_v1 }
  0xe9   : > { %v2598_v57 = vpop.f32.mrb[0].mxu0  ;;  %v2601_v60 = vpop.f32.mrb[0].mxu1 }
  0xea   : > { %v2019_v58 = vpop.f32.mrb[1].mxu0  ;;  %v2135_v63 = vpop.f32.mrb[1].mxu1 }
  0xeb   : > { %v2603_v61 = vpop.f32.mrb[2].mxu0  ;;  %v2606_v2 = vpop.f32.mrb[2].mxu1 }
  0xec   : > { %v2020_v0 = vpop.f32.mrb[3].mxu0  ;;  %v2136_v3 = vpop.f32.mrb[3].mxu1 }
  0xee   : > { %2126 = vmatmul.mubr.msk.bf16.gmra.mrb[108].mxu0 %vm611_vm1, %v2318_v59  ;;  %2242 = vmatmul.mubr.msk.bf16.gmra.mrb[108].mxu1 %vm611_vm1, %v2319_v62 }
  0xef   : > { %2129 = vmatprep.mubr.msk.bf16.mxu0 %vm2330_vm0, %v2329_v1 }
  0xf1   : > { %v2612_v4 = vpop.f32.mrb[4].mxu0  ;;  %v2615_v7 = vpop.f32.mrb[4].mxu1 }
  0xf2   : > { %v2023_v5 = vpop.f32.mrb[5].mxu0  ;;  %v2139_v9 = vpop.f32.mrb[5].mxu1 }
  0xf3   : > { %v2617_v8 = vpop.f32.mrb[6].mxu0  ;;  %v2619_v11 = vpop.f32.mrb[6].mxu1 }
  0xf4   : > { %v2024_v10 = vpop.f32.mrb[7].mxu0  ;;  %v2140_v12 = vpop.f32.mrb[7].mxu1 }
  0xf6   : > { %2130 = vmatmul.mubr.msk.bf16.gmra.mrb[112].mxu0 %vm611_vm1, %v2320_v6 }
  0xf9   : > { %v2622_v13 = vpop.f32.mrb[8].mxu0  ;;  %v2624_v15 = vpop.f32.mrb[8].mxu1 }
  0xfa   : > { %v2027_v14 = vpop.f32.mrb[9].mxu0  ;;  %v1439_v16 = vrot.slane %v2624_v15, 4  ;;  %v2143_v17 = vpop.f32.mrb[9].mxu1 }
  0xfb   : > { %v2626_v1 = vpop.f32.mrb[10].mxu0  ;;  %v1068_v19 = vpop.f32.mrb[10].mxu1 }
  0xfc   : > { %v2028_v18 = vpop.f32.mrb[11].mxu0  ;;  %v1440_v20 = vrot.slane %v1068_v19, 4  ;;  %v2144_v21 = vpop.f32.mrb[11].mxu1 }
  0xfe   : > { %v2630_v22 = vsel %vm1284_vm2, %v1439_v16, %v1440_v20 }
 0x101   : > { %v2632_v23 = vpop.f32.mrb[12].mxu0  ;;  %v1073_v25 = vpop.f32.mrb[12].mxu1 }
 0x102   : > { %v2031_v24 = vpop.f32.mrb[13].mxu0  ;;  %v1442_v27 = vrot.slane %v1073_v25, 4  ;;  %v2147_v28 = vpop.f32.mrb[13].mxu1 }
 0x103   : > { %v2634_v26 = vpop.f32.mrb[14].mxu0  ;;  %v1076_v30 = vpop.f32.mrb[14].mxu1 }
 0x104   : > { %v2032_v29 = vpop.f32.mrb[15].mxu0  ;;  %v1444_v31 = vrot.slane %v1076_v30, 4  ;;  %v2148_v32 = vpop.f32.mrb[15].mxu1  ;;  %v2637_v33 = vsel %vm1284_vm2, %v1440_v20, %v1442_v27 }
 0x106   : > { %v2640_v34 = vsel %vm1284_vm2, %v1442_v27, %v1444_v31 }
 0x109   : > { %v2642_v35 = vpop.f32.mrb[16].mxu0  ;;  %v1081_v37 = vpop.f32.mrb[16].mxu1 }
 0x10a   : > { %v2035_v36 = vpop.f32.mrb[17].mxu0  ;;  %v1446_v39 = vrot.slane %v1081_v37, 4  ;;  %v2151_v40 = vpop.f32.mrb[17].mxu1 }
 0x10b   : > { %v2644_v38 = vpop.f32.mrb[18].mxu0  ;;  %v1084_v42 = vpop.f32.mrb[18].mxu1 }
 0x10c   : > { %v2036_v41 = vpop.f32.mrb[19].mxu0  ;;  %v1448_v43 = vrot.slane %v1084_v42, 4  ;;  %v2152_v44 = vpop.f32.mrb[19].mxu1  ;;  %v2647_v45 = vsel %vm1284_vm2, %v1444_v31, %v1446_v39 }
 0x10d   : > { %3155 = vst [vmem:[#allocation2_spill] sm:$0xff] %v2647_v45 }
 0x10e   : > { %v2650_v46 = vsel %vm1284_vm2, %v1446_v39, %v1448_v43 }
 0x10f   : > { %3156 = vst [vmem:[#allocation3_spill] sm:$0xff] %v2650_v46 }
 0x111   : > { %v2652_v47 = vpop.f32.mrb[20].mxu0  ;;  %v1089_v49 = vpop.f32.mrb[20].mxu1 }
 0x112   : > { %v2039_v48 = vpop.f32.mrb[21].mxu0  ;;  %v1450_v51 = vrot.slane %v1089_v49, 4  ;;  %v2155_v52 = vpop.f32.mrb[21].mxu1 }
 0x113   : > { %v2654_v50 = vpop.f32.mrb[22].mxu0  ;;  %v1092_v54 = vpop.f32.mrb[22].mxu1 }
 0x114   : > { %v2040_v53 = vpop.f32.mrb[23].mxu0  ;;  %v1452_v55 = vrot.slane %v1092_v54, 4  ;;  %v2156_v56 = vpop.f32.mrb[23].mxu1  ;;  %v2657_v58 = vsel %vm1284_vm2, %v1448_v43, %v1450_v51 }
 0x115   : > { %3157 = vst [vmem:[#allocation4_spill] sm:$0xff] %v2657_v58 }
 0x116   : > { %v2660_v59 = vsel %vm1284_vm2, %v1450_v51, %v1452_v55 }
 0x117   : > { %3158 = vst [vmem:[#allocation5_spill] sm:$0xff] %v2660_v59 }
 0x119   : > { %v2662_v62 = vpop.f32.mrb[24].mxu0  ;;  %v1097_v0 = vpop.f32.mrb[24].mxu1 }
 0x11a   : > { %v2043_v63 = vpop.f32.mrb[25].mxu0  ;;  %v1454_v5 = vrot.slane %v1097_v0, 4  ;;  %v2159_v6 = vpop.f32.mrb[25].mxu1  ;;  %v1285_v9 = vrot.slane %v2662_v62, 4 }
 0x11b   : > { %v868_v3 = vpop.f32.mrb[26].mxu0  ;;  %v1100_v14 = vpop.f32.mrb[26].mxu1 }
 0x11c   : > { %v1286_v10 = vrot.slane %v868_v3, 4  ;;  %v2044_v12 = vpop.f32.mrb[27].mxu0  ;;  %v1456_v16 = vrot.slane %v1100_v14, 4  ;;  %v2160_v17 = vpop.f32.mrb[27].mxu1  ;;  %v2666_v18 = vsel %vm1284_vm2, %v1452_v55, %v1454_v5 }
 0x11d   : > { %3159 = vst [vmem:[#allocation6_spill] sm:$0xff] %v2666_v18 }
 0x11e   : > { %v2669_v19 = vsel %vm1284_vm2, %v1285_v9, %v1286_v10  ;;  %v2672_v20 = vsel %vm1284_vm2, %v1454_v5, %v1456_v16 }
 0x11f   : > { %v1323_v21 = vmax.f32 %v2598_v57, %v2669_v19 }
 0x121   : > { %v873_v24 = vpop.f32.mrb[28].mxu0  ;;  %v1105_v28 = vpop.f32.mrb[28].mxu1 }
 0x122   : > { %v1288_v25 = vrot.slane %v873_v24, 4  ;;  %v2047_v27 = vpop.f32.mrb[29].mxu0  ;;  %v1458_v30 = vrot.slane %v1105_v28, 4  ;;  %v2163_v31 = vpop.f32.mrb[29].mxu1 }
 0x123   : > { %v876_v29 = vpop.f32.mrb[30].mxu0  ;;  %v1108_v37 = vpop.f32.mrb[30].mxu1 }
 0x124   : > { %v1290_v32 = vrot.slane %v876_v29, 4  ;;  %v2048_v36 = vpop.f32.mrb[31].mxu0  ;;  %v2677_v39 = vsel %vm1284_vm2, %v1286_v10, %v1288_v25  ;;  %v2680_v40 = vsel %vm1284_vm2, %v1456_v16, %v1458_v30  ;;  %v1460_v41 = vrot.slane %v1108_v37, 4  ;;  %v2164_v42 = vpop.f32.mrb[31].mxu1 }
 0x125   : > { %v1324_v43 = vmax.f32 %v2603_v61, %v2677_v39  ;;  %v2331_v37 = vmov 0  }
 0x126   : > { %v2685_v44 = vsel %vm1284_vm2, %v1288_v25, %v1290_v32  ;;  %v2688_v48 = vsel %vm1284_vm2, %v1458_v30, %v1460_v41  ;;  %172 = vst [vmem:[%s2718_s25] sm:$0xf] %v2331_v37  ;;  %173 = vst [vmem:[%s2718_s25 + $0x4] sm:$0xf] %v2331_v37 }
 0x127   : > { %174 = vst [vmem:[%s2718_s25 + $0x8] sm:$0xf] %v2331_v37  ;;  %175 = vst [vmem:[%s2718_s25 + $0xc] sm:$0xf] %v2331_v37 }
 0x128   : > { %193 = vst [vmem:[%s2718_s25 + $0x54] sm:$0xf] %v2331_v37  ;;  %194 = vst [vmem:[%s2718_s25 + $0x58] sm:$0xf] %v2331_v37 }
 0x129   : > { %v881_v51 = vpop.f32.mrb[32].mxu0  ;;  %v2692_v54 = vpop.f32.mrb[32].mxu1  ;;  %195 = vst [vmem:[%s2718_s25 + $0x5c] sm:$0xf] %v2331_v37  ;;  %196 = vst [vmem:[%s2718_s25 + $0x60] sm:$0xf] %v2331_v37 }
 0x12a   : > { %v1292_v52 = vrot.slane %v881_v51, 4  ;;  %v2051_v53 = vpop.f32.mrb[33].mxu0  ;;  %v3147_v56 = vrot.slane %v2692_v54, 4  ;;  %v2167_v63 = vpop.f32.mrb[33].mxu1  ;;  %197 = vst [vmem:[%s2718_s25 + $0x64] sm:$0xf] %v2331_v37 }
 0x12b   : > { %v884_v55 = vpop.f32.mrb[34].mxu0  ;;  %v2695_v5 = vpop.f32.mrb[34].mxu1  ;;  %198 = vst [vmem:[%s2718_s25 + $0x68] sm:$0x1] %v2331_v37  ;;  %176 = vst [vmem:[%s2718_s25 + $0x10] sm:$0xf] %v2331_v37 }
 0x12c   : > { %v1294_v0 = vrot.slane %v884_v55, 4  ;;  %v2052_v3 = vpop.f32.mrb[35].mxu0  ;;  %v2698_v6 = vsel %vm1284_vm2, %v1290_v32, %v1292_v52  ;;  %v2703_v9 = vsel %vm1284_vm2, %v1460_v41, %v3147_v56  ;;  %v2168_v10 = vpop.f32.mrb[35].mxu1  ;;  %177 = vst [vmem:[%s2718_s25 + $0x14] sm:$0xf] %v2331_v37 }
 0x12d   : > { %178 = vst [vmem:[%s2718_s25 + $0x18] sm:$0xf] %v2331_v37  ;;  %179 = vst [vmem:[%s2718_s25 + $0x1c] sm:$0xf] %v2331_v37  ;;  %v3166_v61 = vmax.f32 %v2617_v8, %v2698_v6 }
 0x12e   : > { %v2708_v14 = vsel %vm1284_vm2, %v1292_v52, %v1294_v0  ;;  %180 = vst [vmem:[%s2718_s25 + $0x20] sm:$0xf] %v2331_v37  ;;  %181 = vst [vmem:[%s2718_s25 + $0x24] sm:$0xf] %v2331_v37 }
 0x12f   : > { %182 = vst [vmem:[%s2718_s25 + $0x28] sm:$0xf] %v2331_v37  ;;  %183 = vst [vmem:[%s2718_s25 + $0x2c] sm:$0xf] %v2331_v37 }
 0x130   : > { %184 = vst [vmem:[%s2718_s25 + $0x30] sm:$0xf] %v2331_v37  ;;  %185 = vst [vmem:[%s2718_s25 + $0x34] sm:$0xf] %v2331_v37 }
 0x131   : > { %v889_v17 = vpop.f32.mrb[36].mxu0  ;;  %v2713_v27 = vpop.f32.mrb[36].mxu1  ;;  %186 = vst [vmem:[%s2718_s25 + $0x38] sm:$0xf] %v2331_v37  ;;  %187 = vst [vmem:[%s2718_s25 + $0x3c] sm:$0xf] %v2331_v37 }
 0x132   : > { %v1296_v24 = vrot.slane %v889_v17, 4  ;;  %v2055_v25 = vpop.f32.mrb[37].mxu0  ;;  %v2171_v29 = vpop.f32.mrb[37].mxu1  ;;  %188 = vst [vmem:[%s2718_s25 + $0x40] sm:$0xf] %v2331_v37 }
 0x133   : > { %v892_v28 = vpop.f32.mrb[38].mxu0  ;;  %v2720_v32 = vpop.f32.mrb[38].mxu1  ;;  %189 = vst [vmem:[%s2718_s25 + $0x44] sm:$0xf] %v2331_v37  ;;  %190 = vst [vmem:[%s2718_s25 + $0x48] sm:$0xf] %v2331_v37 }
 0x134   : > { %v1298_v30 = vrot.slane %v892_v28, 4  ;;  %v2056_v31 = vpop.f32.mrb[39].mxu0  ;;  %v2723_v36 = vsel %vm1284_vm2, %v1294_v0, %v1296_v24  ;;  %191 = vst [vmem:[%s2718_s25 + $0x4c] sm:$0xf] %v2331_v37  ;;  %192 = vst [vmem:[%s2718_s25 + $0x50] sm:$0xf] %v2331_v37 }
 0x135   : > { %v2172_v41 = vpop.f32.mrb[39].mxu1  ;;  %v3168_v8 = vmax.f32 %v2626_v1, %v2723_v36 }
 0x136   : > { %v2755_v51 = vsel %vm1284_vm2, %v1296_v24, %v1298_v30 }
 0x139   : > { %v897_v53 = vpop.f32.mrb[40].mxu0  ;;  %v2759_v0 = vpop.f32.mrb[40].mxu1 }
 0x13a   : > { %v1300_v55 = vrot.slane %v897_v53, 4  ;;  %v2059_v63 = vpop.f32.mrb[41].mxu0  ;;  %3160 = vst [vmem:[#allocation7_spill] sm:$0xff] %v2759_v0  ;;  %v2175_v10 = vpop.f32.mrb[41].mxu1 }
 0x13b   : > { %v900_v3 = vpop.f32.mrb[42].mxu0  ;;  %v2761_v28 = vpop.f32.mrb[42].mxu1 }
 0x13c   : > { %v1302_v17 = vrot.slane %v900_v3, 4  ;;  %v2060_v25 = vpop.f32.mrb[43].mxu0  ;;  %3161 = vst [vmem:[#allocation8_spill] sm:$0xff] %v2761_v28  ;;  %v2764_v29 = vsel %vm1284_vm2, %v1298_v30, %v1300_v55  ;;  %v2176_v31 = vpop.f32.mrb[43].mxu1 }
 0x13e   : > { %v2769_v37 = vsel %vm1284_vm2, %v1300_v55, %v1302_v17 }
 0x141   : > { %v905_v53 = vpop.f32.mrb[44].mxu0  ;;  %v2773_v3 = vpop.f32.mrb[44].mxu1 }
 0x142   : > { %v1304_v63 = vrot.slane %v905_v53, 4  ;;  %v2063_v10 = vpop.f32.mrb[45].mxu0  ;;  %3162 = vst [vmem:[#allocation9_spill] sm:$0xff] %v2773_v3  ;;  %v2179_v56 = vpop.f32.mrb[45].mxu1 }
 0x143   : > { %v908_v25 = vpop.f32.mrb[46].mxu0  ;;  %v2775_v42 = vpop.f32.mrb[46].mxu1 }
 0x144   : > { %v1306_v52 = vrot.slane %v908_v25, 4  ;;  %v2064_v30 = vpop.f32.mrb[47].mxu0  ;;  %3163 = vst [vmem:[#allocation10_spill] sm:$0xff] %v2775_v42  ;;  %v2778_v31 = vsel %vm1284_vm2, %v1302_v17, %v1304_v63  ;;  %v2180_v24 = vpop.f32.mrb[47].mxu1 }
 0x146   : > { %v2783_v41 = vsel %vm1284_vm2, %v1304_v63, %v1306_v52 }
 0x149   : > { %v913_v10 = vpop.f32.mrb[48].mxu0  ;;  %v2787_v25 = vpop.f32.mrb[48].mxu1 }
 0x14a   : > { %v1308_v16 = vrot.slane %v913_v10, 4  ;;  %v2067_v56 = vpop.f32.mrb[49].mxu0  ;;  %3164 = vst [vmem:[#allocation11_spill] sm:$0xff] %v2787_v25  ;;  %v2183_v12 = vpop.f32.mrb[49].mxu1 }
 0x14b   : > { %v916_v30 = vpop.f32.mrb[50].mxu0  ;;  %v2797_v55 = vpop.f32.mrb[50].mxu1 }
 0x14c   : > { %v2790_v17 = vmax.f32 %v2662_v62, %v1308_v16  ;;  %v2795_v24 = vmax.f32 %v1323_v21, %v916_v30  ;;  %v2068_v63 = vpop.f32.mrb[51].mxu0  ;;  %v2800_v53 = vsel %vm1284_vm2, %v1306_v52, %v1308_v16  ;;  %v2184_v10 = vpop.f32.mrb[51].mxu1  ;;  %v3165_v30 = vmax.f32 %v2612_v4, %v2685_v44 }
 0x14d   : > { %v3167_v4 = vmax.f32 %v2622_v13, %v2708_v14  ;;  %v3170_v13 = vmax.f32 %v2632_v23, %v2755_v51 }
 0x151   : > { %v921_v49 = vpop.f32.mrb[52].mxu0  ;;  %v2809_v57 = vpop.f32.mrb[52].mxu1 }
 0x152   : > { %v2807_v62 = vmax.f32 %v1324_v43, %v921_v49  ;;  %v2071_v12 = vpop.f32.mrb[53].mxu0  ;;  %v2187_v21 = vpop.f32.mrb[53].mxu1 }
 0x153   : > { %v924_v19 = vpop.f32.mrb[54].mxu0  ;;  %v2816_v63 = vpop.f32.mrb[54].mxu1 }
 0x154   : > { %v2814_v16 = vmax.f32 %v3165_v30, %v924_v19  ;;  %v2072_v52 = vpop.f32.mrb[55].mxu0  ;;  %v2188_v10 = vpop.f32.mrb[55].mxu1 }
 0x159   : > { %v929_v56 = vpop.f32.mrb[56].mxu0  ;;  %v2823_v49 = vpop.f32.mrb[56].mxu1 }
 0x15a   : > { %v2821_v39 = vmax.f32 %v3166_v61, %v929_v56  ;;  %v2075_v43 = vpop.f32.mrb[57].mxu0  ;;  %v2191_v21 = vpop.f32.mrb[57].mxu1 }
 0x15b   : > { %v932_v12 = vpop.f32.mrb[58].mxu0  ;;  %v2830_v30 = vpop.f32.mrb[58].mxu1 }
 0x15c   : > { %v2828_v44 = vmax.f32 %v3167_v4, %v932_v12  ;;  %v2076_v19 = vpop.f32.mrb[59].mxu0  ;;  %v2192_v52 = vpop.f32.mrb[59].mxu1  ;;  %v1516_v25 = vrot.slane %v2830_v30, 4 }
 0x161   : > { %v937_v10 = vpop.f32.mrb[60].mxu0  ;;  %v1169_v61 = vpop.f32.mrb[60].mxu1 }
 0x162   : > { %v2836_v6 = vmax.f32 %v3168_v8, %v937_v10  ;;  %v2079_v56 = vpop.f32.mrb[61].mxu0  ;;  %v1517_v21 = vrot.slane %v1169_v61, 4  ;;  %v2195_v42 = vpop.f32.mrb[61].mxu1  ;;  %v3171_v10 = vmax.f32 %v2634_v26, %v2764_v29 }
 0x163   : > { %v940_v43 = vpop.f32.mrb[62].mxu0  ;;  %v1172_v4 = vpop.f32.mrb[62].mxu1 }
 0x164   : > { %3169 = vst [vmem:[#allocation12_spill] sm:$0xff] %v2836_v6  ;;  %v2841_v14 = vmax.f32 %v3170_v13, %v940_v43  ;;  %v2080_v12 = vpop.f32.mrb[63].mxu0  ;;  %v2844_v19 = vsel %vm1284_vm2, %v1516_v25, %v1517_v21  ;;  %v1519_v52 = vrot.slane %v1172_v4, 4  ;;  %v2196_v18 = vpop.f32.mrb[63].mxu1  ;;  %v3173_v25 = vmax.f32 %v2642_v35, %v2769_v37 }
 0x166   : > { %v2847_v1 = vsel %vm1284_vm2, %v1517_v21, %v1519_v52 }
 0x169   : > { %v945_v36 = vpop.f32.mrb[64].mxu0  ;;  %v1177_v23 = vpop.f32.mrb[64].mxu1 }
 0x16a   : > { %v2852_v42 = vmax.f32 %v3171_v10, %v945_v36  ;;  %v2083_v8 = vpop.f32.mrb[65].mxu0  ;;  %v1521_v56 = vrot.slane %v1177_v23, 4  ;;  %v2199_v61 = vpop.f32.mrb[65].mxu1  ;;  %v3176_v36 = vmax.f32 %v2644_v38, %v2778_v31 }
 0x16b   : > { %v948_v51 = vpop.f32.mrb[66].mxu0  ;;  %v1180_v13 = vpop.f32.mrb[66].mxu1 }
 0x16c   : > { %3172 = vst [vmem:[#allocation13_spill] sm:$0xff] %v2852_v42  ;;  %v2857_v43 = vmax.f32 %v3173_v25, %v948_v51  ;;  %v2084_v18 = vpop.f32.mrb[67].mxu0  ;;  %v2860_v21 = vsel %vm1284_vm2, %v1519_v52, %v1521_v56  ;;  %v1523_v12 = vrot.slane %v1180_v13, 4  ;;  %v2200_v4 = vpop.f32.mrb[67].mxu1  ;;  %v3177_v52 = vmax.f32 %v2652_v47, %v2783_v41 }
 0x16d   : > { %3174 = vst [vmem:[#allocation14_spill] sm:$0xff] %v2860_v21 }
 0x16e   : > { %v2863_v26 = vsel %vm1284_vm2, %v1521_v56, %v1523_v12 }
 0x16f   : > { %3175 = vst [vmem:[#allocation15_spill] sm:$0xff] %v2863_v26 }
 0x171   : > { %v953_v29 = vpop.f32.mrb[68].mxu0  ;;  %v1185_v35 = vpop.f32.mrb[68].mxu1 }
 0x172   : > { %v2868_v10 = vmax.f32 %v3176_v36, %v953_v29  ;;  %v2087_v8 = vpop.f32.mrb[69].mxu0  ;;  %v1525_v23 = vrot.slane %v1185_v35, 4  ;;  %v2203_v51 = vpop.f32.mrb[69].mxu1  ;;  %v3180_v29 = vmax.f32 %v2654_v50, %v2800_v53 }
 0x173   : > { %v956_v37 = vpop.f32.mrb[70].mxu0  ;;  %v1188_v18 = vpop.f32.mrb[70].mxu1 }
 0x174   : > { %v2873_v61 = vmax.f32 %v3177_v52, %v956_v37  ;;  %v2088_v25 = vpop.f32.mrb[71].mxu0  ;;  %v2876_v56 = vsel %vm1284_vm2, %v1523_v12, %v1525_v23  ;;  %v1527_v13 = vrot.slane %v1188_v18, 4  ;;  %v2204_v4 = vpop.f32.mrb[71].mxu1 }
 0x175   : > { %3178 = vst [vmem:[#allocation16_spill] sm:$0xff] %v2876_v56 }
 0x176   : > { %v2879_v38 = vsel %vm1284_vm2, %v1525_v23, %v1527_v13 }
 0x177   : > { %3179 = vst [vmem:[#allocation17_spill] sm:$0xff] %v2879_v38 }
 0x179   : > { %v961_v31 = vpop.f32.mrb[72].mxu0  ;;  %v1193_v47 = vpop.f32.mrb[72].mxu1 }
 0x17a   : > { %v2884_v36 = vmax.f32 %v3180_v29, %v961_v31  ;;  %v2091_v8 = vpop.f32.mrb[73].mxu0  ;;  %v1529_v35 = vrot.slane %v1193_v47, 4  ;;  %v2207_v37 = vpop.f32.mrb[73].mxu1 }
 0x17b   : > { %v2886_v41 = vpop.f32.mrb[74].mxu0  ;;  %v1196_v52 = vpop.f32.mrb[74].mxu1 }
 0x17c   : > { %v2092_v51 = vpop.f32.mrb[75].mxu0  ;;  %v2891_v23 = vsel %vm1284_vm2, %v1527_v13, %v1529_v35  ;;  %v1531_v25 = vrot.slane %v1196_v52, 4  ;;  %v2208_v18 = vpop.f32.mrb[75].mxu1  ;;  %v1362_v4 = vrot.slane %v2886_v41, 4 }
 0x17d   : > { %3181 = vst [vmem:[#allocation18_spill] sm:$0xff] %v2891_v23 }
 0x17e   : > { %v2894_v50 = vsel %vm1284_vm2, %v1529_v35, %v1531_v25 }
 0x17f   : > { %3182 = vst [vmem:[#allocation19_spill] sm:$0xff] %v2894_v50 }
 0x181   : > { %v969_v53 = vpop.f32.mrb[76].mxu0  ;;  %v1201_v8 = vpop.f32.mrb[76].mxu1 }
 0x182   : > { %v1363_v31 = vrot.slane %v969_v53, 4  ;;  %v2095_v29 = vpop.f32.mrb[77].mxu0  ;;  %v1533_v37 = vrot.slane %v1201_v8, 4  ;;  %v2211_v38 = vpop.f32.mrb[77].mxu1 }
 0x183   : > { %v972_v47 = vpop.f32.mrb[78].mxu0  ;;  %v1204_v59 = vpop.f32.mrb[78].mxu1 }
 0x184   : > { %v1365_v12 = vrot.slane %v972_v47, 4  ;;  %v2096_v51 = vpop.f32.mrb[79].mxu0  ;;  %v2898_v13 = vsel %vm1284_vm2, %v1362_v4, %v1363_v31  ;;  %v1535_v52 = vrot.slane %v1204_v59, 4  ;;  %v2212_v18 = vpop.f32.mrb[79].mxu1  ;;  %v2903_v50 = vsel %vm1284_vm2, %v1531_v25, %v1533_v37 }
 0x186   : > { %v2906_v53 = vsel %vm1284_vm2, %v1363_v31, %v1365_v12  ;;  %v2911_v29 = vsel %vm1284_vm2, %v1533_v37, %v1535_v52 }
 0x189   : > { %v977_v8 = vpop.f32.mrb[80].mxu0  ;;  %v1209_v59 = vpop.f32.mrb[80].mxu1 }
 0x18a   : > { %v1367_v4 = vrot.slane %v977_v8, 4  ;;  %v2099_v47 = vpop.f32.mrb[81].mxu0  ;;  %v1537_v18 = vrot.slane %v1209_v59, 4  ;;  %v2215_v23 = vpop.f32.mrb[81].mxu1 }
 0x18b   : > { %v980_v51 = vpop.f32.mrb[82].mxu0  ;;  %v2913_v25 = vpop.f32.mrb[82].mxu1 }
 0x18c   : > { %v1369_v35 = vrot.slane %v980_v51, 4  ;;  %v2100_v3 = vpop.f32.mrb[83].mxu0  ;;  %v2916_v31 = vsel %vm1284_vm2, %v1365_v12, %v1367_v4  ;;  %v3148_v58 = vrot.slane %v2913_v25, 4  ;;  %v2216_v38 = vpop.f32.mrb[83].mxu1  ;;  %v2922_v8 = vsel %vm1284_vm2, %v1535_v52, %v1537_v18 }
 0x18e   : > { %v2925_v47 = vsel %vm1284_vm2, %v1367_v4, %v1369_v35  ;;  %v2932_v12 = vsel %vm1284_vm2, %v1537_v18, %v3148_v58 }
 0x191   : > { %v985_v23 = vpop.f32.mrb[84].mxu0  ;;  %v2934_v51 = vpop.f32.mrb[84].mxu1 }
 0x192   : > { %v1371_v59 = vrot.slane %v985_v23, 4  ;;  %v2103_v38 = vpop.f32.mrb[85].mxu0  ;;  %v2219_v56 = vpop.f32.mrb[85].mxu1 }
 0x193   : > { %v988_v37 = vpop.f32.mrb[86].mxu0  ;;  %v2936_v46 = vpop.f32.mrb[86].mxu1 }
 0x194   : > { %v1373_v52 = vrot.slane %v988_v37, 4  ;;  %v2104_v28 = vpop.f32.mrb[87].mxu0  ;;  %v2939_v4 = vsel %vm1284_vm2, %v1369_v35, %v1371_v59  ;;  %v2220_v3 = vpop.f32.mrb[87].mxu1 }
 0x195   : > { %3183 = vst [vmem:[#allocation20_spill] sm:$0xff] %v2939_v4 }
 0x196   : > { %v2944_v18 = vsel %vm1284_vm2, %v1371_v59, %v1373_v52 }
 0x197   : > { %3184 = vst [vmem:[#allocation21_spill] sm:$0xff] %v2944_v18 }
 0x199   : > { %v993_v38 = vpop.f32.mrb[88].mxu0  ;;  %v2948_v37 = vpop.f32.mrb[88].mxu1 }
 0x19a   : > { %v1375_v58 = vrot.slane %v993_v38, 4  ;;  %v2107_v56 = vpop.f32.mrb[89].mxu0  ;;  %v2223_v0 = vpop.f32.mrb[89].mxu1 }
 0x19b   : > { %v996_v28 = vpop.f32.mrb[90].mxu0  ;;  %v2950_v45 = vpop.f32.mrb[90].mxu1 }
 0x19c   : > { %v1377_v21 = vrot.slane %v996_v28, 4  ;;  %v2108_v35 = vpop.f32.mrb[91].mxu0  ;;  %3185 = vst [vmem:[#allocation22_spill] sm:$0xff] %v2950_v45  ;;  %v2953_v3 = vsel %vm1284_vm2, %v1373_v52, %v1375_v58  ;;  %v2224_v26 = vpop.f32.mrb[91].mxu1 }
 0x19d   : > { %3186 = vst [vmem:[#allocation23_spill] sm:$0xff] %v2953_v3 }
 0x19e   : > { %v2958_v23 = vsel %vm1284_vm2, %v1375_v58, %v1377_v21 }
 0x19f   : > { %3187 = vst [vmem:[#allocation24_spill] sm:$0xff] %v2958_v23 }
 0x1a1   : > { %v1001_v56 = vpop.f32.mrb[92].mxu0  ;;  %v2962_v28 = vpop.f32.mrb[92].mxu1 }
 0x1a2   : > { %v1379_v18 = vrot.slane %v1001_v56, 4  ;;  %v2111_v0 = vpop.f32.mrb[93].mxu0  ;;  %v2227_v6 = vpop.f32.mrb[93].mxu1 }
 0x1a3   : > { %v1004_v35 = vpop.f32.mrb[94].mxu0  ;;  %v2965_v4 = vpop.f32.mrb[94].mxu1 }
 0x1a4   : > { %v1380_v52 = vsel %vm1284_vm2, %v1377_v21, %v1379_v18  ;;  %v1381_v45 = vrot.slane %v1004_v35, 4  ;;  %v2112_v26 = vpop.f32.mrb[95].mxu0  ;;  %3188 = vst [vmem:[#allocation25_spill] sm:$0xff] %v2965_v4  ;;  %v2228_v58 = vpop.f32.mrb[95].mxu1 }
 0x1a5   : > { %v1408_v59 = vmax.f32 %v2857_v43, %v1380_v52 }
 0x1a6   : > { %v1382_v3 = vsel %vm1284_vm2, %v1379_v18, %v1381_v45 }
 0x1a7   : > { %v1421_v38 = vmax.f32 %v1408_v59, %v2601_v60  ;;  %v1409_v56 = vmax.f32 %v2868_v10, %v1382_v3 }
 0x1a9   : > { %v1422_v0 = vmax.f32 %v1409_v56, %v2606_v2  ;;  %v1009_v23 = vpop.f32.mrb[96].mxu0  ;;  %v1485_v6 = vmax.f32 %v1421_v38, %v2672_v20  ;;  %v2973_v35 = vpop.f32.mrb[96].mxu1 }
 0x1aa   : > { %v1383_v42 = vrot.slane %v1009_v23, 4  ;;  %v2115_v21 = vpop.f32.mrb[97].mxu0  ;;  %v2231_v4 = vpop.f32.mrb[97].mxu1 }
 0x1ab   : > { %v1012_v26 = vpop.f32.mrb[98].mxu0  ;;  %v1498_v43 = vmax.f32 %v1485_v6, %v2797_v55  ;;  %v1486_v52 = vmax.f32 %v1422_v0, %v2680_v40  ;;  %v2978_v10 = vpop.f32.mrb[98].mxu1  ;;  %v3189_v55 = vmax.f32 %v2790_v17, %v2886_v41  ;;  %v2999_v17 = vld [vmem:[%s3145_s2] ss:$0 sm:$0xff]  ;;  %v3191_v41 = vrot.slane %v2692_v54, 4 }
 0x1ac   : > { %v1384_v18 = vsel %vm1284_vm2, %v1381_v45, %v1383_v42  ;;  %v1385_v60 = vrot.slane %v1012_v26, 4  ;;  %v2116_v59 = vpop.f32.mrb[99].mxu0  ;;  %v2232_v3 = vpop.f32.mrb[99].mxu1 }
 0x1ad   : > { %v1410_v2 = vmax.f32 %v2873_v61, %v1384_v18  ;;  %v1562_v20 = vmax.f32 %v1498_v43, %v2903_v50  ;;  %v1499_v23 = vmax.f32 %v1486_v52, %v2809_v57  ;;  %v3190_v57 = vmax.f32 %v2795_v24, %v2898_v13 }
 0x1ae   : > { %v1386_v38 = vsel %vm1284_vm2, %v1383_v42, %v1385_v60  ;;  %v1412_v4 = vmax.f32 %v3189_v55, %v1385_v60  ;;  %v3192_v13 = vmax.f32 %v2807_v62, %v2906_v53  ;;  %v3193_v3 = vrot.slane %v2913_v25, 4 }
 0x1af   : > { %v1423_v40 = vmax.f32 %v1410_v2, %v2615_v7  ;;  %v1411_v45 = vmax.f32 %v2884_v36, %v1386_v38  ;;  %v1563_v58 = vmax.f32 %v1499_v23, %v2911_v29  ;;  %v3194_v55 = vmax.f32 %v2814_v16, %v2916_v31 }
 0x1b0   : > { %v1425_v56 = vmax.f32 %v1412_v4, %v2624_v15 }
 0x1b1   : > { %v1424_v61 = vmax.f32 %v1411_v45, %v2619_v11  ;;  %v1017_v0 = vpop.f32.mrb[100].mxu0  ;;  %v1487_v50 = vmax.f32 %v1423_v40, %v2688_v48  ;;  %v1249_v7 = vpop.f32.mrb[100].mxu1 }
 0x1b2   : > { %v1413_v42 = vmax.f32 %v3190_v57, %v1017_v0  ;;  %v2119_v36 = vpop.f32.mrb[101].mxu0  ;;  %v1489_v29 = vmax.f32 %v1425_v56, %v3191_v41  ;;  %v1575_v15 = vmax.f32 %v1562_v20, %v1249_v7  ;;  %v2235_v6 = vpop.f32.mrb[101].mxu1 }
 0x1b3   : > { %v1020_v11 = vpop.f32.mrb[102].mxu0  ;;  %v1500_v21 = vmax.f32 %v1487_v50, %v2816_v63  ;;  %v1488_v48 = vmax.f32 %v1424_v61, %v2703_v9  ;;  %v1252_v43 = vpop.f32.mrb[102].mxu1 }
 0x1b4   : > { %v1477_v24 = vmax.f32 %v1413_v42, %v2630_v22  ;;  %v1414_v26 = vmax.f32 %v3192_v13, %v1020_v11  ;;  %v2120_v52 = vpop.f32.mrb[103].mxu0  ;;  %v1502_v18 = vmax.f32 %v1489_v29, %v2830_v30  ;;  %v1595_v54 = vadd.f32 %v2999_v17, %v1575_v15  ;;  %v2236_v59 = vpop.f32.mrb[103].mxu1  ;;  %v3198_v11 = vld [vmem:[#allocation2_spill] sm:$0xff] }
 0x1b5   : > { %v1576_v60 = vmax.f32 %v1563_v58, %v1252_v43  ;;  %v1564_v2 = vmax.f32 %v1500_v21, %v2922_v8  ;;  %v1501_v63 = vmax.f32 %v1488_v48, %v2823_v49  ;;  %v3199_v43 = vld [vmem:[#allocation14_spill] sm:$0xff] }
 0x1b6   : > { %v1490_v9 = vmax.f32 %v1477_v24, %v2695_v5  ;;  %v1478_v22 = vmax.f32 %v1414_v26, %v2637_v33  ;;  %v3017_v62 = vmax.f32 %v1502_v18, %v3193_v3  ;;  %v1608_v53 = vmax.f32 %v1595_v54, 0.0  ;;  %v3200_v18 = vld [vmem:[#allocation7_spill] sm:$0xff] }
 0x1b7   : > { %v1596_v20 = vadd.f32 %v2999_v17, %v1576_v60  ;;  %v1565_v30 = vmax.f32 %v1501_v63, %v2932_v12 }
 0x1b8   : > { %v1554_v23 = vmax.f32 %v1490_v9, %v2844_v19  ;;  %v1491_v38 = vmax.f32 %v1478_v22, %v2713_v27  ;;  %v3023_v8 = vpack.c.bf16 %v1608_v53, %v1608_v53  ;;  %v3201_v22 = vld [vmem:[#allocation15_spill] sm:$0xff] }
 0x1b9   : > { %v1609_v49 = vmax.f32 %v1596_v20, 0.0  ;;  %v1025_v5 = vpop.f32.mrb[104].mxu0  ;;  %v1257_v12 = vpop.f32.mrb[104].mxu1 }
 0x1ba   : > { %v1567_v33 = vmax.f32 %v1554_v23, %v2934_v51  ;;  %v1555_v25 = vmax.f32 %v1491_v38, %v2847_v1  ;;  %v1415_v4 = vmax.f32 %v3194_v55, %v1025_v5  ;;  %v2123_v40 = vpop.f32.mrb[105].mxu0  ;;  %v1701_v27 = vrot.slane %v3023_v8, 5  ;;  %v2239_v56 = vpop.f32.mrb[105].mxu1 }
 0x1bb   : > { %v1935_v19 = vrot.slane %v3023_v8, 11  ;;  %v1950_v45 = vpack.c.bf16 %v1609_v49, %v1609_v49  ;;  %v1577_v58 = vmax.f32 %v1564_v2, %v1257_v12  ;;  %v1028_v61 = vpop.f32.mrb[106].mxu0  ;;  %v3197_v51 = vmax.f32 %v2821_v39, %v2925_v47  ;;  %v1260_v57 = vpop.f32.mrb[106].mxu1  ;;  %v3204_v49 = vld [vmem:[#allocation20_spill] sm:$0xff] }
 0x1bc   : > { %v1587_v0 = vadd.f32 %v2999_v17, %v1567_v33  ;;  %v1568_v1 = vmax.f32 %v1555_v25, %v2936_v46  ;;  %v1479_v31 = vmax.f32 %v1415_v4, %v2640_v34  ;;  %v2124_v42 = vpop.f32.mrb[107].mxu0  ;;  %v1703_v7 = vrot.slane %v1701_v27, 4  ;;  %v2240_v29 = vpop.f32.mrb[107].mxu1 }
 0x1bd   : > { %v1416_v50 = vmax.f32 %v3197_v51, %v1028_v61  ;;  %v1712_v36 = vrot.slane %v1950_v45, 7  ;;  %v1597_v46 = vadd.f32 %v2999_v17, %v1577_v58  ;;  %v1578_v41 = vmax.f32 %v1565_v30, %v1260_v57 }
 0x1be   : > { %v1600_v15 = vmax.f32 %v1587_v0, 0.0  ;;  %v1588_v6 = vadd.f32 %v2999_v17, %v1568_v1  ;;  %v1492_v34 = vmax.f32 %v1479_v31, %v2720_v32  ;;  %1707 = vst [vmem:[%s2718_s25 + $0x3c] sm:$0x3] %v1703_v7  ;;  %v3205_v5 = vmax.f32 %v2828_v44, %v3204_v49  ;;  %v3206_v44 = vld [vmem:[#allocation22_spill] sm:$0xff] }
 0x1bf   : > { %v1480_v39 = vmax.f32 %v1416_v50, %v3198_v11  ;;  %v1713_v47 = vsel %vm3036_vm7, %v1935_v19, %v1712_v36  ;;  %v1714_v21 = vrot.slane %v1712_v36, 4  ;;  %v1610_v48 = vmax.f32 %v1597_v46, 0.0  ;;  %v3207_v50 = vld [vmem:[#allocation3_spill] sm:$0xff] }
 0x1c0   : > { %v1598_v24 = vadd.f32 %v2999_v17, %v1578_v41  ;;  %v1941_v13 = vpack.c.bf16 %v1600_v15, %v1600_v15  ;;  %v1601_v26 = vmax.f32 %v1588_v6, 0.0  ;;  %1717 = vst [vmem:[%s2718_s25 + $0x40] sm:$0xf] %v1713_v47  ;;  %v1556_v52 = vmax.f32 %v1492_v34, %v3199_v43  ;;  %v3208_v41 = vld [vmem:[#allocation8_spill] sm:$0xff]  ;;  %v3210_v6 = vld [vmem:[#allocation21_spill] sm:$0xff] }
 0x1c1   : > { %v1493_v54 = vmax.f32 %v1480_v39, %v3200_v18  ;;  %1718 = vst [vmem:[%s2718_s25 + $0x44] sm:$0x1] %v1714_v21  ;;  %v1951_v60 = vpack.c.bf16 %v1610_v48, %v1610_v48  ;;  %v1033_v59 = vpop.f32.mrb[108].mxu0  ;;  %v1265_v53 = vpop.f32.mrb[108].mxu1  ;;  %v3209_v15 = vld [vmem:[#allocation12_spill] sm:$0xff] }
 0x1c2   : > { %v1611_v32 = vmax.f32 %v1598_v24, 0.0  ;;  %v1628_v2 = vrot.slane %v1941_v13, 5  ;;  %v1942_v63 = vpack.c.bf16 %v1601_v26, %v1601_v26  ;;  %v1569_v9 = vmax.f32 %v1556_v52, %v2948_v37  ;;  %v2127_v20 = vpop.f32.mrb[109].mxu0  ;;  %v2243_v55 = vpop.f32.mrb[109].mxu1  ;;  %v3212_v13 = vld [vmem:[#allocation16_spill] sm:$0xff] }
 0x1c3   : > { %v1557_v3 = vmax.f32 %v1493_v54, %v3201_v22  ;;  %v1724_v30 = vrot.slane %v1951_v60, 5  ;;  %v1417_v33 = vmax.f32 %v3205_v5, %v1033_v59  ;;  %v1579_v25 = vmax.f32 %v3017_v62, %v1265_v53  ;;  %v1036_v37 = vpop.f32.mrb[110].mxu0  ;;  %v1268_v58 = vpop.f32.mrb[110].mxu1  ;;  %v3213_v43 = vld [vmem:[#allocation4_spill] sm:$0xff]  ;;  %v3214_v59 = vld [vmem:[#allocation23_spill] sm:$0xff]  ;;  %v3216_v53 = vld [vmem:[#allocation9_spill] sm:$0xff] }
 0x1c4   : > { %v1952_v38 = vpack.c.bf16 %v1611_v32, %v1611_v32  ;;  %v1629_v4 = vrot.slane %v1628_v2, 4  ;;  %1634 = vst [vmem:[%s2718_s25 + $0xc] sm:$0x8] %v1628_v2  ;;  %v1630_v12 = vrot.slane %v1942_v63, 5  ;;  %v1642_v40 = vrot.slane %v1942_v63, 7  ;;  %v2128_v45 = vpop.f32.mrb[111].mxu0 }
 0x1c5   : > { %v1589_v19 = vadd.f32 %v2999_v17, %v1569_v9  ;;  %v1725_v56 = vrot.slane %v1724_v30, 4  ;;  %1730 = vst [vmem:[%s2718_s25 + $0x44] sm:$0x8] %v1724_v30  ;;  %v1570_v61 = vmax.f32 %v1557_v3, %v3206_v44  ;;  %v2244_v1 = vpop.f32.mrb[111].mxu1  ;;  %v1481_v57 = vmax.f32 %v1417_v33, %v3207_v50  ;;  %v3217_v30 = vld [vmem:[#allocation13_spill] sm:$0xff] }
 0x1c6   : > { %v1726_v0 = vrot.slane %v1952_v38, 5  ;;  %v1735_v62 = vrot.slane %v1952_v38, 7  ;;  %1648 = vst [vmem:[%s2718_s25 + $0x14] sm:$0xc] %v1642_v40  ;;  %v1631_v51 = vsel %vm3062_vm8, %v1629_v4, %v1630_v12  ;;  %v1599_v36 = vadd.f32 %v2999_v17, %v1579_v25  ;;  %v3218_v38 = vld [vmem:[#allocation24_spill] sm:$0xff]  ;;  %v3220_v55 = vld [vmem:[#allocation5_spill] sm:$0xff] }
 0x1c7   : > { %v1602_v31 = vmax.f32 %v1589_v19, 0.0  ;;  %v1590_v42 = vadd.f32 %v2999_v17, %v1570_v61  ;;  %1635 = vst [vmem:[%s2718_s25 + $0x10] sm:$0xf] %v1631_v51  ;;  %v1494_v29 = vmax.f32 %v1481_v57, %v3208_v41  ;;  %v3211_v34 = vmax.f32 %v3209_v15, %v3210_v6  ;;  %v3222_v19 = vld [vmem:[#allocation6_spill] sm:$0xff]  ;;  %v3224_v1 = vld [vmem:[#allocation25_spill] sm:$0xff]  ;;  %v3225_v51 = vld [vmem:[#allocation11_spill] sm:$0xff] }
 0x1c8   : > { %v1727_v7 = vsel %vm3062_vm8, %v1725_v56, %v1726_v0  ;;  %1741 = vst [vmem:[%s2718_s25 + $0x4c] sm:$0xc] %v1735_v62  ;;  %v1612_v47 = vmax.f32 %v1599_v36, 0.0  ;;  %v1643_v48 = vrot.slane %v1642_v40, 4  ;;  %v1736_v60 = vrot.slane %v1735_v62, 4  ;;  %v3221_v40 = vld [vmem:[#allocation17_spill] sm:$0xff] }
 0x1c9   : > { %v1943_v46 = vpack.c.bf16 %v1602_v31, %v1602_v31  ;;  %1731 = vst [vmem:[%s2718_s25 + $0x48] sm:$0xf] %v1727_v7  ;;  %v1418_v11 = vmax.f32 %v3211_v34, %v1036_v37  ;;  %v1603_v39 = vmax.f32 %v1590_v42, 0.0  ;;  %v1041_v21 = vpop.f32.mrb[112].mxu0  ;;  %v1558_v26 = vmax.f32 %v1494_v29, %v3212_v13  ;;  %v3223_v61 = vld [vmem:[#allocation10_spill] sm:$0xff] }
 0x1ca   : > { %v2131_v18 = vpop.f32.mrb[113].mxu0  ;;  %v1953_v32 = vpack.c.bf16 %v1612_v47, %v1612_v47  ;;  %v3215_v2 = vmax.f32 %v2841_v14, %v3214_v59  ;;  %v3219_v49 = vmax.f32 %v3217_v30, %v3218_v38  ;;  %v3226_v57 = vld [vmem:[#allocation18_spill] sm:$0xff] }
 0x1cb   : > { %v1644_v24 = vrot.slane %v1943_v46, 7  ;;  %v1482_v52 = vmax.f32 %v1418_v11, %v3213_v43  ;;  %v1944_v54 = vpack.c.bf16 %v1603_v39, %v1603_v39  ;;  %v1044_v9 = vpop.f32.mrb[114].mxu0  ;;  %v1571_v3 = vmax.f32 %v1558_v26, %v2962_v28 }
 0x1cc   : > { %v1419_v63 = vmax.f32 %v3215_v2, %v1041_v21  ;;  %v1420_v5 = vmax.f32 %v3219_v49, %v1044_v9  ;;  %v2132_v33 = vpop.f32.mrb[115].mxu0  ;;  %v1926_v25 = vrot.slane %v1943_v46, 9  ;;  %v1737_v37 = vrot.slane %v1953_v32, 7  ;;  %v3227_v46 = vld [vmem:[#allocation19_spill] sm:$0xff] }
 0x1cd   : > { %v1645_v22 = vsel %vm3036_vm7, %v1643_v48, %v1644_v24  ;;  %v1495_v20 = vmax.f32 %v1482_v52, %v3216_v53  ;;  %v1654_v14 = vrot.slane %v1944_v54, 5  ;;  %v1591_v12 = vadd.f32 %v2999_v17, %v1571_v3 }
 0x1ce   : > { %1649 = vst [vmem:[%s2718_s25 + $0x18] sm:$0x7] %v1645_v22  ;;  %v1483_v4 = vmax.f32 %v1419_v63, %v3220_v55  ;;  %v1484_v45 = vmax.f32 %v1420_v5, %v3222_v19  ;;  %v1738_v44 = vsel %vm3036_vm7, %v1736_v60, %v1737_v37  ;;  %v1928_v15 = vrot.slane %v1944_v54, 11 }
 0x1cf   : > { %v1559_v28 = vmax.f32 %v1495_v20, %v3221_v40  ;;  %v1656_v58 = vrot.slane %v1654_v14, 4  ;;  %v1655_v56 = vsel %vm3062_vm8, %v1926_v25, %v1654_v14  ;;  %v1604_v62 = vmax.f32 %v1591_v12, 0.0  ;;  %1742 = vst [vmem:[%s2718_s25 + $0x50] sm:$0x7] %v1738_v44 }
 0x1d0   : > { %v1496_v0 = vmax.f32 %v1483_v4, %v3223_v61  ;;  %1659 = vst [vmem:[%s2718_s25 + $0x1c] sm:$0xe] %v1655_v56  ;;  %v1497_v50 = vmax.f32 %v1484_v45, %v3225_v51 }
 0x1d1   : > { %v1572_v31 = vmax.f32 %v1559_v28, %v3224_v1  ;;  %1660 = vst [vmem:[%s2718_s25 + $0x20] sm:$0x3] %v1656_v58  ;;  %v1945_v7 = vpack.c.bf16 %v1604_v62, %v1604_v62 }
 0x1d2   : > { %v1560_v42 = vmax.f32 %v1496_v0, %v3226_v57  ;;  %v1561_v41 = vmax.f32 %v1497_v50, %v3227_v46 }
 0x1d3   : > { %v1592_v36 = vadd.f32 %v2999_v17, %v1572_v31  ;;  %v1666_v6 = vrot.slane %v1945_v7, 7 }
 0x1d4   : > { %v1573_v29 = vmax.f32 %v1560_v42, %v2973_v35  ;;  %v1574_v11 = vmax.f32 %v1561_v41, %v2978_v10 }
 0x1d5   : > { %v1605_v34 = vmax.f32 %v1592_v36, 0.0  ;;  %v1667_v47 = vsel %vm3036_vm7, %v1928_v15, %v1666_v6  ;;  %v1668_v21 = vrot.slane %v1666_v6, 4 }
 0x1d6   : > { %v1593_v39 = vadd.f32 %v2999_v17, %v1573_v29  ;;  %v1594_v24 = vadd.f32 %v2999_v17, %v1574_v11  ;;  %1671 = vst [vmem:[%s2718_s25 + $0x24] sm:$0xf] %v1667_v47 }
 0x1d7   : > { %v1946_v48 = vpack.c.bf16 %v1605_v34, %v1605_v34  ;;  %1672 = vst [vmem:[%s2718_s25 + $0x28] sm:$0x1] %v1668_v21 }
 0x1d8   : > { %v1606_v13 = vmax.f32 %v1593_v39, 0.0  ;;  %v1607_v26 = vmax.f32 %v1594_v24, 0.0 }
 0x1d9   : > { %v1678_v35 = vrot.slane %v1946_v48, 5 }
 0x1da   : > { %v1947_v43 = vpack.c.bf16 %v1606_v13, %v1606_v13  ;;  %v1948_v10 = vpack.c.bf16 %v1607_v26, %v1607_v26 }
 0x1db   : > { %1684 = vst [vmem:[%s2718_s25 + $0x28] sm:$0x8] %v1678_v35  ;;  %v1679_v52 = vrot.slane %v1678_v35, 4 }
 0x1dc   : > { %v1680_v18 = vrot.slane %v1947_v43, 5  ;;  %v1688_v54 = vrot.slane %v1947_v43, 7  ;;  %v1690_v60 = vrot.slane %v1948_v10, 7  ;;  %v1933_v32 = vrot.slane %v1948_v10, 9 }
 0x1de   : > { %v1681_v17 = vsel %vm3062_vm8, %v1679_v52, %v1680_v18  ;;  %v1689_v59 = vrot.slane %v1688_v54, 4  ;;  %1694 = vst [vmem:[%s2718_s25 + $0x30] sm:$0xc] %v1688_v54  ;;  %v1702_v2 = vsel %vm3062_vm8, %v1933_v32, %v1701_v27 }
 0x1df   : > { %1685 = vst [vmem:[%s2718_s25 + $0x2c] sm:$0xf] %v1681_v17  ;;  %1706 = vst [vmem:[%s2718_s25 + $0x38] sm:$0xe] %v1702_v2 }
 0x1e0   : > { %v1691_v63 = vsel %vm3036_vm7, %v1689_v59, %v1690_v60 }
 0x1e1   : > { %1695 = vst [vmem:[%s2718_s25 + $0x34] sm:$0x7] %v1691_v63 }
 0x1e2 PF: > { %s13_s12 = sadd.s32 1, %s2327_s12  }
 0x1e3   : > { %p10_p4 = scmp.ge.s32.totalorder %s13_s12, 4  }
 0x1e5   :  { %12 = sbr.rel (!%p10_p4) target bundleno = 1 (0x1), region = 62 }

// kernel: net_forward.5
= control target key start
LH: loop header
LB: loop body
LE: loop exit
PB: predicated region body
PF: predicated region fallthrough
CT: control target
= control target key end

     0   :  { %9 = vsyncpa [#allocation4], 0  ;;  %s2271_s15 = smov 0   ;;  %s2273_s16 = smov 0   ;;  %s2654_s0 = inlined_call_operand.vmem [shape: bf16[2,4096], index: 0, kind: input, shape index: {}]   ;;  %s2655_s1 = inlined_call_operand.vmem [shape: bf16[4096,384], index: 1, kind: input, shape index: {}]   ;;  %s2656_s2 = inlined_call_operand.vmem [shape: bf16[384,192], index: 2, kind: input, shape index: {}]   ;;  %s2657_s3 = inlined_call_operand.vmem [shape: bf16[192,128], index: 3, kind: input, shape index: {}]   ;;  %s2658_s4 = inlined_call_operand.hbm [shape: f32[2,128], index: 4, kind: output, shape index: {}]  }
   0x1   :  { %s2275_s17 = smov 0  }
   0x2 LB: > { %s1718_s18 = sadd.s32 4294967295, %s2239_s17   ;;  %s24_s19 = sadd.s32 1, %s2235_s16  ;;  %s2239_s17 = sphi %s2275_s17, %s15_s17   ;;  %s2235_s16 = sphi %s2273_s16, %s2661_s16   ;;  %s2231_s15 = sphi %s2271_s15, %s2660_s15  }
   0x3   : > { %p25_p0 = scmp.ge.s32.totalorder %s24_s19, 8  ;;  %p1721_p1 = scmp.ge.s32.totalorder %s2239_s17, 1 }
   0x4   : > { %p193_p2 = scmp.lt.s32.totalorder %s2239_s17, 9 }
   0x5   : > { %s2663_s19 = smov (%p25_p0, %s24_s19), 0 }
   0x6   : > { %p194_p3 = pnand %p1721_p1, %p193_p2 }
   0x7   : > { %s1722_s20 = sshll.u32 (!%p194_p3), %s2231_s15, 2  ;;  %s1723_s21 = sshll.u32 (!%p194_p3), %s2231_s15, 6 }
   0x8   : > { %197 = sbr.rel (%p194_p3) target bundleno = 859 (0x35b), region = 36  ;;  %p226_p4 = scmp.lt.s32.totalorder (!%p194_p3), %s1722_s20, 31 }
   0x9   : > { %p233_p5 = scmp.lt.s32.totalorder (!%p194_p3), %s1723_s21, 511  ;;  %p1725_p6 = scmp.ne.s32.totalorder (!%p194_p3), %s2231_s15, 0 }
   0xf   : > { %s2665_s20 = smov (!%p226_p4, %s1722_s20), 31  ;;  %s2667_s21 = smov (!%p233_p5, %s1723_s21), 511 }
  0x10   : > { %s230_s24 = scalar_lea.vmem %s2654_s0, %s2665_s20  ;;  %s1939_s25 = smul.u32 12, %s2667_s21  ;;  %v2241_v0 = vmov (!%p1725_p6), 0.0  }
  0x11   : > { %243 = sbr.rel (%p1725_p6) target bundleno = 24 (0x18), region = 40  ;;  %244 = vst [vmem:[#allocation2] sm:$0x3f] (!%p1725_p6), %v2241_v0 }
  0x12   : > { %s2303_s28 = scalar_lea.vmem %s2655_s1, %s1939_s25 }
  0x18 PF: > { %v1975_v1 = vld [vmem:[%s2303_s28 + $0x4] ss:$12 sps:$4 sm:$0xff]   ;;  %v1977_v2 = vld [vmem:[%s2303_s28] ss:$12 sps:$4 sm:$0xff]   ;;  %v1978_v3 = vld [vmem:[%s2303_s28 + $0x1c] ss:$12 sps:$4 sm:$0xff]   ;;  %v387_v31 = vlaneseq }
  0x19   : > { %916 = vmatprep.subr.bf16.mxu0 %v1975_v1  ;;  %v1980_v4 = vld [vmem:[%s2303_s28 + $0x18] ss:$12 sps:$4 sm:$0xff]   ;;  %v1981_v5 = vld [vmem:[%s2303_s28 + $0x34] ss:$12 sps:$4 sm:$0xff]   ;;  %v1983_v6 = vld [vmem:[%s2303_s28 + $0x30] ss:$12 sps:$4 sm:$0xff]  }
  0x1a   : > { %917 = vmatpush1.bf16.msra.mxu0 %v1977_v2  ;;  %v1984_v7 = vld [vmem:[%s2303_s28 + $0x4c] ss:$12 sps:$4 sm:$0xff]   ;;  %v1986_v8 = vld [vmem:[%s2303_s28 + $0x48] ss:$12 sps:$4 sm:$0xff]   ;;  %v1987_v9 = vld [vmem:[%s2303_s28 + $0x64] ss:$12 sps:$4 sm:$0xff]  }
  0x1b   : > { %918 = vmatprep.subr.bf16.mxu0 %v1978_v3  ;;  %v1999_v10 = vld [vmem:[%s2303_s28 + $0xc8] ss:$12 sps:$4 sm:$0xff]   ;;  %v1989_v12 = vld [vmem:[%s2303_s28 + $0x60] ss:$12 sps:$4 sm:$0xff]   ;;  %v1992_v16 = vld [vmem:[%s2303_s28 + $0x78] ss:$12 sps:$4 sm:$0xff]  }
  0x1c   : > { %v2000_v11 = vld [vmem:[%s2303_s28 + $0x8] ss:$12 sps:$4 sm:$0xff]   ;;  %1889 = vmatprep.subr.bf16.mxu1 %v1999_v10  ;;  %v2004_v13 = vld [vmem:[%s2303_s28 + $0xe0] ss:$12 sps:$4 sm:$0xff]   ;;  %v2009_v17 = vld [vmem:[%s2303_s28 + $0xf8] ss:$12 sps:$4 sm:$0xff]  }
  0x1d   : > { %1890 = vmatpush3.bf16.msra.mxu1 %v2000_v11  ;;  %v2005_v14 = vld [vmem:[%s2303_s28 + $0x20] ss:$12 sps:$4 sm:$0xff]   ;;  %v1990_v15 = vld [vmem:[%s2303_s28 + $0x7c] ss:$12 sps:$4 sm:$0xff]   ;;  %v2010_v18 = vld [vmem:[%s2303_s28 + $0x38] ss:$12 sps:$4 sm:$0xff]  }
  0x1e   : > { %919 = vmatpush1.bf16.msra.mxu0 %v1980_v4  ;;  %1891 = vmatprep.subr.bf16.mxu1 %v2004_v13  ;;  %v1993_v19 = vld [vmem:[%s2303_s28 + $0x94] ss:$12 sps:$4 sm:$0xff]   ;;  %v2014_v20 = vld [vmem:[%s2303_s28 + $0x110] ss:$12 sps:$4 sm:$0xff]   ;;  %v1996_v23 = vld [vmem:[%s2303_s28 + $0xac] ss:$12 sps:$4 sm:$0xff]  }
  0x1f   : > { %920 = vmatprep.subr.bf16.mxu0 %v1981_v5  ;;  %v2015_v21 = vld [vmem:[%s2303_s28 + $0x50] ss:$12 sps:$4 sm:$0xff]   ;;  %v2019_v24 = vld [vmem:[%s2303_s28 + $0x128] ss:$12 sps:$4 sm:$0xff]   ;;  %v2024_v28 = vld [vmem:[%s2303_s28 + $0x140] ss:$12 sps:$4 sm:$0xff]  }
  0x20   : > { %v1995_v22 = vld [vmem:[%s2303_s28 + $0x90] ss:$12 sps:$4 sm:$0xff]   ;;  %v1998_v25 = vld [vmem:[%s2303_s28 + $0xa8] ss:$12 sps:$4 sm:$0xff]   ;;  %v2242_v29 = vmov 1966171168  }
  0x21   : > { %1892 = vmatpush3.bf16.msra.mxu1 %v2005_v14  ;;  %v2020_v26 = vld [vmem:[%s2303_s28 + $0x68] ss:$12 sps:$4 sm:$0xff]   ;;  %v2001_v27 = vld [vmem:[%s2303_s28 + $0xc4] ss:$12 sps:$4 sm:$0xff]   ;;  %v385_v30 = vunpack.c.l.s4 %v2242_v29  ;;  %v2003_v32 = vld [vmem:[%s2303_s28 + $0xc0] ss:$12 sps:$4 sm:$0xff]  }
  0x22   : > { %921 = vmatpush1.bf16.msra.mxu0 %v1983_v6  ;;  %1893 = vmatprep.subr.bf16.mxu1 %v2009_v17  ;;  %v2025_v33 = vld [vmem:[%s2303_s28 + $0x80] ss:$12 sps:$4 sm:$0xff]   ;;  %v2029_v34 = vld [vmem:[%s2303_s28 + $0x158] ss:$12 sps:$4 sm:$0xff]   ;;  %v2006_v35 = vld [vmem:[%s2303_s28 + $0xdc] ss:$12 sps:$4 sm:$0xff]  }
  0x23   : > { %922 = vmatprep.subr.bf16.mxu0 %v1984_v7  ;;  %v386_v36 = vunpack.c.0.s8 %v385_v30  ;;  %v2338_v37 = vshrl.u32 %v387_v31, 7  ;;  %v2008_v38 = vld [vmem:[%s2303_s28 + $0xd8] ss:$12 sps:$4 sm:$0xff]   ;;  %v2034_v40 = vld [vmem:[%s2303_s28 + $0x170] ss:$12 sps:$4 sm:$0xff]   ;;  %p1823_p7 = scmp.ne.s32.totalorder %s2231_s15, 7 }
  0x24   : > { %v2030_v39 = vld [vmem:[%s2303_s28 + $0x98] ss:$12 sps:$4 sm:$0xff]   ;;  %v2011_v41 = vld [vmem:[%s2303_s28 + $0xf4] ss:$12 sps:$4 sm:$0xff]   ;;  %v2013_v43 = vld [vmem:[%s2303_s28 + $0xf0] ss:$12 sps:$4 sm:$0xff]  }
  0x25   : > { %1894 = vmatpush3.bf16.msra.mxu1 %v2010_v18  ;;  %v389_v42 = vsub.s32 %v386_v36, %v2338_v37  ;;  %v1726_v44 = vld.sshfl [vmem:[%s230_s24] sm:$0x33 pattern:$0x75316420]  ;;  %v2035_v45 = vld [vmem:[%s2303_s28 + $0xb0] ss:$12 sps:$4 sm:$0xff]  }
  0x26   : > { %923 = vmatpush1.bf16.msra.mxu0 %v1986_v8  ;;  %1895 = vmatprep.subr.bf16.mxu1 %v2014_v20  ;;  %v383_v46 = vcombine.high %v1726_v44, %v1726_v44  ;;  %v2039_v47 = vld [vmem:[%s2303_s28 + $0x248] ss:$12 sps:$4 sm:$0xff]   ;;  %v2016_v48 = vld [vmem:[%s2303_s28 + $0x10c] ss:$12 sps:$4 sm:$0xff]   ;;  %v2021_v55 = vld [vmem:[%s2303_s28 + $0x124] ss:$12 sps:$4 sm:$0xff]  }
  0x27   : > { %924 = vmatprep.subr.bf16.mxu0 %v1987_v9  ;;  %v2018_v50 = vld [vmem:[%s2303_s28 + $0x108] ss:$12 sps:$4 sm:$0xff]   ;;  %v2355_v51 = vrot.slane %v1726_v44, %v389_v42  ;;  %v2044_v54 = vld [vmem:[%s2303_s28 + $0x260] ss:$12 sps:$4 sm:$0xff]   ;;  %v2049_v58 = vld [vmem:[%s2303_s28 + $0x278] ss:$12 sps:$4 sm:$0xff]  }
  0x28   : > { %v397_v49 = vrot.slane %v383_v46, %v389_v42  ;;  %v2040_v52 = vld [vmem:[%s2303_s28 + $0x188] ss:$12 sps:$4 sm:$0xff]   ;;  %v2045_v56 = vld [vmem:[%s2303_s28 + $0x1a0] ss:$12 sps:$4 sm:$0xff]   ;;  %v2028_v60 = vld [vmem:[%s2303_s28 + $0x138] ss:$12 sps:$4 sm:$0xff]  }
  0x29   : > { %1896 = vmatpush3.bf16.msra.mxu1 %v2015_v21  ;;  %v2023_v57 = vld [vmem:[%s2303_s28 + $0x120] ss:$12 sps:$4 sm:$0xff]   ;;  %v2026_v59 = vld [vmem:[%s2303_s28 + $0x13c] ss:$12 sps:$4 sm:$0xff]   ;;  %v2050_v61 = vld [vmem:[%s2303_s28 + $0x1b8] ss:$12 sps:$4 sm:$0xff]  }
  0x2a   : > { %925 = vmatpush1.bf16.msra.mxu0 %v1989_v12  ;;  %1897 = vmatprep.subr.bf16.mxu1 %v2019_v24  ;;  %v399_v53 = vcombine.high %v397_v49, %v397_v49  ;;  %v2054_v62 = vld [vmem:[%s2303_s28 + $0x290] ss:$12 sps:$4 sm:$0xff]   ;;  %v2031_v63 = vld [vmem:[%s2303_s28 + $0x154] ss:$12 sps:$4 sm:$0xff]   ;;  %v2036_v3 = vld [vmem:[%s2303_s28 + $0x16c] ss:$12 sps:$4 sm:$0xff]  }
  0x2b   : > { %926 = vmatprep.subr.bf16.mxu0 %v1990_v15  ;;  %1030 = vmatprep.mubr.bf16.mxu1 %v397_v49  ;;  %v2033_v0 = vld [vmem:[%s2303_s28 + $0x150] ss:$12 sps:$4 sm:$0xff]   ;;  %v2059_v2 = vld [vmem:[%s2303_s28 + $0x2a8] ss:$12 sps:$4 sm:$0xff]   ;;  %v2064_v6 = vld [vmem:[%s2303_s28 + $0x2c0] ss:$12 sps:$4 sm:$0xff]  }
  0x2c   : > { %948 = vmatprep.mubr.bf16.mxu0 %v397_v49  ;;  %v2055_v1 = vld [vmem:[%s2303_s28 + $0x1d0] ss:$12 sps:$4 sm:$0xff]   ;;  %v2038_v4 = vld [vmem:[%s2303_s28 + $0x168] ss:$12 sps:$4 sm:$0xff]   ;;  %v2041_v8 = vld [vmem:[%s2303_s28 + $0x180] ss:$12 sps:$4 sm:$0xff]  }
  0x2d   : > { %1898 = vmatpush3.bf16.msra.mxu1 %v2020_v26  ;;  %v2060_v5 = vld [vmem:[%s2303_s28 + $0x1e8] ss:$12 sps:$4 sm:$0xff]   ;;  %v2043_v7 = vld [vmem:[%s2303_s28 + $0x184] ss:$12 sps:$4 sm:$0xff]   ;;  %v2065_v9 = vld [vmem:[%s2303_s28 + $0x200] ss:$12 sps:$4 sm:$0xff]  }
  0x2e   : > { %927 = vmatpush1.bf16.msra.mxu0 %v1992_v16  ;;  %1899 = vmatprep.subr.bf16.mxu1 %v2024_v28  ;;  %v2069_v10 = vld [vmem:[%s2303_s28 + $0x2d8] ss:$12 sps:$4 sm:$0xff]   ;;  %v2048_v11 = vld [vmem:[%s2303_s28 + $0x19c] ss:$12 sps:$4 sm:$0xff]   ;;  %v2053_v15 = vld [vmem:[%s2303_s28 + $0x1b4] ss:$12 sps:$4 sm:$0xff]  }
  0x2f   : > { %928 = vmatprep.subr.bf16.mxu0 %v1993_v19  ;;  %v2046_v12 = vld [vmem:[%s2303_s28 + $0x198] ss:$12 sps:$4 sm:$0xff]   ;;  %v2074_v14 = vld [vmem:[%s2303_s28 + $0x2f0] ss:$12 sps:$4 sm:$0xff]   ;;  %v398_v19 = vcombine.high %v2355_v51, %v2355_v51  ;;  %v2056_v20 = vld [vmem:[%s2303_s28 + $0x1c8] ss:$12 sps:$4 sm:$0xff]  }
  0x30   : > { %v2070_v13 = vld [vmem:[%s2303_s28 + $0x218] ss:$12 sps:$4 sm:$0xff]   ;;  %v2075_v16 = vld [vmem:[%s2303_s28 + $0x230] ss:$12 sps:$4 sm:$0xff]   ;;  %v2076_v28 = vld [vmem:[%s2303_s28 + $0x228] ss:$12 sps:$4 sm:$0xff]  }
  0x31   : > { %1900 = vmatpush3.bf16.msra.mxu1 %v2025_v33  ;;  %v2051_v17 = vld [vmem:[%s2303_s28 + $0x1b0] ss:$12 sps:$4 sm:$0xff]   ;;  %v2058_v18 = vld [vmem:[%s2303_s28 + $0x1cc] ss:$12 sps:$4 sm:$0xff]   ;;  %v2087_v33 = vld [vmem:[%s2303_s28 + $0x274] ss:$12 sps:$4 sm:$0xff]  }
  0x32   : > { %929 = vmatpush1.bf16.msra.mxu0 %v1995_v22  ;;  %1901 = vmatprep.subr.bf16.mxu1 %v2029_v34  ;;  %v2063_v21 = vld [vmem:[%s2303_s28 + $0x1e4] ss:$12 sps:$4 sm:$0xff]   ;;  %v2061_v22 = vld [vmem:[%s2303_s28 + $0x1e0] ss:$12 sps:$4 sm:$0xff]   ;;  %v2084_v31 = vld [vmem:[%s2303_s28 + $0x25c] ss:$12 sps:$4 sm:$0xff]  }
  0x33   : > { %930 = vmatprep.subr.bf16.mxu0 %v1996_v23  ;;  %v2068_v23 = vld [vmem:[%s2303_s28 + $0x1fc] ss:$12 sps:$4 sm:$0xff]   ;;  %v2066_v24 = vld [vmem:[%s2303_s28 + $0x1f8] ss:$12 sps:$4 sm:$0xff]   ;;  %v2079_v30 = vld [vmem:[%s2303_s28 + $0x240] ss:$12 sps:$4 sm:$0xff]  }
  0x34   : > { %v2071_v26 = vld [vmem:[%s2303_s28 + $0x210] ss:$12 sps:$4 sm:$0xff]   ;;  %v2088_v36 = vld [vmem:[%s2303_s28 + $0x288] ss:$12 sps:$4 sm:$0xff]   ;;  %v2102_v44 = vld [vmem:[%s2303_s28 + $0x2ec] ss:$12 sps:$4 sm:$0xff]  }
  0x35   : > { %1902 = vmatpush3.bf16.msra.mxu1 %v2030_v39  ;;  %v2081_v29 = vld [vmem:[%s2303_s28 + $0x244] ss:$12 sps:$4 sm:$0xff]   ;;  %v2091_v39 = vld [vmem:[%s2303_s28 + $0x2a0] ss:$12 sps:$4 sm:$0xff]   ;;  %vm1599_vm0 = vcmask (!%p1823_p7), 523264  }
  0x36   : > { %931 = vmatpush1.bf16.msra.mxu0 %v1998_v25  ;;  %1903 = vmatprep.subr.bf16.mxu1 %v2034_v40  ;;  %v2073_v25 = vld [vmem:[%s2303_s28 + $0x214] ss:$12 sps:$4 sm:$0xff]   ;;  %v2085_v34 = vld [vmem:[%s2303_s28 + $0x270] ss:$12 sps:$4 sm:$0xff]  }
  0x37   : > { %932 = vmatprep.subr.bf16.mxu0 %v2001_v27  ;;  %v2078_v27 = vld [vmem:[%s2303_s28 + $0x22c] ss:$12 sps:$4 sm:$0xff]   ;;  %v2096_v40 = vld [vmem:[%s2303_s28 + $0x2bc] ss:$12 sps:$4 sm:$0xff]   ;;  %v2099_v42 = vld [vmem:[%s2303_s28 + $0x2d4] ss:$12 sps:$4 sm:$0xff]  }
  0x39   : > { %1904 = vmatpush3.bf16.msra.mxu1 %v2035_v45  ;;  %v2100_v45 = vld [vmem:[%s2303_s28 + $0x2e8] ss:$12 sps:$4 sm:$0xff]  }
  0x3a   : > { %933 = vmatpush1.bf16.msra.mxu0 %v2003_v32  ;;  %1911 = vmatprep.subr.bf16.mxu1 %v2039_v47  ;;  %v2082_v32 = vld [vmem:[%s2303_s28 + $0x258] ss:$12 sps:$4 sm:$0xff]  }
  0x3b   : > { %934 = vmatprep.subr.bf16.mxu0 %v2006_v35  ;;  %v2090_v35 = vld [vmem:[%s2303_s28 + $0x28c] ss:$12 sps:$4 sm:$0xff]  }
  0x3c   : > { %1031 = vmatmul.mubr.bf16.vlgmr.msra.gmra.mrb[0].mxu1 %v2355_v51 }
  0x3d   : > { %1912 = vmatpush3.bf16.msra.mxu1 %v2040_v52  ;;  %1070 = vmatprep.mubr.bf16.mxu1 %v399_v53 }
  0x3e   : > { %935 = vmatpush1.bf16.msra.mxu0 %v2008_v38  ;;  %1913 = vmatprep.subr.bf16.mxu1 %v2044_v54  ;;  %v2093_v38 = vld [vmem:[%s2303_s28 + $0x2a4] ss:$12 sps:$4 sm:$0xff]  }
  0x3f   : > { %936 = vmatprep.subr.bf16.mxu0 %v2011_v41  ;;  %v2094_v41 = vld [vmem:[%s2303_s28 + $0x2b8] ss:$12 sps:$4 sm:$0xff]  }
  0x41   : > { %1914 = vmatpush3.bf16.msra.mxu1 %v2045_v56 }
  0x42   : > { %937 = vmatpush1.bf16.msra.mxu0 %v2013_v43  ;;  %1915 = vmatprep.subr.bf16.mxu1 %v2049_v58  ;;  %v2097_v43 = vld [vmem:[%s2303_s28 + $0x2d0] ss:$12 sps:$4 sm:$0xff]  }
  0x43   : > { %938 = vmatprep.subr.bf16.mxu0 %v2016_v48 }
  0x45   : > { %1916 = vmatpush3.bf16.msra.mxu1 %v2050_v61 }
  0x46   : > { %939 = vmatpush1.bf16.msra.mxu0 %v2018_v50  ;;  %1917 = vmatprep.subr.bf16.mxu1 %v2054_v62 }
  0x47   : > { %940 = vmatprep.subr.bf16.mxu0 %v2021_v55 }
  0x49   : > { %1918 = vmatpush3.bf16.msra.mxu1 %v2055_v1 }
  0x4a   : > { %941 = vmatpush1.bf16.msra.mxu0 %v2023_v57  ;;  %1919 = vmatprep.subr.bf16.mxu1 %v2059_v2  ;;  %v2243_v57 = vmov 1983009808  }
  0x4b   : > { %942 = vmatprep.subr.bf16.mxu0 %v2026_v59  ;;  %v1083_v58 = vunpack.c.l.s4 %v2243_v57  ;;  %v2154_v57 = vld [vmem:[%s2656_s2 + $0xc4] ss:$8 sps:$4 sm:$0xff] (!%p1823_p7)  }
  0x4d   : > { %1920 = vmatpush3.bf16.msra.mxu1 %v2060_v5  ;;  %v1084_v59 = vunpack.c.0.s8 %v1083_v58  ;;  %v2176_v58 = vld [vmem:[%s2657_s3 + $0x8] sm:$0xff] (!%p1823_p7)  }
  0x4e   : > { %943 = vmatpush1.bf16.msra.mxu0 %v2028_v60  ;;  %1921 = vmatprep.subr.bf16.mxu1 %v2064_v6 }
  0x4f   : > { %944 = vmatprep.subr.bf16.mxu0 %v2031_v63  ;;  %v2417_v60 = vsub.s32 %v1084_v59, %v2338_v37  ;;  %v2103_v37 = vld [vmem:[%s2656_s2 + $0x4] ss:$8 sps:$4 sm:$0xff] (!%p1823_p7)   ;;  %v2156_v59 = vld [vmem:[%s2656_s2 + $0xc0] ss:$8 sps:$4 sm:$0xff] (!%p1823_p7)  }
  0x51   : > { %1922 = vmatpush3.bf16.msra.mxu1 %v2065_v9  ;;  %v2106_v9 = vld [vmem:[%s2656_s2 + $0x14] ss:$8 sps:$4 sm:$0xff] (!%p1823_p7)  }
  0x52   : > { %945 = vmatpush1.bf16.msra.mxu0 %v2033_v0  ;;  %1923 = vmatprep.subr.bf16.mxu1 %v2069_v10  ;;  %v2108_v10 = vld [vmem:[%s2656_s2 + $0x10] ss:$8 sps:$4 sm:$0xff] (!%p1823_p7)  }
  0x53   : > { %946 = vmatprep.subr.bf16.mxu0 %v2036_v3 }
  0x55   : > { %1924 = vmatpush3.bf16.msra.mxu1 %v2070_v13  ;;  %v2112_v13 = vld [vmem:[%s2656_s2 + $0x34] ss:$8 sps:$4 sm:$0xff] (!%p1823_p7)  }
  0x56   : > { %947 = vmatpush1.bf16.msra.mxu0 %v2038_v4  ;;  %1925 = vmatprep.subr.bf16.mxu1 %v2074_v14  ;;  %v245_v4 = vld [vmem:[#allocation2] sm:$0x3f]  ;;  %v2114_v14 = vld [vmem:[%s2656_s2 + $0x30] ss:$8 sps:$4 sm:$0xff] (!%p1823_p7)  }
  0x57   : > { %957 = vmatprep.subr.bf16.mxu0 %v2043_v7  ;;  %v2105_v7 = vld [vmem:[%s2656_s2] ss:$8 sps:$4 sm:$0xff] (!%p1823_p7)  }
  0x59   : > { %949 = vmatmul.mubr.bf16.vlgmr.msra.gmra.mrb[0].mxu0 %v2355_v51  ;;  %1926 = vmatpush3.bf16.msra.mxu1 %v2075_v16  ;;  %v2129_v16 = vld [vmem:[%s2656_s2 + $0x100] ss:$8 sps:$4 sm:$0xff] (!%p1823_p7)  }
  0x5a   : > { %958 = vmatpush1.bf16.msra.mxu0 %v2041_v8  ;;  %989 = vmatprep.mubr.bf16.mxu0 %v399_v53  ;;  %v2244_v8 = vmov (!%p1823_p7), 0  }
  0x5b   : > { %959 = vmatprep.subr.bf16.mxu0 %v2048_v11  ;;  %v2109_v11 = vld [vmem:[%s2656_s2 + $0x24] ss:$8 sps:$4 sm:$0xff] (!%p1823_p7)  }
  0x5c   : > { %1071 = vmatmul.mubr.bf16.vlgmr.msra.gmra.mrb[4].mxu1 %v398_v19 }
  0x5d   : > { %1490 = vmatprep.mubr.bf16.mxu1 (!%p1823_p7), %v2244_v8 }
  0x5e   : > { %960 = vmatpush1.bf16.msra.mxu0 %v2046_v12  ;;  %v2111_v12 = vld [vmem:[%s2656_s2 + $0x20] ss:$8 sps:$4 sm:$0xff] (!%p1823_p7)  }
  0x5f   : > { %961 = vmatprep.subr.bf16.mxu0 %v2053_v15  ;;  %v2127_v15 = vld [vmem:[%s2656_s2 + $0x104] ss:$8 sps:$4 sm:$0xff] (!%p1823_p7)  }
  0x60   : > { %1458 = vmatprep.subr.bf16.mxu1 (!%p1823_p7), %v2127_v15 }
  0x61   : > { %1459 = vmatpush1.bf16.msra.mxu1 (!%p1823_p7), %v2129_v16 }
  0x62   : > { %962 = vmatpush1.bf16.msra.mxu0 %v2051_v17  ;;  %v2115_v17 = vld [vmem:[%s2656_s2 + $0x44] ss:$8 sps:$4 sm:$0xff] (!%p1823_p7)  }
  0x63   : > { %963 = vmatprep.subr.bf16.mxu0 %v2058_v18  ;;  %v2133_v18 = vld [vmem:[%s2656_s2 + $0x114] ss:$8 sps:$4 sm:$0xff] (!%p1823_p7)  }
  0x64   : > { %1460 = vmatprep.subr.bf16.mxu1 (!%p1823_p7), %v2133_v18 }
  0x66   : > { %964 = vmatpush1.bf16.msra.mxu0 %v2056_v20  ;;  %v2117_v20 = vld [vmem:[%s2656_s2 + $0x40] ss:$8 sps:$4 sm:$0xff] (!%p1823_p7)  }
  0x67   : > { %965 = vmatprep.subr.bf16.mxu0 %v2063_v21  ;;  %v2118_v21 = vld [vmem:[%s2656_s2 + $0x54] ss:$8 sps:$4 sm:$0xff] (!%p1823_p7)  }
  0x6a   : > { %966 = vmatpush1.bf16.msra.mxu0 %v2061_v22  ;;  %v2139_v22 = vld [vmem:[%s2656_s2 + $0x124] ss:$8 sps:$4 sm:$0xff] (!%p1823_p7)  }
  0x6b   : > { %967 = vmatprep.subr.bf16.mxu0 %v2068_v23  ;;  %v2141_v23 = vld [vmem:[%s2656_s2 + $0x120] ss:$8 sps:$4 sm:$0xff] (!%p1823_p7)  }
  0x6e   : > { %968 = vmatpush1.bf16.msra.mxu0 %v2066_v24  ;;  %v2120_v24 = vld [vmem:[%s2656_s2 + $0x50] ss:$8 sps:$4 sm:$0xff] (!%p1823_p7)  }
  0x6f   : > { %969 = vmatprep.subr.bf16.mxu0 %v2073_v25  ;;  %v2145_v25 = vld [vmem:[%s2656_s2 + $0x134] ss:$8 sps:$4 sm:$0xff] (!%p1823_p7)  }
  0x72   : > { %970 = vmatpush1.bf16.msra.mxu0 %v2071_v26  ;;  %v2121_v26 = vld [vmem:[%s2656_s2 + $0x64] ss:$8 sps:$4 sm:$0xff] (!%p1823_p7)  }
  0x73   : > { %971 = vmatprep.subr.bf16.mxu0 %v2078_v27  ;;  %v2147_v27 = vld [vmem:[%s2656_s2 + $0x130] ss:$8 sps:$4 sm:$0xff] (!%p1823_p7)  }
  0x76   : > { %972 = vmatpush1.bf16.msra.mxu0 %v2076_v28  ;;  %v2123_v28 = vld [vmem:[%s2656_s2 + $0x60] ss:$8 sps:$4 sm:$0xff] (!%p1823_p7)  }
  0x77   : > { %973 = vmatprep.subr.bf16.mxu0 %v2081_v29  ;;  %v2151_v29 = vld [vmem:[%s2656_s2 + $0x144] ss:$8 sps:$4 sm:$0xff] (!%p1823_p7)  }
  0x7a   : > { %974 = vmatpush1.bf16.msra.mxu0 %v2079_v30  ;;  %v2124_v30 = vld [vmem:[%s2656_s2 + $0x74] ss:$8 sps:$4 sm:$0xff] (!%p1823_p7)  }
  0x7b   : > { %975 = vmatprep.subr.bf16.mxu0 %v2084_v31  ;;  %v2153_v31 = vld [vmem:[%s2656_s2 + $0x140] ss:$8 sps:$4 sm:$0xff] (!%p1823_p7)  }
  0x7e   : > { %976 = vmatpush1.bf16.msra.mxu0 %v2082_v32  ;;  %v2126_v32 = vld [vmem:[%s2656_s2 + $0x70] ss:$8 sps:$4 sm:$0xff] (!%p1823_p7)  }
  0x7f   : > { %977 = vmatprep.subr.bf16.mxu0 %v2087_v33  ;;  %v2157_v33 = vld [vmem:[%s2656_s2 + $0x154] ss:$8 sps:$4 sm:$0xff] (!%p1823_p7)  }
  0x82   : > { %978 = vmatpush1.bf16.msra.mxu0 %v2085_v34  ;;  %v2130_v34 = vld [vmem:[%s2656_s2 + $0x84] ss:$8 sps:$4 sm:$0xff] (!%p1823_p7)  }
  0x83   : > { %979 = vmatprep.subr.bf16.mxu0 %v2090_v35  ;;  %v2132_v35 = vld [vmem:[%s2656_s2 + $0x80] ss:$8 sps:$4 sm:$0xff] (!%p1823_p7)  }
  0x86   : > { %980 = vmatpush1.bf16.msra.mxu0 %v2088_v36  ;;  %v2159_v36 = vld [vmem:[%s2656_s2 + $0x150] ss:$8 sps:$4 sm:$0xff] (!%p1823_p7)  }
  0x87   : > { %981 = vmatprep.subr.bf16.mxu0 %v2093_v38  ;;  %v2136_v38 = vld [vmem:[%s2656_s2 + $0x94] ss:$8 sps:$4 sm:$0xff] (!%p1823_p7)  }
  0x8a   : > { %982 = vmatpush1.bf16.msra.mxu0 %v2091_v39  ;;  %v2163_v39 = vld [vmem:[%s2656_s2 + $0x164] ss:$8 sps:$4 sm:$0xff] (!%p1823_p7)  }
  0x8b   : > { %983 = vmatprep.subr.bf16.mxu0 %v2096_v40 }
  0x8e   : > { %984 = vmatpush1.bf16.msra.mxu0 %v2094_v41  ;;  %v2138_v41 = vld [vmem:[%s2656_s2 + $0x90] ss:$8 sps:$4 sm:$0xff] (!%p1823_p7)  }
  0x8f   : > { %985 = vmatprep.subr.bf16.mxu0 %v2099_v42 }
  0x92   : > { %986 = vmatpush1.bf16.msra.mxu0 %v2097_v43  ;;  %v2165_v43 = vld [vmem:[%s2656_s2 + $0x160] ss:$8 sps:$4 sm:$0xff] (!%p1823_p7)  }
  0x93   : > { %987 = vmatprep.subr.bf16.mxu0 %v2102_v44  ;;  %v2169_v44 = vld [vmem:[%s2656_s2 + $0x174] ss:$8 sps:$4 sm:$0xff] (!%p1823_p7)  }
  0x96   : > { %988 = vmatpush1.bf16.msra.mxu0 %v2100_v45 }
  0x97   : > { %1417 = vmatprep.subr.bf16.mxu0 (!%p1823_p7), %v2103_v37  ;;  %v2181_v37 = vld [vmem:[%s2657_s3 + $0x30] sm:$0xff] (!%p1823_p7)  }
  0x99   : > { %990 = vmatmul.mubr.bf16.vlgmr.msra.gmra.mrb[0].mxu0 %v398_v19  ;;  %v2135_v19 = vld [vmem:[%s2656_s2 + $0x110] ss:$8 sps:$4 sm:$0xff] (!%p1823_p7)  }
  0x9a   : > { %1418 = vmatpush1.bf16.msra.mxu0 (!%p1823_p7), %v2105_v7  ;;  %1461 = vmatpush1.bf16.msra.mxu1 (!%p1823_p7), %v2135_v19  ;;  %v2182_v7 = vld [vmem:[%s2657_s3 + $0x38] sm:$0xff] (!%p1823_p7)  }
  0x9b   : > { %1419 = vmatprep.subr.bf16.mxu0 (!%p1823_p7), %v2106_v9  ;;  %1462 = vmatprep.subr.bf16.mxu1 (!%p1823_p7), %v2139_v22  ;;  %v2183_v9 = vld [vmem:[%s2657_s3 + $0x40] sm:$0xff] (!%p1823_p7)  }
  0x9e   : > { %1420 = vmatpush1.bf16.msra.mxu0 (!%p1823_p7), %v2108_v10  ;;  %1463 = vmatpush1.bf16.msra.mxu1 (!%p1823_p7), %v2141_v23  ;;  %v2184_v10 = vld [vmem:[%s2657_s3 + $0x48] sm:$0xff] (!%p1823_p7)  }
  0x9f   : > { %1421 = vmatprep.subr.bf16.mxu0 (!%p1823_p7), %v2109_v11  ;;  %1464 = vmatprep.subr.bf16.mxu1 (!%p1823_p7), %v2145_v25  ;;  %v2185_v11 = vld [vmem:[%s2657_s3 + $0x50] sm:$0xff] (!%p1823_p7)  }
  0xa2   : > { %1422 = vmatpush1.bf16.msra.mxu0 (!%p1823_p7), %v2111_v12  ;;  %1465 = vmatpush1.bf16.msra.mxu1 (!%p1823_p7), %v2147_v27  ;;  %v2186_v12 = vld [vmem:[%s2657_s3 + $0x58] sm:$0xff] (!%p1823_p7)  }
  0xa3   : > { %1423 = vmatprep.subr.bf16.mxu0 (!%p1823_p7), %v2112_v13  ;;  %1466 = vmatprep.subr.bf16.mxu1 (!%p1823_p7), %v2151_v29 }
  0xa6   : > { %1424 = vmatpush1.bf16.msra.mxu0 (!%p1823_p7), %v2114_v14  ;;  %1467 = vmatpush1.bf16.msra.mxu1 (!%p1823_p7), %v2153_v31 }
  0xa7   : > { %1425 = vmatprep.subr.bf16.mxu0 (!%p1823_p7), %v2115_v17  ;;  %1468 = vmatprep.subr.bf16.mxu1 (!%p1823_p7), %v2157_v33 }
  0xaa   : > { %1426 = vmatpush1.bf16.msra.mxu0 (!%p1823_p7), %v2117_v20  ;;  %1469 = vmatpush1.bf16.msra.mxu1 (!%p1823_p7), %v2159_v36 }
  0xab   : > { %1427 = vmatprep.subr.bf16.mxu0 (!%p1823_p7), %v2118_v21  ;;  %1470 = vmatprep.subr.bf16.mxu1 (!%p1823_p7), %v2163_v39 }
  0xae   : > { %1428 = vmatpush1.bf16.msra.mxu0 (!%p1823_p7), %v2120_v24  ;;  %1471 = vmatpush1.bf16.msra.mxu1 (!%p1823_p7), %v2165_v43 }
  0xaf   : > { %1429 = vmatprep.subr.bf16.mxu0 (!%p1823_p7), %v2121_v26  ;;  %1472 = vmatprep.subr.bf16.mxu1 (!%p1823_p7), %v2169_v44 }
  0xb2   : > { %1430 = vmatpush1.bf16.msra.mxu0 (!%p1823_p7), %v2123_v28 }
  0xb3   : > { %1431 = vmatprep.subr.bf16.mxu0 (!%p1823_p7), %v2124_v30 }
  0xb6   : > { %1432 = vmatpush1.bf16.msra.mxu0 (!%p1823_p7), %v2126_v32 }
  0xb7   : > { %1433 = vmatprep.subr.bf16.mxu0 (!%p1823_p7), %v2130_v34 }
  0xba   : > { %1434 = vmatpush1.bf16.msra.mxu0 (!%p1823_p7), %v2132_v35 }
  0xbb   : > { %1435 = vmatprep.subr.bf16.mxu0 (!%p1823_p7), %v2136_v38 }
  0xbe   : > { %1436 = vmatpush1.bf16.msra.mxu0 (!%p1823_p7), %v2138_v41 }
 0x10f   : > { %v1905_v46 = vpop.f32.mrb[0].mxu1 }
 0x110   : > { %v1906_v47 = vpop.f32.mrb[1].mxu1 }
 0x111   : > { %v1907_v48 = vadd.f32 %v1906_v47, %v1905_v46  ;;  %v1908_v49 = vpop.f32.mrb[2].mxu1  ;;  %v2142_v47 = vld [vmem:[%s2656_s2 + $0xa4] ss:$8 sps:$4 sm:$0xff] (!%p1823_p7)  }
 0x112   : > { %v1909_v50 = vpop.f32.mrb[3].mxu1  ;;  %1437 = vmatprep.subr.bf16.mxu0 (!%p1823_p7), %v2142_v47 }
 0x113   : > { %v2171_v50 = vld [vmem:[%s2656_s2 + $0x170] ss:$8 sps:$4 sm:$0xff] (!%p1823_p7)  }
 0x114   : > { %1473 = vmatpush1.bf16.msra.mxu1 (!%p1823_p7), %v2171_v50 }
 0x115   : > { %1603 = vmatprep.subr.bf16.mxu1 (!%p1823_p7), %v2244_v8 }
 0x12f   : > { %v1927_v51 = vpop.f32.mrb[4].mxu1 }
 0x130   : > { %v1928_v52 = vpop.f32.mrb[5].mxu1 }
 0x131   : > { %v1929_v53 = vadd.f32 %v1928_v52, %v1927_v51  ;;  %v1930_v54 = vpop.f32.mrb[6].mxu1  ;;  %v2144_v51 = vld [vmem:[%s2656_s2 + $0xa0] ss:$8 sps:$4 sm:$0xff] (!%p1823_p7)  }
 0x132   : > { %v1931_v55 = vpop.f32.mrb[7].mxu1  ;;  %1438 = vmatpush1.bf16.msra.mxu0 (!%p1823_p7), %v2144_v51 }
 0x133   : > { %v1073_v56 = vadd.f32 %v1929_v53, %v1907_v48  ;;  %v2148_v53 = vld [vmem:[%s2656_s2 + $0xb4] ss:$8 sps:$4 sm:$0xff] (!%p1823_p7)   ;;  %v2175_v55 = vld [vmem:[%s2657_s3] sm:$0xff] (!%p1823_p7)  }
 0x134   : > { %1439 = vmatprep.subr.bf16.mxu0 (!%p1823_p7), %v2148_v53 }
 0x135   : > { %v1095_v2 = vrot.slane %v1073_v56, %v2417_v60  ;;  %v2150_v56 = vld [vmem:[%s2656_s2 + $0xb0] ss:$8 sps:$4 sm:$0xff] (!%p1823_p7)  }
 0x136   : > { %1440 = vmatpush1.bf16.msra.mxu0 (!%p1823_p7), %v2150_v56 }
 0x137   : > { %1441 = vmatprep.subr.bf16.mxu0 (!%p1823_p7), %v2154_v57 }
 0x13a   : > { %1442 = vmatpush1.bf16.msra.mxu0 (!%p1823_p7), %v2156_v59 }
 0x16c   : > { %v991_v61 = vpop.f32.mrb[0].mxu0 }
 0x16d   : > { %v993_v62 = vpop.f32.mrb[1].mxu0 }
 0x16e   : > { %v1081_v63 = vcombine.low %v991_v61, %v993_v62  ;;  %v995_v0 = vpop.f32.mrb[2].mxu0  ;;  %v2177_v61 = vld [vmem:[%s2657_s3 + $0x10] sm:$0xff] (!%p1823_p7)  }
 0x16f   : > { %v996_v1 = vpop.f32.mrb[3].mxu0  ;;  %v2162_v62 = vld [vmem:[%s2656_s2 + $0xd0] ss:$8 sps:$4 sm:$0xff] (!%p1823_p7)  }
 0x170   : > { %v1088_v3 = vrot.slane %v1081_v63, %v2417_v60  ;;  %1103 = sbr.rel (%p1823_p7) target bundleno = 834 (0x342), region = 44  ;;  %v2166_v63 = vld [vmem:[%s2656_s2 + $0xe4] ss:$8 sps:$4 sm:$0xff] (!%p1823_p7)   ;;  %v2178_v0 = vld [vmem:[%s2657_s3 + $0x18] sm:$0xff] (!%p1823_p7)   ;;  %v2168_v1 = vld [vmem:[%s2656_s2 + $0xe0] ss:$8 sps:$4 sm:$0xff] (!%p1823_p7)  }
 0x172   : > { %v1096_v5 = vcombine.low %v1088_v3, %v1095_v2  ;;  %v2172_v2 = vld [vmem:[%s2656_s2 + $0xf4] ss:$8 sps:$4 sm:$0xff] (!%p1823_p7)   ;;  %v2179_v3 = vld [vmem:[%s2657_s3 + $0x20] sm:$0xff] (!%p1823_p7)  }
 0x174   : > { %v1098_v6 = vadd.f32 %v1096_v5, %v245_v4  ;;  %v2174_v4 = vld [vmem:[%s2656_s2 + $0xf0] ss:$8 sps:$4 sm:$0xff] (!%p1823_p7)  }
 0x176   : > { %1099 = vst [vmem:[#allocation2] sm:$0x3f] %v1098_v6  ;;  %v2180_v6 = vld [vmem:[%s2657_s3 + $0x28] sm:$0xff] (!%p1823_p7)  }
 0x17d   : > { %v1104_v40 = vld [vmem:[#allocation2] sm:$0x3f] }
 0x17e   : > { %v1105_v42 = vmax.f32 %v1104_v40, 0.0 }
 0x180   : > { %v1107_v45 = vcombine.high %v1105_v42, %v1105_v42  ;;  %v1114_v46 = vrot.slane %v1105_v42, %v2417_v60 }
 0x182   : > { %v1121_v48 = vrot.slane %v1107_v45, %v2417_v60  ;;  %v1122_v49 = vcombine.high %v1114_v46, %v1114_v46  ;;  %v2160_v60 = vld [vmem:[%s2656_s2 + $0xd4] ss:$8 sps:$4 sm:$0xff]   ;;  %v1126_v5 = vpack.c.bf16 %v1114_v46, %v1114_v46 }
 0x183   : > { %1443 = vmatprep.subr.bf16.mxu0 %v2160_v60 }
 0x184   : > { %v1127_v52 = vpack.c.bf16 %v1122_v49, %v1122_v49  ;;  %v1128_v54 = vpack.c.bf16 %v1121_v48, %v1121_v48  ;;  %1444 = vmatpush1.bf16.msra.mxu0 %v2162_v62 }
 0x185   : > { %1445 = vmatprep.subr.bf16.mxu0 %v2166_v63 }
 0x186   : > { %1449 = vmatprep.mubr.bf16.mxu0 %v1127_v52  ;;  %1491 = vmatmul.mubr.bf16.vlgmr.msra.gmra.mrb[0].mxu1 %v1128_v54 }
 0x187   : > { %1604 = vmatpush1.bf16.msra.mxu1 %v2175_v55 }
 0x188   : > { %1605 = vmatprep.subr.bf16.mxu1 %v2244_v8  ;;  %1446 = vmatpush1.bf16.msra.mxu0 %v2168_v1 }
 0x189   : > { %1447 = vmatprep.subr.bf16.mxu0 %v2172_v2 }
 0x18b   : > { %1606 = vmatpush1.bf16.msra.mxu1 %v2176_v58 }
 0x18c   : > { %1607 = vmatprep.subr.bf16.mxu1 %v2244_v8  ;;  %1448 = vmatpush1.bf16.msra.mxu0 %v2174_v4 }
 0x18f   : > { %1608 = vmatpush1.bf16.msra.mxu1 %v2177_v61  ;;  %1450 = vmatmul.mubr.bf16.vlgmr.msra.gmra.mrb[0].mxu0 %v1126_v5 }
 0x190   : > { %1609 = vmatprep.subr.bf16.mxu1 %v2244_v8 }
 0x193   : > { %1610 = vmatpush1.bf16.msra.mxu1 %v2178_v0 }
 0x194   : > { %1611 = vmatprep.subr.bf16.mxu1 %v2244_v8 }
 0x197   : > { %1612 = vmatpush1.bf16.msra.mxu1 %v2179_v3 }
 0x198   : > { %1613 = vmatprep.subr.bf16.mxu1 %v2244_v8 }
 0x19b   : > { %1614 = vmatpush1.bf16.msra.mxu1 %v2180_v6 }
 0x19c   : > { %1615 = vmatprep.subr.bf16.mxu1 %v2244_v8 }
 0x19f   : > { %1616 = vmatpush1.bf16.msra.mxu1 %v2181_v37 }
 0x1a0   : > { %1617 = vmatprep.subr.bf16.mxu1 %v2244_v8 }
 0x1a3   : > { %1618 = vmatpush1.bf16.msra.mxu1 %v2182_v7 }
 0x1a4   : > { %1619 = vmatprep.subr.bf16.mxu1 %v2244_v8 }
 0x1a7   : > { %1620 = vmatpush1.bf16.msra.mxu1 %v2183_v9 }
 0x1a8   : > { %1621 = vmatprep.subr.bf16.mxu1 %v2244_v8 }
 0x1ab   : > { %1622 = vmatpush1.bf16.msra.mxu1 %v2184_v10 }
 0x1ac   : > { %1623 = vmatprep.subr.bf16.mxu1 %v2244_v8 }
 0x1af   : > { %1624 = vmatpush1.bf16.msra.mxu1 %v2185_v11 }
 0x1b0   : > { %1625 = vmatprep.subr.bf16.mxu1 %v2244_v8 }
 0x1b3   : > { %1626 = vmatpush1.bf16.msra.mxu1 %v2186_v12 }
 0x259   : > { %v1492_v13 = vpop.f32.mrb[0].mxu1 }
 0x25a   : > { %v1494_v14 = vpop.f32.mrb[1].mxu1 }
 0x25b   : > { %v1496_v15 = vpop.f32.mrb[2].mxu1 }
 0x25c   : > { %v1497_v16 = vpop.f32.mrb[3].mxu1 }
 0x262   : > { %v1451_v17 = vpop.f32.mrb[0].mxu0 }
 0x263   : > { %v1493_v18 = vadd.f32 %v1492_v13, %v1451_v17  ;;  %v1453_v19 = vpop.f32.mrb[1].mxu0 }
 0x264   : > { %v1495_v20 = vadd.f32 %v1494_v14, %v1453_v19  ;;  %v1455_v21 = vpop.f32.mrb[2].mxu0 }
 0x265   : > { %v1499_v22 = vmax.f32 %v1493_v18, 0.0  ;;  %v1456_v23 = vpop.f32.mrb[3].mxu0 }
 0x266   : > { %v1500_v24 = vmax.f32 %v1495_v20, 0.0 }
 0x267   : > { %v1501_v8 = vpack.c.bf16 %v1499_v22, %v1499_v22 }
 0x268   : > { %v1502_v25 = vpack.c.bf16 %v1500_v24, %v1500_v24 }
 0x26a   : > { %1884 = vmatprep.mubr.msk.bf16.mxu1 %vm1599_vm0, %v1502_v25 }
 0x26b   : > { %1636 = vmatmul.mubr.bf16.vlgmr.msra.gmra.mrb[4].mxu1 %v1501_v8 }
 0x33e   : > { %v1637_v26 = vpop.f32.mrb[4].mxu1 }
 0x33f   : > { %1643 = vst [vmem:[#allocation3] sm:$0x3] %v1637_v26  ;;  %v1639_v27 = vpop.f32.mrb[5].mxu1 }
 0x340   : > { %v1640_v28 = vpop.f32.mrb[6].mxu1 }
 0x341   : > { %v1641_v29 = vpop.f32.mrb[7].mxu1 }
 0x342 PF: > { %p2619_p8 = scmp.eq.s32.totalorder %s1718_s18, 7  ;;  %s2245_s20 = smov [#allocation3]  }
 0x343   : > { %s1653_s21 = sshll.u32 %s2245_s20, 4  ;;  %s1654_s21 = int_to_ptr.vmem [resolvable:$true] %s1653_s21 }
 0x344   : > { %s2187_s22 = scalar_lea.vmem %s1654_s21, 32  ;;  %p2194_p12 = scmp.lt.s32.totalorder %s1654_s21, %s1654_s21 }
 0x345   : > { %p2188_p9 = scmp.ne.s32.totalorder %s1654_s21, %s2187_s22  ;;  %p2195_p13 = scmp.lt.s32.totalorder %s2187_s22, %s2187_s22 }
 0x347   : > { %p2189_p10 = pnand %p2188_p9, %p2619_p8  ;;  %p2196_p0 = por %p2195_p13, %p2194_p12 }
 0x349   : > { %p2190_p11 = pneg %p2189_p10 }
 0x34b   : > { %p2197_p1 = pnand %p2196_p0, %p2190_p11 }
 0x34d   : > { %2200 = shalt.err (!%p2197_p1)
}
 0x34e   : > { %s2201_s18 = scalar_lea.hbm %s2658_s4, 32 }
 0x34f   : > { %p2202_p2 = scmp.ne.s32.totalorder %s2658_s4, %s2201_s18  ;;  %p2207_p5 = scmp.lt.u32.totalorder %s2201_s18, %s2658_s4 }
 0x351   : > { %p2203_p3 = pnand %p2202_p2, %p2619_p8 }
 0x353   : > { %p2204_p4 = pneg %p2203_p3 }
 0x355   : > { %p2209_p6 = pnand %p2207_p5, %p2204_p4 }
 0x357   : > { %2212 = shalt.err (!%p2209_p6)
}
 0x358   : > { %1941 = dma.vmem_to_hbm [thread:$0]  (%p2619_p8), %s1654_s21, 32, %s2658_s4, [#allocation4]  }
 0x359   : > { %2226 = dma.done.wait (%p2619_p8), [#allocation4], 32  }
 0x35a   : > { %2228 = vsyncadd (%p2619_p8), [#allocation4], 4294967264 }
 0x35b PF: > { %s15_s17 = sadd.s32 1, %s2239_s17   ;;  %s2660_s15 = smov %s2235_s16 }
 0x35c   : > { %p12_p7 = scmp.ge.s32.totalorder %s15_s17, 10   ;;  %s2661_s16 = smov %s2663_s19 }
 0x35e   :  { %14 = sbr.rel (!%p12_p7) target bundleno = 2 (0x2), region = 75 }
 0x365   :  { %1666 = vsyncpa [#allocation4], 1 }
 0x366   :  { %1668 = vsyncpa [#allocation4 + $0x1], 1 }

// kernel: net_forward.4
= control target key start
LH: loop header
LB: loop body
LE: loop exit
PB: predicated region body
PF: predicated region fallthrough
CT: control target
= control target key end

     0   :  { %s12238_s12 = smov 0   ;;  %s15730_s0 = inlined_call_operand.vmem [shape: bf16[2,210,128], index: 0, kind: input, shape index: {}]   ;;  %s15731_s1 = inlined_call_operand.vmem [shape: bf16[3200,256], index: 1, kind: input, shape index: {}]   ;;  %s15732_s2 = inlined_call_operand.vmem [shape: f32[1,256], index: 2, kind: input, shape index: {}]   ;;  %s15733_s3 = inlined_call_operand.vmem [shape: bf16[2,16,256], index: 3, kind: output, shape index: {}]  }
   0x1 LB: > { %s10053_s13 = sadd.s32 4294967295, %s12215_s12   ;;  %p10057_p0 = scmp.ge.s32.totalorder %s12215_s12, 1  ;;  %s12215_s12 = sphi %s12238_s12, %s13_s12  }
   0x2   : > { %p137_p1 = scmp.lt.s32.totalorder %s12215_s12, 3 }
   0x4   : > { %p138_p2 = pnand %p10057_p0, %p137_p1 }
   0x5   : > { %v11244_v0 = vld [vmem:[%s15731_s1 + $0x4] ss:$8 sps:$4 sm:$0xff] (!%p138_p2)   ;;  %v11248_v2 = vld [vmem:[%s15731_s1] ss:$8 sps:$4 sm:$0xff] (!%p138_p2)   ;;  %v11250_v4 = vld [vmem:[%s15731_s1 + $0x14] ss:$8 sps:$4 sm:$0xff] (!%p138_p2)  }
   0x6   : > { %141 = sbr.rel (%p138_p2) target bundleno = 1038 (0x40e), region = 32  ;;  %v11246_v1 = vld [vmem:[%s15731_s1 + $0x604] ss:$8 sps:$4 sm:$0xff] (!%p138_p2)   ;;  %7822 = vmatprep.subr.bf16.mxu1 (!%p138_p2), %v11244_v0  ;;  %v11249_v3 = vld [vmem:[%s15731_s1 + $0x600] ss:$8 sps:$4 sm:$0xff] (!%p138_p2)   ;;  %p161_p3 = scmp.lt.s32.totalorder (!%p138_p2), %s10053_s13, 1 }
   0x7   : > { %8560 = vmatprep.subr.bf16.mxu0 (!%p138_p2), %v11246_v1  ;;  %7823 = vmatpush1.bf16.msra.mxu1 (!%p138_p2), %v11248_v2  ;;  %v11252_v5 = vld [vmem:[%s15731_s1 + $0x614] ss:$8 sps:$4 sm:$0xff] (!%p138_p2)   ;;  %v11254_v6 = vld [vmem:[%s15731_s1 + $0x10] ss:$8 sps:$4 sm:$0xff] (!%p138_p2)   ;;  %v11256_v8 = vld [vmem:[%s15731_s1 + $0x24] ss:$8 sps:$4 sm:$0xff] (!%p138_p2)  }
   0x8   : > { %8561 = vmatpush1.bf16.msra.mxu0 (!%p138_p2), %v11249_v3  ;;  %7824 = vmatprep.subr.bf16.mxu1 (!%p138_p2), %v11250_v4  ;;  %v11255_v7 = vld [vmem:[%s15731_s1 + $0x610] ss:$8 sps:$4 sm:$0xff] (!%p138_p2)   ;;  %v11258_v9 = vld [vmem:[%s15731_s1 + $0x624] ss:$8 sps:$4 sm:$0xff] (!%p138_p2)   ;;  %v11260_v10 = vld [vmem:[%s15731_s1 + $0x20] ss:$8 sps:$4 sm:$0xff] (!%p138_p2)  }
   0x9   : > { %8562 = vmatprep.subr.bf16.mxu0 (!%p138_p2), %v11252_v5  ;;  %v11261_v11 = vld [vmem:[%s15731_s1 + $0x620] ss:$8 sps:$4 sm:$0xff] (!%p138_p2)   ;;  %v11262_v12 = vld [vmem:[%s15731_s1 + $0x34] ss:$8 sps:$4 sm:$0xff] (!%p138_p2)   ;;  %v11266_v14 = vld [vmem:[%s15731_s1 + $0x30] ss:$8 sps:$4 sm:$0xff] (!%p138_p2)  }
   0xa   : > { %v11264_v13 = vld [vmem:[%s15731_s1 + $0x634] ss:$8 sps:$4 sm:$0xff] (!%p138_p2)   ;;  %v11267_v15 = vld [vmem:[%s15731_s1 + $0x630] ss:$8 sps:$4 sm:$0xff] (!%p138_p2)   ;;  %v11268_v16 = vld [vmem:[%s15731_s1 + $0x44] ss:$8 sps:$4 sm:$0xff] (!%p138_p2)  }
   0xb   : > { %7825 = vmatpush1.bf16.msra.mxu1 (!%p138_p2), %v11254_v6  ;;  %v11270_v17 = vld [vmem:[%s15731_s1 + $0x644] ss:$8 sps:$4 sm:$0xff] (!%p138_p2)   ;;  %v11272_v18 = vld [vmem:[%s15731_s1 + $0x40] ss:$8 sps:$4 sm:$0xff] (!%p138_p2)   ;;  %v11274_v20 = vld [vmem:[%s15731_s1 + $0x54] ss:$8 sps:$4 sm:$0xff] (!%p138_p2)  }
   0xc   : > { %8563 = vmatpush1.bf16.msra.mxu0 (!%p138_p2), %v11255_v7  ;;  %7826 = vmatprep.subr.bf16.mxu1 (!%p138_p2), %v11256_v8  ;;  %v11273_v19 = vld [vmem:[%s15731_s1 + $0x640] ss:$8 sps:$4 sm:$0xff] (!%p138_p2)   ;;  %v11276_v21 = vld [vmem:[%s15731_s1 + $0x654] ss:$8 sps:$4 sm:$0xff] (!%p138_p2)   ;;  %v11278_v22 = vld [vmem:[%s15731_s1 + $0x50] ss:$8 sps:$4 sm:$0xff] (!%p138_p2)  }
   0xd   : > { %8564 = vmatprep.subr.bf16.mxu0 %v11258_v9  ;;  %v11279_v23 = vld [vmem:[%s15731_s1 + $0x650] ss:$8 sps:$4 sm:$0xff]   ;;  %v11280_v24 = vld [vmem:[%s15731_s1 + $0x64] ss:$8 sps:$4 sm:$0xff]   ;;  %v11284_v26 = vld [vmem:[%s15731_s1 + $0x60] ss:$8 sps:$4 sm:$0xff]  }
   0xe   : > { %v11282_v25 = vld [vmem:[%s15731_s1 + $0x664] ss:$8 sps:$4 sm:$0xff]   ;;  %v11285_v27 = vld [vmem:[%s15731_s1 + $0x660] ss:$8 sps:$4 sm:$0xff]   ;;  %v11286_v28 = vld [vmem:[%s15731_s1 + $0x74] ss:$8 sps:$4 sm:$0xff]  }
   0xf   : > { %7827 = vmatpush1.bf16.msra.mxu1 %v11260_v10  ;;  %v11288_v29 = vld [vmem:[%s15731_s1 + $0x674] ss:$8 sps:$4 sm:$0xff]   ;;  %v11290_v30 = vld [vmem:[%s15731_s1 + $0x70] ss:$8 sps:$4 sm:$0xff]   ;;  %v11292_v32 = vld [vmem:[%s15731_s1 + $0x84] ss:$8 sps:$4 sm:$0xff]  }
  0x10   : > { %8565 = vmatpush1.bf16.msra.mxu0 %v11261_v11  ;;  %7828 = vmatprep.subr.bf16.mxu1 %v11262_v12  ;;  %v11291_v31 = vld [vmem:[%s15731_s1 + $0x670] ss:$8 sps:$4 sm:$0xff]   ;;  %v11294_v33 = vld [vmem:[%s15731_s1 + $0x684] ss:$8 sps:$4 sm:$0xff]   ;;  %v11296_v34 = vld [vmem:[%s15731_s1 + $0x80] ss:$8 sps:$4 sm:$0xff]  }
  0x11   : > { %8566 = vmatprep.subr.bf16.mxu0 %v11264_v13  ;;  %v11297_v35 = vld [vmem:[%s15731_s1 + $0x680] ss:$8 sps:$4 sm:$0xff]   ;;  %v11298_v36 = vld [vmem:[%s15731_s1 + $0x94] ss:$8 sps:$4 sm:$0xff]   ;;  %s15826_s13 = smov (!%p161_p3, %s10053_s13), 1  ;;  %vm974_vm2 = vcmask 1040384  }
  0x12   : > { %v11300_v37 = vld [vmem:[%s15731_s1 + $0x694] ss:$8 sps:$4 sm:$0xff]   ;;  %v11302_v38 = vld [vmem:[%s15731_s1 + $0x90] ss:$8 sps:$4 sm:$0xff]   ;;  %v11304_v40 = vld [vmem:[%s15731_s1 + $0xa4] ss:$8 sps:$4 sm:$0xff]  }
  0x13   : > { %7829 = vmatpush1.bf16.msra.mxu1 %v11266_v14  ;;  %v11303_v39 = vld [vmem:[%s15731_s1 + $0x690] ss:$8 sps:$4 sm:$0xff]   ;;  %s11234_s21 = smul.u32 108, %s15826_s13  ;;  %v11306_v41 = vld [vmem:[%s15731_s1 + $0x6a4] ss:$8 sps:$4 sm:$0xff]   ;;  %vm975_vm3 = vcmask 1044484  }
  0x14   : > { %8567 = vmatpush1.bf16.msra.mxu0 %v11267_v15  ;;  %7830 = vmatprep.subr.bf16.mxu1 %v11268_v16  ;;  %vm15734_vm0 = vsmask.f32 3328  ;;  %v11308_v42 = vld [vmem:[%s15731_s1 + $0xa0] ss:$8 sps:$4 sm:$0xff]   ;;  %vm227_vm1 = vsmask.f32 7440  ;;  %vm12423_vm6 = vmor %vm974_vm2, %vm975_vm3 }
  0x15   : > { %8568 = vmatprep.subr.bf16.mxu0 %v11270_v17  ;;  %v11309_v43 = vld [vmem:[%s15731_s1 + $0x6a0] ss:$8 sps:$4 sm:$0xff]   ;;  %v11310_v44 = vld [vmem:[%s15731_s1 + $0xb4] ss:$8 sps:$4 sm:$0xff]   ;;  %s12391_s5 = scalar_lea.vmem %s15730_s0, %s11234_s21  ;;  %vm1087_vm4 = vsmask.f32 256  ;;  %vm12437_vm7 = vmor %vm15734_vm0, %vm227_vm1 }
  0x16   : > { %v11312_v45 = vld [vmem:[%s15731_s1 + $0x6b4] ss:$8 sps:$4 sm:$0xff]   ;;  %vm1088_vm5 = vsmask.f32 4368  ;;  %v11314_v46 = vld [vmem:[%s15731_s1 + $0xb0] ss:$8 sps:$4 sm:$0xff]  }
  0x17   : > { %7831 = vmatpush1.bf16.msra.mxu1 %v11272_v18  ;;  %v11315_v47 = vld [vmem:[%s15731_s1 + $0x6b0] ss:$8 sps:$4 sm:$0xff]   ;;  %v172_v48 = vld [vmem:[%s12391_s5] sm:$0xf]  ;;  %v11316_v49 = vld [vmem:[%s15731_s1 + $0xc4] ss:$8 sps:$4 sm:$0xff]  }
  0x18   : > { %8569 = vmatpush1.bf16.msra.mxu0 %v11273_v19  ;;  %7832 = vmatprep.subr.bf16.mxu1 %v11274_v20  ;;  %v11318_v50 = vld [vmem:[%s15731_s1 + $0x6c4] ss:$8 sps:$4 sm:$0xff]   ;;  %190 = vst [vmem:[#allocation2] sm:$0xf] %v172_v48  ;;  %v208_v52 = vld [vmem:[%s12391_s5] sm:$0xf]  ;;  %vm12467_vm8 = vmor %vm1087_vm4, %vm1088_vm5 }
  0x19   : > { %8570 = vmatprep.subr.bf16.mxu0 %v11276_v21  ;;  %v173_v51 = vld [vmem:[%s12391_s5 + $0x4] sm:$0xf]  ;;  %v210_v54 = vld [vmem:[%s12391_s5 + $0x8] sm:$0xf]  ;;  %v230_v55 = vshrl.u32 %v208_v52, 16  ;;  %v233_v56 = vshll.u32 %v208_v52, 16 }
  0x1a   : > { %v209_v53 = vld [vmem:[%s12391_s5 + $0x4] sm:$0xf]  ;;  %191 = vst [vmem:[#allocation2 + $0x64] sm:$0xf] %v173_v51  ;;  %v249_v59 = vshll.u32 %v210_v54, 16  ;;  %v253_v60 = vshrl.u32 %v210_v54, 16 }
  0x1b   : > { %7833 = vmatpush1.bf16.msra.mxu1 %v11278_v22  ;;  %v239_v57 = vshll.u32 %v209_v53, 16  ;;  %v243_v58 = vshrl.u32 %v209_v53, 16  ;;  %v2053_v61 = vld [vmem:[%s12391_s5 + $0xc] sm:$0x8]  ;;  %v2054_v62 = vld [vmem:[%s12391_s5 + $0x10] sm:$0xf] }
  0x1c   : > { %8571 = vmatpush1.bf16.msra.mxu0 %v11279_v23  ;;  %7834 = vmatprep.subr.bf16.mxu1 %v11280_v24  ;;  %v11320_v63 = vld [vmem:[%s15731_s1 + $0xc0] ss:$8 sps:$4 sm:$0xff]   ;;  %v232_v1 = vrot.slane %v230_v55, 4  ;;  %v235_v2 = vrot.slane %v233_v56, 5  ;;  %v2055_v6 = vld [vmem:[%s12391_s5 + $0x14] sm:$0xf] }
  0x1d   : > { %8572 = vmatprep.subr.bf16.mxu0 %v11282_v25  ;;  %v11321_v0 = vld [vmem:[%s15731_s1 + $0x6c0] ss:$8 sps:$4 sm:$0xff]   ;;  %v241_v3 = vrot.slane %v239_v57, 5  ;;  %v245_v4 = vrot.slane %v243_v58, 4  ;;  %v11322_v7 = vld [vmem:[%s15731_s1 + $0xd4] ss:$8 sps:$4 sm:$0xff]  }
  0x1e   : > { %v251_v8 = vrot.slane %v249_v59, 5  ;;  %v255_v9 = vrot.slane %v253_v60, 4  ;;  %v10067_v10 = vrot.slane %v2053_v61, 11  ;;  %v2093_v11 = vrot.slane %v2054_v62, 7  ;;  %v2182_v12 = vld [vmem:[%s12391_s5 + $0xc] sm:$0x8] }
  0x1f   : > { %7835 = vmatpush1.bf16.msra.mxu1 %v11284_v26  ;;  %v11324_v13 = vld [vmem:[%s15731_s1 + $0x6d4] ss:$8 sps:$4 sm:$0xff]   ;;  %v236_v15 = vor.u32 %v235_v2, %v232_v1  ;;  %v246_v16 = vor.u32 %v245_v4, %v241_v3  ;;  %v2096_v17 = vrot.slane %v2055_v6, 7  ;;  %v2183_v18 = vld [vmem:[%s12391_s5 + $0x10] sm:$0xf]  ;;  %v2202_v19 = vshrl.u32 %v2182_v12, 16 }
  0x20   : > { %8573 = vmatpush1.bf16.msra.mxu0 %v11285_v27  ;;  %7836 = vmatprep.subr.bf16.mxu1 %v11286_v28  ;;  %v256_v20 = vor.u32 %v255_v9, %v251_v8  ;;  %v2094_v21 = vsel %vm12423_vm6, %v10067_v10, %v2093_v11  ;;  %v2095_v22 = vrot.slane %v2093_v11, 4  ;;  %v2184_v23 = vld [vmem:[%s12391_s5 + $0x14] sm:$0xf]  ;;  %v2207_v24 = vshrl.u32 %v2183_v18, 16  ;;  %v11326_v25 = vld [vmem:[%s15731_s1 + $0xd0] ss:$8 sps:$4 sm:$0xff]  }
  0x21   : > { %8574 = vmatprep.subr.bf16.mxu0 %v11288_v29  ;;  %v11327_v26 = vld [vmem:[%s15731_s1 + $0x6d0] ss:$8 sps:$4 sm:$0xff]   ;;  %v237_v27 = vrot.slane %v236_v15, 4  ;;  %v247_v28 = vrot.slane %v246_v16, 4  ;;  %v2098_v29 = vrot.slane %v2096_v17, 4  ;;  %vm480_vm9 = vcmask 1042432  }
  0x22   : > { %2164 = vst [vmem:[#allocation2 + $0x30] sm:$0xf] %v2094_v21  ;;  %v11334_v51 = vld [vmem:[%s15731_s1 + $0xf4] ss:$8 sps:$4 sm:$0xff]   ;;  %v2056_v57 = vld [vmem:[%s12391_s5 + $0x18] sm:$0xf] }
  0x23   : > { %7837 = vmatpush1.bf16.msra.mxu1 %v11290_v30  ;;  %v10068_v30 = vrot.slane %v2202_v19, 11  ;;  %v11336_v52 = vld [vmem:[%s15731_s1 + $0x6f4] ss:$8 sps:$4 sm:$0xff]   ;;  %v2099_v61 = vrot.slane %v2056_v57, 7  ;;  %v2185_v62 = vld [vmem:[%s12391_s5 + $0x18] sm:$0xf] }
  0x24   : > { %8575 = vmatpush1.bf16.msra.mxu0 %v11291_v31  ;;  %7838 = vmatprep.subr.bf16.mxu1 %v11292_v32  ;;  %v12451_v31 = vrot.slane %v256_v20, 4  ;;  %v2097_v32 = vsel %vm12423_vm6, %v2095_v22, %v2096_v17  ;;  %v12494_v60 = vld [vmem:[%s12391_s5 + $0x1c] sm:$0xf]  ;;  %v11338_v4 = vld [vmem:[%s15731_s1 + $0xf0] ss:$8 sps:$4 sm:$0xff]   ;;  %v2225_v15 = vshrl.u32 %v2185_v62, 16 }
  0x25   : > { %8576 = vmatprep.subr.bf16.mxu0 %v11294_v33  ;;  %v2209_v33 = vrot.slane %v2207_v24, 7  ;;  %2165 = vst [vmem:[#allocation2 + $0x94] sm:$0xf] %v2097_v32  ;;  %v2102_v2 = vrot.slane %v12494_v60, 7  ;;  %v11339_v10 = vld [vmem:[%s15731_s1 + $0x6f0] ss:$8 sps:$4 sm:$0xff]  }
  0x26   : > { %v11348_v11 = vld [vmem:[%s15731_s1 + $0x104] ss:$8 sps:$4 sm:$0xff]   ;;  %v2228_v16 = vshll.u32 %v2185_v62, 16  ;;  %v11346_v24 = vld [vmem:[%s15731_s1 + $0x100] ss:$8 sps:$4 sm:$0xff]   ;;  %vm481_vm10 = vcmask 1046532  }
  0x27   : > { %7839 = vmatpush1.bf16.msra.mxu1 %v11296_v34  ;;  %v2210_v34 = vshll.u32 %v2183_v18, 16  ;;  %v11360_v20 = vld [vmem:[%s15731_s1 + $0x704] ss:$8 sps:$4 sm:$0xff]   ;;  %v11361_v62 = vld [vmem:[%s15731_s1 + $0x120] ss:$8 sps:$4 sm:$0xff]   ;;  %vm12888_vm11 = vmor %vm480_vm9, %vm481_vm10  ;;  %vm15738_vm15 = vcmask 1041408  }
  0x28   : > { %8577 = vmatpush1.bf16.msra.mxu0 %v11297_v35  ;;  %7840 = vmatprep.subr.bf16.mxu1 %v11298_v36  ;;  %v11328_v35 = vld [vmem:[%s15731_s1 + $0xe4] ss:$8 sps:$4 sm:$0xff]   ;;  %vm15735_vm12 = vsmask.f32 2304  ;;  %vm591_vm13 = vsmask.f32 6416 }
  0x29   : > { %8578 = vmatprep.subr.bf16.mxu0 %v11300_v37  ;;  %v11330_v36 = vld [vmem:[%s15731_s1 + $0x6e4] ss:$8 sps:$4 sm:$0xff]   ;;  %v242_v37 = vsel %vm12437_vm7, %v237_v27, %v241_v3  ;;  %v2186_v3 = vld [vmem:[%s12391_s5 + $0x1c] sm:$0xf]  ;;  %vm12924_vm14 = vmor %vm15735_vm12, %vm591_vm13  ;;  %vm845_vm1 = vcmask 1045508   ;;  %s10720_s15 = sshll.u32 %s15826_s13, 4 }
  0x2a   : > { %426 = vst [vmem:[#allocation2 + $0x4] sm:$0xf] %v242_v37  ;;  %v2234_v18 = vshrl.u32 %v2186_v3, 16  ;;  %v2237_v19 = vshll.u32 %v2186_v3, 16  ;;  %v11351_v27 = vld [vmem:[%s15731_s1 + $0x114] ss:$8 sps:$4 sm:$0xff]   ;;  %vm13288_vm5 = vmor %vm15738_vm15, %vm845_vm1  ;;  %s15350_s17 = scalar_lea.vmem %s15733_s3, %s10720_s15 }
  0x2b   : > { %7841 = vmatpush1.bf16.msra.mxu1 %v11302_v38  ;;  %v252_v38 = vsel %vm12437_vm7, %v247_v28, %v251_v8  ;;  %v2101_v8 = vrot.slane %v2099_v61, 4  ;;  %v11366_v37 = vld [vmem:[%s15731_s1 + $0x714] ss:$8 sps:$4 sm:$0xff]   ;;  %vm1830_vm9 = vsmask.f32 1280 }
  0x2c   : > { %8579 = vmatpush1.bf16.msra.mxu0 %v11303_v39  ;;  %7842 = vmatprep.subr.bf16.mxu1 %v11304_v40  ;;  %v2216_v40 = vshrl.u32 %v2184_v23, 16  ;;  %427 = vst [vmem:[#allocation2 + $0x68] sm:$0xf] %v252_v38  ;;  %v213_v38 = vld [vmem:[%s12391_s5 + $0x14] sm:$0xf] }
  0x2d   : > { %8580 = vmatprep.subr.bf16.mxu0 %v11306_v41  ;;  %v2219_v41 = vshll.u32 %v2184_v23, 16  ;;  %v2103_v17 = vsel %vm12423_vm6, %v2101_v8, %v2102_v2  ;;  %v2227_v23 = vrot.slane %v2225_v15, 7  ;;  %v11376_v15 = vld [vmem:[%s15731_s1 + $0x720] ss:$8 sps:$4 sm:$0xff]   ;;  %vm1831_vm10 = vsmask.f32 5392 }
  0x2e   : > { %v12479_v48 = vrot.slane %v2216_v40, 7  ;;  %2167 = vst [vmem:[#allocation2 + $0x15c] sm:$0xf] %v2103_v17  ;;  %v214_v40 = vld [vmem:[%s12391_s5 + $0x18] sm:$0xf]  ;;  %vm13795_vm13 = vmor %vm1830_vm9, %vm1831_vm10 }
  0x2f   : > { %7843 = vmatpush1.bf16.msra.mxu1 %v11308_v42  ;;  %v2212_v42 = vor.u32 %v2210_v34, %v2209_v33  ;;  %v176_v34 = vld [vmem:[%s12391_s5 + $0x10] sm:$0xf]  ;;  %v11939_v5 = vld [vmem:[%s15731_s1 + $0xaf4] ss:$8 sps:$4 sm:$0xff]   ;;  %vm9614_vm1 = vsmask.f32 7958 }
  0x30   : > { %8581 = vmatpush1.bf16.msra.mxu0 %v11309_v43  ;;  %7844 = vmatprep.subr.bf16.mxu1 %v11310_v44  ;;  %v2214_v43 = vrot.slane %v2209_v33, 4  ;;  %v174_v44 = vld [vmem:[%s12391_s5 + $0x8] sm:$0xf]  ;;  %v2221_v58 = vor.u32 %v2219_v41, %v12479_v48  ;;  %v2223_v9 = vrot.slane %v12479_v48, 4  ;;  %194 = vst [vmem:[#allocation2 + $0x190] sm:$0xf] %v176_v34 }
  0x31   : > { %8582 = vmatprep.subr.bf16.mxu0 %v11312_v45  ;;  %v175_v45 = vld [vmem:[%s12391_s5 + $0xc] sm:$0xf]  ;;  %192 = vst [vmem:[#allocation2 + $0xc8] sm:$0xf] %v174_v44  ;;  %v2213_v53 = vsel %vm12467_vm8, %v10068_v30, %v2212_v42  ;;  %v2232_v30 = vrot.slane %v2227_v23, 4 }
  0x32   : > { %193 = vst [vmem:[#allocation2 + $0x12c] sm:$0xf] %v175_v45  ;;  %2385 = vst [vmem:[#allocation2 + $0x34] sm:$0xf] %v2213_v53  ;;  %v2222_v6 = vsel %vm12467_vm8, %v2214_v43, %v2221_v58  ;;  %v11358_v33 = vld [vmem:[%s15731_s1 + $0x700] ss:$8 sps:$4 sm:$0xff]  }
  0x33   : > { %7845 = vmatpush1.bf16.msra.mxu1 %v11314_v46  ;;  %v11332_v46 = vld [vmem:[%s15731_s1 + $0xe0] ss:$8 sps:$4 sm:$0xff]   ;;  %2386 = vst [vmem:[#allocation2 + $0x98] sm:$0xf] %v2222_v6  ;;  %v11343_v43 = vld [vmem:[#allocation2 + $0x30] ss:$100 sps:$4 sm:$0xff]  }
  0x34   : > { %8583 = vmatpush1.bf16.msra.mxu0 %v11315_v47  ;;  %7846 = vmatprep.subr.bf16.mxu1 %v11316_v49  ;;  %v11333_v47 = vld [vmem:[%s15731_s1 + $0x6e0] ss:$8 sps:$4 sm:$0xff]   ;;  %v211_v49 = vld [vmem:[%s12391_s5 + $0xc] sm:$0xf]  ;;  %v11349_v45 = vld [vmem:[%s15731_s1 + $0x110] ss:$8 sps:$4 sm:$0xff]  }
  0x35   : > { %8584 = vmatprep.subr.bf16.mxu0 %v11318_v50  ;;  %v212_v50 = vld [vmem:[%s12391_s5 + $0x10] sm:$0xf]  ;;  %v259_v54 = vshll.u32 %v211_v49, 16  ;;  %v263_v55 = vshrl.u32 %v211_v49, 16  ;;  %v11342_v21 = vld [vmem:[#allocation2 + $0x4] ss:$100 sps:$4 sm:$0xff]  }
  0x36   : > { %v269_v56 = vshll.u32 %v212_v50, 16  ;;  %v273_v59 = vshrl.u32 %v212_v50, 16  ;;  %7854 = vmatprep.mubr.bf16.mxu1 %v11342_v21  ;;  %v2058_v42 = vld [vmem:[%s12391_s5 + $0x20] sm:$0xf]  ;;  %v11363_v48 = vld [vmem:[%s15731_s1 + $0x124] ss:$8 sps:$4 sm:$0xff]  }
  0x37   : > { %7847 = vmatpush1.bf16.msra.mxu1 %v11320_v63  ;;  %v261_v63 = vrot.slane %v259_v54, 5  ;;  %v283_v50 = vshrl.u32 %v213_v38, 16  ;;  %v293_v53 = vshrl.u32 %v214_v40, 16  ;;  %v12560_v54 = vld [vmem:[%s12391_s5 + $0x24] sm:$0xf] }
  0x38   : > { %8585 = vmatpush1.bf16.msra.mxu0 %v11321_v0  ;;  %7848 = vmatprep.subr.bf16.mxu1 %v11322_v7  ;;  %v265_v0 = vrot.slane %v263_v55, 4  ;;  %v12497_v1 = vrot.slane %v269_v56, 5  ;;  %v2100_v7 = vsel %vm12423_vm6, %v2098_v29, %v2099_v61  ;;  %v2230_v29 = vor.u32 %v2228_v16, %v2227_v23  ;;  %v2187_v61 = vld [vmem:[%s12391_s5 + $0x20] sm:$0xf]  ;;  %v11378_v16 = vld [vmem:[%s15731_s1 + $0x724] ss:$8 sps:$4 sm:$0xff]  }
  0x39   : > { %8586 = vmatprep.subr.bf16.mxu0 %v11324_v13  ;;  %v262_v12 = vsel %vm12437_vm7, %v12451_v31, %v261_v63  ;;  %2166 = vst [vmem:[#allocation2 + $0xf8] sm:$0xf] %v2100_v7  ;;  %v275_v31 = vrot.slane %v273_v59, 4  ;;  %v2104_v55 = vrot.slane %v2102_v2, 4  ;;  %v2105_v56 = vrot.slane %v2058_v42, 7 }
  0x3a   : > { %v266_v13 = vor.u32 %v265_v0, %v261_v63  ;;  %428 = vst [vmem:[#allocation2 + $0xcc] sm:$0xf] %v262_v12  ;;  %v11345_v44 = vld [vmem:[#allocation2 + $0x34] ss:$100 sps:$4 sm:$0xff]   ;;  %v285_v57 = vrot.slane %v283_v50, 4  ;;  %v2108_v59 = vrot.slane %v12560_v54, 7 }
  0x3b   : > { %7849 = vmatpush1.bf16.msra.mxu1 %v11326_v25  ;;  %v12528_v25 = vrot.slane %v2234_v18, 7  ;;  %v276_v41 = vor.u32 %v275_v31, %v12497_v1  ;;  %8592 = vmatprep.mubr.bf16.mxu0 %v11345_v44  ;;  %v11364_v63 = vld [vmem:[%s15731_s1 + $0x710] ss:$8 sps:$4 sm:$0xff]   ;;  %v2106_v0 = vsel %vm12423_vm6, %v2104_v55, %v2105_v56  ;;  %v2188_v2 = vld [vmem:[%s12391_s5 + $0x24] sm:$0xf]  ;;  %v2243_v3 = vshrl.u32 %v2187_v61, 16 }
  0x3c   : > { %8587 = vmatpush1.bf16.msra.mxu0 %v11327_v26  ;;  %7850 = vmatprep.subr.bf16.mxu1 %v11328_v35  ;;  %v267_v22 = vrot.slane %v266_v13, 4  ;;  %v11340_v26 = vld [vmem:[#allocation2] ss:$100 sps:$4 sm:$0xff]   ;;  %v177_v35 = vld [vmem:[%s12391_s5 + $0x14] sm:$0xf]  ;;  %v2252_v13 = vshrl.u32 %v2188_v2, 16 }
  0x3d   : > { %8588 = vmatprep.subr.bf16.mxu0 %v11330_v36  ;;  %v2239_v32 = vor.u32 %v2237_v19, %v12528_v25  ;;  %v2231_v36 = vsel %vm12467_vm8, %v2223_v9, %v2230_v29  ;;  %195 = vst [vmem:[#allocation2 + $0x1f4] sm:$0xf] %v177_v35  ;;  %v277_v49 = vrot.slane %v276_v41, 4  ;;  %v11356_v6 = vld [vmem:[#allocation2 + $0xc8] ss:$100 sps:$4 sm:$0xff]   ;;  %v2246_v9 = vshll.u32 %v2187_v61, 16 }
  0x3e   : > { %v272_v28 = vsel %vm12437_vm7, %v267_v22, %v12497_v1  ;;  %2387 = vst [vmem:[#allocation2 + $0xfc] sm:$0xf] %v2231_v36  ;;  %v2107_v1 = vrot.slane %v2105_v56, 4  ;;  %v11369_v7 = vld [vmem:[%s15731_s1 + $0x134] ss:$8 sps:$4 sm:$0xff]   ;;  %v2245_v12 = vrot.slane %v2243_v3, 7 }
  0x3f   : > { %7851 = vmatpush1.bf16.msra.mxu1 %v11332_v46  ;;  %429 = vst [vmem:[#allocation2 + $0x130] sm:$0xf] %v272_v28  ;;  %v2240_v46 = vsel %vm12467_vm8, %v2232_v30, %v2239_v32  ;;  %2168 = vst [vmem:[#allocation2 + $0x1c0] sm:$0xf] %v2106_v0  ;;  %v2255_v18 = vshll.u32 %v2188_v2, 16  ;;  %v295_v19 = vrot.slane %v293_v53, 4 }
  0x40   : > { %8589 = vmatpush1.bf16.msra.mxu0 %v11333_v47  ;;  %7852 = vmatprep.subr.bf16.mxu1 %v11334_v51  ;;  %v279_v47 = vshll.u32 %v213_v38, 16  ;;  %2388 = vst [vmem:[#allocation2 + $0x160] sm:$0xf] %v2240_v46  ;;  %v289_v51 = vshll.u32 %v214_v40, 16  ;;  %v11357_v21 = vld [vmem:[#allocation2 + $0xf8] ss:$100 sps:$4 sm:$0xff]   ;;  %v2248_v23 = vor.u32 %v2246_v9, %v2245_v12 }
  0x41   : > { %8590 = vmatprep.subr.bf16.mxu0 %v11336_v52  ;;  %v11367_v22 = vld [vmem:[%s15731_s1 + $0x130] ss:$8 sps:$4 sm:$0xff]   ;;  %v11384_v31 = vld [vmem:[%s15731_s1 + $0x734] ss:$8 sps:$4 sm:$0xff]   ;;  %v216_v36 = vld [vmem:[%s12391_s5 + $0x20] sm:$0xf] }
  0x42   : > { %v281_v52 = vrot.slane %v279_v47, 5  ;;  %v291_v58 = vrot.slane %v289_v51, 5  ;;  %v11382_v30 = vld [vmem:[%s15731_s1 + $0x730] ss:$8 sps:$4 sm:$0xff]   ;;  %v179_v34 = vld [vmem:[%s12391_s5 + $0x1c] sm:$0xf] }
  0x43   : > { %7853 = vmatpush1.bf16.msra.mxu1 %v11338_v4  ;;  %v178_v32 = vld [vmem:[%s12391_s5 + $0x18] sm:$0xf]  ;;  %v215_v35 = vld [vmem:[%s12391_s5 + $0x1c] sm:$0xf]  ;;  %197 = vst [vmem:[#allocation2 + $0x2bc] sm:$0xf] %v179_v34 }
  0x44   : > { %8591 = vmatpush1.bf16.msra.mxu0 %v11339_v10  ;;  %7945 = vmatprep.subr.bf16.mxu1 %v11348_v11  ;;  %v282_v60 = vsel %vm12437_vm7, %v277_v49, %v281_v52  ;;  %v286_v8 = vor.u32 %v285_v57, %v281_v52  ;;  %v2109_v10 = vsel %vm12423_vm6, %v2107_v1, %v2108_v59  ;;  %v2241_v11 = vrot.slane %v12528_v25, 4  ;;  %v2060_v50 = vld [vmem:[%s12391_s5 + $0x28] sm:$0xf]  ;;  %v2061_v52 = vld [vmem:[%s12391_s5 + $0x2c] sm:$0xf] }
  0x45   : > { %8683 = vmatprep.subr.bf16.mxu0 %v11360_v20  ;;  %430 = vst [vmem:[#allocation2 + $0x194] sm:$0xf] %v282_v60  ;;  %2169 = vst [vmem:[#allocation2 + $0x224] sm:$0xf] %v2109_v10  ;;  %v2250_v25 = vrot.slane %v2245_v12, 4  ;;  %v296_v28 = vor.u32 %v295_v19, %v291_v58  ;;  %v299_v40 = vshll.u32 %v215_v35, 16 }
  0x46   : > { %7855 = vmatmul.mubr.bf16.vlgmr.msra.gmra.mrb[0].mxu1 %v11340_v26  ;;  %v11352_v4 = vld [vmem:[#allocation2 + $0xcc] ss:$100 sps:$4 sm:$0xff]   ;;  %v287_v17 = vrot.slane %v286_v8, 4  ;;  %v12596_v26 = vrot.slane %v2252_v13, 7  ;;  %v2249_v29 = vsel %vm12467_vm8, %v2241_v11, %v2248_v23  ;;  %196 = vst [vmem:[#allocation2 + $0x258] sm:$0xf] %v178_v32 }
  0x47   : > { %7946 = vmatpush1.bf16.msra.mxu1 %v11346_v24  ;;  %8593 = vmatmul.mubr.bf16.vlgmr.msra.gmra.mrb[0].mxu0 %v11343_v43  ;;  %v11354_v20 = vld [vmem:[#allocation2 + $0xfc] ss:$100 sps:$4 sm:$0xff]   ;;  %2389 = vst [vmem:[#allocation2 + $0x1c4] sm:$0xf] %v2249_v29  ;;  %v297_v38 = vrot.slane %v296_v28, 4  ;;  %v303_v41 = vshrl.u32 %v215_v35, 16 }
  0x48   : > { %7947 = vmatprep.subr.bf16.mxu1 %v11351_v27  ;;  %8684 = vmatpush1.bf16.msra.mxu0 %v11358_v33  ;;  %v292_v24 = vsel %vm12437_vm7, %v287_v17, %v291_v58  ;;  %v11381_v27 = vld [vmem:[%s15731_s1 + $0x144] ss:$8 sps:$4 sm:$0xff]   ;;  %v2257_v33 = vor.u32 %v2255_v18, %v12596_v26  ;;  %v309_v42 = vshll.u32 %v216_v36, 16  ;;  %v313_v44 = vshrl.u32 %v216_v36, 16  ;;  %v2189_v55 = vld [vmem:[%s12391_s5 + $0x28] sm:$0xf] }
  0x49   : > { %8685 = vmatprep.subr.bf16.mxu0 %v11366_v37  ;;  %7864 = vmatprep.mubr.bf16.mxu1 %v11352_v4  ;;  %431 = vst [vmem:[#allocation2 + $0x1f8] sm:$0xf] %v292_v24  ;;  %v11379_v37 = vld [vmem:[%s15731_s1 + $0x140] ss:$8 sps:$4 sm:$0xff]   ;;  %v2110_v46 = vrot.slane %v2108_v59, 4  ;;  %v301_v47 = vrot.slane %v299_v40, 5 }
  0x4a   : > { %8602 = vmatprep.mubr.bf16.mxu0 %v11354_v20  ;;  %v2258_v43 = vsel %vm12467_vm8, %v2250_v25, %v2257_v33  ;;  %v12624_v49 = vrot.slane %v309_v42, 5  ;;  %v2259_v51 = vrot.slane %v12596_v26, 4  ;;  %v2111_v53 = vrot.slane %v2060_v50, 7  ;;  %v11387_v57 = vld [vmem:[%s15731_s1 + $0x150] ss:$8 sps:$4 sm:$0xff]  }
  0x4b   : > { %7948 = vmatpush1.bf16.msra.mxu1 %v11349_v45  ;;  %v11389_v45 = vld [vmem:[%s15731_s1 + $0x154] ss:$8 sps:$4 sm:$0xff]   ;;  %2390 = vst [vmem:[#allocation2 + $0x228] sm:$0xf] %v2258_v43  ;;  %v302_v56 = vsel %vm12437_vm7, %v297_v38, %v301_v47  ;;  %v2114_v58 = vrot.slane %v2061_v52, 7  ;;  %v2261_v61 = vshrl.u32 %v2189_v55, 16 }
  0x4c   : > { %7949 = vmatprep.subr.bf16.mxu1 %v11363_v48  ;;  %8686 = vmatpush1.bf16.msra.mxu0 %v11364_v63  ;;  %v305_v48 = vrot.slane %v303_v41, 4  ;;  %v2190_v59 = vld [vmem:[%s12391_s5 + $0x2c] sm:$0xf]  ;;  %v11374_v63 = vld [vmem:[#allocation2 + $0x190] ss:$100 sps:$4 sm:$0xff]   ;;  %v2112_v60 = vsel %vm12423_vm6, %v2110_v46, %v2111_v53  ;;  %v2113_v0 = vrot.slane %v2111_v53, 4 }
  0x4d   : > { %8687 = vmatprep.subr.bf16.mxu0 %v11378_v16  ;;  %432 = vst [vmem:[#allocation2 + $0x25c] sm:$0xf] %v302_v56  ;;  %2170 = vst [vmem:[#allocation2 + $0x288] sm:$0xf] %v2112_v60  ;;  %v2263_v2 = vrot.slane %v2261_v61, 7  ;;  %v2264_v3 = vshll.u32 %v2189_v55, 16 }
  0x4e   : > { %7865 = vmatmul.mubr.bf16.gmra.mrb[4].mxu1 %v11356_v6  ;;  %v306_v54 = vor.u32 %v305_v48, %v301_v47  ;;  %v2270_v4 = vshrl.u32 %v2190_v59, 16  ;;  %v2115_v6 = vsel %vm12423_vm6, %v2113_v0, %v2114_v58  ;;  %v11394_v8 = vld [vmem:[%s15731_s1 + $0x740] ss:$8 sps:$4 sm:$0xff]   ;;  %v11396_v9 = vld [vmem:[%s15731_s1 + $0x744] ss:$8 sps:$4 sm:$0xff]   ;;  %v315_v19 = vrot.slane %v313_v44, 4 }
  0x4f   : > { %7950 = vmatpush1.bf16.msra.mxu1 %v11361_v62  ;;  %8603 = vmatmul.mubr.bf16.gmra.mrb[4].mxu0 %v11357_v21  ;;  %2171 = vst [vmem:[#allocation2 + $0x2ec] sm:$0xf] %v2115_v6  ;;  %v2266_v11 = vor.u32 %v2264_v3, %v2263_v2  ;;  %v2268_v12 = vrot.slane %v2263_v2, 4  ;;  %v11399_v16 = vld [vmem:[%s15731_s1 + $0x164] ss:$8 sps:$4 sm:$0xff]   ;;  %v2116_v24 = vrot.slane %v2114_v58, 4 }
  0x50   : > { %7951 = vmatprep.subr.bf16.mxu1 %v11369_v7  ;;  %8688 = vmatpush1.bf16.msra.mxu0 %v11376_v15  ;;  %v11370_v62 = vld [vmem:[#allocation2 + $0x194] ss:$100 sps:$4 sm:$0xff]   ;;  %v307_v1 = vrot.slane %v306_v54, 4  ;;  %v2273_v7 = vshll.u32 %v2190_v59, 16  ;;  %v12649_v13 = vrot.slane %v2270_v4, 7  ;;  %v316_v28 = vor.u32 %v315_v19, %v12624_v49 }
  0x51   : > { %8689 = vmatprep.subr.bf16.mxu0 %v11384_v31  ;;  %7874 = vmatprep.mubr.bf16.mxu1 %v11370_v62  ;;  %v11397_v15 = vld [vmem:[%s15731_s1 + $0x160] ss:$8 sps:$4 sm:$0xff]   ;;  %v2267_v20 = vsel %vm12467_vm8, %v2259_v51, %v2266_v11  ;;  %v11402_v23 = vld [vmem:[%s15731_s1 + $0x754] ss:$8 sps:$4 sm:$0xff]   ;;  %v181_v26 = vld [vmem:[%s12391_s5 + $0x24] sm:$0xf] }
  0x52   : > { %v312_v10 = vsel %vm12437_vm7, %v307_v1, %v12624_v49  ;;  %v11372_v17 = vld [vmem:[#allocation2 + $0x1c4] ss:$100 sps:$4 sm:$0xff]   ;;  %v2275_v21 = vor.u32 %v2273_v7, %v12649_v13  ;;  %2391 = vst [vmem:[#allocation2 + $0x28c] sm:$0xf] %v2267_v20  ;;  %v180_v25 = vld [vmem:[%s12391_s5 + $0x20] sm:$0xf] }
  0x53   : > { %7952 = vmatpush1.bf16.msra.mxu1 %v11367_v22  ;;  %v11375_v18 = vld [vmem:[#allocation2 + $0x1c0] ss:$100 sps:$4 sm:$0xff]   ;;  %433 = vst [vmem:[#allocation2 + $0x2c0] sm:$0xf] %v312_v10  ;;  %v11400_v22 = vld [vmem:[%s15731_s1 + $0x750] ss:$8 sps:$4 sm:$0xff]   ;;  %8612 = vmatprep.mubr.bf16.mxu0 %v11372_v17 }
  0x54   : > { %7953 = vmatprep.subr.bf16.mxu1 %v11381_v27  ;;  %8690 = vmatpush1.bf16.msra.mxu0 %v11382_v30  ;;  %v217_v27 = vld [vmem:[%s12391_s5 + $0x24] sm:$0xf]  ;;  %v2276_v29 = vsel %vm12467_vm8, %v2268_v12, %v2275_v21  ;;  %198 = vst [vmem:[#allocation2 + $0x320] sm:$0xf] %v180_v25  ;;  %199 = vst [vmem:[#allocation2 + $0x384] sm:$0xf] %v181_v26 }
  0x55   : > { %8691 = vmatprep.subr.bf16.mxu0 %v11396_v9  ;;  %v218_v30 = vld [vmem:[%s12391_s5 + $0x28] sm:$0xf]  ;;  %v319_v31 = vshll.u32 %v217_v27, 16  ;;  %v323_v32 = vshrl.u32 %v217_v27, 16  ;;  %v2277_v33 = vrot.slane %v12649_v13, 4  ;;  %v317_v34 = vrot.slane %v316_v28, 4 }
  0x56   : > { %7875 = vmatmul.mubr.bf16.gmra.mrb[8].mxu1 %v11374_v63  ;;  %2392 = vst [vmem:[#allocation2 + $0x2f0] sm:$0xf] %v2276_v29  ;;  %v329_v35 = vshll.u32 %v218_v30, 16  ;;  %v333_v36 = vshrl.u32 %v218_v30, 16  ;;  %v2063_v41 = vld [vmem:[%s12391_s5 + $0x34] sm:$0xf] }
  0x57   : > { %7954 = vmatpush1.bf16.msra.mxu1 %v11379_v37  ;;  %8613 = vmatmul.mubr.bf16.gmra.mrb[8].mxu0 %v11375_v18  ;;  %v2062_v37 = vld [vmem:[%s12391_s5 + $0x30] sm:$0xf]  ;;  %v321_v38 = vrot.slane %v319_v31, 5  ;;  %v325_v40 = vrot.slane %v323_v32, 4  ;;  %v2120_v44 = vrot.slane %v2063_v41, 7 }
  0x58   : > { %7955 = vmatprep.subr.bf16.mxu1 %v11389_v45  ;;  %8692 = vmatpush1.bf16.msra.mxu0 %v11394_v8  ;;  %v2117_v42 = vrot.slane %v2062_v37, 7  ;;  %v331_v43 = vrot.slane %v329_v35, 5  ;;  %v2191_v45 = vld [vmem:[%s12391_s5 + $0x30] sm:$0xf]  ;;  %v2192_v46 = vld [vmem:[%s12391_s5 + $0x34] sm:$0xf] }
  0x59   : > { %8693 = vmatprep.subr.bf16.mxu0 %v11402_v23  ;;  %v11392_v48 = vld [vmem:[#allocation2 + $0x258] ss:$100 sps:$4 sm:$0xff]   ;;  %v322_v49 = vsel %vm12437_vm7, %v317_v34, %v321_v38  ;;  %v326_v50 = vor.u32 %v325_v40, %v321_v38  ;;  %v2279_v53 = vshrl.u32 %v2191_v45, 16  ;;  %v2282_v55 = vshll.u32 %v2191_v45, 16  ;;  %v11412_v0 = vld [vmem:[%s15731_s1 + $0x760] ss:$8 sps:$4 sm:$0xff]  }
  0x5a   : > { %v11385_v47 = vld [vmem:[#allocation2 + $0x25c] ss:$100 sps:$4 sm:$0xff]   ;;  %v2118_v51 = vsel %vm12423_vm6, %v2116_v24, %v2117_v42  ;;  %v2119_v52 = vrot.slane %v2117_v42, 4  ;;  %434 = vst [vmem:[#allocation2 + $0x324] sm:$0xf] %v322_v49  ;;  %v2288_v56 = vshrl.u32 %v2192_v46, 16 }
  0x5b   : > { %7956 = vmatpush1.bf16.msra.mxu1 %v11387_v57  ;;  %2172 = vst [vmem:[#allocation2 + $0x350] sm:$0xf] %v2118_v51  ;;  %v2291_v54 = vshll.u32 %v2192_v46, 16  ;;  %v11408_v57 = vld [vmem:[%s15731_s1 + $0x170] ss:$8 sps:$4 sm:$0xff]   ;;  %7884 = vmatprep.mubr.bf16.mxu1 %v11385_v47  ;;  %v327_v58 = vrot.slane %v326_v50, 4 }
  0x5c   : > { %7957 = vmatprep.subr.bf16.mxu1 %v11399_v16  ;;  %8694 = vmatpush1.bf16.msra.mxu0 %v11400_v22  ;;  %v2121_v59 = vsel %vm12423_vm6, %v2119_v52, %v2120_v44  ;;  %v11410_v61 = vld [vmem:[%s15731_s1 + $0x174] ss:$8 sps:$4 sm:$0xff]   ;;  %v335_v62 = vrot.slane %v333_v36, 4  ;;  %v2281_v63 = vrot.slane %v2279_v53, 7  ;;  %v12690_v60 = vrot.slane %v2288_v56, 7 }
  0x5d   : > { %2173 = vst [vmem:[#allocation2 + $0x3b4] sm:$0xf] %v2121_v59  ;;  %v11390_v1 = vld [vmem:[#allocation2 + $0x28c] ss:$100 sps:$4 sm:$0xff]   ;;  %v332_v3 = vsel %vm12437_vm7, %v327_v58, %v331_v43  ;;  %v11415_v10 = vld [vmem:[%s15731_s1 + $0x180] ss:$8 sps:$4 sm:$0xff]  }
  0x5e   : > { %7885 = vmatmul.mubr.bf16.gmra.mrb[12].mxu1 %v11392_v48  ;;  %v11393_v2 = vld [vmem:[#allocation2 + $0x288] ss:$100 sps:$4 sm:$0xff]   ;;  %v336_v4 = vor.u32 %v335_v62, %v331_v43  ;;  %435 = vst [vmem:[#allocation2 + $0x388] sm:$0xf] %v332_v3  ;;  %v2284_v6 = vor.u32 %v2282_v55, %v2281_v63  ;;  %v2286_v7 = vrot.slane %v2281_v63, 4  ;;  %v2293_v8 = vor.u32 %v2291_v54, %v12690_v60 }
  0x5f   : > { %7958 = vmatpush1.bf16.msra.mxu1 %v11397_v15  ;;  %v11414_v9 = vld [vmem:[%s15731_s1 + $0x764] ss:$8 sps:$4 sm:$0xff]   ;;  %8622 = vmatprep.mubr.bf16.mxu0 %v11390_v1  ;;  %v2122_v13 = vrot.slane %v2120_v44, 4  ;;  %v11418_v17 = vld [vmem:[%s15731_s1 + $0x770] ss:$8 sps:$4 sm:$0xff]   ;;  %v2295_v22 = vrot.slane %v12690_v60, 4 }
  0x60   : > { %7959 = vmatprep.subr.bf16.mxu1 %v11410_v61  ;;  %v11417_v11 = vld [vmem:[%s15731_s1 + $0x184] ss:$8 sps:$4 sm:$0xff]   ;;  %v337_v12 = vrot.slane %v336_v4, 4  ;;  %8623 = vmatmul.mubr.bf16.gmra.mrb[12].mxu0 %v11393_v2  ;;  %v2285_v15 = vsel %vm12467_vm8, %v2277_v33, %v2284_v6  ;;  %v2294_v16 = vsel %vm12467_vm8, %v2286_v7, %v2293_v8  ;;  %v11420_v18 = vld [vmem:[%s15731_s1 + $0x774] ss:$8 sps:$4 sm:$0xff]  }
  0x61   : > { %8695 = vmatprep.subr.bf16.mxu0 %v11414_v9  ;;  %v182_v19 = vld [vmem:[%s12391_s5 + $0x28] sm:$0xf]  ;;  %2393 = vst [vmem:[#allocation2 + $0x354] sm:$0xf] %v2285_v15  ;;  %2394 = vst [vmem:[#allocation2 + $0x3b8] sm:$0xf] %v2294_v16 }
  0x62   : > { %8696 = vmatpush1.bf16.msra.mxu0 %v11412_v0  ;;  %v183_v20 = vld [vmem:[%s12391_s5 + $0x2c] sm:$0xf]  ;;  %200 = vst [vmem:[#allocation2 + $0x3e8] sm:$0xf] %v182_v19  ;;  %v220_v23 = vld [vmem:[%s12391_s5 + $0x30] sm:$0xf] }
  0x63   : > { %7960 = vmatpush1.bf16.msra.mxu1 %v11408_v57  ;;  %v219_v21 = vld [vmem:[%s12391_s5 + $0x2c] sm:$0xf]  ;;  %8697 = vmatprep.subr.bf16.mxu0 %v11420_v18  ;;  %201 = vst [vmem:[#allocation2 + $0x44c] sm:$0xf] %v183_v20  ;;  %v2064_v26 = vld [vmem:[%s12391_s5 + $0x38] sm:$0xf] }
  0x64   : > { %7961 = vmatprep.subr.bf16.mxu1 %v11417_v11  ;;  %v339_v24 = vshll.u32 %v219_v21, 16  ;;  %v343_v25 = vshrl.u32 %v219_v21, 16  ;;  %v349_v27 = vshll.u32 %v220_v23, 16  ;;  %v353_v28 = vshrl.u32 %v220_v23, 16  ;;  %v2065_v29 = vld [vmem:[%s12391_s5 + $0x3c] sm:$0xf] }
  0x65   : > { %v2123_v30 = vrot.slane %v2064_v26, 7  ;;  %v2126_v33 = vrot.slane %v2065_v29, 7  ;;  %v2193_v34 = vld [vmem:[%s12391_s5 + $0x38] sm:$0xf]  ;;  %v11403_v35 = vld [vmem:[#allocation2 + $0x324] ss:$100 sps:$4 sm:$0xff]  }
  0x66   : > { %v341_v31 = vrot.slane %v339_v24, 5  ;;  %v345_v32 = vrot.slane %v343_v25, 4  ;;  %v11407_v36 = vld [vmem:[#allocation2 + $0x320] ss:$100 sps:$4 sm:$0xff]   ;;  %8698 = vmatpush1.bf16.msra.mxu0 %v11418_v17  ;;  %v351_v37 = vrot.slane %v349_v27, 5  ;;  %v2297_v44 = vshrl.u32 %v2193_v34, 16  ;;  %7894 = vmatprep.mubr.bf16.mxu1 %v11403_v35 }
  0x67   : > { %7962 = vmatpush1.bf16.msra.mxu1 %v11415_v10  ;;  %v2124_v38 = vsel %vm12423_vm6, %v2122_v13, %v2123_v30  ;;  %v2125_v42 = vrot.slane %v2123_v30, 4  ;;  %v2194_v43 = vld [vmem:[%s12391_s5 + $0x3c] sm:$0xf]  ;;  %v11427_v45 = vld [vmem:[%s15731_s1 + $0x780] ss:$8 sps:$4 sm:$0xff]   ;;  %v2300_v46 = vshll.u32 %v2193_v34, 16 }
  0x68   : > { %v342_v40 = vsel %vm12437_vm7, %v337_v12, %v341_v31  ;;  %v346_v41 = vor.u32 %v345_v32, %v341_v31  ;;  %2174 = vst [vmem:[#allocation2 + $0x418] sm:$0xf] %v2124_v38  ;;  %v2306_v47 = vshrl.u32 %v2194_v43, 16  ;;  %v2309_v48 = vshll.u32 %v2194_v43, 16  ;;  %v11429_v49 = vld [vmem:[%s15731_s1 + $0x784] ss:$8 sps:$4 sm:$0xff]   ;;  %7895 = vmatmul.mubr.bf16.gmra.mrb[16].mxu1 %v11407_v36 }
  0x69   : > { %436 = vst [vmem:[#allocation2 + $0x3ec] sm:$0xf] %v342_v40  ;;  %v11405_v50 = vld [vmem:[#allocation2 + $0x354] ss:$100 sps:$4 sm:$0xff]   ;;  %v2127_v52 = vsel %vm12423_vm6, %v2125_v42, %v2126_v33  ;;  %v2299_v53 = vrot.slane %v2297_v44, 7  ;;  %8699 = vmatprep.subr.bf16.mxu0 %v11429_v49  ;;  %v355_v62 = vrot.slane %v353_v28, 4 }
  0x6a   : > { %v347_v51 = vrot.slane %v346_v41, 4  ;;  %v11411_v55 = vld [vmem:[#allocation2 + $0x350] ss:$100 sps:$4 sm:$0xff]   ;;  %2175 = vst [vmem:[#allocation2 + $0x47c] sm:$0xf] %v2127_v52  ;;  %v12738_v56 = vrot.slane %v2306_v47, 7  ;;  %8632 = vmatprep.mubr.bf16.mxu0 %v11405_v50  ;;  %8700 = vmatpush1.bf16.msra.mxu0 %v11427_v45 }
  0x6b   : > { %v11430_v54 = vld [vmem:[%s15731_s1 + $0x190] ss:$8 sps:$4 sm:$0xff]   ;;  %v2302_v58 = vor.u32 %v2300_v46, %v2299_v53  ;;  %v2304_v59 = vrot.slane %v2299_v53, 4  ;;  %v11432_v61 = vld [vmem:[%s15731_s1 + $0x194] ss:$8 sps:$4 sm:$0xff]   ;;  %8633 = vmatmul.mubr.bf16.gmra.mrb[16].mxu0 %v11411_v55  ;;  %v2128_v1 = vrot.slane %v2126_v33, 4  ;;  %v356_v6 = vor.u32 %v355_v62, %v351_v37 }
  0x6c   : > { %v352_v57 = vsel %vm12437_vm7, %v347_v51, %v351_v37  ;;  %v2311_v63 = vor.u32 %v2309_v48, %v12738_v56  ;;  %v11433_v60 = vld [vmem:[%s15731_s1 + $0x790] ss:$8 sps:$4 sm:$0xff]   ;;  %v11435_v0 = vld [vmem:[%s15731_s1 + $0x794] ss:$8 sps:$4 sm:$0xff]   ;;  %7963 = vmatprep.subr.bf16.mxu1 %v11432_v61  ;;  %v11436_v3 = vld [vmem:[%s15731_s1 + $0x1a0] ss:$8 sps:$4 sm:$0xff]  }
  0x6d   : > { %437 = vst [vmem:[#allocation2 + $0x450] sm:$0xf] %v352_v57  ;;  %v2303_v2 = vsel %vm12467_vm8, %v2295_v22, %v2302_v58  ;;  %v11438_v4 = vld [vmem:[%s15731_s1 + $0x1a4] ss:$8 sps:$4 sm:$0xff]   ;;  %v2313_v7 = vrot.slane %v12738_v56, 4  ;;  %7964 = vmatpush1.bf16.msra.mxu1 %v11430_v54  ;;  %8701 = vmatprep.subr.bf16.mxu0 %v11435_v0  ;;  %v357_v13 = vrot.slane %v356_v6, 4 }
  0x6e   : > { %v2312_v8 = vsel %vm12467_vm8, %v2304_v59, %v2311_v63  ;;  %2395 = vst [vmem:[#allocation2 + $0x41c] sm:$0xf] %v2303_v2  ;;  %v184_v9 = vld [vmem:[%s12391_s5 + $0x30] sm:$0xf]  ;;  %v185_v10 = vld [vmem:[%s12391_s5 + $0x34] sm:$0xf]  ;;  %7965 = vmatprep.subr.bf16.mxu1 %v11438_v4  ;;  %8702 = vmatpush1.bf16.msra.mxu0 %v11433_v60 }
  0x6f   : > { %v221_v11 = vld [vmem:[%s12391_s5 + $0x34] sm:$0xf]  ;;  %2396 = vst [vmem:[#allocation2 + $0x480] sm:$0xf] %v2312_v8  ;;  %202 = vst [vmem:[#allocation2 + $0x4b0] sm:$0xf] %v184_v9 }
  0x70   : > { %203 = vst [vmem:[#allocation2 + $0x514] sm:$0xf] %v185_v10  ;;  %v222_v12 = vld [vmem:[%s12391_s5 + $0x38] sm:$0xf]  ;;  %v359_v15 = vshll.u32 %v221_v11, 16  ;;  %v363_v16 = vshrl.u32 %v221_v11, 16 }
  0x71   : > { %v369_v17 = vshll.u32 %v222_v12, 16  ;;  %v373_v18 = vshrl.u32 %v222_v12, 16  ;;  %v2066_v19 = vld [vmem:[%s12391_s5 + $0x40] sm:$0xf]  ;;  %v2067_v20 = vld [vmem:[%s12391_s5 + $0x44] sm:$0xf]  ;;  %7966 = vmatpush1.bf16.msra.mxu1 %v11436_v3 }
  0x72   : > { %v361_v21 = vrot.slane %v359_v15, 5  ;;  %v365_v22 = vrot.slane %v363_v16, 4  ;;  %v2129_v23 = vrot.slane %v2066_v19, 7  ;;  %v2132_v24 = vrot.slane %v2067_v20, 7  ;;  %v2195_v25 = vld [vmem:[%s12391_s5 + $0x40] sm:$0xf] }
  0x73   : > { %v371_v26 = vrot.slane %v369_v17, 5  ;;  %v2196_v27 = vld [vmem:[%s12391_s5 + $0x44] sm:$0xf]  ;;  %v2315_v28 = vshrl.u32 %v2195_v25, 16  ;;  %v2318_v29 = vshll.u32 %v2195_v25, 16  ;;  %v375_v44 = vrot.slane %v373_v18, 4 }
  0x74   : > { %v11421_v30 = vld [vmem:[#allocation2 + $0x3ec] ss:$100 sps:$4 sm:$0xff]   ;;  %v362_v32 = vsel %vm12437_vm7, %v357_v13, %v361_v21  ;;  %v366_v33 = vor.u32 %v365_v22, %v361_v21  ;;  %v2130_v34 = vsel %vm12423_vm6, %v2128_v1, %v2129_v23  ;;  %v2131_v35 = vrot.slane %v2129_v23, 4  ;;  %v11445_v40 = vld [vmem:[%s15731_s1 + $0x7a0] ss:$8 sps:$4 sm:$0xff]  }
  0x75   : > { %v11425_v31 = vld [vmem:[#allocation2 + $0x3e8] ss:$100 sps:$4 sm:$0xff]   ;;  %438 = vst [vmem:[#allocation2 + $0x4b4] sm:$0xf] %v362_v32  ;;  %2176 = vst [vmem:[#allocation2 + $0x4e0] sm:$0xf] %v2130_v34  ;;  %7904 = vmatprep.mubr.bf16.mxu1 %v11421_v30  ;;  %v376_v53 = vor.u32 %v375_v44, %v371_v26 }
  0x76   : > { %v2317_v36 = vrot.slane %v2315_v28, 7  ;;  %v2324_v37 = vshrl.u32 %v2196_v27, 16  ;;  %v2327_v38 = vshll.u32 %v2196_v27, 16  ;;  %v367_v41 = vrot.slane %v366_v33, 4  ;;  %v11447_v43 = vld [vmem:[%s15731_s1 + $0x7a4] ss:$8 sps:$4 sm:$0xff]   ;;  %7905 = vmatmul.mubr.bf16.gmra.mrb[20].mxu1 %v11425_v31 }
  0x77   : > { %v2133_v42 = vsel %vm12423_vm6, %v2131_v35, %v2132_v24  ;;  %v11423_v45 = vld [vmem:[#allocation2 + $0x41c] ss:$100 sps:$4 sm:$0xff]   ;;  %8703 = vmatprep.subr.bf16.mxu0 %v11447_v43  ;;  %v11448_v51 = vld [vmem:[%s15731_s1 + $0x1b0] ss:$8 sps:$4 sm:$0xff]   ;;  %v377_v56 = vrot.slane %v376_v53, 4  ;;  %v2134_v59 = vrot.slane %v2132_v24, 4 }
  0x78   : > { %v11426_v46 = vld [vmem:[#allocation2 + $0x418] ss:$100 sps:$4 sm:$0xff]   ;;  %2177 = vst [vmem:[#allocation2 + $0x544] sm:$0xf] %v2133_v42  ;;  %v2320_v47 = vor.u32 %v2318_v29, %v2317_v36  ;;  %v2322_v48 = vrot.slane %v2317_v36, 4  ;;  %v372_v49 = vsel %vm12437_vm7, %v367_v41, %v371_v26  ;;  %v12788_v50 = vrot.slane %v2324_v37, 7  ;;  %8642 = vmatprep.mubr.bf16.mxu0 %v11423_v45  ;;  %8704 = vmatpush1.bf16.msra.mxu0 %v11445_v40 }
  0x79   : > { %v11450_v52 = vld [vmem:[%s15731_s1 + $0x1b4] ss:$8 sps:$4 sm:$0xff]   ;;  %439 = vst [vmem:[#allocation2 + $0x518] sm:$0xf] %v372_v49  ;;  %v11451_v54 = vld [vmem:[%s15731_s1 + $0x7b0] ss:$8 sps:$4 sm:$0xff]   ;;  %8643 = vmatmul.mubr.bf16.gmra.mrb[20].mxu0 %v11426_v46 }
  0x7a   : > { %v2321_v55 = vsel %vm12467_vm8, %v2313_v7, %v2320_v47  ;;  %v2329_v57 = vor.u32 %v2327_v38, %v12788_v50  ;;  %7967 = vmatprep.subr.bf16.mxu1 %v11450_v52  ;;  %v11453_v58 = vld [vmem:[%s15731_s1 + $0x7b4] ss:$8 sps:$4 sm:$0xff]   ;;  %v11454_v61 = vld [vmem:[%s15731_s1 + $0x1c0] ss:$8 sps:$4 sm:$0xff]   ;;  %v11456_v62 = vld [vmem:[%s15731_s1 + $0x1c4] ss:$8 sps:$4 sm:$0xff]  }
  0x7b   : > { %2397 = vst [vmem:[#allocation2 + $0x4e4] sm:$0xf] %v2321_v55  ;;  %7968 = vmatpush1.bf16.msra.mxu1 %v11448_v51  ;;  %v186_v63 = vld [vmem:[%s12391_s5 + $0x38] sm:$0xf]  ;;  %8705 = vmatprep.subr.bf16.mxu0 %v11453_v58  ;;  %v187_v0 = vld [vmem:[%s12391_s5 + $0x3c] sm:$0xf] }
  0x7c   : > { %v2330_v60 = vsel %vm12467_vm8, %v2322_v48, %v2329_v57  ;;  %204 = vst [vmem:[#allocation2 + $0x578] sm:$0xf] %v186_v63  ;;  %v223_v1 = vld [vmem:[%s12391_s5 + $0x3c] sm:$0xf]  ;;  %v2331_v2 = vrot.slane %v12788_v50, 4  ;;  %8706 = vmatpush1.bf16.msra.mxu0 %v11451_v54  ;;  %7969 = vmatprep.subr.bf16.mxu1 %v11456_v62 }
  0x7d   : > { %2398 = vst [vmem:[#allocation2 + $0x548] sm:$0xf] %v2330_v60  ;;  %205 = vst [vmem:[#allocation2 + $0x5dc] sm:$0xf] %v187_v0  ;;  %v224_v3 = vld [vmem:[%s12391_s5 + $0x40] sm:$0xf] }
  0x7e   : > { %v379_v4 = vshll.u32 %v223_v1, 16  ;;  %v383_v6 = vshrl.u32 %v223_v1, 16  ;;  %v2068_v7 = vld [vmem:[%s12391_s5 + $0x48] sm:$0xf]  ;;  %v389_v8 = vshll.u32 %v224_v3, 16  ;;  %v393_v9 = vshrl.u32 %v224_v3, 16 }
  0x7f   : > { %v2069_v10 = vld [vmem:[%s12391_s5 + $0x4c] sm:$0xf]  ;;  %v2135_v11 = vrot.slane %v2068_v7, 7  ;;  %7970 = vmatpush1.bf16.msra.mxu1 %v11454_v61  ;;  %v2197_v16 = vld [vmem:[%s12391_s5 + $0x48] sm:$0xf] }
  0x80   : > { %v381_v12 = vrot.slane %v379_v4, 5  ;;  %v385_v13 = vrot.slane %v383_v6, 4  ;;  %v2138_v15 = vrot.slane %v2069_v10, 7  ;;  %v11439_v17 = vld [vmem:[#allocation2 + $0x4b4] ss:$100 sps:$4 sm:$0xff]   ;;  %v391_v19 = vrot.slane %v389_v8, 5 }
  0x81   : > { %v11443_v18 = vld [vmem:[#allocation2 + $0x4b0] ss:$100 sps:$4 sm:$0xff]   ;;  %v2136_v20 = vsel %vm12423_vm6, %v2134_v59, %v2135_v11  ;;  %v2137_v23 = vrot.slane %v2135_v11, 4  ;;  %v2198_v24 = vld [vmem:[%s12391_s5 + $0x4c] sm:$0xf]  ;;  %v2333_v25 = vshrl.u32 %v2197_v16, 16  ;;  %7914 = vmatprep.mubr.bf16.mxu1 %v11439_v17 }
  0x82   : > { %v382_v21 = vsel %vm12437_vm7, %v377_v56, %v381_v12  ;;  %v386_v22 = vor.u32 %v385_v13, %v381_v12  ;;  %2178 = vst [vmem:[#allocation2 + $0x5a8] sm:$0xf] %v2136_v20  ;;  %v2336_v26 = vshll.u32 %v2197_v16, 16  ;;  %v2342_v27 = vshrl.u32 %v2198_v24, 16  ;;  %v11463_v29 = vld [vmem:[%s15731_s1 + $0x7c0] ss:$8 sps:$4 sm:$0xff]   ;;  %7915 = vmatmul.mubr.bf16.gmra.mrb[24].mxu1 %v11443_v18 }
  0x83   : > { %440 = vst [vmem:[#allocation2 + $0x57c] sm:$0xf] %v382_v21  ;;  %v2345_v28 = vshll.u32 %v2198_v24, 16  ;;  %v2139_v31 = vsel %vm12423_vm6, %v2137_v23, %v2138_v15  ;;  %v2335_v32 = vrot.slane %v2333_v25, 7  ;;  %v11465_v33 = vld [vmem:[%s15731_s1 + $0x7c4] ss:$8 sps:$4 sm:$0xff]  }
  0x84   : > { %v387_v30 = vrot.slane %v386_v22, 4  ;;  %v11466_v34 = vld [vmem:[%s15731_s1 + $0x1d0] ss:$8 sps:$4 sm:$0xff]   ;;  %v11441_v35 = vld [vmem:[#allocation2 + $0x4e4] ss:$100 sps:$4 sm:$0xff]   ;;  %v12839_v37 = vrot.slane %v2342_v27, 7  ;;  %8707 = vmatprep.subr.bf16.mxu0 %v11465_v33 }
  0x85   : > { %v11444_v36 = vld [vmem:[#allocation2 + $0x4e0] ss:$100 sps:$4 sm:$0xff]   ;;  %2179 = vst [vmem:[#allocation2 + $0x60c] sm:$0xf] %v2139_v31  ;;  %v2338_v40 = vor.u32 %v2336_v26, %v2335_v32  ;;  %v2340_v41 = vrot.slane %v2335_v32, 4  ;;  %v395_v43 = vrot.slane %v393_v9, 4  ;;  %8652 = vmatprep.mubr.bf16.mxu0 %v11441_v35  ;;  %8708 = vmatpush1.bf16.msra.mxu0 %v11463_v29 }
  0x86   : > { %v392_v38 = vsel %vm12437_vm7, %v387_v30, %v391_v19  ;;  %v11468_v42 = vld [vmem:[%s15731_s1 + $0x1d4] ss:$8 sps:$4 sm:$0xff]   ;;  %v2347_v44 = vor.u32 %v2345_v28, %v12839_v37  ;;  %v11469_v45 = vld [vmem:[%s15731_s1 + $0x7d0] ss:$8 sps:$4 sm:$0xff]   ;;  %v188_v47 = vld [vmem:[%s12391_s5 + $0x40] sm:$0xf]  ;;  %8653 = vmatmul.mubr.bf16.gmra.mrb[24].mxu0 %v11444_v36 }
  0x87   : > { %441 = vst [vmem:[#allocation2 + $0x5e0] sm:$0xf] %v392_v38  ;;  %v11471_v46 = vld [vmem:[%s15731_s1 + $0x7d4] ss:$8 sps:$4 sm:$0xff]   ;;  %v2339_v48 = vsel %vm12467_vm8, %v2331_v2, %v2338_v40  ;;  %7971 = vmatprep.subr.bf16.mxu1 %v11468_v42  ;;  %v189_v49 = vld [vmem:[%s12391_s5 + $0x44] sm:$0x3]  ;;  %v396_v51 = vor.u32 %v395_v43, %v391_v19 }
  0x88   : > { %206 = vst [vmem:[#allocation2 + $0x640] sm:$0xf] %v188_v47  ;;  %v225_v50 = vld [vmem:[%s12391_s5 + $0x44] sm:$0x7]  ;;  %v2140_v52 = vrot.slane %v2138_v15, 4  ;;  %v2348_v53 = vsel %vm12467_vm8, %v2340_v41, %v2347_v44  ;;  %7972 = vmatpush1.bf16.msra.mxu1 %v11466_v34  ;;  %8709 = vmatprep.subr.bf16.mxu0 %v11471_v46  ;;  %v2349_v58 = vrot.slane %v12839_v37, 4 }
  0x89   : > { %2399 = vst [vmem:[#allocation2 + $0x5ac] sm:$0xf] %v2339_v48  ;;  %207 = vst [vmem:[#allocation2 + $0x6a4] sm:$0x3] %v189_v49  ;;  %v399_v55 = vshll.u32 %v225_v50, 16  ;;  %v403_v54 = vshrl.u32 %v225_v50, 16  ;;  %8710 = vmatpush1.bf16.msra.mxu0 %v11469_v45 }
  0x8a   : > { %v11474_v57 = vld [vmem:[%s15731_s1 + $0x1e0] ss:$8 sps:$4 sm:$0xff]   ;;  %2400 = vst [vmem:[#allocation2 + $0x610] sm:$0xf] %v2348_v53  ;;  %v397_v56 = vrot.slane %v396_v51, 4 }
  0x8b   : > { %v11476_v59 = vld [vmem:[%s15731_s1 + $0x1e4] ss:$8 sps:$4 sm:$0xff]   ;;  %v2070_v61 = vld [vmem:[%s12391_s5 + $0x50] sm:$0xf]  ;;  %v401_v62 = vrot.slane %v399_v55, 5  ;;  %v405_v63 = vrot.slane %v403_v54, 4 }
  0x8c   : > { %v2071_v60 = vld [vmem:[%s12391_s5 + $0x54] sm:$0x1]  ;;  %v2141_v0 = vrot.slane %v2070_v61, 7  ;;  %7973 = vmatprep.subr.bf16.mxu1 %v11476_v59  ;;  %v2199_v2 = vld [vmem:[%s12391_s5 + $0x50] sm:$0xf] }
  0x8d   : > { %v2144_v1 = vrot.slane %v2071_v60, 7  ;;  %v2200_v3 = vld [vmem:[%s12391_s5 + $0x54] sm:$0x3]  ;;  %v402_v4 = vsel %vm12437_vm7, %v397_v56, %v401_v62  ;;  %v406_v6 = vor.u32 %v405_v63, %v401_v62  ;;  %7974 = vmatpush1.bf16.msra.mxu1 %v11474_v57  ;;  %v11481_v9 = vld [vmem:[%s15731_s1 + $0x7e0] ss:$8 sps:$4 sm:$0xff]   ;;  %v2351_v13 = vshrl.u32 %v2199_v2, 16 }
  0x8e   : > { %v2142_v7 = vsel %vm12423_vm6, %v2140_v52, %v2141_v0  ;;  %v2143_v8 = vrot.slane %v2141_v0, 4  ;;  %v11483_v10 = vld [vmem:[%s15731_s1 + $0x7e4] ss:$8 sps:$4 sm:$0xff]   ;;  %v11457_v11 = vld [vmem:[#allocation2 + $0x57c] ss:$100 sps:$4 sm:$0xff]   ;;  %v2354_v17 = vshll.u32 %v2199_v2, 16 }
  0x8f   : > { %v11461_v12 = vld [vmem:[#allocation2 + $0x578] ss:$100 sps:$4 sm:$0xff]   ;;  %442 = vst [vmem:[#allocation2 + $0x644] sm:$0xf] %v402_v4  ;;  %2180 = vst [vmem:[#allocation2 + $0x670] sm:$0xf] %v2142_v7  ;;  %8711 = vmatprep.subr.bf16.mxu0 %v11483_v10  ;;  %7924 = vmatprep.mubr.bf16.mxu1 %v11457_v11 }
  0x90   : > { %v407_v15 = vrot.slane %v406_v6, 4  ;;  %v2145_v16 = vsel %vm12423_vm6, %v2143_v8, %v2144_v1  ;;  %v2360_v18 = vshrl.u32 %v2200_v3, 16  ;;  %v11484_v19 = vld [vmem:[%s15731_s1 + $0x1f0] ss:$8 sps:$4 sm:$0xff]   ;;  %v2353_v21 = vrot.slane %v2351_v13, 7  ;;  %8712 = vmatpush1.bf16.msra.mxu0 %v11481_v9  ;;  %7925 = vmatmul.mubr.bf16.gmra.mrb[28].mxu1 %v11461_v12 }
  0x91   : > { %2181 = vst [vmem:[#allocation2 + $0x6d4] sm:$0x3] %v2145_v16  ;;  %v2363_v22 = vshll.u32 %v2200_v3, 16  ;;  %v11486_v23 = vld [vmem:[%s15731_s1 + $0x1f4] ss:$8 sps:$4 sm:$0xff]  }
  0x92   : > { %v11459_v24 = vld [vmem:[#allocation2 + $0x5ac] ss:$100 sps:$4 sm:$0xff]   ;;  %443 = vst [vmem:[#allocation2 + $0x6a8] sm:$0x3] %v407_v15  ;;  %v2362_v26 = vrot.slane %v2360_v18, 7  ;;  %v2356_v27 = vor.u32 %v2354_v17, %v2353_v21  ;;  %v2358_v28 = vrot.slane %v2353_v21, 4  ;;  %7975 = vmatprep.subr.bf16.mxu1 %v11486_v23 }
  0x93   : > { %v11462_v25 = vld [vmem:[#allocation2 + $0x5a8] ss:$100 sps:$4 sm:$0xff]   ;;  %v11487_v29 = vld [vmem:[%s15731_s1 + $0x7f0] ss:$8 sps:$4 sm:$0xff]   ;;  %v11489_v30 = vld [vmem:[%s15731_s1 + $0x7f4] ss:$8 sps:$4 sm:$0xff]   ;;  %8662 = vmatprep.mubr.bf16.mxu0 %v11459_v24  ;;  %7976 = vmatpush1.bf16.msra.mxu1 %v11484_v19 }
  0x94   : > { %v2365_v31 = vor.u32 %v2363_v22, %v2362_v26  ;;  %v444_v32 = vld [vmem:[%s12391_s5] sm:$0xe]  ;;  %v445_v33 = vld [vmem:[%s12391_s5 + $0x4] sm:$0xf]  ;;  %v12904_v34 = vld [vmem:[%s12391_s5 + $0x8] sm:$0xf]  ;;  %8663 = vmatmul.mubr.bf16.gmra.mrb[28].mxu0 %v11462_v25  ;;  %v2357_v35 = vsel %vm12467_vm8, %v2349_v58, %v2356_v27  ;;  %8713 = vmatprep.subr.bf16.mxu0 %v11489_v30 }
  0x95   : > { %v10061_v36 = vrot.slane %v444_v32, 9  ;;  %v485_v37 = vrot.slane %v445_v33, 5  ;;  %v488_v38 = vrot.slane %v12904_v34, 5  ;;  %v572_v40 = vld [vmem:[%s12391_s5] sm:$0xe]  ;;  %8714 = vmatpush1.bf16.msra.mxu0 %v11487_v29 }
  0x96   : > { %v2366_v41 = vsel %vm12467_vm8, %v2358_v28, %v2365_v31  ;;  %2401 = vst [vmem:[#allocation2 + $0x674] sm:$0xf] %v2357_v35  ;;  %v573_v42 = vld [vmem:[%s12391_s5 + $0x4] sm:$0xf]  ;;  %v574_v43 = vld [vmem:[%s12391_s5 + $0x8] sm:$0xf] }
  0x97   : > { %v594_v44 = vshrl.u32 %v572_v40, 16  ;;  %2402 = vst [vmem:[#allocation2 + $0x6d8] sm:$0x3] %v2366_v41  ;;  %v486_v45 = vsel %vm12888_vm11, %v10061_v36, %v485_v37  ;;  %v487_v46 = vrot.slane %v485_v37, 4  ;;  %v597_v47 = vshll.u32 %v572_v40, 16 }
  0x98   : > { %v603_v48 = vshrl.u32 %v573_v42, 16  ;;  %v2403_v49 = vld [vmem:[%s12391_s5 + $0x10] sm:$0xf]  ;;  %554 = vst [vmem:[#allocation2 + $0x8] sm:$0xf] %v486_v45  ;;  %v606_v51 = vshll.u32 %v573_v42, 16 }
  0x99   : > { %v596_v50 = vrot.slane %v594_v44, 5  ;;  %v613_v52 = vshrl.u32 %v574_v43, 16  ;;  %v616_v53 = vshll.u32 %v574_v43, 16  ;;  %v2404_v55 = vld [vmem:[%s12391_s5 + $0x14] sm:$0xf]  ;;  %v489_v57 = vsel %vm12888_vm11, %v487_v46, %v488_v38 }
  0x9a   : > { %2421 = vst [vmem:[#allocation2 + $0x38] sm:$0xf] %v2403_v49  ;;  %v11472_v54 = vld [vmem:[#allocation2 + $0x644] ss:$100 sps:$4 sm:$0x3f]   ;;  %v599_v58 = vrot.slane %v597_v47, 6 }
  0x9b   : > { %2422 = vst [vmem:[#allocation2 + $0x9c] sm:$0xf] %v2404_v55  ;;  %v11479_v56 = vld [vmem:[#allocation2 + $0x640] ss:$100 sps:$4 sm:$0x3f]   ;;  %v605_v59 = vrot.slane %v603_v48, 5  ;;  %7934 = vmatprep.mubr.bf16.mxu1 %v11472_v54 }
  0x9c   : > { %555 = vst [vmem:[#allocation2 + $0x6c] sm:$0xf] %v489_v57  ;;  %v608_v61 = vrot.slane %v606_v51, 6  ;;  %v615_v62 = vrot.slane %v613_v52, 5  ;;  %v600_v63 = vor.u32 %v599_v58, %v596_v50  ;;  %v618_v60 = vrot.slane %v616_v53, 6  ;;  %7935 = vmatmul.mubr.bf16.gmra.mrb[32].mxu1 %v11479_v56 }
  0x9d   : > { %v2439_v0 = vld [vmem:[%s12391_s5 + $0x14] sm:$0xe]  ;;  %v2440_v1 = vld [vmem:[%s12391_s5 + $0x18] sm:$0xf]  ;;  %v2441_v4 = vld [vmem:[%s12391_s5 + $0x1c] sm:$0xf] }
  0x9e   : > { %v609_v3 = vor.u32 %v608_v61, %v605_v59  ;;  %v10069_v6 = vrot.slane %v2439_v0, 9  ;;  %v2477_v7 = vrot.slane %v2440_v1, 5  ;;  %v601_v8 = vrot.slane %v600_v63, 4  ;;  %v11498_v11 = vld [vmem:[%s15731_s1 + $0x204] ss:$8 sps:$4 sm:$0xff]  }
  0x9f   : > { %v619_v9 = vor.u32 %v618_v60, %v615_v62  ;;  %v2480_v10 = vrot.slane %v2441_v4, 5  ;;  %v11477_v12 = vld [vmem:[#allocation2 + $0x674] ss:$100 sps:$4 sm:$0x3f]   ;;  %8068 = vmatprep.subr.bf16.mxu1 %v11498_v11  ;;  %v447_v21 = vld [vmem:[%s12391_s5 + $0xc] sm:$0xf] }
  0xa0   : > { %v611_v13 = vrot.slane %v609_v3, 4  ;;  %v2478_v15 = vsel %vm12888_vm11, %v10069_v6, %v2477_v7  ;;  %v11480_v16 = vld [vmem:[#allocation2 + $0x670] ss:$100 sps:$4 sm:$0x3f]   ;;  %v610_v17 = vsel %vm12924_vm14, %v601_v8, %v609_v3  ;;  %v2479_v18 = vrot.slane %v2477_v7, 4  ;;  %8672 = vmatprep.mubr.bf16.mxu0 %v11477_v12 }
  0xa1   : > { %2546 = vst [vmem:[#allocation2 + $0x3c] sm:$0xf] %v2478_v15  ;;  %790 = vst [vmem:[#allocation2 + $0xc] sm:$0xf] %v610_v17  ;;  %v448_v22 = vld [vmem:[%s12391_s5 + $0x10] sm:$0xf]  ;;  %8673 = vmatmul.mubr.bf16.gmra.mrb[32].mxu0 %v11480_v16 }
  0xa2   : > { %v620_v19 = vsel %vm12924_vm14, %v611_v13, %v619_v9  ;;  %v2481_v23 = vsel %vm12888_vm11, %v2479_v18, %v2480_v10  ;;  %v490_v24 = vrot.slane %v488_v38, 4  ;;  %v491_v25 = vrot.slane %v447_v21, 5  ;;  %v575_v27 = vld [vmem:[%s12391_s5 + $0xc] sm:$0xf]  ;;  %v576_v28 = vld [vmem:[%s12391_s5 + $0x10] sm:$0xf] }
  0xa3   : > { %791 = vst [vmem:[#allocation2 + $0x70] sm:$0xf] %v620_v19  ;;  %v494_v26 = vrot.slane %v448_v22, 5  ;;  %2547 = vst [vmem:[#allocation2 + $0xa0] sm:$0xf] %v2481_v23  ;;  %v621_v29 = vrot.slane %v619_v9, 4 }
  0xa4   : > { %v623_v30 = vshrl.u32 %v575_v27, 16  ;;  %v626_v31 = vshll.u32 %v575_v27, 16  ;;  %v2482_v32 = vrot.slane %v2480_v10, 4  ;;  %v492_v33 = vsel %vm12888_vm11, %v490_v24, %v491_v25  ;;  %v2405_v37 = vld [vmem:[%s12391_s5 + $0x18] sm:$0xf] }
  0xa5   : > { %v493_v34 = vrot.slane %v491_v25, 4  ;;  %v633_v35 = vshrl.u32 %v576_v28, 16  ;;  %v636_v36 = vshll.u32 %v576_v28, 16  ;;  %556 = vst [vmem:[#allocation2 + $0xd0] sm:$0xf] %v492_v33  ;;  %v496_v4 = vrot.slane %v494_v26, 4 }
  0xa6   : > { %v625_v38 = vrot.slane %v623_v30, 5  ;;  %v628_v40 = vrot.slane %v626_v31, 6  ;;  %v2406_v41 = vld [vmem:[%s12391_s5 + $0x1c] sm:$0xf]  ;;  %2423 = vst [vmem:[#allocation2 + $0x100] sm:$0xf] %v2405_v37 }
  0xa7   : > { %v2442_v42 = vld [vmem:[%s12391_s5 + $0x20] sm:$0xf]  ;;  %v495_v43 = vsel %vm12888_vm11, %v493_v34, %v494_v26  ;;  %v635_v44 = vrot.slane %v633_v35, 5  ;;  %v638_v45 = vrot.slane %v636_v36, 6  ;;  %2424 = vst [vmem:[#allocation2 + $0x164] sm:$0xf] %v2406_v41 }
  0xa8   : > { %v2443_v46 = vld [vmem:[%s12391_s5 + $0x24] sm:$0xf]  ;;  %v2483_v47 = vrot.slane %v2442_v42, 5  ;;  %v11496_v48 = vld [vmem:[%s15731_s1 + $0x200] ss:$8 sps:$4 sm:$0xff]   ;;  %v629_v49 = vor.u32 %v628_v40, %v625_v38 }
  0xa9   : > { %557 = vst [vmem:[#allocation2 + $0x134] sm:$0xf] %v495_v43  ;;  %v2486_v50 = vrot.slane %v2443_v46, 5  ;;  %v11510_v51 = vld [vmem:[%s15731_s1 + $0x804] ss:$8 sps:$4 sm:$0xff]   ;;  %v12961_v53 = vor.u32 %v638_v45, %v635_v44 }
  0xaa   : > { %v11501_v52 = vld [vmem:[%s15731_s1 + $0x214] ss:$8 sps:$4 sm:$0xff]   ;;  %v2484_v55 = vsel %vm12888_vm11, %v2482_v32, %v2483_v47  ;;  %v2485_v54 = vrot.slane %v2483_v47, 4  ;;  %v11508_v57 = vld [vmem:[%s15731_s1 + $0x800] ss:$8 sps:$4 sm:$0xff]   ;;  %v630_v59 = vsel %vm12924_vm14, %v621_v29, %v629_v49  ;;  %v631_v61 = vrot.slane %v629_v49, 4  ;;  %8806 = vmatprep.subr.bf16.mxu0 %v11510_v51 }
  0xab   : > { %v11490_v58 = vld [vmem:[#allocation2 + $0x8] ss:$100 sps:$4 sm:$0xff]   ;;  %2548 = vst [vmem:[#allocation2 + $0x104] sm:$0xf] %v2484_v55  ;;  %v11493_v62 = vld [vmem:[#allocation2 + $0x38] ss:$100 sps:$4 sm:$0xff]  }
  0xac   : > { %v11492_v56 = vld [vmem:[#allocation2 + $0xc] ss:$100 sps:$4 sm:$0xff]   ;;  %v11495_v63 = vld [vmem:[#allocation2 + $0x3c] ss:$100 sps:$4 sm:$0xff]   ;;  %792 = vst [vmem:[#allocation2 + $0xd4] sm:$0xf] %v630_v59  ;;  %v2487_v60 = vsel %vm12888_vm11, %v2485_v54, %v2486_v50  ;;  %v640_v1 = vsel %vm12924_vm14, %v631_v61, %v12961_v53 }
  0xad   : > { %7977 = vmatprep.mubr.bf16.mxu1 %v11492_v56  ;;  %v11499_v0 = vld [vmem:[%s15731_s1 + $0x210] ss:$8 sps:$4 sm:$0xff]   ;;  %2549 = vst [vmem:[#allocation2 + $0x168] sm:$0xf] %v2487_v60  ;;  %8715 = vmatprep.mubr.bf16.mxu0 %v11495_v63  ;;  %793 = vst [vmem:[#allocation2 + $0x138] sm:$0xf] %v640_v1 }
  0xae   : > { %7978 = vmatmul.mubr.bf16.vlgmr.msra.gmra.mrb[0].mxu1 %v11490_v58  ;;  %v11516_v3 = vld [vmem:[%s15731_s1 + $0x814] ss:$8 sps:$4 sm:$0xff]   ;;  %v641_v6 = vrot.slane %v12961_v53, 4  ;;  %8716 = vmatmul.mubr.bf16.vlgmr.msra.gmra.mrb[0].mxu0 %v11493_v62  ;;  %v11513_v7 = vld [vmem:[%s15731_s1 + $0x224] ss:$8 sps:$4 sm:$0xff]   ;;  %v2488_v9 = vrot.slane %v2486_v50, 4 }
  0xaf   : > { %8069 = vmatpush1.bf16.msra.mxu1 %v11496_v48  ;;  %v11514_v8 = vld [vmem:[%s15731_s1 + $0x810] ss:$8 sps:$4 sm:$0xff]   ;;  %8807 = vmatpush1.bf16.msra.mxu0 %v11508_v57  ;;  %v449_v10 = vld [vmem:[%s12391_s5 + $0x14] sm:$0xf]  ;;  %v2407_v22 = vld [vmem:[%s12391_s5 + $0x20] sm:$0xf] }
  0xb0   : > { %8070 = vmatprep.subr.bf16.mxu1 %v11501_v52  ;;  %v450_v11 = vld [vmem:[%s12391_s5 + $0x18] sm:$0xf]  ;;  %v577_v12 = vld [vmem:[%s12391_s5 + $0x14] sm:$0xf]  ;;  %8808 = vmatprep.subr.bf16.mxu0 %v11516_v3  ;;  %v497_v13 = vrot.slane %v449_v10, 5 }
  0xb1   : > { %v500_v15 = vrot.slane %v450_v11, 5  ;;  %v578_v16 = vld [vmem:[%s12391_s5 + $0x18] sm:$0xf]  ;;  %v643_v17 = vshrl.u32 %v577_v12, 16  ;;  %v646_v18 = vshll.u32 %v577_v12, 16 }
  0xb2   : > { %v653_v19 = vshrl.u32 %v578_v16, 16  ;;  %v656_v21 = vshll.u32 %v578_v16, 16  ;;  %v11511_v23 = vld [vmem:[%s15731_s1 + $0x220] ss:$8 sps:$4 sm:$0xff]   ;;  %v498_v24 = vsel %vm12888_vm11, %v496_v4, %v497_v13  ;;  %v499_v25 = vrot.slane %v497_v13, 4 }
  0xb3   : > { %8071 = vmatpush1.bf16.msra.mxu1 %v11499_v0  ;;  %v645_v26 = vrot.slane %v643_v17, 5  ;;  %v648_v27 = vrot.slane %v646_v18, 6  ;;  %v2408_v28 = vld [vmem:[%s12391_s5 + $0x24] sm:$0xf]  ;;  %2425 = vst [vmem:[#allocation2 + $0x1c8] sm:$0xf] %v2407_v22  ;;  %8809 = vmatpush1.bf16.msra.mxu0 %v11514_v8 }
  0xb4   : > { %v11504_v29 = vld [vmem:[#allocation2 + $0x104] ss:$100 sps:$4 sm:$0xff]   ;;  %8072 = vmatprep.subr.bf16.mxu1 %v11513_v7  ;;  %v11519_v31 = vld [vmem:[%s15731_s1 + $0x234] ss:$8 sps:$4 sm:$0xff]   ;;  %558 = vst [vmem:[#allocation2 + $0x198] sm:$0xf] %v498_v24  ;;  %v501_v35 = vsel %vm12888_vm11, %v499_v25, %v500_v15 }
  0xb5   : > { %v11507_v30 = vld [vmem:[#allocation2 + $0x100] ss:$100 sps:$4 sm:$0xff]   ;;  %v655_v32 = vrot.slane %v653_v19, 5  ;;  %2426 = vst [vmem:[#allocation2 + $0x22c] sm:$0xf] %v2408_v28  ;;  %v649_v36 = vor.u32 %v648_v27, %v645_v26  ;;  %v658_v37 = vrot.slane %v656_v21, 6  ;;  %8725 = vmatprep.mubr.bf16.mxu0 %v11504_v29 }
  0xb6   : > { %v11502_v33 = vld [vmem:[#allocation2 + $0xd4] ss:$100 sps:$4 sm:$0xff]   ;;  %559 = vst [vmem:[#allocation2 + $0x1fc] sm:$0xf] %v501_v35  ;;  %v2444_v38 = vld [vmem:[%s12391_s5 + $0x28] sm:$0xf]  ;;  %8726 = vmatmul.mubr.bf16.gmra.mrb[4].mxu0 %v11507_v30 }
  0xb7   : > { %v11506_v34 = vld [vmem:[#allocation2 + $0xd0] ss:$100 sps:$4 sm:$0xff]   ;;  %v2445_v40 = vld [vmem:[%s12391_s5 + $0x2c] sm:$0xf]  ;;  %7987 = vmatprep.mubr.bf16.mxu1 %v11502_v33  ;;  %v650_v41 = vsel %vm12924_vm14, %v641_v6, %v649_v36  ;;  %v651_v42 = vrot.slane %v649_v36, 4  ;;  %v13008_v43 = vor.u32 %v658_v37, %v655_v32  ;;  %v2489_v44 = vrot.slane %v2444_v38, 5  ;;  %8073 = vmatpush1.bf16.msra.mxu1 %v11511_v23 }
  0xb8   : > { %v11526_v45 = vld [vmem:[%s15731_s1 + $0x820] ss:$8 sps:$4 sm:$0xff]   ;;  %v11528_v46 = vld [vmem:[%s15731_s1 + $0x824] ss:$8 sps:$4 sm:$0xff]   ;;  %7988 = vmatmul.mubr.bf16.gmra.mrb[4].mxu1 %v11506_v34  ;;  %v11517_v47 = vld [vmem:[%s15731_s1 + $0x230] ss:$8 sps:$4 sm:$0xff]   ;;  %8074 = vmatprep.subr.bf16.mxu1 %v11519_v31 }
  0xb9   : > { %794 = vst [vmem:[#allocation2 + $0x19c] sm:$0xf] %v650_v41  ;;  %v2492_v48 = vrot.slane %v2445_v40, 5  ;;  %v502_v49 = vrot.slane %v500_v15, 4  ;;  %v660_v50 = vsel %vm12924_vm14, %v651_v42, %v13008_v43  ;;  %v2490_v51 = vsel %vm12888_vm11, %v2488_v9, %v2489_v44  ;;  %8810 = vmatprep.subr.bf16.mxu0 %v11528_v46  ;;  %v11531_v53 = vld [vmem:[%s15731_s1 + $0x244] ss:$8 sps:$4 sm:$0xff]  }
  0xba   : > { %v2491_v52 = vrot.slane %v2489_v44, 4  ;;  %v661_v55 = vrot.slane %v13008_v43, 4  ;;  %795 = vst [vmem:[#allocation2 + $0x200] sm:$0xf] %v660_v50  ;;  %2550 = vst [vmem:[#allocation2 + $0x1cc] sm:$0xf] %v2490_v51  ;;  %8811 = vmatpush1.bf16.msra.mxu0 %v11526_v45 }
  0xbb   : > { %v11532_v54 = vld [vmem:[%s15731_s1 + $0x830] ss:$8 sps:$4 sm:$0xff]   ;;  %v11534_v57 = vld [vmem:[%s15731_s1 + $0x834] ss:$8 sps:$4 sm:$0xff]   ;;  %v452_v59 = vld [vmem:[%s12391_s5 + $0x20] sm:$0xf]  ;;  %8075 = vmatpush1.bf16.msra.mxu1 %v11517_v47 }
  0xbc   : > { %v451_v58 = vld [vmem:[%s12391_s5 + $0x1c] sm:$0xf]  ;;  %v2493_v56 = vsel %vm12888_vm11, %v2491_v52, %v2492_v48  ;;  %8812 = vmatprep.subr.bf16.mxu0 %v11534_v57  ;;  %v506_v63 = vrot.slane %v452_v59, 5  ;;  %v580_v60 = vld [vmem:[%s12391_s5 + $0x20] sm:$0xf]  ;;  %8076 = vmatprep.subr.bf16.mxu1 %v11531_v53  ;;  %v2494_v19 = vrot.slane %v2492_v48, 4 }
  0xbd   : > { %v503_v61 = vrot.slane %v451_v58, 5  ;;  %v579_v62 = vld [vmem:[%s12391_s5 + $0x1c] sm:$0xf]  ;;  %2551 = vst [vmem:[#allocation2 + $0x230] sm:$0xf] %v2493_v56  ;;  %v673_v7 = vshrl.u32 %v580_v60, 16 }
  0xbe   : > { %v663_v0 = vshrl.u32 %v579_v62, 16  ;;  %v666_v1 = vshll.u32 %v579_v62, 16  ;;  %v11529_v3 = vld [vmem:[%s15731_s1 + $0x240] ss:$8 sps:$4 sm:$0xff]   ;;  %v676_v8 = vshll.u32 %v580_v60, 16  ;;  %8813 = vmatpush1.bf16.msra.mxu0 %v11532_v54  ;;  %v508_v40 = vrot.slane %v506_v63, 4 }
  0xbf   : > { %v504_v4 = vsel %vm12888_vm11, %v502_v49, %v503_v61  ;;  %v505_v6 = vrot.slane %v503_v61, 4  ;;  %v11539_v11 = vld [vmem:[%s15731_s1 + $0x254] ss:$8 sps:$4 sm:$0xff]   ;;  %v2409_v12 = vld [vmem:[%s12391_s5 + $0x28] sm:$0xf]  ;;  %v675_v15 = vrot.slane %v673_v7, 5  ;;  %8077 = vmatpush1.bf16.msra.mxu1 %v11529_v3 }
  0xc0   : > { %560 = vst [vmem:[#allocation2 + $0x260] sm:$0xf] %v504_v4  ;;  %v665_v9 = vrot.slane %v663_v0, 5  ;;  %v668_v10 = vrot.slane %v666_v1, 6  ;;  %v678_v16 = vrot.slane %v676_v8, 6  ;;  %8078 = vmatprep.subr.bf16.mxu1 %v11539_v11 }
  0xc1   : > { %v507_v13 = vsel %vm12888_vm11, %v505_v6, %v506_v63  ;;  %v11537_v17 = vld [vmem:[%s15731_s1 + $0x250] ss:$8 sps:$4 sm:$0xff]   ;;  %v2410_v18 = vld [vmem:[%s12391_s5 + $0x2c] sm:$0xf]  ;;  %2427 = vst [vmem:[#allocation2 + $0x290] sm:$0xf] %v2409_v12 }
  0xc2   : > { %561 = vst [vmem:[#allocation2 + $0x2c4] sm:$0xf] %v507_v13  ;;  %v669_v21 = vor.u32 %v668_v10, %v665_v9  ;;  %2428 = vst [vmem:[#allocation2 + $0x2f4] sm:$0xf] %v2410_v18  ;;  %v2446_v22 = vld [vmem:[%s12391_s5 + $0x30] sm:$0xf]  ;;  %v13057_v25 = vor.u32 %v678_v16, %v675_v15 }
  0xc3   : > { %v2447_v23 = vld [vmem:[%s12391_s5 + $0x34] sm:$0xf]  ;;  %v11520_v24 = vld [vmem:[#allocation2 + $0x19c] ss:$100 sps:$4 sm:$0xff]   ;;  %v2495_v26 = vrot.slane %v2446_v22, 5  ;;  %8079 = vmatpush1.bf16.msra.mxu1 %v11537_v17 }
  0xc4   : > { %v2498_v27 = vrot.slane %v2447_v23, 5  ;;  %v11524_v28 = vld [vmem:[#allocation2 + $0x198] ss:$100 sps:$4 sm:$0xff]   ;;  %v670_v29 = vsel %vm12924_vm14, %v661_v55, %v669_v21  ;;  %v671_v30 = vrot.slane %v669_v21, 4  ;;  %v11544_v31 = vld [vmem:[%s15731_s1 + $0x840] ss:$8 sps:$4 sm:$0xff]   ;;  %7997 = vmatprep.mubr.bf16.mxu1 %v11520_v24 }
  0xc5   : > { %v11522_v32 = vld [vmem:[#allocation2 + $0x1cc] ss:$100 sps:$4 sm:$0xff]   ;;  %796 = vst [vmem:[#allocation2 + $0x264] sm:$0xf] %v670_v29  ;;  %v2496_v34 = vsel %vm12888_vm11, %v2494_v19, %v2495_v26  ;;  %v2497_v35 = vrot.slane %v2495_v26, 4  ;;  %7998 = vmatmul.mubr.bf16.gmra.mrb[8].mxu1 %v11524_v28  ;;  %v681_v43 = vrot.slane %v13057_v25, 4 }
  0xc6   : > { %v11525_v33 = vld [vmem:[#allocation2 + $0x1c8] ss:$100 sps:$4 sm:$0xff]   ;;  %v680_v36 = vsel %vm12924_vm14, %v671_v30, %v13057_v25  ;;  %2552 = vst [vmem:[#allocation2 + $0x294] sm:$0xf] %v2496_v34  ;;  %8735 = vmatprep.mubr.bf16.mxu0 %v11522_v32  ;;  %v2500_v44 = vrot.slane %v2498_v27, 4 }
  0xc7   : > { %v11546_v37 = vld [vmem:[%s15731_s1 + $0x844] ss:$8 sps:$4 sm:$0xff]   ;;  %v11547_v38 = vld [vmem:[%s15731_s1 + $0x260] ss:$8 sps:$4 sm:$0xff]   ;;  %797 = vst [vmem:[#allocation2 + $0x2c8] sm:$0xf] %v680_v36  ;;  %v2499_v41 = vsel %vm12888_vm11, %v2497_v35, %v2498_v27  ;;  %8736 = vmatmul.mubr.bf16.gmra.mrb[8].mxu0 %v11525_v33 }
  0xc8   : > { %v11549_v42 = vld [vmem:[%s15731_s1 + $0x264] ss:$8 sps:$4 sm:$0xff]   ;;  %2553 = vst [vmem:[#allocation2 + $0x2f8] sm:$0xf] %v2499_v41  ;;  %8814 = vmatprep.subr.bf16.mxu0 %v11546_v37  ;;  %v11550_v45 = vld [vmem:[%s15731_s1 + $0x850] ss:$8 sps:$4 sm:$0xff]  }
  0xc9   : > { %v11552_v46 = vld [vmem:[%s15731_s1 + $0x854] ss:$8 sps:$4 sm:$0xff]   ;;  %v453_v47 = vld [vmem:[%s12391_s5 + $0x24] sm:$0xf]  ;;  %8815 = vmatpush1.bf16.msra.mxu0 %v11544_v31  ;;  %8080 = vmatprep.subr.bf16.mxu1 %v11549_v42  ;;  %v454_v48 = vld [vmem:[%s12391_s5 + $0x28] sm:$0xf] }
  0xca   : > { %v509_v49 = vrot.slane %v453_v47, 5  ;;  %v581_v50 = vld [vmem:[%s12391_s5 + $0x24] sm:$0xf]  ;;  %8816 = vmatprep.subr.bf16.mxu0 %v11552_v46  ;;  %v512_v51 = vrot.slane %v454_v48, 5  ;;  %v582_v52 = vld [vmem:[%s12391_s5 + $0x28] sm:$0xf]  ;;  %8081 = vmatpush1.bf16.msra.mxu1 %v11547_v38 }
  0xcb   : > { %v683_v53 = vshrl.u32 %v581_v50, 16  ;;  %v686_v55 = vshll.u32 %v581_v50, 16  ;;  %v693_v58 = vshrl.u32 %v582_v52, 16  ;;  %v696_v56 = vshll.u32 %v582_v52, 16  ;;  %v2411_v59 = vld [vmem:[%s12391_s5 + $0x30] sm:$0xf] }
  0xcc   : > { %v510_v54 = vsel %vm12888_vm11, %v508_v40, %v509_v49  ;;  %v511_v57 = vrot.slane %v509_v49, 4  ;;  %v2412_v63 = vld [vmem:[%s12391_s5 + $0x34] sm:$0xf]  ;;  %2429 = vst [vmem:[#allocation2 + $0x358] sm:$0xf] %v2411_v59  ;;  %v514_v12 = vrot.slane %v512_v51, 4 }
  0xcd   : > { %562 = vst [vmem:[#allocation2 + $0x328] sm:$0xf] %v510_v54  ;;  %v685_v61 = vrot.slane %v683_v53, 5  ;;  %v688_v62 = vrot.slane %v686_v55, 6  ;;  %8817 = vmatpush1.bf16.msra.mxu0 %v11550_v45  ;;  %v695_v0 = vrot.slane %v693_v58, 5  ;;  %v698_v1 = vrot.slane %v696_v56, 6 }
  0xce   : > { %v513_v60 = vsel %vm12888_vm11, %v511_v57, %v512_v51  ;;  %2430 = vst [vmem:[#allocation2 + $0x3bc] sm:$0xf] %v2412_v63  ;;  %v2448_v3 = vld [vmem:[%s12391_s5 + $0x38] sm:$0xf]  ;;  %v11535_v4 = vld [vmem:[#allocation2 + $0x264] ss:$100 sps:$4 sm:$0xff]  }
  0xcf   : > { %v11542_v6 = vld [vmem:[#allocation2 + $0x260] ss:$100 sps:$4 sm:$0xff]   ;;  %563 = vst [vmem:[#allocation2 + $0x38c] sm:$0xf] %v513_v60  ;;  %v689_v7 = vor.u32 %v688_v62, %v685_v61  ;;  %v2501_v8 = vrot.slane %v2448_v3, 5  ;;  %v13098_v11 = vor.u32 %v698_v1, %v695_v0  ;;  %8007 = vmatprep.mubr.bf16.mxu1 %v11535_v4 }
  0xd0   : > { %v11540_v9 = vld [vmem:[#allocation2 + $0x294] ss:$100 sps:$4 sm:$0xff]   ;;  %v2449_v16 = vld [vmem:[%s12391_s5 + $0x3c] sm:$0xf]  ;;  %8008 = vmatmul.mubr.bf16.gmra.mrb[12].mxu1 %v11542_v6  ;;  %v11562_v23 = vld [vmem:[%s15731_s1 + $0x860] ss:$8 sps:$4 sm:$0xff]  }
  0xd1   : > { %v11543_v10 = vld [vmem:[#allocation2 + $0x290] ss:$100 sps:$4 sm:$0xff]   ;;  %v690_v13 = vsel %vm12924_vm14, %v681_v43, %v689_v7  ;;  %v691_v15 = vrot.slane %v689_v7, 4  ;;  %v2502_v17 = vsel %vm12888_vm11, %v2500_v44, %v2501_v8  ;;  %v2503_v18 = vrot.slane %v2501_v8, 4  ;;  %8745 = vmatprep.mubr.bf16.mxu0 %v11540_v9  ;;  %v11564_v25 = vld [vmem:[%s15731_s1 + $0x864] ss:$8 sps:$4 sm:$0xff]  }
  0xd2   : > { %v11558_v19 = vld [vmem:[%s15731_s1 + $0x270] ss:$8 sps:$4 sm:$0xff]   ;;  %798 = vst [vmem:[#allocation2 + $0x32c] sm:$0xf] %v690_v13  ;;  %v2504_v21 = vrot.slane %v2449_v16, 5  ;;  %8746 = vmatmul.mubr.bf16.gmra.mrb[12].mxu0 %v11543_v10  ;;  %v701_v30 = vrot.slane %v13098_v11, 4  ;;  %8818 = vmatprep.subr.bf16.mxu0 %v11564_v25 }
  0xd3   : > { %2554 = vst [vmem:[#allocation2 + $0x35c] sm:$0xf] %v2502_v17  ;;  %v11560_v22 = vld [vmem:[%s15731_s1 + $0x274] ss:$8 sps:$4 sm:$0xff]   ;;  %v700_v24 = vsel %vm12924_vm14, %v691_v15, %v13098_v11  ;;  %v11565_v26 = vld [vmem:[%s15731_s1 + $0x280] ss:$8 sps:$4 sm:$0xff]   ;;  %8819 = vmatpush1.bf16.msra.mxu0 %v11562_v23 }
  0xd4   : > { %v11567_v27 = vld [vmem:[%s15731_s1 + $0x284] ss:$8 sps:$4 sm:$0xff]   ;;  %799 = vst [vmem:[#allocation2 + $0x390] sm:$0xf] %v700_v24  ;;  %v2505_v28 = vsel %vm12888_vm11, %v2503_v18, %v2504_v21  ;;  %8082 = vmatprep.subr.bf16.mxu1 %v11560_v22  ;;  %v11568_v29 = vld [vmem:[%s15731_s1 + $0x870] ss:$8 sps:$4 sm:$0xff]  }
  0xd5   : > { %v2506_v31 = vrot.slane %v2504_v21, 4  ;;  %2555 = vst [vmem:[#allocation2 + $0x3c0] sm:$0xf] %v2505_v28  ;;  %8083 = vmatpush1.bf16.msra.mxu1 %v11558_v19  ;;  %v11570_v32 = vld [vmem:[%s15731_s1 + $0x874] ss:$8 sps:$4 sm:$0xff]  }
  0xd6   : > { %v455_v33 = vld [vmem:[%s12391_s5 + $0x2c] sm:$0xf]  ;;  %v456_v34 = vld [vmem:[%s12391_s5 + $0x30] sm:$0xf]  ;;  %8084 = vmatprep.subr.bf16.mxu1 %v11567_v27  ;;  %8820 = vmatprep.subr.bf16.mxu0 %v11570_v32  ;;  %v2413_v44 = vld [vmem:[%s12391_s5 + $0x38] sm:$0xf] }
  0xd7   : > { %v515_v35 = vrot.slane %v455_v33, 5  ;;  %v518_v36 = vrot.slane %v456_v34, 5  ;;  %v583_v37 = vld [vmem:[%s12391_s5 + $0x2c] sm:$0xf]  ;;  %v584_v38 = vld [vmem:[%s12391_s5 + $0x30] sm:$0xf]  ;;  %8821 = vmatpush1.bf16.msra.mxu0 %v11568_v29 }
  0xd8   : > { %v703_v40 = vshrl.u32 %v583_v37, 16  ;;  %v706_v41 = vshll.u32 %v583_v37, 16  ;;  %v713_v42 = vshrl.u32 %v584_v38, 16  ;;  %v716_v43 = vshll.u32 %v584_v38, 16  ;;  %v2414_v47 = vld [vmem:[%s12391_s5 + $0x3c] sm:$0xf] }
  0xd9   : > { %v516_v45 = vsel %vm12888_vm11, %v514_v12, %v515_v35  ;;  %v517_v46 = vrot.slane %v515_v35, 4  ;;  %2431 = vst [vmem:[#allocation2 + $0x420] sm:$0xf] %v2413_v44  ;;  %v2450_v48 = vld [vmem:[%s12391_s5 + $0x40] sm:$0xf]  ;;  %8085 = vmatpush1.bf16.msra.mxu1 %v11565_v26  ;;  %v520_v13 = vrot.slane %v518_v36, 4 }
  0xda   : > { %564 = vst [vmem:[#allocation2 + $0x3f0] sm:$0xf] %v516_v45  ;;  %v705_v49 = vrot.slane %v703_v40, 5  ;;  %v708_v50 = vrot.slane %v706_v41, 6  ;;  %v715_v51 = vrot.slane %v713_v42, 5  ;;  %v718_v52 = vrot.slane %v716_v43, 6 }
  0xdb   : > { %2432 = vst [vmem:[#allocation2 + $0x484] sm:$0xf] %v2414_v47  ;;  %v519_v53 = vsel %vm12888_vm11, %v517_v46, %v518_v36  ;;  %v2451_v55 = vld [vmem:[%s12391_s5 + $0x44] sm:$0xf]  ;;  %v2507_v54 = vrot.slane %v2450_v48, 5 }
  0xdc   : > { %v11577_v57 = vld [vmem:[%s15731_s1 + $0x880] ss:$8 sps:$4 sm:$0xff]   ;;  %v11553_v58 = vld [vmem:[#allocation2 + $0x32c] ss:$100 sps:$4 sm:$0xff]   ;;  %565 = vst [vmem:[#allocation2 + $0x454] sm:$0xf] %v519_v53  ;;  %v709_v59 = vor.u32 %v708_v50, %v705_v49  ;;  %v13150_v61 = vor.u32 %v718_v52, %v715_v51 }
  0xdd   : > { %v11557_v56 = vld [vmem:[#allocation2 + $0x328] ss:$100 sps:$4 sm:$0xff]   ;;  %v2510_v62 = vrot.slane %v2451_v55, 5  ;;  %v11555_v63 = vld [vmem:[#allocation2 + $0x35c] ss:$100 sps:$4 sm:$0xff]   ;;  %v2508_v0 = vsel %vm12888_vm11, %v2506_v31, %v2507_v54  ;;  %v2509_v1 = vrot.slane %v2507_v54, 4  ;;  %8017 = vmatprep.mubr.bf16.mxu1 %v11553_v58 }
  0xde   : > { %v11561_v60 = vld [vmem:[#allocation2 + $0x358] ss:$100 sps:$4 sm:$0xff]   ;;  %v710_v3 = vsel %vm12924_vm14, %v701_v30, %v709_v59  ;;  %v711_v4 = vrot.slane %v709_v59, 4  ;;  %2556 = vst [vmem:[#allocation2 + $0x424] sm:$0xf] %v2508_v0  ;;  %8755 = vmatprep.mubr.bf16.mxu0 %v11555_v63  ;;  %8018 = vmatmul.mubr.bf16.gmra.mrb[16].mxu1 %v11557_v56  ;;  %v721_v16 = vrot.slane %v13150_v61, 4 }
  0xdf   : > { %v11579_v6 = vld [vmem:[%s15731_s1 + $0x884] ss:$8 sps:$4 sm:$0xff]   ;;  %800 = vst [vmem:[#allocation2 + $0x3f4] sm:$0xf] %v710_v3  ;;  %v2511_v7 = vsel %vm12888_vm11, %v2509_v1, %v2510_v62  ;;  %v11580_v8 = vld [vmem:[%s15731_s1 + $0x290] ss:$8 sps:$4 sm:$0xff]   ;;  %8756 = vmatmul.mubr.bf16.gmra.mrb[16].mxu0 %v11561_v60 }
  0xe0   : > { %v11582_v9 = vld [vmem:[%s15731_s1 + $0x294] ss:$8 sps:$4 sm:$0xff]   ;;  %v720_v10 = vsel %vm12924_vm14, %v711_v4, %v13150_v61  ;;  %2557 = vst [vmem:[#allocation2 + $0x488] sm:$0xf] %v2511_v7  ;;  %8822 = vmatprep.subr.bf16.mxu0 %v11579_v6  ;;  %v11583_v11 = vld [vmem:[%s15731_s1 + $0x890] ss:$8 sps:$4 sm:$0xff]  }
  0xe1   : > { %v11585_v12 = vld [vmem:[%s15731_s1 + $0x894] ss:$8 sps:$4 sm:$0xff]   ;;  %801 = vst [vmem:[#allocation2 + $0x458] sm:$0xf] %v720_v10  ;;  %8086 = vmatprep.subr.bf16.mxu1 %v11582_v9  ;;  %8823 = vmatpush1.bf16.msra.mxu0 %v11577_v57  ;;  %v11586_v15 = vld [vmem:[%s15731_s1 + $0x2a0] ss:$8 sps:$4 sm:$0xff]  }
  0xe2   : > { %v2512_v17 = vrot.slane %v2510_v62, 4  ;;  %8087 = vmatpush1.bf16.msra.mxu1 %v11580_v8  ;;  %8824 = vmatprep.subr.bf16.mxu0 %v11585_v12  ;;  %v11588_v18 = vld [vmem:[%s15731_s1 + $0x2a4] ss:$8 sps:$4 sm:$0xff]   ;;  %v457_v19 = vld [vmem:[%s12391_s5 + $0x34] sm:$0xf] }
  0xe3   : > { %v458_v21 = vld [vmem:[%s12391_s5 + $0x38] sm:$0xf]  ;;  %v521_v22 = vrot.slane %v457_v19, 5  ;;  %v585_v24 = vld [vmem:[%s12391_s5 + $0x34] sm:$0xf]  ;;  %8088 = vmatprep.subr.bf16.mxu1 %v11588_v18 }
  0xe4   : > { %v524_v23 = vrot.slane %v458_v21, 5  ;;  %v586_v25 = vld [vmem:[%s12391_s5 + $0x38] sm:$0xf]  ;;  %v723_v26 = vshrl.u32 %v585_v24, 16  ;;  %v726_v27 = vshll.u32 %v585_v24, 16 }
  0xe5   : > { %v733_v28 = vshrl.u32 %v586_v25, 16  ;;  %v736_v29 = vshll.u32 %v586_v25, 16  ;;  %v2415_v30 = vld [vmem:[%s12391_s5 + $0x40] sm:$0xf]  ;;  %8825 = vmatpush1.bf16.msra.mxu0 %v11583_v11  ;;  %v522_v31 = vsel %vm12888_vm11, %v520_v13, %v521_v22  ;;  %v523_v32 = vrot.slane %v521_v22, 4 }
  0xe6   : > { %v2416_v33 = vld [vmem:[%s12391_s5 + $0x44] sm:$0xf]  ;;  %2433 = vst [vmem:[#allocation2 + $0x4e8] sm:$0xf] %v2415_v30  ;;  %v2452_v34 = vld [vmem:[%s12391_s5 + $0x48] sm:$0xf]  ;;  %8089 = vmatpush1.bf16.msra.mxu1 %v11586_v15 }
  0xe7   : > { %566 = vst [vmem:[#allocation2 + $0x4b8] sm:$0xf] %v522_v31  ;;  %v725_v35 = vrot.slane %v723_v26, 5  ;;  %v728_v36 = vrot.slane %v726_v27, 6  ;;  %v735_v37 = vrot.slane %v733_v28, 5  ;;  %v738_v38 = vrot.slane %v736_v29, 6 }
  0xe8   : > { %2434 = vst [vmem:[#allocation2 + $0x54c] sm:$0xf] %v2416_v33  ;;  %v11573_v40 = vld [vmem:[#allocation2 + $0x424] ss:$100 sps:$4 sm:$0xff]   ;;  %v525_v42 = vsel %vm12888_vm11, %v523_v32, %v524_v23  ;;  %v2513_v43 = vrot.slane %v2452_v34, 5  ;;  %v526_v63 = vrot.slane %v524_v23, 4 }
  0xe9   : > { %v11576_v41 = vld [vmem:[#allocation2 + $0x420] ss:$100 sps:$4 sm:$0xff]   ;;  %v11571_v44 = vld [vmem:[#allocation2 + $0x3f4] ss:$100 sps:$4 sm:$0xff]   ;;  %567 = vst [vmem:[#allocation2 + $0x51c] sm:$0xf] %v525_v42  ;;  %v729_v46 = vor.u32 %v728_v36, %v725_v35  ;;  %v13194_v47 = vor.u32 %v738_v38, %v735_v37  ;;  %8765 = vmatprep.mubr.bf16.mxu0 %v11573_v40 }
  0xea   : > { %v11575_v45 = vld [vmem:[#allocation2 + $0x3f0] ss:$100 sps:$4 sm:$0xff]   ;;  %v2453_v48 = vld [vmem:[%s12391_s5 + $0x4c] sm:$0xf]  ;;  %v2514_v49 = vsel %vm12888_vm11, %v2512_v17, %v2513_v43  ;;  %v2515_v50 = vrot.slane %v2513_v43, 4  ;;  %8027 = vmatprep.mubr.bf16.mxu1 %v11571_v44  ;;  %8766 = vmatmul.mubr.bf16.gmra.mrb[20].mxu0 %v11576_v41 }
  0xeb   : > { %v11595_v51 = vld [vmem:[%s15731_s1 + $0x8a0] ss:$8 sps:$4 sm:$0xff]   ;;  %v730_v52 = vsel %vm12924_vm14, %v721_v16, %v729_v46  ;;  %v731_v53 = vrot.slane %v729_v46, 4  ;;  %v2516_v55 = vrot.slane %v2453_v48, 5  ;;  %2558 = vst [vmem:[#allocation2 + $0x4ec] sm:$0xf] %v2514_v49  ;;  %8028 = vmatmul.mubr.bf16.gmra.mrb[20].mxu1 %v11575_v45 }
  0xec   : > { %v11597_v54 = vld [vmem:[%s15731_s1 + $0x8a4] ss:$8 sps:$4 sm:$0xff]   ;;  %802 = vst [vmem:[#allocation2 + $0x4bc] sm:$0xf] %v730_v52  ;;  %v11598_v57 = vld [vmem:[%s15731_s1 + $0x2b0] ss:$8 sps:$4 sm:$0xff]  }
  0xed   : > { %v11600_v58 = vld [vmem:[%s15731_s1 + $0x2b4] ss:$8 sps:$4 sm:$0xff]   ;;  %v740_v56 = vsel %vm12924_vm14, %v731_v53, %v13194_v47  ;;  %v2517_v59 = vsel %vm12888_vm11, %v2515_v50, %v2516_v55  ;;  %8826 = vmatprep.subr.bf16.mxu0 %v11597_v54  ;;  %v11601_v61 = vld [vmem:[%s15731_s1 + $0x8b0] ss:$8 sps:$4 sm:$0xff]   ;;  %v11604_v60 = vld [vmem:[%s15731_s1 + $0x2c0] ss:$8 sps:$4 sm:$0xff]  }
  0xee   : > { %v11603_v62 = vld [vmem:[%s15731_s1 + $0x8b4] ss:$8 sps:$4 sm:$0xff]   ;;  %803 = vst [vmem:[#allocation2 + $0x520] sm:$0xf] %v740_v56  ;;  %2559 = vst [vmem:[#allocation2 + $0x550] sm:$0xf] %v2517_v59  ;;  %8827 = vmatpush1.bf16.msra.mxu0 %v11595_v51  ;;  %8090 = vmatprep.subr.bf16.mxu1 %v11600_v58 }
  0xef   : > { %v741_v0 = vrot.slane %v13194_v47, 4  ;;  %v2518_v1 = vrot.slane %v2516_v55, 4  ;;  %8091 = vmatpush1.bf16.msra.mxu1 %v11598_v57  ;;  %8828 = vmatprep.subr.bf16.mxu0 %v11603_v62  ;;  %v11606_v3 = vld [vmem:[%s15731_s1 + $0x2c4] ss:$8 sps:$4 sm:$0xff]   ;;  %v459_v4 = vld [vmem:[%s12391_s5 + $0x3c] sm:$0xf] }
  0xf0   : > { %v460_v6 = vld [vmem:[%s12391_s5 + $0x40] sm:$0xf]  ;;  %v527_v7 = vrot.slane %v459_v4, 5  ;;  %v587_v9 = vld [vmem:[%s12391_s5 + $0x3c] sm:$0xf]  ;;  %8092 = vmatprep.subr.bf16.mxu1 %v11606_v3 }
  0xf1   : > { %v530_v8 = vrot.slane %v460_v6, 5  ;;  %v588_v10 = vld [vmem:[%s12391_s5 + $0x40] sm:$0xf]  ;;  %v743_v11 = vshrl.u32 %v587_v9, 16  ;;  %v746_v12 = vshll.u32 %v587_v9, 16 }
  0xf2   : > { %v753_v13 = vshrl.u32 %v588_v10, 16  ;;  %v756_v15 = vshll.u32 %v588_v10, 16  ;;  %v2417_v16 = vld [vmem:[%s12391_s5 + $0x48] sm:$0xf]  ;;  %8829 = vmatpush1.bf16.msra.mxu0 %v11601_v61  ;;  %v528_v17 = vsel %vm12888_vm11, %v526_v63, %v527_v7  ;;  %v529_v18 = vrot.slane %v527_v7, 4 }
  0xf3   : > { %v2418_v19 = vld [vmem:[%s12391_s5 + $0x4c] sm:$0xf]  ;;  %2435 = vst [vmem:[#allocation2 + $0x5b0] sm:$0xf] %v2417_v16  ;;  %v2454_v21 = vld [vmem:[%s12391_s5 + $0x50] sm:$0xf]  ;;  %8093 = vmatpush1.bf16.msra.mxu1 %v11604_v60 }
  0xf4   : > { %568 = vst [vmem:[#allocation2 + $0x580] sm:$0xf] %v528_v17  ;;  %v745_v22 = vrot.slane %v743_v11, 5  ;;  %v748_v23 = vrot.slane %v746_v12, 6  ;;  %v755_v24 = vrot.slane %v753_v13, 5  ;;  %v758_v25 = vrot.slane %v756_v15, 6 }
  0xf5   : > { %2436 = vst [vmem:[#allocation2 + $0x614] sm:$0xf] %v2418_v19  ;;  %v531_v26 = vsel %vm12888_vm11, %v529_v18, %v530_v8  ;;  %v2455_v27 = vld [vmem:[%s12391_s5 + $0x54] sm:$0xf]  ;;  %v2519_v28 = vrot.slane %v2454_v21, 5  ;;  %v532_v45 = vrot.slane %v530_v8, 4 }
  0xf6   : > { %v11613_v29 = vld [vmem:[%s15731_s1 + $0x8c0] ss:$8 sps:$4 sm:$0xff]   ;;  %569 = vst [vmem:[#allocation2 + $0x5e4] sm:$0xf] %v531_v26  ;;  %v749_v31 = vor.u32 %v748_v23, %v745_v22  ;;  %v13246_v32 = vor.u32 %v758_v25, %v755_v24  ;;  %v2522_v33 = vrot.slane %v2455_v27, 5 }
  0xf7   : > { %v11589_v30 = vld [vmem:[#allocation2 + $0x4bc] ss:$100 sps:$4 sm:$0xff]   ;;  %v11591_v34 = vld [vmem:[#allocation2 + $0x4ec] ss:$100 sps:$4 sm:$0xff]   ;;  %v2520_v37 = vsel %vm12888_vm11, %v2518_v1, %v2519_v28  ;;  %v2521_v41 = vrot.slane %v2519_v28, 4 }
  0xf8   : > { %v11593_v35 = vld [vmem:[#allocation2 + $0x4b8] ss:$100 sps:$4 sm:$0xff]   ;;  %v11594_v36 = vld [vmem:[#allocation2 + $0x4e8] ss:$100 sps:$4 sm:$0xff]   ;;  %8037 = vmatprep.mubr.bf16.mxu1 %v11589_v30  ;;  %v750_v38 = vsel %vm12924_vm14, %v741_v0, %v749_v31  ;;  %v751_v40 = vrot.slane %v749_v31, 4  ;;  %8775 = vmatprep.mubr.bf16.mxu0 %v11591_v34  ;;  %v761_v50 = vrot.slane %v13246_v32, 4 }
  0xf9   : > { %2560 = vst [vmem:[#allocation2 + $0x5b4] sm:$0xf] %v2520_v37  ;;  %v11615_v42 = vld [vmem:[%s15731_s1 + $0x8c4] ss:$8 sps:$4 sm:$0xff]   ;;  %8038 = vmatmul.mubr.bf16.gmra.mrb[24].mxu1 %v11593_v35  ;;  %804 = vst [vmem:[#allocation2 + $0x584] sm:$0xf] %v750_v38  ;;  %8776 = vmatmul.mubr.bf16.gmra.mrb[24].mxu0 %v11594_v36  ;;  %v2523_v47 = vsel %vm12888_vm11, %v2521_v41, %v2522_v33 }
  0xfa   : > { %v11616_v43 = vld [vmem:[%s15731_s1 + $0x2d0] ss:$8 sps:$4 sm:$0xff]   ;;  %v11618_v44 = vld [vmem:[%s15731_s1 + $0x2d4] ss:$8 sps:$4 sm:$0xff]   ;;  %v760_v46 = vsel %vm12924_vm14, %v751_v40, %v13246_v32  ;;  %8830 = vmatprep.subr.bf16.mxu0 %v11615_v42  ;;  %2561 = vst [vmem:[#allocation2 + $0x618] sm:$0xf] %v2523_v47 }
  0xfb   : > { %v11619_v48 = vld [vmem:[%s15731_s1 + $0x8d0] ss:$8 sps:$4 sm:$0xff]   ;;  %v11621_v49 = vld [vmem:[%s15731_s1 + $0x8d4] ss:$8 sps:$4 sm:$0xff]   ;;  %805 = vst [vmem:[#allocation2 + $0x5e8] sm:$0xf] %v760_v46  ;;  %8831 = vmatpush1.bf16.msra.mxu0 %v11613_v29  ;;  %8094 = vmatprep.subr.bf16.mxu1 %v11618_v44 }
  0xfc   : > { %v461_v51 = vld [vmem:[%s12391_s5 + $0x44] sm:$0x7]  ;;  %v2524_v53 = vrot.slane %v2522_v33, 4  ;;  %8095 = vmatpush1.bf16.msra.mxu1 %v11616_v43  ;;  %8832 = vmatprep.subr.bf16.mxu0 %v11621_v49  ;;  %v11624_v58 = vld [vmem:[%s15731_s1 + $0x2e0] ss:$8 sps:$4 sm:$0xff]  }
  0xfd   : > { %v589_v52 = vld [vmem:[%s12391_s5 + $0x44] sm:$0xf]  ;;  %v533_v55 = vrot.slane %v461_v51, 5  ;;  %v2419_v59 = vld [vmem:[%s12391_s5 + $0x50] sm:$0xf] }
  0xfe   : > { %v763_v54 = vshrl.u32 %v589_v52, 16  ;;  %v766_v57 = vshll.u32 %v589_v52, 16  ;;  %v11626_v56 = vld [vmem:[%s15731_s1 + $0x2e4] ss:$8 sps:$4 sm:$0xff]   ;;  %v2420_v61 = vld [vmem:[%s12391_s5 + $0x54] sm:$0x3] }
  0xff   : > { %v534_v62 = vsel %vm12888_vm11, %v532_v45, %v533_v55  ;;  %v535_v63 = vrot.slane %v533_v55, 4  ;;  %2437 = vst [vmem:[#allocation2 + $0x678] sm:$0xf] %v2419_v59  ;;  %2438 = vst [vmem:[#allocation2 + $0x6dc] sm:$0x3] %v2420_v61  ;;  %8833 = vmatpush1.bf16.msra.mxu0 %v11619_v48  ;;  %8096 = vmatprep.subr.bf16.mxu1 %v11626_v56 }
 0x100   : > { %v765_v60 = vrot.slane %v763_v54, 5  ;;  %v768_v0 = vrot.slane %v766_v57, 6  ;;  %v2456_v1 = vld [vmem:[%s12391_s5 + $0x58] sm:$0x7]  ;;  %570 = vst [vmem:[#allocation2 + $0x648] sm:$0xf] %v534_v62  ;;  %8097 = vmatpush1.bf16.msra.mxu1 %v11624_v58 }
 0x101   : > { %v2525_v4 = vrot.slane %v2456_v1, 5  ;;  %v11631_v6 = vld [vmem:[%s15731_s1 + $0x8e0] ss:$8 sps:$4 sm:$0xff]   ;;  %571 = vst [vmem:[#allocation2 + $0x6ac] sm:$0x3] %v535_v63 }
 0x102   : > { %v769_v7 = vor.u32 %v768_v0, %v765_v60  ;;  %v11633_v8 = vld [vmem:[%s15731_s1 + $0x8e4] ss:$8 sps:$4 sm:$0xff]   ;;  %v11634_v11 = vld [vmem:[%s15731_s1 + $0x2f0] ss:$8 sps:$4 sm:$0xff]   ;;  %v11636_v12 = vld [vmem:[%s15731_s1 + $0x2f4] ss:$8 sps:$4 sm:$0xff]  }
 0x103   : > { %v2526_v9 = vsel %vm12888_vm11, %v2524_v53, %v2525_v4  ;;  %v2527_v10 = vrot.slane %v2525_v4, 4  ;;  %v11607_v13 = vld [vmem:[#allocation2 + $0x584] ss:$100 sps:$4 sm:$0xff]   ;;  %8834 = vmatprep.subr.bf16.mxu0 %v11633_v8  ;;  %v11609_v17 = vld [vmem:[#allocation2 + $0x5b4] ss:$100 sps:$4 sm:$0xff]   ;;  %8098 = vmatprep.subr.bf16.mxu1 %v11636_v12 }
 0x104   : > { %v770_v15 = vsel %vm12924_vm14, %v761_v50, %v769_v7  ;;  %v771_v16 = vrot.slane %v769_v7, 4  ;;  %2562 = vst [vmem:[#allocation2 + $0x67c] sm:$0xf] %v2526_v9  ;;  %v11611_v18 = vld [vmem:[#allocation2 + $0x580] ss:$100 sps:$4 sm:$0xff]   ;;  %8835 = vmatpush1.bf16.msra.mxu0 %v11631_v6  ;;  %8047 = vmatprep.mubr.bf16.mxu1 %v11607_v13 }
 0x105   : > { %v11612_v19 = vld [vmem:[#allocation2 + $0x5b0] ss:$100 sps:$4 sm:$0xff]   ;;  %806 = vst [vmem:[#allocation2 + $0x64c] sm:$0xf] %v770_v15  ;;  %2563 = vst [vmem:[#allocation2 + $0x6e0] sm:$0x3] %v2527_v10  ;;  %8099 = vmatpush1.bf16.msra.mxu1 %v11634_v11  ;;  %8785 = vmatprep.mubr.bf16.mxu0 %v11609_v17 }
 0x106   : > { %807 = vst [vmem:[#allocation2 + $0x6b0] sm:$0x3] %v771_v16  ;;  %v11637_v21 = vld [vmem:[%s15731_s1 + $0x8f0] ss:$8 sps:$4 sm:$0xff]   ;;  %8048 = vmatmul.mubr.bf16.gmra.mrb[28].mxu1 %v11611_v18  ;;  %v11639_v22 = vld [vmem:[%s15731_s1 + $0x8f4] ss:$8 sps:$4 sm:$0xff]   ;;  %8786 = vmatmul.mubr.bf16.gmra.mrb[28].mxu0 %v11612_v19 }
 0x107   : > { %v808_v23 = vld [vmem:[%s12391_s5] sm:$0xc]  ;;  %v809_v24 = vld [vmem:[%s12391_s5 + $0x4] sm:$0xf]  ;;  %v810_v25 = vld [vmem:[%s12391_s5 + $0x8] sm:$0xf]  ;;  %8836 = vmatprep.subr.bf16.mxu0 %v11639_v22 }
 0x108   : > { %v10062_v26 = vrot.slane %v808_v23, 10  ;;  %v849_v27 = vrot.slane %v809_v24, 6  ;;  %v936_v28 = vld [vmem:[%s12391_s5 + $0x4] sm:$0x8]  ;;  %v852_v29 = vrot.slane %v810_v25, 6  ;;  %8837 = vmatpush1.bf16.msra.mxu0 %v11637_v21 }
 0x109   : > { %v937_v30 = vld [vmem:[%s12391_s5 + $0x8] sm:$0xf]  ;;  %v13320_v31 = vld [vmem:[%s12391_s5 + $0xc] sm:$0xf]  ;;  %v10063_v32 = vrot.slane %v936_v28, 11 }
 0x10a   : > { %v850_v33 = vsel %vm13288_vm5, %v10062_v26, %v849_v27  ;;  %v851_v34 = vrot.slane %v849_v27, 4  ;;  %v979_v35 = vrot.slane %v937_v30, 7  ;;  %v982_v36 = vrot.slane %v13320_v31, 7  ;;  %v2564_v37 = vld [vmem:[%s12391_s5 + $0x14] sm:$0xe] }
 0x10b   : > { %918 = vst [vmem:[#allocation2 + $0x10] sm:$0xf] %v850_v33  ;;  %v2565_v38 = vld [vmem:[%s12391_s5 + $0x18] sm:$0xf]  ;;  %v2566_v40 = vld [vmem:[%s12391_s5 + $0x1c] sm:$0xf] }
 0x10c   : > { %v2583_v41 = vshrl.u32 %v2564_v37, 16  ;;  %v11627_v42 = vld [vmem:[#allocation2 + $0x67c] ss:$100 sps:$4 sm:$0x3f]   ;;  %v853_v43 = vsel %vm13288_vm5, %v851_v34, %v852_v29  ;;  %v980_v44 = vsel %vm12423_vm6, %v10063_v32, %v979_v35  ;;  %v981_v46 = vrot.slane %v979_v35, 4 }
 0x10d   : > { %v11622_v45 = vld [vmem:[#allocation2 + $0x64c] ss:$100 sps:$4 sm:$0x3f]   ;;  %919 = vst [vmem:[#allocation2 + $0x74] sm:$0xf] %v853_v43  ;;  %8795 = vmatprep.mubr.bf16.mxu0 %v11627_v42  ;;  %v2586_v51 = vshll.u32 %v2564_v37, 16 }
 0x10e   : > { %1050 = vst [vmem:[#allocation2 + $0x14] sm:$0xf] %v980_v44  ;;  %v11629_v47 = vld [vmem:[#allocation2 + $0x648] ss:$100 sps:$4 sm:$0x3f]   ;;  %8057 = vmatprep.mubr.bf16.mxu1 %v11622_v45  ;;  %v983_v49 = vsel %vm12423_vm6, %v981_v46, %v982_v36  ;;  %v2585_v50 = vrot.slane %v2583_v41, 5 }
 0x10f   : > { %v11630_v48 = vld [vmem:[#allocation2 + $0x678] ss:$100 sps:$4 sm:$0x3f]   ;;  %v2592_v52 = vshrl.u32 %v2565_v38, 16  ;;  %v2797_v53 = vld [vmem:[%s12391_s5 + $0x14] sm:$0xc]  ;;  %8058 = vmatmul.mubr.bf16.gmra.mrb[32].mxu1 %v11629_v47 }
 0x110   : > { %8796 = vmatmul.mubr.bf16.gmra.mrb[32].mxu0 %v11630_v48  ;;  %1051 = vst [vmem:[#allocation2 + $0x78] sm:$0xf] %v983_v49  ;;  %v2595_v55 = vshll.u32 %v2565_v38, 16  ;;  %v2602_v54 = vshrl.u32 %v2566_v40, 16  ;;  %v2605_v57 = vshll.u32 %v2566_v40, 16  ;;  %v10070_v56 = vrot.slane %v2797_v53, 10 }
 0x111   : > { %v2798_v58 = vld [vmem:[%s12391_s5 + $0x18] sm:$0xf]  ;;  %v2588_v59 = vrot.slane %v2586_v51, 6  ;;  %v2594_v61 = vrot.slane %v2592_v52, 5  ;;  %v2799_v62 = vld [vmem:[%s12391_s5 + $0x1c] sm:$0xf] }
 0x112   : > { %v2835_v63 = vrot.slane %v2798_v58, 6  ;;  %v2597_v60 = vrot.slane %v2595_v55, 6  ;;  %v2604_v0 = vrot.slane %v2602_v54, 5  ;;  %v2607_v1 = vrot.slane %v2605_v57, 6  ;;  %v11648_v9 = vld [vmem:[%s15731_s1 + $0x304] ss:$8 sps:$4 sm:$0xff]  }
 0x113   : > { %v2838_v4 = vrot.slane %v2799_v62, 6  ;;  %v2589_v6 = vor.u32 %v2588_v59, %v2585_v50  ;;  %v811_v12 = vld [vmem:[%s12391_s5 + $0xc] sm:$0xf]  ;;  %v854_v13 = vrot.slane %v852_v29, 4  ;;  %v11646_v17 = vld [vmem:[%s15731_s1 + $0x300] ss:$8 sps:$4 sm:$0xff]   ;;  %8191 = vmatprep.subr.bf16.mxu1 %v11648_v9 }
 0x114   : > { %v2836_v7 = vsel %vm13288_vm5, %v10070_v56, %v2835_v63  ;;  %v2837_v8 = vrot.slane %v2835_v63, 4  ;;  %v2598_v10 = vor.u32 %v2597_v60, %v2594_v61  ;;  %v13342_v11 = vor.u32 %v2607_v1, %v2604_v0  ;;  %v13351_v18 = vld [vmem:[%s12391_s5 + $0x10] sm:$0xf]  ;;  %v11651_v23 = vld [vmem:[%s15731_s1 + $0x314] ss:$8 sps:$4 sm:$0xff]  }
 0x115   : > { %2904 = vst [vmem:[#allocation2 + $0x44] sm:$0xf] %v2836_v7  ;;  %v2590_v15 = vrot.slane %v2589_v6, 4  ;;  %v855_v19 = vrot.slane %v811_v12, 6  ;;  %v939_v21 = vld [vmem:[%s12391_s5 + $0x10] sm:$0xf] }
 0x116   : > { %v2839_v16 = vsel %vm13288_vm5, %v2837_v8, %v2838_v4  ;;  %v2600_v22 = vrot.slane %v2598_v10, 4  ;;  %v858_v24 = vrot.slane %v13351_v18, 6  ;;  %v940_v25 = vld [vmem:[%s12391_s5 + $0x14] sm:$0xf]  ;;  %v984_v26 = vrot.slane %v982_v36, 4 }
 0x117   : > { %2905 = vst [vmem:[#allocation2 + $0xa8] sm:$0xf] %v2839_v16  ;;  %v985_v27 = vrot.slane %v939_v21, 7  ;;  %v11640_v28 = vld [vmem:[#allocation2 + $0x10] ss:$100 sps:$4 sm:$0xff]   ;;  %v2599_v30 = vsel %vm12924_vm14, %v2590_v15, %v2598_v10  ;;  %v856_v31 = vsel %vm13288_vm5, %v854_v13, %v855_v19  ;;  %v857_v32 = vrot.slane %v855_v19, 4 }
 0x118   : > { %v11642_v29 = vld [vmem:[#allocation2 + $0x14] ss:$100 sps:$4 sm:$0xff]   ;;  %v2609_v33 = vsel %vm12924_vm14, %v2600_v22, %v13342_v11  ;;  %2779 = vst [vmem:[#allocation2 + $0x40] sm:$0xf] %v2599_v30  ;;  %920 = vst [vmem:[#allocation2 + $0xd8] sm:$0xf] %v856_v31 }
 0x119   : > { %v986_v34 = vsel %vm12423_vm6, %v984_v26, %v985_v27  ;;  %v987_v35 = vrot.slane %v985_v27, 4  ;;  %v988_v36 = vrot.slane %v940_v25, 7  ;;  %v2567_v37 = vld [vmem:[%s12391_s5 + $0x20] sm:$0xf]  ;;  %v2568_v38 = vld [vmem:[%s12391_s5 + $0x24] sm:$0xf]  ;;  %8100 = vmatprep.mubr.bf16.mxu1 %v11642_v29  ;;  %v859_v40 = vsel %vm13288_vm5, %v857_v32, %v858_v24 }
 0x11a   : > { %2780 = vst [vmem:[#allocation2 + $0xa4] sm:$0xf] %v2609_v33  ;;  %1052 = vst [vmem:[#allocation2 + $0xdc] sm:$0xf] %v986_v34  ;;  %v2610_v41 = vrot.slane %v13342_v11, 4  ;;  %v2612_v42 = vshrl.u32 %v2567_v37, 16  ;;  %8101 = vmatmul.mubr.bf16.vlgmr.msra.gmra.mrb[0].mxu1 %v11640_v28 }
 0x11b   : > { %v2615_v43 = vshll.u32 %v2567_v37, 16  ;;  %v2800_v44 = vld [vmem:[%s12391_s5 + $0x20] sm:$0xf]  ;;  %921 = vst [vmem:[#allocation2 + $0x13c] sm:$0xf] %v859_v40  ;;  %v989_v45 = vsel %vm12423_vm6, %v987_v35, %v988_v36  ;;  %v2622_v46 = vshrl.u32 %v2568_v38, 16  ;;  %8192 = vmatpush1.bf16.msra.mxu1 %v11646_v17 }
 0x11c   : > { %v2625_v47 = vshll.u32 %v2568_v38, 16  ;;  %v2801_v48 = vld [vmem:[%s12391_s5 + $0x24] sm:$0xf]  ;;  %v2840_v49 = vrot.slane %v2838_v4, 4  ;;  %v11649_v50 = vld [vmem:[%s15731_s1 + $0x310] ss:$8 sps:$4 sm:$0xff]   ;;  %8193 = vmatprep.subr.bf16.mxu1 %v11651_v23 }
 0x11d   : > { %1053 = vst [vmem:[#allocation2 + $0x140] sm:$0xf] %v989_v45  ;;  %v2614_v51 = vrot.slane %v2612_v42, 5  ;;  %v2617_v52 = vrot.slane %v2615_v43, 6  ;;  %v2841_v53 = vrot.slane %v2800_v44, 6  ;;  %v2844_v55 = vrot.slane %v2801_v48, 6 }
 0x11e   : > { %v2624_v54 = vrot.slane %v2622_v46, 5  ;;  %v2627_v57 = vrot.slane %v2625_v47, 6  ;;  %v11660_v58 = vld [vmem:[%s15731_s1 + $0x904] ss:$8 sps:$4 sm:$0xff]   ;;  %v11658_v60 = vld [vmem:[%s15731_s1 + $0x900] ss:$8 sps:$4 sm:$0xff]  }
 0x11f   : > { %v2618_v56 = vor.u32 %v2617_v52, %v2614_v51  ;;  %v2842_v59 = vsel %vm13288_vm5, %v2840_v49, %v2841_v53  ;;  %v2843_v61 = vrot.slane %v2841_v53, 4  ;;  %v11663_v62 = vld [vmem:[%s15731_s1 + $0x324] ss:$8 sps:$4 sm:$0xff]   ;;  %8929 = vmatprep.subr.bf16.mxu0 %v11660_v58  ;;  %v11661_v0 = vld [vmem:[%s15731_s1 + $0x320] ss:$8 sps:$4 sm:$0xff]   ;;  %8194 = vmatpush1.bf16.msra.mxu1 %v11649_v50  ;;  %v860_v8 = vrot.slane %v858_v24, 4 }
 0x120   : > { %v13388_v63 = vor.u32 %v2627_v57, %v2624_v54  ;;  %2906 = vst [vmem:[#allocation2 + $0x10c] sm:$0xf] %v2842_v59  ;;  %v11666_v7 = vld [vmem:[%s15731_s1 + $0x914] ss:$8 sps:$4 sm:$0xff]   ;;  %v11645_v10 = vld [vmem:[#allocation2 + $0x44] ss:$100 sps:$4 sm:$0xff]   ;;  %8195 = vmatprep.subr.bf16.mxu1 %v11663_v62 }
 0x121   : > { %v2619_v1 = vsel %vm12924_vm14, %v2610_v41, %v2618_v56  ;;  %v2620_v4 = vrot.slane %v2618_v56, 4  ;;  %v2845_v6 = vsel %vm13288_vm5, %v2843_v61, %v2844_v55  ;;  %v11643_v9 = vld [vmem:[#allocation2 + $0x40] ss:$100 sps:$4 sm:$0xff]   ;;  %v990_v11 = vrot.slane %v988_v36, 4  ;;  %v11667_v13 = vld [vmem:[%s15731_s1 + $0x330] ss:$8 sps:$4 sm:$0xff]   ;;  %8838 = vmatprep.mubr.bf16.mxu0 %v11645_v10 }
 0x122   : > { %2781 = vst [vmem:[#allocation2 + $0x108] sm:$0xf] %v2619_v1  ;;  %2907 = vst [vmem:[#allocation2 + $0x170] sm:$0xf] %v2845_v6  ;;  %v11669_v15 = vld [vmem:[%s15731_s1 + $0x334] ss:$8 sps:$4 sm:$0xff]   ;;  %8839 = vmatmul.mubr.bf16.vlgmr.msra.gmra.mrb[0].mxu0 %v11643_v9 }
 0x123   : > { %v2629_v12 = vsel %vm12924_vm14, %v2620_v4, %v13388_v63  ;;  %v2630_v16 = vrot.slane %v13388_v63, 4  ;;  %v11656_v18 = vld [vmem:[#allocation2 + $0xd8] ss:$100 sps:$4 sm:$0xff]   ;;  %v2846_v21 = vrot.slane %v2844_v55, 4  ;;  %8196 = vmatpush1.bf16.msra.mxu1 %v11661_v0  ;;  %v813_v22 = vld [vmem:[%s12391_s5 + $0x14] sm:$0xf]  ;;  %8930 = vmatpush1.bf16.msra.mxu0 %v11658_v60 }
 0x124   : > { %v11652_v17 = vld [vmem:[#allocation2 + $0xdc] ss:$100 sps:$4 sm:$0xff]   ;;  %2782 = vst [vmem:[#allocation2 + $0x16c] sm:$0xf] %v2629_v12  ;;  %v11664_v19 = vld [vmem:[%s15731_s1 + $0x910] ss:$8 sps:$4 sm:$0xff]   ;;  %8931 = vmatprep.subr.bf16.mxu0 %v11666_v7  ;;  %8197 = vmatprep.subr.bf16.mxu1 %v11669_v15 }
 0x125   : > { %v814_v23 = vld [vmem:[%s12391_s5 + $0x18] sm:$0xf]  ;;  %8110 = vmatprep.mubr.bf16.mxu1 %v11652_v17  ;;  %v861_v25 = vrot.slane %v813_v22, 6  ;;  %v942_v27 = vld [vmem:[%s12391_s5 + $0x1c] sm:$0xf] }
 0x126   : > { %v941_v24 = vld [vmem:[%s12391_s5 + $0x18] sm:$0xf]  ;;  %v864_v26 = vrot.slane %v814_v23, 6  ;;  %8111 = vmatmul.mubr.bf16.gmra.mrb[4].mxu1 %v11656_v18  ;;  %v994_v29 = vrot.slane %v942_v27, 7  ;;  %v2569_v30 = vld [vmem:[%s12391_s5 + $0x28] sm:$0xf] }
 0x127   : > { %v991_v28 = vrot.slane %v941_v24, 7  ;;  %v2570_v31 = vld [vmem:[%s12391_s5 + $0x2c] sm:$0xf]  ;;  %v862_v32 = vsel %vm13288_vm5, %v860_v8, %v861_v25  ;;  %v863_v33 = vrot.slane %v861_v25, 4  ;;  %v2802_v36 = vld [vmem:[%s12391_s5 + $0x28] sm:$0xf]  ;;  %8198 = vmatpush1.bf16.msra.mxu1 %v11667_v13  ;;  %8932 = vmatpush1.bf16.msra.mxu0 %v11664_v19 }
 0x128   : > { %v13428_v37 = vld [vmem:[%s12391_s5 + $0x2c] sm:$0xf]  ;;  %922 = vst [vmem:[#allocation2 + $0x1a0] sm:$0xf] %v862_v32  ;;  %v2632_v38 = vshrl.u32 %v2569_v30, 16  ;;  %v2635_v40 = vshll.u32 %v2569_v30, 16 }
 0x129   : > { %v992_v34 = vsel %vm12423_vm6, %v990_v11, %v991_v28  ;;  %v993_v35 = vrot.slane %v991_v28, 4  ;;  %v2642_v41 = vshrl.u32 %v2570_v31, 16  ;;  %v2645_v42 = vshll.u32 %v2570_v31, 16  ;;  %v11676_v47 = vld [vmem:[%s15731_s1 + $0x920] ss:$8 sps:$4 sm:$0xff]  }
 0x12a   : > { %1054 = vst [vmem:[#allocation2 + $0x1a4] sm:$0xf] %v992_v34  ;;  %v865_v43 = vsel %vm13288_vm5, %v863_v33, %v864_v26  ;;  %v2847_v45 = vrot.slane %v2802_v36, 6  ;;  %v2850_v46 = vrot.slane %v13428_v37, 6  ;;  %v11678_v48 = vld [vmem:[%s15731_s1 + $0x924] ss:$8 sps:$4 sm:$0xff]  }
 0x12b   : > { %v995_v44 = vsel %vm12423_vm6, %v993_v35, %v994_v29  ;;  %v11654_v49 = vld [vmem:[#allocation2 + $0x10c] ss:$100 sps:$4 sm:$0xff]   ;;  %923 = vst [vmem:[#allocation2 + $0x204] sm:$0xf] %v865_v43  ;;  %v2634_v51 = vrot.slane %v2632_v38, 5  ;;  %v2637_v52 = vrot.slane %v2635_v40, 6  ;;  %8933 = vmatprep.subr.bf16.mxu0 %v11678_v48 }
 0x12c   : > { %v11657_v50 = vld [vmem:[#allocation2 + $0x108] ss:$100 sps:$4 sm:$0xff]   ;;  %1055 = vst [vmem:[#allocation2 + $0x208] sm:$0xf] %v995_v44  ;;  %v2644_v53 = vrot.slane %v2642_v41, 5  ;;  %v2647_v55 = vrot.slane %v2645_v42, 6  ;;  %v2848_v54 = vsel %vm13288_vm5, %v2846_v21, %v2847_v45  ;;  %8848 = vmatprep.mubr.bf16.mxu0 %v11654_v49  ;;  %8934 = vmatpush1.bf16.msra.mxu0 %v11676_v47 }
 0x12d   : > { %v11679_v57 = vld [vmem:[%s15731_s1 + $0x340] ss:$8 sps:$4 sm:$0xff]   ;;  %v2849_v58 = vrot.slane %v2847_v45, 4  ;;  %2908 = vst [vmem:[#allocation2 + $0x1d4] sm:$0xf] %v2848_v54  ;;  %v866_v59 = vrot.slane %v864_v26, 4  ;;  %8849 = vmatmul.mubr.bf16.gmra.mrb[4].mxu0 %v11657_v50  ;;  %v2638_v61 = vor.u32 %v2637_v52, %v2634_v51 }
 0x12e   : > { %v11681_v56 = vld [vmem:[%s15731_s1 + $0x344] ss:$8 sps:$4 sm:$0xff]   ;;  %v13449_v62 = vor.u32 %v2647_v55, %v2644_v53  ;;  %v11682_v60 = vld [vmem:[%s15731_s1 + $0x930] ss:$8 sps:$4 sm:$0xff]   ;;  %v11684_v0 = vld [vmem:[%s15731_s1 + $0x934] ss:$8 sps:$4 sm:$0xff]  }
 0x12f   : > { %v815_v1 = vld [vmem:[%s12391_s5 + $0x1c] sm:$0xf]  ;;  %v2851_v4 = vsel %vm13288_vm5, %v2849_v58, %v2850_v46  ;;  %8199 = vmatprep.subr.bf16.mxu1 %v11681_v56  ;;  %v816_v6 = vld [vmem:[%s12391_s5 + $0x20] sm:$0xf]  ;;  %v996_v9 = vrot.slane %v994_v29, 4  ;;  %v2639_v10 = vsel %vm12924_vm14, %v2630_v16, %v2638_v61  ;;  %v2640_v11 = vrot.slane %v2638_v61, 4  ;;  %8935 = vmatprep.subr.bf16.mxu0 %v11684_v0 }
 0x130   : > { %v867_v7 = vrot.slane %v815_v1, 6  ;;  %v943_v8 = vld [vmem:[%s12391_s5 + $0x20] sm:$0xf]  ;;  %2909 = vst [vmem:[#allocation2 + $0x238] sm:$0xf] %v2851_v4  ;;  %8200 = vmatpush1.bf16.msra.mxu1 %v11679_v57  ;;  %v870_v12 = vrot.slane %v816_v6, 6  ;;  %8936 = vmatpush1.bf16.msra.mxu0 %v11682_v60 }
 0x131   : > { %v944_v13 = vld [vmem:[%s12391_s5 + $0x24] sm:$0xf]  ;;  %v997_v15 = vrot.slane %v943_v8, 7  ;;  %2783 = vst [vmem:[#allocation2 + $0x1d0] sm:$0xf] %v2639_v10  ;;  %v2649_v21 = vsel %vm12924_vm14, %v2640_v11, %v13449_v62  ;;  %v2650_v30 = vrot.slane %v13449_v62, 4 }
 0x132   : > { %v868_v17 = vsel %vm13288_vm5, %v866_v59, %v867_v7  ;;  %v869_v18 = vrot.slane %v867_v7, 4  ;;  %v1000_v19 = vrot.slane %v944_v13, 7  ;;  %v11687_v63 = vld [vmem:[%s15731_s1 + $0x350] ss:$8 sps:$4 sm:$0xff]   ;;  %v11674_v22 = vld [vmem:[#allocation2 + $0x1a0] ss:$100 sps:$4 sm:$0xff]  }
 0x133   : > { %v11670_v16 = vld [vmem:[#allocation2 + $0x1a4] ss:$100 sps:$4 sm:$0xff]   ;;  %924 = vst [vmem:[#allocation2 + $0x268] sm:$0xf] %v868_v17  ;;  %v998_v23 = vsel %vm12423_vm6, %v996_v9, %v997_v15  ;;  %v999_v24 = vrot.slane %v997_v15, 4  ;;  %v2852_v38 = vrot.slane %v2850_v46, 4 }
 0x134   : > { %2784 = vst [vmem:[#allocation2 + $0x234] sm:$0xf] %v2649_v21  ;;  %v871_v25 = vsel %vm13288_vm5, %v869_v18, %v870_v12  ;;  %1056 = vst [vmem:[#allocation2 + $0x26c] sm:$0xf] %v998_v23  ;;  %v11689_v26 = vld [vmem:[%s15731_s1 + $0x354] ss:$8 sps:$4 sm:$0xff]   ;;  %8120 = vmatprep.mubr.bf16.mxu1 %v11670_v16 }
 0x135   : > { %v2571_v27 = vld [vmem:[%s12391_s5 + $0x30] sm:$0xf]  ;;  %v2572_v28 = vld [vmem:[%s12391_s5 + $0x34] sm:$0xf]  ;;  %925 = vst [vmem:[#allocation2 + $0x2cc] sm:$0xf] %v871_v25  ;;  %v1001_v29 = vsel %vm12423_vm6, %v999_v24, %v1000_v19  ;;  %8121 = vmatmul.mubr.bf16.gmra.mrb[8].mxu1 %v11674_v22  ;;  %8201 = vmatprep.subr.bf16.mxu1 %v11689_v26 }
 0x136   : > { %v2652_v31 = vshrl.u32 %v2571_v27, 16  ;;  %v2655_v32 = vshll.u32 %v2571_v27, 16  ;;  %v2804_v33 = vld [vmem:[%s12391_s5 + $0x30] sm:$0xf]  ;;  %1057 = vst [vmem:[#allocation2 + $0x2d0] sm:$0xf] %v1001_v29  ;;  %8202 = vmatpush1.bf16.msra.mxu1 %v11687_v63 }
 0x137   : > { %v2662_v34 = vshrl.u32 %v2572_v28, 16  ;;  %v2665_v35 = vshll.u32 %v2572_v28, 16  ;;  %v2805_v36 = vld [vmem:[%s12391_s5 + $0x34] sm:$0xf]  ;;  %v2853_v40 = vrot.slane %v2804_v33, 6  ;;  %v872_v55 = vrot.slane %v870_v12, 4 }
 0x138   : > { %v2654_v41 = vrot.slane %v2652_v31, 5  ;;  %v2657_v42 = vrot.slane %v2655_v32, 6  ;;  %v2856_v43 = vrot.slane %v2805_v36, 6  ;;  %v11694_v44 = vld [vmem:[%s15731_s1 + $0x940] ss:$8 sps:$4 sm:$0xff]   ;;  %v1002_v54 = vrot.slane %v1000_v19, 4 }
 0x139   : > { %v2664_v45 = vrot.slane %v2662_v34, 5  ;;  %v2667_v47 = vrot.slane %v2665_v35, 6  ;;  %v2854_v48 = vsel %vm13288_vm5, %v2852_v38, %v2853_v40  ;;  %v2855_v49 = vrot.slane %v2853_v40, 4  ;;  %v11696_v37 = vld [vmem:[%s15731_s1 + $0x944] ss:$8 sps:$4 sm:$0xff]  }
 0x13a   : > { %v2658_v46 = vor.u32 %v2657_v42, %v2654_v41  ;;  %2910 = vst [vmem:[#allocation2 + $0x29c] sm:$0xf] %v2854_v48  ;;  %v11697_v50 = vld [vmem:[%s15731_s1 + $0x360] ss:$8 sps:$4 sm:$0xff]   ;;  %8937 = vmatprep.subr.bf16.mxu0 %v11696_v37  ;;  %v11699_v53 = vld [vmem:[%s15731_s1 + $0x364] ss:$8 sps:$4 sm:$0xff]  }
 0x13b   : > { %v13504_v51 = vor.u32 %v2667_v47, %v2664_v45  ;;  %v2857_v52 = vsel %vm13288_vm5, %v2855_v49, %v2856_v43  ;;  %v11672_v57 = vld [vmem:[#allocation2 + $0x1d4] ss:$100 sps:$4 sm:$0xff]   ;;  %8938 = vmatpush1.bf16.msra.mxu0 %v11694_v44  ;;  %8203 = vmatprep.subr.bf16.mxu1 %v11699_v53  ;;  %v2858_v60 = vrot.slane %v2856_v43, 4  ;;  %v817_v7 = vld [vmem:[%s12391_s5 + $0x24] sm:$0xf] }
 0x13c   : > { %v11675_v58 = vld [vmem:[#allocation2 + $0x1d0] ss:$100 sps:$4 sm:$0xff]   ;;  %v2659_v56 = vsel %vm12924_vm14, %v2650_v30, %v2658_v46  ;;  %v2660_v59 = vrot.slane %v2658_v46, 4  ;;  %2911 = vst [vmem:[#allocation2 + $0x300] sm:$0xf] %v2857_v52  ;;  %8858 = vmatprep.mubr.bf16.mxu0 %v11672_v57  ;;  %8204 = vmatpush1.bf16.msra.mxu1 %v11697_v50  ;;  %v873_v10 = vrot.slane %v817_v7, 6 }
 0x13d   : > { %2785 = vst [vmem:[#allocation2 + $0x298] sm:$0xf] %v2659_v56  ;;  %v11700_v61 = vld [vmem:[%s15731_s1 + $0x950] ss:$8 sps:$4 sm:$0xff]   ;;  %v11702_v62 = vld [vmem:[%s15731_s1 + $0x954] ss:$8 sps:$4 sm:$0xff]   ;;  %8859 = vmatmul.mubr.bf16.gmra.mrb[8].mxu0 %v11675_v58 }
 0x13e   : > { %v11685_v0 = vld [vmem:[#allocation2 + $0x26c] ss:$100 sps:$4 sm:$0xff]   ;;  %v2669_v1 = vsel %vm12924_vm14, %v2660_v59, %v13504_v51  ;;  %v2670_v6 = vrot.slane %v13504_v51, 4  ;;  %8939 = vmatprep.subr.bf16.mxu0 %v11702_v62  ;;  %v818_v8 = vld [vmem:[%s12391_s5 + $0x28] sm:$0xf]  ;;  %v874_v19 = vsel %vm13288_vm5, %v872_v55, %v873_v10  ;;  %v875_v63 = vrot.slane %v873_v10, 4 }
 0x13f   : > { %v11692_v4 = vld [vmem:[#allocation2 + $0x268] ss:$100 sps:$4 sm:$0xff]   ;;  %2786 = vst [vmem:[#allocation2 + $0x2fc] sm:$0xf] %v2669_v1  ;;  %8130 = vmatprep.mubr.bf16.mxu1 %v11685_v0  ;;  %8940 = vmatpush1.bf16.msra.mxu0 %v11700_v61  ;;  %v876_v11 = vrot.slane %v818_v8, 6 }
 0x140   : > { %v945_v9 = vld [vmem:[%s12391_s5 + $0x28] sm:$0xf]  ;;  %v946_v12 = vld [vmem:[%s12391_s5 + $0x2c] sm:$0xf]  ;;  %8131 = vmatmul.mubr.bf16.gmra.mrb[12].mxu1 %v11692_v4  ;;  %v2573_v17 = vld [vmem:[%s12391_s5 + $0x38] sm:$0xf] }
 0x141   : > { %v1003_v13 = vrot.slane %v945_v9, 7  ;;  %v1006_v15 = vrot.slane %v946_v12, 7  ;;  %v2574_v18 = vld [vmem:[%s12391_s5 + $0x3c] sm:$0xf]  ;;  %v2806_v22 = vld [vmem:[%s12391_s5 + $0x38] sm:$0xf]  ;;  %v877_v29 = vsel %vm13288_vm5, %v875_v63, %v876_v11 }
 0x142   : > { %v13535_v23 = vld [vmem:[%s12391_s5 + $0x3c] sm:$0xf]  ;;  %926 = vst [vmem:[#allocation2 + $0x330] sm:$0xf] %v874_v19  ;;  %v2672_v24 = vshrl.u32 %v2573_v17, 16  ;;  %v2675_v25 = vshll.u32 %v2573_v17, 16 }
 0x143   : > { %v1004_v16 = vsel %vm12423_vm6, %v1002_v54, %v1003_v13  ;;  %v1005_v21 = vrot.slane %v1003_v13, 4  ;;  %v2682_v26 = vshrl.u32 %v2574_v18, 16  ;;  %v2685_v27 = vshll.u32 %v2574_v18, 16  ;;  %v11708_v28 = vld [vmem:[%s15731_s1 + $0x370] ss:$8 sps:$4 sm:$0xff]  }
 0x144   : > { %1058 = vst [vmem:[#allocation2 + $0x334] sm:$0xf] %v1004_v16  ;;  %v2859_v31 = vrot.slane %v2806_v22, 6  ;;  %v2862_v32 = vrot.slane %v13535_v23, 6  ;;  %v11710_v33 = vld [vmem:[%s15731_s1 + $0x374] ss:$8 sps:$4 sm:$0xff]  }
 0x145   : > { %v1007_v30 = vsel %vm12423_vm6, %v1005_v21, %v1006_v15  ;;  %927 = vst [vmem:[#allocation2 + $0x394] sm:$0xf] %v877_v29  ;;  %v2674_v34 = vrot.slane %v2672_v24, 5  ;;  %v2677_v35 = vrot.slane %v2675_v25, 6  ;;  %v2684_v36 = vrot.slane %v2682_v26, 5  ;;  %8205 = vmatprep.subr.bf16.mxu1 %v11710_v33 }
 0x146   : > { %1059 = vst [vmem:[#allocation2 + $0x398] sm:$0xf] %v1007_v30  ;;  %v2687_v38 = vrot.slane %v2685_v27, 6  ;;  %v11690_v40 = vld [vmem:[#allocation2 + $0x29c] ss:$100 sps:$4 sm:$0xff]   ;;  %v2860_v42 = vsel %vm13288_vm5, %v2858_v60, %v2859_v31  ;;  %v2861_v43 = vrot.slane %v2859_v31, 4  ;;  %8206 = vmatpush1.bf16.msra.mxu1 %v11708_v28 }
 0x147   : > { %v11693_v41 = vld [vmem:[#allocation2 + $0x298] ss:$100 sps:$4 sm:$0xff]   ;;  %v2678_v44 = vor.u32 %v2677_v35, %v2674_v34  ;;  %2912 = vst [vmem:[#allocation2 + $0x364] sm:$0xf] %v2860_v42  ;;  %v11712_v47 = vld [vmem:[%s15731_s1 + $0x960] ss:$8 sps:$4 sm:$0xff]   ;;  %8868 = vmatprep.mubr.bf16.mxu0 %v11690_v40 }
 0x148   : > { %v13550_v45 = vor.u32 %v2687_v38, %v2684_v36  ;;  %v11714_v48 = vld [vmem:[%s15731_s1 + $0x964] ss:$8 sps:$4 sm:$0xff]   ;;  %v878_v49 = vrot.slane %v876_v11, 4  ;;  %v2863_v37 = vsel %vm13288_vm5, %v2861_v43, %v2862_v32  ;;  %v11715_v46 = vld [vmem:[%s15731_s1 + $0x380] ss:$8 sps:$4 sm:$0xff]   ;;  %v1008_v51 = vrot.slane %v1006_v15, 4  ;;  %8869 = vmatmul.mubr.bf16.gmra.mrb[12].mxu0 %v11693_v41 }
 0x149   : > { %v11717_v50 = vld [vmem:[%s15731_s1 + $0x384] ss:$8 sps:$4 sm:$0xff]   ;;  %v2679_v52 = vsel %vm12924_vm14, %v2670_v6, %v2678_v44  ;;  %v2680_v53 = vrot.slane %v2678_v44, 4  ;;  %2913 = vst [vmem:[#allocation2 + $0x3c8] sm:$0xf] %v2863_v37  ;;  %8941 = vmatprep.subr.bf16.mxu0 %v11714_v48  ;;  %v2864_v22 = vrot.slane %v2862_v32, 4 }
 0x14a   : > { %v11718_v55 = vld [vmem:[%s15731_s1 + $0x970] ss:$8 sps:$4 sm:$0xff]   ;;  %v11720_v54 = vld [vmem:[%s15731_s1 + $0x974] ss:$8 sps:$4 sm:$0xff]   ;;  %2787 = vst [vmem:[#allocation2 + $0x360] sm:$0xf] %v2679_v52  ;;  %8942 = vmatpush1.bf16.msra.mxu0 %v11712_v47  ;;  %8207 = vmatprep.subr.bf16.mxu1 %v11717_v50 }
 0x14b   : > { %v819_v57 = vld [vmem:[%s12391_s5 + $0x2c] sm:$0xf]  ;;  %v820_v58 = vld [vmem:[%s12391_s5 + $0x30] sm:$0xf]  ;;  %v2690_v56 = vrot.slane %v13550_v45, 4  ;;  %v2689_v59 = vsel %vm12924_vm14, %v2680_v53, %v13550_v45  ;;  %8943 = vmatprep.subr.bf16.mxu0 %v11720_v54  ;;  %8208 = vmatpush1.bf16.msra.mxu1 %v11715_v46 }
 0x14c   : > { %v879_v61 = vrot.slane %v819_v57, 6  ;;  %v882_v62 = vrot.slane %v820_v58, 6  ;;  %v947_v60 = vld [vmem:[%s12391_s5 + $0x30] sm:$0xf]  ;;  %v948_v0 = vld [vmem:[%s12391_s5 + $0x34] sm:$0xf] }
 0x14d   : > { %v11703_v1 = vld [vmem:[#allocation2 + $0x334] ss:$100 sps:$4 sm:$0xff]   ;;  %2788 = vst [vmem:[#allocation2 + $0x3c4] sm:$0xf] %v2689_v59  ;;  %v1009_v6 = vrot.slane %v947_v60, 7  ;;  %v1012_v9 = vrot.slane %v948_v0, 7 }
 0x14e   : > { %v11707_v4 = vld [vmem:[#allocation2 + $0x330] ss:$100 sps:$4 sm:$0xff]   ;;  %v880_v7 = vsel %vm13288_vm5, %v878_v49, %v879_v61  ;;  %v881_v8 = vrot.slane %v879_v61, 4  ;;  %v2575_v10 = vld [vmem:[%s12391_s5 + $0x40] sm:$0xf]  ;;  %8140 = vmatprep.mubr.bf16.mxu1 %v11703_v1  ;;  %8944 = vmatpush1.bf16.msra.mxu0 %v11718_v55  ;;  %v884_v47 = vrot.slane %v882_v62, 4 }
 0x14f   : > { %v2576_v11 = vld [vmem:[%s12391_s5 + $0x44] sm:$0xf]  ;;  %928 = vst [vmem:[#allocation2 + $0x3f8] sm:$0xf] %v880_v7  ;;  %v1010_v12 = vsel %vm12423_vm6, %v1008_v51, %v1009_v6  ;;  %v1011_v13 = vrot.slane %v1009_v6, 4  ;;  %v2692_v15 = vshrl.u32 %v2575_v10, 16  ;;  %8141 = vmatmul.mubr.bf16.gmra.mrb[16].mxu1 %v11707_v4 }
 0x150   : > { %v2695_v17 = vshll.u32 %v2575_v10, 16  ;;  %v2808_v18 = vld [vmem:[%s12391_s5 + $0x40] sm:$0xf]  ;;  %v883_v19 = vsel %vm13288_vm5, %v881_v8, %v882_v62  ;;  %1060 = vst [vmem:[#allocation2 + $0x3fc] sm:$0xf] %v1010_v12  ;;  %v2702_v63 = vshrl.u32 %v2576_v11, 16 }
 0x151   : > { %v2705_v16 = vshll.u32 %v2576_v11, 16  ;;  %v2809_v21 = vld [vmem:[%s12391_s5 + $0x44] sm:$0xf]  ;;  %929 = vst [vmem:[#allocation2 + $0x45c] sm:$0xf] %v883_v19  ;;  %v1013_v24 = vsel %vm12423_vm6, %v1011_v13, %v1012_v9  ;;  %v2694_v25 = vrot.slane %v2692_v15, 5 }
 0x152   : > { %v2697_v26 = vrot.slane %v2695_v17, 6  ;;  %v2865_v27 = vrot.slane %v2808_v18, 6  ;;  %v11727_v28 = vld [vmem:[%s15731_s1 + $0x980] ss:$8 sps:$4 sm:$0xff]   ;;  %1061 = vst [vmem:[#allocation2 + $0x460] sm:$0xf] %v1013_v24 }
 0x153   : > { %v2704_v29 = vrot.slane %v2702_v63, 5  ;;  %v2707_v30 = vrot.slane %v2705_v16, 6  ;;  %v2868_v31 = vrot.slane %v2809_v21, 6  ;;  %v11729_v23 = vld [vmem:[%s15731_s1 + $0x984] ss:$8 sps:$4 sm:$0xff]   ;;  %v1014_v49 = vrot.slane %v1012_v9, 4 }
 0x154   : > { %v2698_v32 = vor.u32 %v2697_v26, %v2694_v25  ;;  %v2866_v33 = vsel %vm13288_vm5, %v2864_v22, %v2865_v27  ;;  %v2867_v34 = vrot.slane %v2865_v27, 4  ;;  %v11730_v35 = vld [vmem:[%s15731_s1 + $0x390] ss:$8 sps:$4 sm:$0xff]   ;;  %v11732_v36 = vld [vmem:[%s15731_s1 + $0x394] ss:$8 sps:$4 sm:$0xff]   ;;  %8945 = vmatprep.subr.bf16.mxu0 %v11729_v23 }
 0x155   : > { %v11705_v38 = vld [vmem:[#allocation2 + $0x364] ss:$100 sps:$4 sm:$0xff]   ;;  %v13612_v41 = vor.u32 %v2707_v30, %v2704_v29  ;;  %2914 = vst [vmem:[#allocation2 + $0x42c] sm:$0xf] %v2866_v33  ;;  %8209 = vmatprep.subr.bf16.mxu1 %v11732_v36  ;;  %8946 = vmatpush1.bf16.msra.mxu0 %v11727_v28  ;;  %v11733_v45 = vld [vmem:[%s15731_s1 + $0x990] ss:$8 sps:$4 sm:$0xff]  }
 0x156   : > { %v11711_v40 = vld [vmem:[#allocation2 + $0x360] ss:$100 sps:$4 sm:$0xff]   ;;  %v2699_v42 = vsel %vm12924_vm14, %v2690_v56, %v2698_v32  ;;  %v2700_v43 = vrot.slane %v2698_v32, 4  ;;  %v2869_v44 = vsel %vm13288_vm5, %v2867_v34, %v2868_v31  ;;  %8878 = vmatprep.mubr.bf16.mxu0 %v11705_v38  ;;  %8210 = vmatpush1.bf16.msra.mxu1 %v11730_v35  ;;  %v11735_v48 = vld [vmem:[%s15731_s1 + $0x994] ss:$8 sps:$4 sm:$0xff]   ;;  %v2870_v52 = vrot.slane %v2868_v31, 4 }
 0x157   : > { %2789 = vst [vmem:[#allocation2 + $0x428] sm:$0xf] %v2699_v42  ;;  %2915 = vst [vmem:[#allocation2 + $0x490] sm:$0xf] %v2869_v44  ;;  %v2710_v37 = vrot.slane %v13612_v41, 4  ;;  %8879 = vmatmul.mubr.bf16.gmra.mrb[16].mxu0 %v11711_v40  ;;  %8947 = vmatprep.subr.bf16.mxu0 %v11735_v48 }
 0x158   : > { %v2709_v46 = vsel %vm12924_vm14, %v2700_v43, %v13612_v41  ;;  %v11736_v50 = vld [vmem:[%s15731_s1 + $0x3a0] ss:$8 sps:$4 sm:$0xff]   ;;  %v11738_v51 = vld [vmem:[%s15731_s1 + $0x3a4] ss:$8 sps:$4 sm:$0xff]   ;;  %v821_v53 = vld [vmem:[%s12391_s5 + $0x34] sm:$0xf] }
 0x159   : > { %2790 = vst [vmem:[#allocation2 + $0x48c] sm:$0xf] %v2709_v46  ;;  %v822_v55 = vld [vmem:[%s12391_s5 + $0x38] sm:$0xf]  ;;  %v11721_v57 = vld [vmem:[#allocation2 + $0x3fc] ss:$100 sps:$4 sm:$0xff]   ;;  %8211 = vmatprep.subr.bf16.mxu1 %v11738_v51  ;;  %8948 = vmatpush1.bf16.msra.mxu0 %v11733_v45 }
 0x15a   : > { %v949_v54 = vld [vmem:[%s12391_s5 + $0x38] sm:$0xf]  ;;  %v885_v56 = vrot.slane %v821_v53, 6  ;;  %8212 = vmatpush1.bf16.msra.mxu1 %v11736_v50  ;;  %v888_v59 = vrot.slane %v822_v55, 6  ;;  %v950_v61 = vld [vmem:[%s12391_s5 + $0x3c] sm:$0xf]  ;;  %8150 = vmatprep.mubr.bf16.mxu1 %v11721_v57 }
 0x15b   : > { %v11725_v58 = vld [vmem:[#allocation2 + $0x3f8] ss:$100 sps:$4 sm:$0xff]   ;;  %v1015_v62 = vrot.slane %v949_v54, 7  ;;  %v2577_v60 = vld [vmem:[%s12391_s5 + $0x48] sm:$0xf]  ;;  %v1018_v4 = vrot.slane %v950_v61, 7 }
 0x15c   : > { %v886_v0 = vsel %vm13288_vm5, %v884_v47, %v885_v56  ;;  %v887_v1 = vrot.slane %v885_v56, 4  ;;  %v2578_v6 = vld [vmem:[%s12391_s5 + $0x4c] sm:$0xf]  ;;  %v2712_v7 = vshrl.u32 %v2577_v60, 16  ;;  %8151 = vmatmul.mubr.bf16.gmra.mrb[20].mxu1 %v11725_v58  ;;  %v2715_v10 = vshll.u32 %v2577_v60, 16 }
 0x15d   : > { %930 = vst [vmem:[#allocation2 + $0x4c0] sm:$0xf] %v886_v0  ;;  %v1016_v8 = vsel %vm12423_vm6, %v1014_v49, %v1015_v62  ;;  %v1017_v9 = vrot.slane %v1015_v62, 4  ;;  %v2722_v11 = vshrl.u32 %v2578_v6, 16  ;;  %v2810_v12 = vld [vmem:[%s12391_s5 + $0x48] sm:$0xf] }
 0x15e   : > { %v889_v13 = vsel %vm13288_vm5, %v887_v1, %v888_v59  ;;  %1062 = vst [vmem:[#allocation2 + $0x4c4] sm:$0xf] %v1016_v8  ;;  %v2714_v15 = vrot.slane %v2712_v7, 5  ;;  %v2725_v17 = vshll.u32 %v2578_v6, 16  ;;  %v2811_v18 = vld [vmem:[%s12391_s5 + $0x4c] sm:$0xf] }
 0x15f   : > { %v2871_v19 = vrot.slane %v2810_v12, 6  ;;  %931 = vst [vmem:[#allocation2 + $0x524] sm:$0xf] %v889_v13  ;;  %v1019_v63 = vsel %vm12423_vm6, %v1017_v9, %v1018_v4  ;;  %v2717_v16 = vrot.slane %v2715_v10, 6  ;;  %v2724_v21 = vrot.slane %v2722_v11, 5 }
 0x160   : > { %v2874_v22 = vrot.slane %v2811_v18, 6  ;;  %v11745_v24 = vld [vmem:[%s15731_s1 + $0x9a0] ss:$8 sps:$4 sm:$0xff]   ;;  %v11723_v25 = vld [vmem:[#allocation2 + $0x42c] ss:$100 sps:$4 sm:$0xff]   ;;  %v2727_v27 = vrot.slane %v2725_v17, 6 }
 0x161   : > { %v11726_v26 = vld [vmem:[#allocation2 + $0x428] ss:$100 sps:$4 sm:$0xff]   ;;  %1063 = vst [vmem:[#allocation2 + $0x528] sm:$0xf] %v1019_v63  ;;  %v2872_v28 = vsel %vm13288_vm5, %v2870_v52, %v2871_v19  ;;  %v2718_v29 = vor.u32 %v2717_v16, %v2714_v15  ;;  %v2873_v30 = vrot.slane %v2871_v19, 4  ;;  %8888 = vmatprep.mubr.bf16.mxu0 %v11723_v25  ;;  %v890_v34 = vrot.slane %v888_v59, 4 }
 0x162   : > { %2916 = vst [vmem:[#allocation2 + $0x4f4] sm:$0xf] %v2872_v28  ;;  %v11747_v31 = vld [vmem:[%s15731_s1 + $0x9a4] ss:$8 sps:$4 sm:$0xff]   ;;  %v11748_v23 = vld [vmem:[%s15731_s1 + $0x3b0] ss:$8 sps:$4 sm:$0xff]   ;;  %v13661_v32 = vor.u32 %v2727_v27, %v2724_v21  ;;  %8889 = vmatmul.mubr.bf16.gmra.mrb[20].mxu0 %v11726_v26 }
 0x163   : > { %v11750_v33 = vld [vmem:[%s15731_s1 + $0x3b4] ss:$8 sps:$4 sm:$0xff]   ;;  %v1020_v35 = vrot.slane %v1018_v4, 4  ;;  %v2719_v36 = vsel %vm12924_vm14, %v2710_v37, %v2718_v29  ;;  %v2720_v38 = vrot.slane %v2718_v29, 4  ;;  %v2875_v40 = vsel %vm13288_vm5, %v2873_v30, %v2874_v22  ;;  %8949 = vmatprep.subr.bf16.mxu0 %v11747_v31  ;;  %v11751_v42 = vld [vmem:[%s15731_s1 + $0x9b0] ss:$8 sps:$4 sm:$0xff]  }
 0x164   : > { %v11753_v43 = vld [vmem:[%s15731_s1 + $0x9b4] ss:$8 sps:$4 sm:$0xff]   ;;  %2791 = vst [vmem:[#allocation2 + $0x4f0] sm:$0xf] %v2719_v36  ;;  %2917 = vst [vmem:[#allocation2 + $0x558] sm:$0xf] %v2875_v40  ;;  %8950 = vmatpush1.bf16.msra.mxu0 %v11745_v24  ;;  %8213 = vmatprep.subr.bf16.mxu1 %v11750_v33 }
 0x165   : > { %v11754_v41 = vld [vmem:[%s15731_s1 + $0x3c0] ss:$8 sps:$4 sm:$0xff]   ;;  %v11756_v44 = vld [vmem:[%s15731_s1 + $0x3c4] ss:$8 sps:$4 sm:$0xff]   ;;  %v2730_v45 = vrot.slane %v13661_v32, 4  ;;  %v2729_v47 = vsel %vm12924_vm14, %v2720_v38, %v13661_v32  ;;  %8214 = vmatpush1.bf16.msra.mxu1 %v11748_v23  ;;  %8951 = vmatprep.subr.bf16.mxu0 %v11753_v43  ;;  %v2876_v37 = vrot.slane %v2874_v22, 4 }
 0x166   : > { %v823_v48 = vld [vmem:[%s12391_s5 + $0x3c] sm:$0xf]  ;;  %v824_v49 = vld [vmem:[%s12391_s5 + $0x40] sm:$0xf]  ;;  %2792 = vst [vmem:[#allocation2 + $0x554] sm:$0xf] %v2729_v47  ;;  %8215 = vmatprep.subr.bf16.mxu1 %v11756_v44 }
 0x167   : > { %v891_v46 = vrot.slane %v823_v48, 6  ;;  %v894_v50 = vrot.slane %v824_v49, 6  ;;  %v951_v51 = vld [vmem:[%s12391_s5 + $0x40] sm:$0xf]  ;;  %v952_v52 = vld [vmem:[%s12391_s5 + $0x44] sm:$0xf] }
 0x168   : > { %v11739_v53 = vld [vmem:[#allocation2 + $0x4c4] ss:$100 sps:$4 sm:$0xff]   ;;  %v1021_v54 = vrot.slane %v951_v51, 7  ;;  %8952 = vmatpush1.bf16.msra.mxu0 %v11751_v42  ;;  %v1024_v56 = vrot.slane %v952_v52, 7  ;;  %v2579_v59 = vld [vmem:[%s12391_s5 + $0x50] sm:$0xf] }
 0x169   : > { %v11743_v55 = vld [vmem:[#allocation2 + $0x4c0] ss:$100 sps:$4 sm:$0xff]   ;;  %v892_v57 = vsel %vm13288_vm5, %v890_v34, %v891_v46  ;;  %v893_v58 = vrot.slane %v891_v46, 4  ;;  %v2580_v61 = vld [vmem:[%s12391_s5 + $0x54] sm:$0xf]  ;;  %8160 = vmatprep.mubr.bf16.mxu1 %v11739_v53  ;;  %8216 = vmatpush1.bf16.msra.mxu1 %v11754_v41  ;;  %v2732_v0 = vshrl.u32 %v2579_v59, 16 }
 0x16a   : > { %932 = vst [vmem:[#allocation2 + $0x588] sm:$0xf] %v892_v57  ;;  %v1022_v62 = vsel %vm12423_vm6, %v1020_v35, %v1021_v54  ;;  %v1023_v60 = vrot.slane %v1021_v54, 4  ;;  %v2735_v1 = vshll.u32 %v2579_v59, 16  ;;  %v2812_v4 = vld [vmem:[%s12391_s5 + $0x50] sm:$0xf]  ;;  %8161 = vmatmul.mubr.bf16.gmra.mrb[24].mxu1 %v11743_v55 }
 0x16b   : > { %v895_v6 = vsel %vm13288_vm5, %v893_v58, %v894_v50  ;;  %1064 = vst [vmem:[#allocation2 + $0x58c] sm:$0xf] %v1022_v62  ;;  %v2742_v7 = vshrl.u32 %v2580_v61, 16  ;;  %v2745_v8 = vshll.u32 %v2580_v61, 16  ;;  %v2813_v9 = vld [vmem:[%s12391_s5 + $0x54] sm:$0xf] }
 0x16c   : > { %v2877_v10 = vrot.slane %v2812_v4, 6  ;;  %933 = vst [vmem:[#allocation2 + $0x5ec] sm:$0xf] %v895_v6  ;;  %v1025_v11 = vsel %vm12423_vm6, %v1023_v60, %v1024_v56  ;;  %v2734_v12 = vrot.slane %v2732_v0, 5  ;;  %v2737_v13 = vrot.slane %v2735_v1, 6 }
 0x16d   : > { %v2880_v15 = vrot.slane %v2813_v9, 6  ;;  %v11763_v17 = vld [vmem:[%s15731_s1 + $0x9c0] ss:$8 sps:$4 sm:$0xff]   ;;  %1065 = vst [vmem:[#allocation2 + $0x5f0] sm:$0xf] %v1025_v11  ;;  %v2744_v18 = vrot.slane %v2742_v7, 5 }
 0x16e   : > { %v2747_v19 = vrot.slane %v2745_v8, 6  ;;  %v2878_v63 = vsel %vm13288_vm5, %v2876_v37, %v2877_v10  ;;  %v2879_v16 = vrot.slane %v2877_v10, 4  ;;  %v11765_v21 = vld [vmem:[%s15731_s1 + $0x9c4] ss:$8 sps:$4 sm:$0xff]   ;;  %v11741_v22 = vld [vmem:[#allocation2 + $0x4f4] ss:$100 sps:$4 sm:$0xff]   ;;  %v2738_v25 = vor.u32 %v2737_v13, %v2734_v12 }
 0x16f   : > { %v11744_v24 = vld [vmem:[#allocation2 + $0x4f0] ss:$100 sps:$4 sm:$0xff]   ;;  %2918 = vst [vmem:[#allocation2 + $0x5bc] sm:$0xf] %v2878_v63  ;;  %v896_v26 = vrot.slane %v894_v50, 4  ;;  %8953 = vmatprep.subr.bf16.mxu0 %v11765_v21  ;;  %v1026_v31 = vrot.slane %v1024_v56, 4  ;;  %8898 = vmatprep.mubr.bf16.mxu0 %v11741_v22 }
 0x170   : > { %v13712_v27 = vor.u32 %v2747_v19, %v2744_v18  ;;  %v2881_v28 = vsel %vm13288_vm5, %v2879_v16, %v2880_v15  ;;  %v11766_v29 = vld [vmem:[%s15731_s1 + $0x3d0] ss:$8 sps:$4 sm:$0xff]   ;;  %v11768_v30 = vld [vmem:[%s15731_s1 + $0x3d4] ss:$8 sps:$4 sm:$0xff]   ;;  %v2739_v23 = vsel %vm12924_vm14, %v2730_v45, %v2738_v25  ;;  %v2740_v32 = vrot.slane %v2738_v25, 4  ;;  %8954 = vmatpush1.bf16.msra.mxu0 %v11763_v17 }
 0x171   : > { %2919 = vst [vmem:[#allocation2 + $0x620] sm:$0xf] %v2881_v28  ;;  %v11769_v33 = vld [vmem:[%s15731_s1 + $0x9d0] ss:$8 sps:$4 sm:$0xff]   ;;  %v2882_v34 = vrot.slane %v2880_v15, 4  ;;  %8899 = vmatmul.mubr.bf16.gmra.mrb[24].mxu0 %v11744_v24  ;;  %8217 = vmatprep.subr.bf16.mxu1 %v11768_v30 }
 0x172   : > { %2793 = vst [vmem:[#allocation2 + $0x5b8] sm:$0xf] %v2739_v23  ;;  %v11771_v35 = vld [vmem:[%s15731_s1 + $0x9d4] ss:$8 sps:$4 sm:$0xff]   ;;  %v825_v36 = vld [vmem:[%s12391_s5 + $0x44] sm:$0xf]  ;;  %v2749_v40 = vsel %vm12924_vm14, %v2740_v32, %v13712_v27  ;;  %8218 = vmatpush1.bf16.msra.mxu1 %v11766_v29 }
 0x173   : > { %v953_v38 = vld [vmem:[%s12391_s5 + $0x48] sm:$0xf]  ;;  %v897_v42 = vrot.slane %v825_v36, 6  ;;  %v954_v43 = vld [vmem:[%s12391_s5 + $0x4c] sm:$0x1]  ;;  %8955 = vmatprep.subr.bf16.mxu0 %v11771_v35  ;;  %v2750_v56 = vrot.slane %v13712_v27, 4 }
 0x174   : > { %v1027_v41 = vrot.slane %v953_v38, 7  ;;  %2794 = vst [vmem:[#allocation2 + $0x61c] sm:$0xf] %v2749_v40  ;;  %v1030_v44 = vrot.slane %v954_v43, 7  ;;  %v11774_v45 = vld [vmem:[%s15731_s1 + $0x3e0] ss:$8 sps:$4 sm:$0xff]   ;;  %8956 = vmatpush1.bf16.msra.mxu0 %v11769_v33 }
 0x175   : > { %v11776_v47 = vld [vmem:[%s15731_s1 + $0x3e4] ss:$8 sps:$4 sm:$0xff]   ;;  %v898_v37 = vsel %vm13288_vm5, %v896_v26, %v897_v42  ;;  %v899_v46 = vrot.slane %v897_v42, 4  ;;  %v2581_v52 = vld [vmem:[%s12391_s5 + $0x58] sm:$0xf] }
 0x176   : > { %v11757_v48 = vld [vmem:[#allocation2 + $0x58c] ss:$100 sps:$4 sm:$0xff]   ;;  %v1028_v50 = vsel %vm12423_vm6, %v1026_v31, %v1027_v41  ;;  %934 = vst [vmem:[#allocation2 + $0x650] sm:$0xf] %v898_v37  ;;  %v1029_v51 = vrot.slane %v1027_v41, 4  ;;  %8219 = vmatprep.subr.bf16.mxu1 %v11776_v47  ;;  %v2752_v55 = vshrl.u32 %v2581_v52, 16 }
 0x177   : > { %v11761_v49 = vld [vmem:[#allocation2 + $0x588] ss:$100 sps:$4 sm:$0xff]   ;;  %1066 = vst [vmem:[#allocation2 + $0x654] sm:$0xf] %v1028_v50  ;;  %v2814_v53 = vld [vmem:[%s12391_s5 + $0x58] sm:$0xf]  ;;  %8170 = vmatprep.mubr.bf16.mxu1 %v11757_v48  ;;  %8220 = vmatpush1.bf16.msra.mxu1 %v11774_v45 }
 0x178   : > { %935 = vst [vmem:[#allocation2 + $0x6b4] sm:$0x3] %v899_v46  ;;  %v2755_v54 = vshll.u32 %v2581_v52, 16  ;;  %v2883_v57 = vrot.slane %v2814_v53, 6  ;;  %8171 = vmatmul.mubr.bf16.gmra.mrb[28].mxu1 %v11761_v49  ;;  %v1031_v58 = vsel %vm12423_vm6, %v1029_v51, %v1030_v44  ;;  %v11781_v59 = vld [vmem:[%s15731_s1 + $0x9e0] ss:$8 sps:$4 sm:$0xff]  }
 0x179   : > { %v11783_v61 = vld [vmem:[%s15731_s1 + $0x9e4] ss:$8 sps:$4 sm:$0xff]   ;;  %1067 = vst [vmem:[#allocation2 + $0x6b8] sm:$0x3] %v1031_v58  ;;  %v2754_v62 = vrot.slane %v2752_v55, 5 }
 0x17a   : > { %v2757_v60 = vrot.slane %v2755_v54, 6  ;;  %v2884_v0 = vsel %vm13288_vm5, %v2882_v34, %v2883_v57  ;;  %v2885_v1 = vrot.slane %v2883_v57, 4  ;;  %v11784_v4 = vld [vmem:[%s15731_s1 + $0x3f0] ss:$8 sps:$4 sm:$0xff]   ;;  %8957 = vmatprep.subr.bf16.mxu0 %v11783_v61  ;;  %v11786_v6 = vld [vmem:[%s15731_s1 + $0x3f4] ss:$8 sps:$4 sm:$0xff]  }
 0x17b   : > { %2920 = vst [vmem:[#allocation2 + $0x684] sm:$0xf] %v2884_v0  ;;  %v11759_v7 = vld [vmem:[#allocation2 + $0x5bc] ss:$100 sps:$4 sm:$0xff]   ;;  %8958 = vmatpush1.bf16.msra.mxu0 %v11781_v59  ;;  %8221 = vmatprep.subr.bf16.mxu1 %v11786_v6  ;;  %v11787_v10 = vld [vmem:[%s15731_s1 + $0x9f0] ss:$8 sps:$4 sm:$0xff]  }
 0x17c   : > { %v11762_v8 = vld [vmem:[#allocation2 + $0x5b8] ss:$100 sps:$4 sm:$0xff]   ;;  %v2758_v9 = vor.u32 %v2757_v60, %v2754_v62  ;;  %2921 = vst [vmem:[#allocation2 + $0x6e8] sm:$0x3] %v2885_v1  ;;  %v1068_v12 = vld [vmem:[%s12391_s5 + $0x4] sm:$0x8]  ;;  %8908 = vmatprep.mubr.bf16.mxu0 %v11759_v7  ;;  %8222 = vmatpush1.bf16.msra.mxu1 %v11784_v4 }
 0x17d   : > { %v11789_v11 = vld [vmem:[%s15731_s1 + $0x9f4] ss:$8 sps:$4 sm:$0xff]   ;;  %v1069_v17 = vld [vmem:[%s12391_s5 + $0x8] sm:$0xf]  ;;  %v1070_v18 = vld [vmem:[%s12391_s5 + $0xc] sm:$0xf]  ;;  %8909 = vmatmul.mubr.bf16.gmra.mrb[28].mxu0 %v11762_v8 }
 0x17e   : > { %v2759_v13 = vsel %vm12924_vm14, %v2750_v56, %v2758_v9  ;;  %v2760_v15 = vrot.slane %v2758_v9, 4  ;;  %8959 = vmatprep.subr.bf16.mxu0 %v11789_v11  ;;  %v1091_v19 = vshrl.u32 %v1068_v12, 16  ;;  %v1096_v63 = vshrl.u32 %v1069_v17, 16  ;;  %v1292_v22 = vld [vmem:[%s12391_s5 + $0x8] sm:$0xf] }
 0x17f   : > { %2795 = vst [vmem:[#allocation2 + $0x680] sm:$0xf] %v2759_v13  ;;  %v1099_v16 = vshll.u32 %v1069_v17, 16  ;;  %v1105_v21 = vshrl.u32 %v1070_v18, 16  ;;  %8960 = vmatpush1.bf16.msra.mxu0 %v11787_v10  ;;  %v1108_v24 = vshll.u32 %v1070_v18, 16 }
 0x180   : > { %2796 = vst [vmem:[#allocation2 + $0x6e4] sm:$0x3] %v2760_v15  ;;  %v1293_v25 = vld [vmem:[%s12391_s5 + $0xc] sm:$0xf]  ;;  %1310 = vst [vmem:[#allocation2 + $0x1c] sm:$0xf] %v1292_v22 }
 0x181   : > { %v2922_v26 = vld [vmem:[%s12391_s5 + $0x14] sm:$0xc]  ;;  %v10064_v28 = vrot.slane %v1091_v19, 11  ;;  %1311 = vst [vmem:[#allocation2 + $0x80] sm:$0xf] %v1293_v25  ;;  %v1098_v30 = vrot.slane %v1096_v63, 7 }
 0x182   : > { %v11772_v27 = vld [vmem:[#allocation2 + $0x654] ss:$100 sps:$4 sm:$0x3f]   ;;  %v13779_v31 = vrot.slane %v1105_v21, 7  ;;  %v2942_v23 = vshrl.u32 %v2922_v26, 16  ;;  %v2945_v34 = vshll.u32 %v2922_v26, 16 }
 0x183   : > { %v11779_v29 = vld [vmem:[#allocation2 + $0x650] ss:$100 sps:$4 sm:$0x3f]   ;;  %8180 = vmatprep.mubr.bf16.mxu1 %v11772_v27  ;;  %v2923_v32 = vld [vmem:[%s12391_s5 + $0x18] sm:$0xf]  ;;  %v1101_v35 = vor.u32 %v1099_v16, %v1098_v30  ;;  %v1103_v36 = vrot.slane %v1098_v30, 4 }
 0x184   : > { %v2924_v33 = vld [vmem:[%s12391_s5 + $0x1c] sm:$0xf]  ;;  %8181 = vmatmul.mubr.bf16.gmra.mrb[32].mxu1 %v11779_v29  ;;  %v1110_v38 = vor.u32 %v1108_v24, %v13779_v31  ;;  %v2944_v40 = vrot.slane %v2942_v23, 6  ;;  %v3161_v42 = vld [vmem:[%s12391_s5 + $0x14] sm:$0x8]  ;;  %v2947_v43 = vrot.slane %v2945_v34, 7 }
 0x185   : > { %v2951_v41 = vshrl.u32 %v2923_v32, 16  ;;  %v2954_v44 = vshll.u32 %v2923_v32, 16  ;;  %v2961_v45 = vshrl.u32 %v2924_v33, 16  ;;  %v3162_v47 = vld [vmem:[%s12391_s5 + $0x18] sm:$0xf]  ;;  %v1102_v48 = vsel %vm12467_vm8, %v10064_v28, %v1101_v35 }
 0x186   : > { %v1111_v49 = vsel %vm12467_vm8, %v1103_v36, %v1110_v38  ;;  %v2964_v37 = vshll.u32 %v2924_v33, 16  ;;  %v13791_v46 = vld [vmem:[%s12391_s5 + $0x1c] sm:$0xf]  ;;  %v10071_v50 = vrot.slane %v3161_v42, 11  ;;  %1274 = vst [vmem:[#allocation2 + $0x18] sm:$0xf] %v1102_v48  ;;  %v2948_v52 = vor.u32 %v2947_v43, %v2944_v40 }
 0x187   : > { %v11777_v51 = vld [vmem:[#allocation2 + $0x684] ss:$100 sps:$4 sm:$0x3f]   ;;  %1275 = vst [vmem:[#allocation2 + $0x7c] sm:$0xf] %v1111_v49  ;;  %v2953_v53 = vrot.slane %v2951_v41, 6 }
 0x188   : > { %v11780_v55 = vld [vmem:[#allocation2 + $0x680] ss:$100 sps:$4 sm:$0x3f]   ;;  %v2956_v54 = vrot.slane %v2954_v44, 7  ;;  %v2963_v57 = vrot.slane %v2961_v45, 6  ;;  %v2966_v58 = vrot.slane %v2964_v37, 7  ;;  %8918 = vmatprep.mubr.bf16.mxu0 %v11777_v51 }
 0x189   : > { %v2949_v59 = vrot.slane %v2948_v52, 4  ;;  %v3201_v61 = vrot.slane %v3162_v47, 7  ;;  %v3204_v62 = vrot.slane %v13791_v46, 7  ;;  %v11798_v60 = vld [vmem:[%s15731_s1 + $0x404] ss:$8 sps:$4 sm:$0xff]   ;;  %8919 = vmatmul.mubr.bf16.gmra.mrb[32].mxu0 %v11780_v55  ;;  %v1112_v9 = vrot.slane %v13779_v31, 4 }
 0x18a   : > { %v2957_v0 = vor.u32 %v2956_v54, %v2953_v53  ;;  %v13803_v1 = vor.u32 %v2966_v58, %v2963_v57  ;;  %v1071_v4 = vld [vmem:[%s12391_s5 + $0x10] sm:$0xf]  ;;  %8314 = vmatprep.subr.bf16.mxu1 %v11798_v60  ;;  %v1072_v8 = vld [vmem:[%s12391_s5 + $0x14] sm:$0xf]  ;;  %v11796_v19 = vld [vmem:[%s15731_s1 + $0x400] ss:$8 sps:$4 sm:$0xff]  }
 0x18b   : > { %v3202_v6 = vsel %vm12423_vm6, %v10071_v50, %v3201_v61  ;;  %v3203_v7 = vrot.slane %v3201_v61, 4  ;;  %v1114_v10 = vshrl.u32 %v1071_v4, 16  ;;  %v1117_v13 = vshll.u32 %v1071_v4, 16  ;;  %v1294_v17 = vld [vmem:[%s12391_s5 + $0x10] sm:$0xf] }
 0x18c   : > { %v2958_v11 = vsel %vm13795_vm13, %v2949_v59, %v2957_v0  ;;  %v2959_v12 = vrot.slane %v2957_v0, 4  ;;  %3272 = vst [vmem:[#allocation2 + $0x4c] sm:$0xf] %v3202_v6  ;;  %v1123_v15 = vshrl.u32 %v1072_v8, 16  ;;  %v1126_v16 = vshll.u32 %v1072_v8, 16 }
 0x18d   : > { %3143 = vst [vmem:[#allocation2 + $0x48] sm:$0xf] %v2958_v11  ;;  %v3205_v18 = vsel %vm12423_vm6, %v3203_v7, %v3204_v62  ;;  %v1116_v63 = vrot.slane %v1114_v10, 7  ;;  %v1295_v21 = vld [vmem:[%s12391_s5 + $0x14] sm:$0xf]  ;;  %v2969_v28 = vrot.slane %v13803_v1, 4 }
 0x18e   : > { %1312 = vst [vmem:[#allocation2 + $0xe4] sm:$0xf] %v1294_v17  ;;  %v2925_v22 = vld [vmem:[%s12391_s5 + $0x20] sm:$0xf]  ;;  %v11790_v24 = vld [vmem:[#allocation2 + $0x18] ss:$100 sps:$4 sm:$0xff]   ;;  %v2968_v25 = vsel %vm13795_vm13, %v2959_v12, %v13803_v1 }
 0x18f   : > { %3273 = vst [vmem:[#allocation2 + $0xb0] sm:$0xf] %v3205_v18  ;;  %v11801_v26 = vld [vmem:[%s15731_s1 + $0x414] ss:$8 sps:$4 sm:$0xff]   ;;  %v13826_v27 = vrot.slane %v1123_v15, 7  ;;  %v1119_v30 = vor.u32 %v1117_v13, %v1116_v63  ;;  %v1121_v31 = vrot.slane %v1116_v63, 4 }
 0x190   : > { %1313 = vst [vmem:[#allocation2 + $0x148] sm:$0xf] %v1295_v21  ;;  %v11792_v29 = vld [vmem:[#allocation2 + $0x1c] ss:$100 sps:$4 sm:$0xff]   ;;  %3144 = vst [vmem:[#allocation2 + $0xac] sm:$0xf] %v2968_v25 }
 0x191   : > { %v2926_v23 = vld [vmem:[%s12391_s5 + $0x24] sm:$0xf]  ;;  %v2971_v32 = vshrl.u32 %v2925_v22, 16  ;;  %v1128_v33 = vor.u32 %v1126_v16, %v13826_v27  ;;  %v2974_v34 = vshll.u32 %v2925_v22, 16  ;;  %v3164_v38 = vld [vmem:[%s12391_s5 + $0x20] sm:$0xf]  ;;  %8223 = vmatprep.mubr.bf16.mxu1 %v11792_v29  ;;  %v1120_v40 = vsel %vm12467_vm8, %v1112_v9, %v1119_v30 }
 0x192   : > { %v2981_v35 = vshrl.u32 %v2926_v23, 16  ;;  %v2984_v36 = vshll.u32 %v2926_v23, 16  ;;  %v3165_v43 = vld [vmem:[%s12391_s5 + $0x24] sm:$0xf]  ;;  %v3206_v41 = vrot.slane %v3204_v62, 4  ;;  %v3207_v44 = vrot.slane %v3164_v38, 7  ;;  %8224 = vmatmul.mubr.bf16.vlgmr.msra.gmra.mrb[0].mxu1 %v11790_v24 }
 0x193   : > { %v2973_v42 = vrot.slane %v2971_v32, 6  ;;  %v1129_v45 = vsel %vm12467_vm8, %v1121_v31, %v1128_v33  ;;  %1276 = vst [vmem:[#allocation2 + $0xe0] sm:$0xf] %v1120_v40  ;;  %v2976_v47 = vrot.slane %v2974_v34, 7  ;;  %8315 = vmatpush1.bf16.msra.mxu1 %v11796_v19  ;;  %v11799_v37 = vld [vmem:[%s15731_s1 + $0x410] ss:$8 sps:$4 sm:$0xff]  }
 0x194   : > { %v2983_v48 = vrot.slane %v2981_v35, 6  ;;  %v2986_v49 = vrot.slane %v2984_v36, 7  ;;  %1277 = vst [vmem:[#allocation2 + $0x144] sm:$0xf] %v1129_v45  ;;  %v3208_v46 = vsel %vm12423_vm6, %v3206_v41, %v3207_v44  ;;  %v3209_v50 = vrot.slane %v3207_v44, 4  ;;  %8316 = vmatprep.subr.bf16.mxu1 %v11801_v26 }
 0x195   : > { %v3210_v51 = vrot.slane %v3165_v43, 7  ;;  %v11810_v52 = vld [vmem:[%s15731_s1 + $0xa04] ss:$8 sps:$4 sm:$0xff]   ;;  %v2977_v53 = vor.u32 %v2976_v47, %v2973_v42  ;;  %3274 = vst [vmem:[#allocation2 + $0x114] sm:$0xf] %v3208_v46  ;;  %v1130_v61 = vrot.slane %v13826_v27, 4 }
 0x196   : > { %v13845_v55 = vor.u32 %v2986_v49, %v2983_v48  ;;  %v11813_v54 = vld [vmem:[%s15731_s1 + $0x424] ss:$8 sps:$4 sm:$0xff]   ;;  %v11808_v58 = vld [vmem:[%s15731_s1 + $0xa00] ss:$8 sps:$4 sm:$0xff]   ;;  %9052 = vmatprep.subr.bf16.mxu0 %v11810_v52  ;;  %v11816_v4 = vld [vmem:[%s15731_s1 + $0xa14] ss:$8 sps:$4 sm:$0xff]  }
 0x197   : > { %v3211_v57 = vsel %vm12423_vm6, %v3209_v50, %v3210_v51  ;;  %v11811_v59 = vld [vmem:[%s15731_s1 + $0x420] ss:$8 sps:$4 sm:$0xff]   ;;  %v11795_v60 = vld [vmem:[#allocation2 + $0x4c] ss:$100 sps:$4 sm:$0xff]   ;;  %v2978_v0 = vsel %vm13795_vm13, %v2969_v28, %v2977_v53  ;;  %v2979_v1 = vrot.slane %v2977_v53, 4  ;;  %8317 = vmatpush1.bf16.msra.mxu1 %v11799_v37  ;;  %v3212_v7 = vrot.slane %v3210_v51, 4 }
 0x198   : > { %v11793_v62 = vld [vmem:[#allocation2 + $0x48] ss:$100 sps:$4 sm:$0xff]   ;;  %3275 = vst [vmem:[#allocation2 + $0x178] sm:$0xf] %v3211_v57  ;;  %3145 = vst [vmem:[#allocation2 + $0x110] sm:$0xf] %v2978_v0  ;;  %8961 = vmatprep.mubr.bf16.mxu0 %v11795_v60  ;;  %8318 = vmatprep.subr.bf16.mxu1 %v11813_v54 }
 0x199   : > { %v11819_v6 = vld [vmem:[%s15731_s1 + $0x434] ss:$8 sps:$4 sm:$0xff]   ;;  %v2988_v8 = vsel %vm13795_vm13, %v2979_v1, %v13845_v55  ;;  %v11814_v9 = vld [vmem:[%s15731_s1 + $0xa10] ss:$8 sps:$4 sm:$0xff]   ;;  %8962 = vmatmul.mubr.bf16.vlgmr.msra.gmra.mrb[0].mxu0 %v11793_v62  ;;  %v11802_v63 = vld [vmem:[#allocation2 + $0xe4] ss:$100 sps:$4 sm:$0xff]  }
 0x19a   : > { %v1073_v10 = vld [vmem:[%s12391_s5 + $0x18] sm:$0xf]  ;;  %v1074_v11 = vld [vmem:[%s12391_s5 + $0x1c] sm:$0xf]  ;;  %3146 = vst [vmem:[#allocation2 + $0x174] sm:$0xf] %v2988_v8  ;;  %9053 = vmatpush1.bf16.msra.mxu0 %v11808_v58  ;;  %8233 = vmatprep.mubr.bf16.mxu1 %v11802_v63 }
 0x19b   : > { %v1296_v12 = vld [vmem:[%s12391_s5 + $0x18] sm:$0xf]  ;;  %v1132_v15 = vshrl.u32 %v1073_v10, 16  ;;  %v1135_v17 = vshll.u32 %v1073_v10, 16  ;;  %v1141_v18 = vshrl.u32 %v1074_v11, 16  ;;  %v1144_v19 = vshll.u32 %v1074_v11, 16  ;;  %8319 = vmatpush1.bf16.msra.mxu1 %v11811_v59  ;;  %9054 = vmatprep.subr.bf16.mxu0 %v11816_v4 }
 0x19c   : > { %v11817_v13 = vld [vmem:[%s15731_s1 + $0x430] ss:$8 sps:$4 sm:$0xff]   ;;  %1314 = vst [vmem:[#allocation2 + $0x1ac] sm:$0xf] %v1296_v12  ;;  %v11806_v16 = vld [vmem:[#allocation2 + $0xe0] ss:$100 sps:$4 sm:$0xff]   ;;  %8320 = vmatprep.subr.bf16.mxu1 %v11819_v6 }
 0x19d   : > { %v2989_v21 = vrot.slane %v13845_v55, 4  ;;  %v1134_v22 = vrot.slane %v1132_v15, 7  ;;  %v13880_v24 = vrot.slane %v1141_v18, 7  ;;  %v1297_v25 = vld [vmem:[%s12391_s5 + $0x1c] sm:$0xf]  ;;  %8234 = vmatmul.mubr.bf16.gmra.mrb[4].mxu1 %v11806_v16 }
 0x19e   : > { %v2927_v26 = vld [vmem:[%s12391_s5 + $0x28] sm:$0xf]  ;;  %1315 = vst [vmem:[#allocation2 + $0x210] sm:$0xf] %v1297_v25  ;;  %v2928_v27 = vld [vmem:[%s12391_s5 + $0x2c] sm:$0xf]  ;;  %9055 = vmatpush1.bf16.msra.mxu0 %v11814_v9 }
 0x19f   : > { %v2991_v28 = vshrl.u32 %v2927_v26, 16  ;;  %v2994_v29 = vshll.u32 %v2927_v26, 16  ;;  %v3166_v30 = vld [vmem:[%s12391_s5 + $0x28] sm:$0xf]  ;;  %v1137_v31 = vor.u32 %v1135_v17, %v1134_v22  ;;  %v1139_v23 = vrot.slane %v1134_v22, 4  ;;  %8321 = vmatpush1.bf16.msra.mxu1 %v11817_v13 }
 0x1a0   : > { %v1146_v32 = vor.u32 %v1144_v19, %v13880_v24  ;;  %v3001_v33 = vshrl.u32 %v2928_v27, 16  ;;  %v13888_v34 = vld [vmem:[%s12391_s5 + $0x2c] sm:$0xf]  ;;  %v3004_v38 = vshll.u32 %v2928_v27, 16  ;;  %v3213_v40 = vrot.slane %v3166_v30, 7 }
 0x1a1   : > { %v2993_v35 = vrot.slane %v2991_v28, 6  ;;  %v2996_v36 = vrot.slane %v2994_v29, 7  ;;  %v1138_v42 = vsel %vm12467_vm8, %v1130_v61, %v1137_v31  ;;  %v3216_v44 = vrot.slane %v13888_v34, 7  ;;  %v11826_v45 = vld [vmem:[%s15731_s1 + $0xa20] ss:$8 sps:$4 sm:$0xff]  }
 0x1a2   : > { %v1147_v43 = vsel %vm12467_vm8, %v1139_v23, %v1146_v32  ;;  %v3003_v41 = vrot.slane %v3001_v33, 6  ;;  %v11828_v47 = vld [vmem:[%s15731_s1 + $0xa24] ss:$8 sps:$4 sm:$0xff]   ;;  %v11804_v48 = vld [vmem:[#allocation2 + $0x114] ss:$100 sps:$4 sm:$0xff]   ;;  %v3006_v46 = vrot.slane %v3004_v38, 7  ;;  %v3214_v50 = vsel %vm12423_vm6, %v3212_v7, %v3213_v40 }
 0x1a3   : > { %v11807_v49 = vld [vmem:[#allocation2 + $0x110] ss:$100 sps:$4 sm:$0xff]   ;;  %1278 = vst [vmem:[#allocation2 + $0x1a8] sm:$0xf] %v1138_v42  ;;  %1279 = vst [vmem:[#allocation2 + $0x20c] sm:$0xf] %v1147_v43  ;;  %v2997_v37 = vor.u32 %v2996_v36, %v2993_v35  ;;  %9056 = vmatprep.subr.bf16.mxu0 %v11828_v47  ;;  %8971 = vmatprep.mubr.bf16.mxu0 %v11804_v48 }
 0x1a4   : > { %v3215_v51 = vrot.slane %v3213_v40, 4  ;;  %3276 = vst [vmem:[#allocation2 + $0x1dc] sm:$0xf] %v3214_v50  ;;  %v11829_v52 = vld [vmem:[%s15731_s1 + $0x440] ss:$8 sps:$4 sm:$0xff]   ;;  %v13911_v57 = vor.u32 %v3006_v46, %v3003_v41  ;;  %9057 = vmatpush1.bf16.msra.mxu0 %v11826_v45  ;;  %v1148_v0 = vrot.slane %v13880_v24, 4 }
 0x1a5   : > { %v11831_v53 = vld [vmem:[%s15731_s1 + $0x444] ss:$8 sps:$4 sm:$0xff]   ;;  %v2998_v55 = vsel %vm13795_vm13, %v2989_v21, %v2997_v37  ;;  %v2999_v54 = vrot.slane %v2997_v37, 4  ;;  %v11832_v58 = vld [vmem:[%s15731_s1 + $0xa30] ss:$8 sps:$4 sm:$0xff]   ;;  %8972 = vmatmul.mubr.bf16.gmra.mrb[4].mxu0 %v11807_v49  ;;  %v3218_v27 = vrot.slane %v3216_v44, 4 }
 0x1a6   : > { %v11834_v59 = vld [vmem:[%s15731_s1 + $0xa34] ss:$8 sps:$4 sm:$0xff]   ;;  %3147 = vst [vmem:[#allocation2 + $0x1d8] sm:$0xf] %v2998_v55  ;;  %v3217_v61 = vsel %vm12423_vm6, %v3215_v51, %v3216_v44  ;;  %8322 = vmatprep.subr.bf16.mxu1 %v11831_v53  ;;  %v1075_v62 = vld [vmem:[%s12391_s5 + $0x20] sm:$0xf] }
 0x1a7   : > { %v1076_v60 = vld [vmem:[%s12391_s5 + $0x24] sm:$0xf]  ;;  %v3008_v1 = vsel %vm13795_vm13, %v2999_v54, %v13911_v57  ;;  %3277 = vst [vmem:[#allocation2 + $0x240] sm:$0xf] %v3217_v61  ;;  %8323 = vmatpush1.bf16.msra.mxu1 %v11829_v52  ;;  %9058 = vmatprep.subr.bf16.mxu0 %v11834_v59  ;;  %v1150_v4 = vshrl.u32 %v1075_v62, 16  ;;  %v1153_v6 = vshll.u32 %v1075_v62, 16 }
 0x1a8   : > { %v1159_v7 = vshrl.u32 %v1076_v60, 16  ;;  %v1298_v8 = vld [vmem:[%s12391_s5 + $0x20] sm:$0xf]  ;;  %3148 = vst [vmem:[#allocation2 + $0x23c] sm:$0xf] %v3008_v1  ;;  %v1162_v9 = vshll.u32 %v1076_v60, 16  ;;  %9059 = vmatpush1.bf16.msra.mxu0 %v11832_v58 }
 0x1a9   : > { %v1299_v10 = vld [vmem:[%s12391_s5 + $0x24] sm:$0xf]  ;;  %1316 = vst [vmem:[#allocation2 + $0x274] sm:$0xf] %v1298_v8  ;;  %v11837_v11 = vld [vmem:[%s15731_s1 + $0x450] ss:$8 sps:$4 sm:$0xff]  }
 0x1aa   : > { %v3009_v12 = vrot.slane %v13911_v57, 4  ;;  %v1152_v13 = vrot.slane %v1150_v4, 7  ;;  %v13933_v15 = vrot.slane %v1159_v7, 7  ;;  %1317 = vst [vmem:[#allocation2 + $0x2d8] sm:$0xf] %v1299_v10 }
 0x1ab   : > { %v11839_v17 = vld [vmem:[%s15731_s1 + $0x454] ss:$8 sps:$4 sm:$0xff]   ;;  %v2929_v18 = vld [vmem:[%s12391_s5 + $0x30] sm:$0xf]  ;;  %v11824_v21 = vld [vmem:[#allocation2 + $0x1a8] ss:$100 sps:$4 sm:$0xff]  }
 0x1ac   : > { %v11820_v19 = vld [vmem:[#allocation2 + $0x1ac] ss:$100 sps:$4 sm:$0xff]   ;;  %v3011_v63 = vshrl.u32 %v2929_v18, 16  ;;  %v3014_v16 = vshll.u32 %v2929_v18, 16  ;;  %v1155_v22 = vor.u32 %v1153_v6, %v1152_v13  ;;  %v1157_v24 = vrot.slane %v1152_v13, 4  ;;  %8324 = vmatprep.subr.bf16.mxu1 %v11839_v17 }
 0x1ad   : > { %v1164_v25 = vor.u32 %v1162_v9, %v13933_v15  ;;  %v2930_v26 = vld [vmem:[%s12391_s5 + $0x34] sm:$0xf]  ;;  %8243 = vmatprep.mubr.bf16.mxu1 %v11820_v19  ;;  %v3168_v23 = vld [vmem:[%s12391_s5 + $0x30] sm:$0xf]  ;;  %8325 = vmatpush1.bf16.msra.mxu1 %v11837_v11  ;;  %v11844_v43 = vld [vmem:[%s15731_s1 + $0xa40] ss:$8 sps:$4 sm:$0xff]  }
 0x1ae   : > { %v3013_v28 = vrot.slane %v3011_v63, 6  ;;  %v3016_v29 = vrot.slane %v3014_v16, 7  ;;  %v3021_v30 = vshrl.u32 %v2930_v26, 16  ;;  %v3024_v31 = vshll.u32 %v2930_v26, 16  ;;  %8244 = vmatmul.mubr.bf16.gmra.mrb[8].mxu1 %v11824_v21  ;;  %v3169_v34 = vld [vmem:[%s12391_s5 + $0x34] sm:$0xf] }
 0x1af   : > { %v1156_v32 = vsel %vm12467_vm8, %v1148_v0, %v1155_v22  ;;  %v1165_v33 = vsel %vm12467_vm8, %v1157_v24, %v1164_v25  ;;  %v3219_v35 = vrot.slane %v3168_v23, 7  ;;  %v3222_v42 = vrot.slane %v3169_v34, 7  ;;  %v11822_v41 = vld [vmem:[#allocation2 + $0x1dc] ss:$100 sps:$4 sm:$0xff]   ;;  %v11846_v46 = vld [vmem:[%s15731_s1 + $0xa44] ss:$8 sps:$4 sm:$0xff]  }
 0x1b0   : > { %1280 = vst [vmem:[#allocation2 + $0x270] sm:$0xf] %v1156_v32  ;;  %1281 = vst [vmem:[#allocation2 + $0x2d4] sm:$0xf] %v1165_v33  ;;  %v3017_v36 = vor.u32 %v3016_v29, %v3013_v28  ;;  %v3023_v38 = vrot.slane %v3021_v30, 6  ;;  %v3026_v40 = vrot.slane %v3024_v31, 7  ;;  %8981 = vmatprep.mubr.bf16.mxu0 %v11822_v41  ;;  %9060 = vmatprep.subr.bf16.mxu0 %v11846_v46 }
 0x1b1   : > { %v11825_v44 = vld [vmem:[#allocation2 + $0x1d8] ss:$100 sps:$4 sm:$0xff]   ;;  %v3220_v45 = vsel %vm12423_vm6, %v3218_v27, %v3219_v35  ;;  %v3221_v47 = vrot.slane %v3219_v35, 4  ;;  %v11847_v51 = vld [vmem:[%s15731_s1 + $0x460] ss:$8 sps:$4 sm:$0xff]   ;;  %v1166_v57 = vrot.slane %v13933_v15, 4  ;;  %9061 = vmatpush1.bf16.msra.mxu0 %v11844_v43 }
 0x1b2   : > { %v3018_v48 = vsel %vm13795_vm13, %v3009_v12, %v3017_v36  ;;  %v3019_v49 = vrot.slane %v3017_v36, 4  ;;  %v13954_v37 = vor.u32 %v3026_v40, %v3023_v38  ;;  %3278 = vst [vmem:[#allocation2 + $0x2a4] sm:$0xf] %v3220_v45  ;;  %v11849_v52 = vld [vmem:[%s15731_s1 + $0x464] ss:$8 sps:$4 sm:$0xff]   ;;  %8982 = vmatmul.mubr.bf16.gmra.mrb[8].mxu0 %v11825_v44  ;;  %v3224_v8 = vrot.slane %v3222_v42, 4 }
 0x1b3   : > { %3149 = vst [vmem:[#allocation2 + $0x2a0] sm:$0xf] %v3018_v48  ;;  %v3223_v50 = vsel %vm12423_vm6, %v3221_v47, %v3222_v42  ;;  %v11850_v55 = vld [vmem:[%s15731_s1 + $0xa50] ss:$8 sps:$4 sm:$0xff]   ;;  %v11852_v54 = vld [vmem:[%s15731_s1 + $0xa54] ss:$8 sps:$4 sm:$0xff]   ;;  %8326 = vmatprep.subr.bf16.mxu1 %v11849_v52 }
 0x1b4   : > { %v3028_v53 = vsel %vm13795_vm13, %v3019_v49, %v13954_v37  ;;  %3279 = vst [vmem:[#allocation2 + $0x308] sm:$0xf] %v3223_v50  ;;  %v1077_v58 = vld [vmem:[%s12391_s5 + $0x28] sm:$0xf]  ;;  %v1078_v59 = vld [vmem:[%s12391_s5 + $0x2c] sm:$0xf]  ;;  %8327 = vmatpush1.bf16.msra.mxu1 %v11847_v51  ;;  %9062 = vmatprep.subr.bf16.mxu0 %v11852_v54 }
 0x1b5   : > { %3150 = vst [vmem:[#allocation2 + $0x304] sm:$0xf] %v3028_v53  ;;  %v1300_v61 = vld [vmem:[%s12391_s5 + $0x28] sm:$0xf]  ;;  %v1168_v62 = vshrl.u32 %v1077_v58, 16  ;;  %v1171_v60 = vshll.u32 %v1077_v58, 16  ;;  %9063 = vmatpush1.bf16.msra.mxu0 %v11850_v55 }
 0x1b6   : > { %v1177_v0 = vshrl.u32 %v1078_v59, 16  ;;  %v1180_v1 = vshll.u32 %v1078_v59, 16  ;;  %v1301_v4 = vld [vmem:[%s12391_s5 + $0x2c] sm:$0xf]  ;;  %1318 = vst [vmem:[#allocation2 + $0x33c] sm:$0xf] %v1300_v61 }
 0x1b7   : > { %v11835_v6 = vld [vmem:[#allocation2 + $0x274] ss:$100 sps:$4 sm:$0xff]   ;;  %1319 = vst [vmem:[#allocation2 + $0x3a0] sm:$0xf] %v1301_v4  ;;  %v3029_v7 = vrot.slane %v13954_v37, 4  ;;  %v1170_v10 = vrot.slane %v1168_v62, 7 }
 0x1b8   : > { %v11842_v9 = vld [vmem:[#allocation2 + $0x270] ss:$100 sps:$4 sm:$0xff]   ;;  %v13982_v11 = vrot.slane %v1177_v0, 7  ;;  %v2931_v12 = vld [vmem:[%s12391_s5 + $0x38] sm:$0xf]  ;;  %8253 = vmatprep.mubr.bf16.mxu1 %v11835_v6 }
 0x1b9   : > { %v2932_v13 = vld [vmem:[%s12391_s5 + $0x3c] sm:$0xf]  ;;  %v3031_v15 = vshrl.u32 %v2931_v12, 16  ;;  %v3034_v17 = vshll.u32 %v2931_v12, 16  ;;  %v3170_v18 = vld [vmem:[%s12391_s5 + $0x38] sm:$0xf]  ;;  %8254 = vmatmul.mubr.bf16.gmra.mrb[12].mxu1 %v11842_v9  ;;  %v1173_v19 = vor.u32 %v1171_v60, %v1170_v10 }
 0x1ba   : > { %v1175_v63 = vrot.slane %v1170_v10, 4  ;;  %v1182_v16 = vor.u32 %v1180_v1, %v13982_v11  ;;  %v3041_v21 = vshrl.u32 %v2932_v13, 16  ;;  %v3171_v22 = vld [vmem:[%s12391_s5 + $0x3c] sm:$0xf]  ;;  %v3044_v26 = vshll.u32 %v2932_v13, 16 }
 0x1bb   : > { %v3033_v24 = vrot.slane %v3031_v15, 6  ;;  %v3036_v25 = vrot.slane %v3034_v17, 7  ;;  %v3225_v27 = vrot.slane %v3170_v18, 7  ;;  %v11840_v28 = vld [vmem:[#allocation2 + $0x2a4] ss:$100 sps:$4 sm:$0xff]   ;;  %v1174_v30 = vsel %vm12467_vm8, %v1166_v57, %v1173_v19 }
 0x1bc   : > { %v11843_v29 = vld [vmem:[#allocation2 + $0x2a0] ss:$100 sps:$4 sm:$0xff]   ;;  %v1183_v31 = vsel %vm12467_vm8, %v1175_v63, %v1182_v16  ;;  %v3043_v23 = vrot.slane %v3041_v21, 6  ;;  %1282 = vst [vmem:[#allocation2 + $0x338] sm:$0xf] %v1174_v30  ;;  %v3046_v33 = vrot.slane %v3044_v26, 7  ;;  %8991 = vmatprep.mubr.bf16.mxu0 %v11840_v28 }
 0x1bd   : > { %1283 = vst [vmem:[#allocation2 + $0x39c] sm:$0xf] %v1183_v31  ;;  %v3037_v32 = vor.u32 %v3036_v25, %v3033_v24  ;;  %v3226_v34 = vsel %vm12423_vm6, %v3224_v8, %v3225_v27  ;;  %v3227_v35 = vrot.slane %v3225_v27, 4  ;;  %v11858_v36 = vld [vmem:[%s15731_s1 + $0x470] ss:$8 sps:$4 sm:$0xff]   ;;  %v3228_v40 = vrot.slane %v3171_v22, 7  ;;  %8992 = vmatmul.mubr.bf16.gmra.mrb[12].mxu0 %v11843_v29 }
 0x1be   : > { %v11860_v38 = vld [vmem:[%s15731_s1 + $0x474] ss:$8 sps:$4 sm:$0xff]   ;;  %3280 = vst [vmem:[#allocation2 + $0x36c] sm:$0xf] %v3226_v34  ;;  %v11862_v42 = vld [vmem:[%s15731_s1 + $0xa60] ss:$8 sps:$4 sm:$0xff]   ;;  %v14009_v45 = vor.u32 %v3046_v33, %v3043_v23 }
 0x1bf   : > { %v11864_v43 = vld [vmem:[%s15731_s1 + $0xa64] ss:$8 sps:$4 sm:$0xff]   ;;  %v3038_v41 = vsel %vm13795_vm13, %v3029_v7, %v3037_v32  ;;  %v3039_v44 = vrot.slane %v3037_v32, 4  ;;  %8328 = vmatprep.subr.bf16.mxu1 %v11860_v38  ;;  %v11865_v47 = vld [vmem:[%s15731_s1 + $0x480] ss:$8 sps:$4 sm:$0xff]   ;;  %v3229_v48 = vsel %vm12423_vm6, %v3227_v35, %v3228_v40  ;;  %v1184_v37 = vrot.slane %v13982_v11, 4 }
 0x1c0   : > { %3151 = vst [vmem:[#allocation2 + $0x368] sm:$0xf] %v3038_v41  ;;  %9064 = vmatprep.subr.bf16.mxu0 %v11864_v43  ;;  %8329 = vmatpush1.bf16.msra.mxu1 %v11858_v36  ;;  %v11867_v49 = vld [vmem:[%s15731_s1 + $0x484] ss:$8 sps:$4 sm:$0xff]   ;;  %v3230_v46 = vrot.slane %v3228_v40, 4  ;;  %v3049_v4 = vrot.slane %v14009_v45, 4 }
 0x1c1   : > { %v3048_v50 = vsel %vm13795_vm13, %v3039_v44, %v14009_v45  ;;  %3281 = vst [vmem:[#allocation2 + $0x3d0] sm:$0xf] %v3229_v48  ;;  %9065 = vmatpush1.bf16.msra.mxu0 %v11862_v42  ;;  %v11868_v51 = vld [vmem:[%s15731_s1 + $0xa70] ss:$8 sps:$4 sm:$0xff]   ;;  %v11870_v52 = vld [vmem:[%s15731_s1 + $0xa74] ss:$8 sps:$4 sm:$0xff]   ;;  %8330 = vmatprep.subr.bf16.mxu1 %v11867_v49 }
 0x1c2   : > { %v1079_v53 = vld [vmem:[%s12391_s5 + $0x30] sm:$0xf]  ;;  %3152 = vst [vmem:[#allocation2 + $0x3cc] sm:$0xf] %v3048_v50  ;;  %v1080_v55 = vld [vmem:[%s12391_s5 + $0x34] sm:$0xf]  ;;  %9066 = vmatprep.subr.bf16.mxu0 %v11870_v52 }
 0x1c3   : > { %v1186_v54 = vshrl.u32 %v1079_v53, 16  ;;  %v1189_v57 = vshll.u32 %v1079_v53, 16  ;;  %v1302_v58 = vld [vmem:[%s12391_s5 + $0x30] sm:$0xf]  ;;  %v1195_v59 = vshrl.u32 %v1080_v55, 16  ;;  %v1198_v61 = vshll.u32 %v1080_v55, 16 }
 0x1c4   : > { %v1303_v62 = vld [vmem:[%s12391_s5 + $0x34] sm:$0xf]  ;;  %1320 = vst [vmem:[#allocation2 + $0x404] sm:$0xf] %v1302_v58  ;;  %v2933_v60 = vld [vmem:[%s12391_s5 + $0x40] sm:$0xf]  ;;  %8331 = vmatpush1.bf16.msra.mxu1 %v11865_v47 }
 0x1c5   : > { %v11853_v0 = vld [vmem:[#allocation2 + $0x33c] ss:$100 sps:$4 sm:$0xff]   ;;  %v1188_v1 = vrot.slane %v1186_v54, 7  ;;  %1321 = vst [vmem:[#allocation2 + $0x468] sm:$0xf] %v1303_v62  ;;  %9067 = vmatpush1.bf16.msra.mxu0 %v11868_v51  ;;  %v14035_v7 = vrot.slane %v1195_v59, 7 }
 0x1c6   : > { %v11857_v6 = vld [vmem:[#allocation2 + $0x338] ss:$100 sps:$4 sm:$0xff]   ;;  %v2934_v8 = vld [vmem:[%s12391_s5 + $0x44] sm:$0xf]  ;;  %v3051_v9 = vshrl.u32 %v2933_v60, 16  ;;  %8263 = vmatprep.mubr.bf16.mxu1 %v11853_v0  ;;  %v3054_v12 = vshll.u32 %v2933_v60, 16 }
 0x1c7   : > { %v1191_v10 = vor.u32 %v1189_v57, %v1188_v1  ;;  %v1193_v11 = vrot.slane %v1188_v1, 4  ;;  %v3061_v13 = vshrl.u32 %v2934_v8, 16  ;;  %v3172_v15 = vld [vmem:[%s12391_s5 + $0x40] sm:$0xf]  ;;  %8264 = vmatmul.mubr.bf16.gmra.mrb[16].mxu1 %v11857_v6  ;;  %v1200_v17 = vor.u32 %v1198_v61, %v14035_v7  ;;  %v3173_v63 = vld [vmem:[%s12391_s5 + $0x44] sm:$0xf] }
 0x1c8   : > { %v3053_v18 = vrot.slane %v3051_v9, 6  ;;  %v3064_v19 = vshll.u32 %v2934_v8, 16  ;;  %v3231_v16 = vrot.slane %v3172_v15, 7  ;;  %v3056_v22 = vrot.slane %v3054_v12, 7  ;;  %v11877_v26 = vld [vmem:[%s15731_s1 + $0xa80] ss:$8 sps:$4 sm:$0xff]  }
 0x1c9   : > { %v1192_v21 = vsel %vm12467_vm8, %v1184_v37, %v1191_v10  ;;  %v3063_v24 = vrot.slane %v3061_v13, 6  ;;  %v3234_v25 = vrot.slane %v3173_v63, 7  ;;  %v11855_v27 = vld [vmem:[#allocation2 + $0x36c] ss:$100 sps:$4 sm:$0xff]   ;;  %v1201_v29 = vsel %vm12467_vm8, %v1193_v11, %v1200_v17  ;;  %v11882_v36 = vld [vmem:[%s15731_s1 + $0x494] ss:$8 sps:$4 sm:$0xff]  }
 0x1ca   : > { %v11861_v28 = vld [vmem:[#allocation2 + $0x368] ss:$100 sps:$4 sm:$0xff]   ;;  %1284 = vst [vmem:[#allocation2 + $0x400] sm:$0xf] %v1192_v21  ;;  %v3066_v30 = vrot.slane %v3064_v19, 7  ;;  %v3232_v31 = vsel %vm12423_vm6, %v3230_v46, %v3231_v16  ;;  %v3057_v23 = vor.u32 %v3056_v22, %v3053_v18  ;;  %v3233_v32 = vrot.slane %v3231_v16, 4  ;;  %9001 = vmatprep.mubr.bf16.mxu0 %v11855_v27  ;;  %8332 = vmatprep.subr.bf16.mxu1 %v11882_v36 }
 0x1cb   : > { %1285 = vst [vmem:[#allocation2 + $0x464] sm:$0xf] %v1201_v29  ;;  %3282 = vst [vmem:[#allocation2 + $0x434] sm:$0xf] %v3232_v31  ;;  %v11879_v33 = vld [vmem:[%s15731_s1 + $0xa84] ss:$8 sps:$4 sm:$0xff]   ;;  %9002 = vmatmul.mubr.bf16.gmra.mrb[16].mxu0 %v11861_v28 }
 0x1cc   : > { %v14053_v34 = vor.u32 %v3066_v30, %v3063_v24  ;;  %v11880_v35 = vld [vmem:[%s15731_s1 + $0x490] ss:$8 sps:$4 sm:$0xff]   ;;  %v3058_v38 = vsel %vm13795_vm13, %v3049_v4, %v3057_v23  ;;  %v3059_v40 = vrot.slane %v3057_v23, 4  ;;  %v3235_v42 = vsel %vm12423_vm6, %v3233_v32, %v3234_v25  ;;  %9068 = vmatprep.subr.bf16.mxu0 %v11879_v33  ;;  %v11885_v41 = vld [vmem:[%s15731_s1 + $0xa94] ss:$8 sps:$4 sm:$0xff]  }
 0x1cd   : > { %v11883_v43 = vld [vmem:[%s15731_s1 + $0xa90] ss:$8 sps:$4 sm:$0xff]   ;;  %3153 = vst [vmem:[#allocation2 + $0x430] sm:$0xf] %v3058_v38  ;;  %3283 = vst [vmem:[#allocation2 + $0x498] sm:$0xf] %v3235_v42  ;;  %9069 = vmatpush1.bf16.msra.mxu0 %v11877_v26  ;;  %8333 = vmatpush1.bf16.msra.mxu1 %v11880_v35 }
 0x1ce   : > { %v11886_v44 = vld [vmem:[%s15731_s1 + $0x4a0] ss:$8 sps:$4 sm:$0xff]   ;;  %v1202_v45 = vrot.slane %v14035_v7, 4  ;;  %v3236_v47 = vrot.slane %v3234_v25, 4  ;;  %v3068_v48 = vsel %vm13795_vm13, %v3059_v40, %v14053_v34  ;;  %9070 = vmatprep.subr.bf16.mxu0 %v11885_v41  ;;  %v11888_v49 = vld [vmem:[%s15731_s1 + $0x4a4] ss:$8 sps:$4 sm:$0xff]  }
 0x1cf   : > { %v1081_v37 = vld [vmem:[%s12391_s5 + $0x38] sm:$0xf]  ;;  %v1082_v46 = vld [vmem:[%s12391_s5 + $0x3c] sm:$0xf]  ;;  %3154 = vst [vmem:[#allocation2 + $0x494] sm:$0xf] %v3068_v48  ;;  %8334 = vmatprep.subr.bf16.mxu1 %v11888_v49 }
 0x1d0   : > { %v1204_v50 = vshrl.u32 %v1081_v37, 16  ;;  %v1207_v51 = vshll.u32 %v1081_v37, 16  ;;  %v1213_v52 = vshrl.u32 %v1082_v46, 16  ;;  %v1304_v53 = vld [vmem:[%s12391_s5 + $0x38] sm:$0xf]  ;;  %v3069_v55 = vrot.slane %v14053_v34, 4 }
 0x1d1   : > { %v1216_v54 = vshll.u32 %v1082_v46, 16  ;;  %v1305_v57 = vld [vmem:[%s12391_s5 + $0x3c] sm:$0xf]  ;;  %1322 = vst [vmem:[#allocation2 + $0x4cc] sm:$0xf] %v1304_v53  ;;  %9071 = vmatpush1.bf16.msra.mxu0 %v11883_v43  ;;  %8335 = vmatpush1.bf16.msra.mxu1 %v11886_v44 }
 0x1d2   : > { %v2935_v58 = vld [vmem:[%s12391_s5 + $0x48] sm:$0xf]  ;;  %v11875_v61 = vld [vmem:[#allocation2 + $0x400] ss:$100 sps:$4 sm:$0xff]   ;;  %v1206_v62 = vrot.slane %v1204_v50, 7  ;;  %v14087_v60 = vrot.slane %v1213_v52, 7 }
 0x1d3   : > { %v11871_v59 = vld [vmem:[#allocation2 + $0x404] ss:$100 sps:$4 sm:$0xff]   ;;  %1323 = vst [vmem:[#allocation2 + $0x530] sm:$0xf] %v1305_v57  ;;  %v2936_v0 = vld [vmem:[%s12391_s5 + $0x4c] sm:$0xf] }
 0x1d4   : > { %v3071_v1 = vshrl.u32 %v2935_v58, 16  ;;  %v3074_v4 = vshll.u32 %v2935_v58, 16  ;;  %8273 = vmatprep.mubr.bf16.mxu1 %v11871_v59  ;;  %v1209_v6 = vor.u32 %v1207_v51, %v1206_v62  ;;  %v1211_v7 = vrot.slane %v1206_v62, 4  ;;  %v3174_v10 = vld [vmem:[%s12391_s5 + $0x48] sm:$0xf] }
 0x1d5   : > { %v3081_v8 = vshrl.u32 %v2936_v0, 16  ;;  %v3084_v9 = vshll.u32 %v2936_v0, 16  ;;  %8274 = vmatmul.mubr.bf16.gmra.mrb[20].mxu1 %v11875_v61  ;;  %v1218_v11 = vor.u32 %v1216_v54, %v14087_v60  ;;  %v3175_v15 = vld [vmem:[%s12391_s5 + $0x4c] sm:$0xf]  ;;  %v3237_v17 = vrot.slane %v3174_v10, 7 }
 0x1d6   : > { %v3073_v12 = vrot.slane %v3071_v1, 6  ;;  %v3076_v13 = vrot.slane %v3074_v4, 7  ;;  %v1210_v18 = vsel %vm12467_vm8, %v1202_v45, %v1209_v6  ;;  %v3240_v16 = vrot.slane %v3175_v15, 7  ;;  %v11895_v21 = vld [vmem:[%s15731_s1 + $0xaa0] ss:$8 sps:$4 sm:$0xff]  }
 0x1d7   : > { %v3083_v19 = vrot.slane %v3081_v8, 6  ;;  %v3086_v63 = vrot.slane %v3084_v9, 7  ;;  %v11873_v22 = vld [vmem:[#allocation2 + $0x434] ss:$100 sps:$4 sm:$0xff]   ;;  %v1219_v25 = vsel %vm12467_vm8, %v1211_v7, %v1218_v11  ;;  %1286 = vst [vmem:[#allocation2 + $0x4c8] sm:$0xf] %v1210_v18  ;;  %v3238_v27 = vsel %vm12423_vm6, %v3236_v47, %v3237_v17 }
 0x1d8   : > { %v11876_v24 = vld [vmem:[#allocation2 + $0x430] ss:$100 sps:$4 sm:$0xff]   ;;  %v3077_v26 = vor.u32 %v3076_v13, %v3073_v12  ;;  %v3239_v28 = vrot.slane %v3237_v17, 4  ;;  %1287 = vst [vmem:[#allocation2 + $0x52c] sm:$0xf] %v1219_v25  ;;  %9011 = vmatprep.mubr.bf16.mxu0 %v11873_v22  ;;  %v1220_v38 = vrot.slane %v14087_v60, 4 }
 0x1d9   : > { %v14102_v29 = vor.u32 %v3086_v63, %v3083_v19  ;;  %3284 = vst [vmem:[#allocation2 + $0x4fc] sm:$0xf] %v3238_v27  ;;  %v11897_v30 = vld [vmem:[%s15731_s1 + $0xaa4] ss:$8 sps:$4 sm:$0xff]   ;;  %v11898_v31 = vld [vmem:[%s15731_s1 + $0x4b0] ss:$8 sps:$4 sm:$0xff]   ;;  %9012 = vmatmul.mubr.bf16.gmra.mrb[20].mxu0 %v11876_v24 }
 0x1da   : > { %v3078_v23 = vsel %vm13795_vm13, %v3069_v55, %v3077_v26  ;;  %v3079_v32 = vrot.slane %v3077_v26, 4  ;;  %v3241_v33 = vsel %vm12423_vm6, %v3239_v28, %v3240_v16  ;;  %v11900_v34 = vld [vmem:[%s15731_s1 + $0x4b4] ss:$8 sps:$4 sm:$0xff]   ;;  %9072 = vmatprep.subr.bf16.mxu0 %v11897_v30  ;;  %v11901_v35 = vld [vmem:[%s15731_s1 + $0xab0] ss:$8 sps:$4 sm:$0xff]   ;;  %v3242_v41 = vrot.slane %v3240_v16, 4 }
 0x1db   : > { %3155 = vst [vmem:[#allocation2 + $0x4f8] sm:$0xf] %v3078_v23  ;;  %3285 = vst [vmem:[#allocation2 + $0x560] sm:$0xf] %v3241_v33  ;;  %v11903_v36 = vld [vmem:[%s15731_s1 + $0xab4] ss:$8 sps:$4 sm:$0xff]   ;;  %9073 = vmatpush1.bf16.msra.mxu0 %v11895_v21  ;;  %8336 = vmatprep.subr.bf16.mxu1 %v11900_v34 }
 0x1dc   : > { %v3088_v40 = vsel %vm13795_vm13, %v3079_v32, %v14102_v29  ;;  %v11904_v42 = vld [vmem:[%s15731_s1 + $0x4c0] ss:$8 sps:$4 sm:$0xff]   ;;  %v11906_v43 = vld [vmem:[%s15731_s1 + $0x4c4] ss:$8 sps:$4 sm:$0xff]   ;;  %8337 = vmatpush1.bf16.msra.mxu1 %v11898_v31  ;;  %9074 = vmatprep.subr.bf16.mxu0 %v11903_v36  ;;  %v3089_v50 = vrot.slane %v14102_v29, 4 }
 0x1dd   : > { %3156 = vst [vmem:[#allocation2 + $0x55c] sm:$0xf] %v3088_v40  ;;  %v1083_v44 = vld [vmem:[%s12391_s5 + $0x40] sm:$0xf]  ;;  %v1084_v45 = vld [vmem:[%s12391_s5 + $0x44] sm:$0xf]  ;;  %8338 = vmatprep.subr.bf16.mxu1 %v11906_v43 }
 0x1de   : > { %v1306_v47 = vld [vmem:[%s12391_s5 + $0x40] sm:$0xf]  ;;  %v1222_v48 = vshrl.u32 %v1083_v44, 16  ;;  %v1225_v49 = vshll.u32 %v1083_v44, 16  ;;  %v1231_v37 = vshrl.u32 %v1084_v45, 16  ;;  %v1234_v51 = vshll.u32 %v1084_v45, 16 }
 0x1df   : > { %v1307_v46 = vld [vmem:[%s12391_s5 + $0x44] sm:$0xf]  ;;  %1324 = vst [vmem:[#allocation2 + $0x594] sm:$0xf] %v1306_v47  ;;  %v2937_v52 = vld [vmem:[%s12391_s5 + $0x50] sm:$0xf]  ;;  %9075 = vmatpush1.bf16.msra.mxu0 %v11901_v35 }
 0x1e0   : > { %1325 = vst [vmem:[#allocation2 + $0x5f8] sm:$0xf] %v1307_v46  ;;  %v2938_v53 = vld [vmem:[%s12391_s5 + $0x54] sm:$0xf]  ;;  %v11889_v55 = vld [vmem:[#allocation2 + $0x4cc] ss:$100 sps:$4 sm:$0xff]   ;;  %8339 = vmatpush1.bf16.msra.mxu1 %v11904_v42 }
 0x1e1   : > { %v11893_v54 = vld [vmem:[#allocation2 + $0x4c8] ss:$100 sps:$4 sm:$0xff]   ;;  %v1224_v57 = vrot.slane %v1222_v48, 7  ;;  %v14140_v58 = vrot.slane %v1231_v37, 7  ;;  %v3091_v59 = vshrl.u32 %v2937_v52, 16  ;;  %v3094_v61 = vshll.u32 %v2937_v52, 16  ;;  %8283 = vmatprep.mubr.bf16.mxu1 %v11889_v55 }
 0x1e2   : > { %v3101_v62 = vshrl.u32 %v2938_v53, 16  ;;  %v3176_v60 = vld [vmem:[%s12391_s5 + $0x50] sm:$0xf]  ;;  %v3104_v4 = vshll.u32 %v2938_v53, 16  ;;  %v3177_v6 = vld [vmem:[%s12391_s5 + $0x54] sm:$0xf]  ;;  %8284 = vmatmul.mubr.bf16.gmra.mrb[24].mxu1 %v11893_v54 }
 0x1e3   : > { %v1227_v0 = vor.u32 %v1225_v49, %v1224_v57  ;;  %v1229_v1 = vrot.slane %v1224_v57, 4  ;;  %v3243_v7 = vrot.slane %v3176_v60, 7  ;;  %v1236_v8 = vor.u32 %v1234_v51, %v14140_v58  ;;  %v11891_v12 = vld [vmem:[#allocation2 + $0x4fc] ss:$100 sps:$4 sm:$0xff]   ;;  %v11915_v24 = vld [vmem:[%s15731_s1 + $0xac4] ss:$8 sps:$4 sm:$0xff]  }
 0x1e4   : > { %v3093_v9 = vrot.slane %v3091_v59, 6  ;;  %v3096_v10 = vrot.slane %v3094_v61, 7  ;;  %v3103_v11 = vrot.slane %v3101_v62, 6  ;;  %v11894_v13 = vld [vmem:[#allocation2 + $0x4f8] ss:$100 sps:$4 sm:$0xff]   ;;  %v3106_v17 = vrot.slane %v3104_v4, 7  ;;  %9021 = vmatprep.mubr.bf16.mxu0 %v11891_v12  ;;  %9076 = vmatprep.subr.bf16.mxu0 %v11915_v24 }
 0x1e5   : > { %v1228_v15 = vsel %vm12467_vm8, %v1220_v38, %v1227_v0  ;;  %v3244_v18 = vsel %vm12423_vm6, %v3242_v41, %v3243_v7  ;;  %v1237_v19 = vsel %vm12467_vm8, %v1229_v1, %v1236_v8  ;;  %v3245_v16 = vrot.slane %v3243_v7, 4  ;;  %v11913_v22 = vld [vmem:[%s15731_s1 + $0xac0] ss:$8 sps:$4 sm:$0xff]   ;;  %v11916_v26 = vld [vmem:[%s15731_s1 + $0x4d0] ss:$8 sps:$4 sm:$0xff]   ;;  %9022 = vmatmul.mubr.bf16.gmra.mrb[24].mxu0 %v11894_v13 }
 0x1e6   : > { %1288 = vst [vmem:[#allocation2 + $0x590] sm:$0xf] %v1228_v15  ;;  %v3097_v63 = vor.u32 %v3096_v10, %v3093_v9  ;;  %v3246_v21 = vrot.slane %v3177_v6, 7  ;;  %3286 = vst [vmem:[#allocation2 + $0x5c4] sm:$0xf] %v3244_v18  ;;  %v14157_v25 = vor.u32 %v3106_v17, %v3103_v11  ;;  %v1238_v28 = vrot.slane %v14140_v58, 4  ;;  %9077 = vmatpush1.bf16.msra.mxu0 %v11913_v22 }
 0x1e7   : > { %1289 = vst [vmem:[#allocation2 + $0x5f4] sm:$0xf] %v1237_v19  ;;  %v11918_v27 = vld [vmem:[%s15731_s1 + $0x4d4] ss:$8 sps:$4 sm:$0xff]   ;;  %v11919_v23 = vld [vmem:[%s15731_s1 + $0xad0] ss:$8 sps:$4 sm:$0xff]  }
 0x1e8   : > { %v3098_v29 = vsel %vm13795_vm13, %v3089_v50, %v3097_v63  ;;  %v3099_v30 = vrot.slane %v3097_v63, 4  ;;  %v3247_v31 = vsel %vm12423_vm6, %v3245_v16, %v3246_v21  ;;  %v3248_v32 = vrot.slane %v3246_v21, 4  ;;  %8340 = vmatprep.subr.bf16.mxu1 %v11918_v27  ;;  %v11921_v33 = vld [vmem:[%s15731_s1 + $0xad4] ss:$8 sps:$4 sm:$0xff]   ;;  %v1085_v34 = vld [vmem:[%s12391_s5 + $0x48] sm:$0xf] }
 0x1e9   : > { %3157 = vst [vmem:[#allocation2 + $0x5c0] sm:$0xf] %v3098_v29  ;;  %3287 = vst [vmem:[#allocation2 + $0x628] sm:$0xf] %v3247_v31  ;;  %v1086_v35 = vld [vmem:[%s12391_s5 + $0x4c] sm:$0x3]  ;;  %8341 = vmatpush1.bf16.msra.mxu1 %v11916_v26  ;;  %9078 = vmatprep.subr.bf16.mxu0 %v11921_v33 }
 0x1ea   : > { %v3108_v36 = vsel %vm13795_vm13, %v3099_v30, %v14157_v25  ;;  %v1240_v38 = vshrl.u32 %v1085_v34, 16  ;;  %v1243_v40 = vshll.u32 %v1085_v34, 16  ;;  %v1249_v42 = vshrl.u32 %v1086_v35, 16  ;;  %v1308_v43 = vld [vmem:[%s12391_s5 + $0x48] sm:$0xf]  ;;  %9079 = vmatpush1.bf16.msra.mxu0 %v11919_v23 }
 0x1eb   : > { %3158 = vst [vmem:[#allocation2 + $0x624] sm:$0xf] %v3108_v36  ;;  %v1252_v41 = vshll.u32 %v1086_v35, 16  ;;  %v1309_v44 = vld [vmem:[%s12391_s5 + $0x4c] sm:$0x3]  ;;  %v3109_v50 = vrot.slane %v14157_v25, 4 }
 0x1ec   : > { %1326 = vst [vmem:[#allocation2 + $0x65c] sm:$0xf] %v1308_v43  ;;  %v11924_v45 = vld [vmem:[%s15731_s1 + $0x4e0] ss:$8 sps:$4 sm:$0xff]   ;;  %v1242_v47 = vrot.slane %v1240_v38, 7  ;;  %v1251_v48 = vrot.slane %v1249_v42, 7 }
 0x1ed   : > { %1327 = vst [vmem:[#allocation2 + $0x6c0] sm:$0x3] %v1309_v44  ;;  %v11926_v49 = vld [vmem:[%s15731_s1 + $0x4e4] ss:$8 sps:$4 sm:$0xff]   ;;  %v2939_v37 = vld [vmem:[%s12391_s5 + $0x58] sm:$0xf] }
 0x1ee   : > { %v2940_v46 = vld [vmem:[%s12391_s5 + $0x5c] sm:$0x1]  ;;  %v3111_v51 = vshrl.u32 %v2939_v37, 16  ;;  %v3114_v52 = vshll.u32 %v2939_v37, 16  ;;  %v11907_v53 = vld [vmem:[#allocation2 + $0x594] ss:$100 sps:$4 sm:$0xff]   ;;  %v1245_v54 = vor.u32 %v1243_v40, %v1242_v47  ;;  %v1254_v58 = vor.u32 %v1252_v41, %v1251_v48  ;;  %8342 = vmatprep.subr.bf16.mxu1 %v11926_v49 }
 0x1ef   : > { %v11911_v55 = vld [vmem:[#allocation2 + $0x590] ss:$100 sps:$4 sm:$0xff]   ;;  %v1247_v57 = vrot.slane %v1242_v47, 4  ;;  %v3121_v62 = vshll.u32 %v2940_v46, 16  ;;  %v3178_v60 = vld [vmem:[%s12391_s5 + $0x58] sm:$0xf]  ;;  %8343 = vmatpush1.bf16.msra.mxu1 %v11924_v45  ;;  %8293 = vmatprep.mubr.bf16.mxu1 %v11907_v53 }
 0x1f0   : > { %v3113_v59 = vrot.slane %v3111_v51, 6  ;;  %v3116_v61 = vrot.slane %v3114_v52, 7  ;;  %v1246_v0 = vsel %vm12467_vm8, %v1238_v28, %v1245_v54  ;;  %v3179_v4 = vld [vmem:[%s12391_s5 + $0x5c] sm:$0x1]  ;;  %v3249_v6 = vrot.slane %v3178_v60, 7  ;;  %8294 = vmatmul.mubr.bf16.gmra.mrb[28].mxu1 %v11911_v55 }
 0x1f1   : > { %v1255_v1 = vsel %vm12467_vm8, %v1247_v57, %v1254_v58  ;;  %1290 = vst [vmem:[#allocation2 + $0x658] sm:$0xf] %v1246_v0  ;;  %v3123_v8 = vrot.slane %v3121_v62, 7  ;;  %v3252_v9 = vrot.slane %v3179_v4, 7  ;;  %v11931_v10 = vld [vmem:[%s15731_s1 + $0xae0] ss:$8 sps:$4 sm:$0xff]  }
 0x1f2   : > { %1291 = vst [vmem:[#allocation2 + $0x6bc] sm:$0x3] %v1255_v1  ;;  %v3117_v7 = vor.u32 %v3116_v61, %v3113_v59  ;;  %v11933_v11 = vld [vmem:[%s15731_s1 + $0xae4] ss:$8 sps:$4 sm:$0xff]   ;;  %v3250_v39 = vsel %vm12423_vm6, %v3248_v32, %v3249_v6  ;;  %v3251_v15 = vrot.slane %v3249_v6, 4 }
 0x1f3   : > { %v11909_v12 = vld [vmem:[#allocation2 + $0x5c4] ss:$100 sps:$4 sm:$0xff]   ;;  %3288 = vst [vmem:[#allocation2 + $0x68c] sm:$0xf] %v3250_v39  ;;  %9080 = vmatprep.subr.bf16.mxu0 %v11933_v11  ;;  %v11934_v19 = vld [vmem:[%s15731_s1 + $0x4f0] ss:$8 sps:$4 sm:$0xff]  }
 0x1f4   : > { %v11912_v13 = vld [vmem:[#allocation2 + $0x5c0] ss:$100 sps:$4 sm:$0xff]   ;;  %v3118_v17 = vsel %vm13795_vm13, %v3109_v50, %v3117_v7  ;;  %v3119_v18 = vrot.slane %v3117_v7, 4  ;;  %9031 = vmatprep.mubr.bf16.mxu0 %v11909_v12  ;;  %v3253_v63 = vsel %vm12423_vm6, %v3251_v15, %v3252_v9  ;;  %9081 = vmatpush1.bf16.msra.mxu0 %v11931_v10  ;;  %v11936_v16 = vld [vmem:[%s15731_s1 + $0x4f4] ss:$8 sps:$4 sm:$0xff]   ;;  %vm9583_vm6 = vcmask 1041409  }
 0x1f5   : > { %3159 = vst [vmem:[#allocation2 + $0x688] sm:$0xf] %v3118_v17  ;;  %9032 = vmatmul.mubr.bf16.gmra.mrb[28].mxu0 %v11912_v13  ;;  %3289 = vst [vmem:[#allocation2 + $0x6f0] sm:$0x3] %v3253_v63  ;;  %v11937_v22 = vld [vmem:[%s15731_s1 + $0xaf0] ss:$8 sps:$4 sm:$0xff]   ;;  %8344 = vmatprep.subr.bf16.mxu1 %v11936_v16 }
 0x1f6   : > { %v3124_v21 = vsel %vm13795_vm13, %v3119_v18, %v3123_v8  ;;  %v1328_v24 = vld [vmem:[%s12391_s5 + $0x8] sm:$0xf]  ;;  %v1329_v25 = vld [vmem:[%s12391_s5 + $0xc] sm:$0xf]  ;;  %v14227_v26 = vld [vmem:[%s12391_s5 + $0x10] sm:$0xf]  ;;  %9082 = vmatprep.subr.bf16.mxu0 %v11939_v5  ;;  %8345 = vmatpush1.bf16.msra.mxu1 %v11934_v19 }
 0x1f7   : > { %3160 = vst [vmem:[#allocation2 + $0x6ec] sm:$0x3] %v3124_v21  ;;  %v1347_v27 = vshrl.u32 %v1328_v24, 16  ;;  %v1350_v28 = vshll.u32 %v1328_v24, 16  ;;  %v1356_v29 = vshll.u32 %v1329_v25, 16  ;;  %v1360_v30 = vshrl.u32 %v1329_v25, 16  ;;  %vm15332_vm10 = vmand %vm9583_vm6, %vm1830_vm9 }
 0x1f8   : > { %v1366_v31 = vshll.u32 %v14227_v26, 16  ;;  %v1370_v23 = vshrl.u32 %v14227_v26, 16  ;;  %v1561_v32 = vld [vmem:[%s12391_s5 + $0x8] sm:$0xe]  ;;  %9083 = vmatpush1.bf16.msra.mxu0 %v11937_v22  ;;  %v1562_v43 = vld [vmem:[%s12391_s5 + $0xc] sm:$0xf] }
 0x1f9   : > { %v11922_v33 = vld [vmem:[#allocation2 + $0x65c] ss:$100 sps:$4 sm:$0x3f]   ;;  %v1349_v35 = vrot.slane %v1347_v27, 4  ;;  %v1352_v36 = vrot.slane %v1350_v28, 5  ;;  %v1358_v38 = vrot.slane %v1356_v29, 5 }
 0x1fa   : > { %v11929_v34 = vld [vmem:[#allocation2 + $0x658] ss:$100 sps:$4 sm:$0x3f]   ;;  %8303 = vmatprep.mubr.bf16.mxu1 %v11922_v33  ;;  %v1362_v40 = vrot.slane %v1360_v30, 4  ;;  %v14232_v42 = vrot.slane %v1366_v31, 5  ;;  %v10065_v45 = vrot.slane %v1561_v32, 9 }
 0x1fb   : > { %v1563_v41 = vld [vmem:[%s12391_s5 + $0x10] sm:$0xf]  ;;  %8304 = vmatmul.mubr.bf16.gmra.mrb[32].mxu1 %v11929_v34  ;;  %v1353_v44 = vor.u32 %v1352_v36, %v1349_v35  ;;  %v1599_v47 = vrot.slane %v1562_v43, 5  ;;  %v3290_v49 = vld [vmem:[%s12391_s5 + $0x1c] sm:$0xf]  ;;  %v1372_v19 = vrot.slane %v1370_v23, 4 }
 0x1fc   : > { %v1602_v48 = vrot.slane %v1563_v41, 5  ;;  %v1363_v37 = vor.u32 %v1362_v40, %v1358_v38  ;;  %v3291_v46 = vld [vmem:[%s12391_s5 + $0x20] sm:$0xf]  ;;  %3308 = vst [vmem:[#allocation2 + $0x50] sm:$0xf] %v3290_v49 }
 0x1fd   : > { %v3326_v50 = vld [vmem:[%s12391_s5 + $0x1c] sm:$0xf]  ;;  %v3327_v51 = vld [vmem:[%s12391_s5 + $0x20] sm:$0xf]  ;;  %v1354_v53 = vrot.slane %v1353_v44, 4  ;;  %v1600_v55 = vsel %vm12888_vm11, %v10065_v45, %v1599_v47  ;;  %v1601_v58 = vrot.slane %v1599_v47, 4  ;;  %v1373_v27 = vor.u32 %v1372_v19, %v14232_v42 }
 0x1fe   : > { %v11927_v52 = vld [vmem:[#allocation2 + $0x68c] ss:$100 sps:$4 sm:$0x3f]   ;;  %3309 = vst [vmem:[#allocation2 + $0xb4] sm:$0xf] %v3291_v46  ;;  %v1364_v57 = vrot.slane %v1363_v37, 4 }
 0x1ff   : > { %v11930_v54 = vld [vmem:[#allocation2 + $0x688] ss:$100 sps:$4 sm:$0x3f]   ;;  %1668 = vst [vmem:[#allocation2 + $0x24] sm:$0xf] %v1600_v55  ;;  %v3345_v59 = vshrl.u32 %v3326_v50, 16  ;;  %9041 = vmatprep.mubr.bf16.mxu0 %v11927_v52  ;;  %v1359_v61 = vsel %vm12437_vm7, %v1354_v53, %v1358_v38  ;;  %v1603_v6 = vsel %vm12888_vm11, %v1601_v58, %v1602_v48 }
 0x200   : > { %v3328_v62 = vld [vmem:[%s12391_s5 + $0x24] sm:$0xf]  ;;  %v3348_v60 = vshll.u32 %v3326_v50, 16  ;;  %v3354_v0 = vshll.u32 %v3327_v51, 16  ;;  %v3358_v1 = vshrl.u32 %v3327_v51, 16  ;;  %9042 = vmatmul.mubr.bf16.gmra.mrb[32].mxu0 %v11930_v54  ;;  %v1369_v4 = vsel %vm12437_vm7, %v1364_v57, %v14232_v42 }
 0x201   : > { %1543 = vst [vmem:[#allocation2 + $0x20] sm:$0xf] %v1359_v61  ;;  %v3347_v7 = vrot.slane %v3345_v59, 4  ;;  %v3364_v8 = vshll.u32 %v3328_v62, 16  ;;  %1544 = vst [vmem:[#allocation2 + $0x84] sm:$0xf] %v1369_v4 }
 0x202   : > { %1669 = vst [vmem:[#allocation2 + $0x88] sm:$0xf] %v1603_v6  ;;  %v3350_v9 = vrot.slane %v3348_v60, 5  ;;  %v3356_v10 = vrot.slane %v3354_v0, 5  ;;  %v3360_v11 = vrot.slane %v3358_v1, 4  ;;  %v1604_v63 = vrot.slane %v1602_v48, 4 }
 0x203   : > { %v11948_v12 = vld [vmem:[%s15731_s1 + $0x504] ss:$8 sps:$4 sm:$0xff]   ;;  %v3366_v13 = vrot.slane %v3364_v8, 5  ;;  %v1331_v17 = vld [vmem:[%s12391_s5 + $0x14] sm:$0xf]  ;;  %v3368_v16 = vshrl.u32 %v3328_v62, 16 }
 0x204   : > { %v3351_v39 = vor.u32 %v3350_v9, %v3347_v7  ;;  %v3361_v15 = vor.u32 %v3360_v11, %v3356_v10  ;;  %8437 = vmatprep.subr.bf16.mxu1 %v11948_v12  ;;  %v14255_v18 = vld [vmem:[%s12391_s5 + $0x18] sm:$0xf]  ;;  %v1376_v21 = vshll.u32 %v1331_v17, 16  ;;  %v1380_v22 = vshrl.u32 %v1331_v17, 16  ;;  %v1564_v24 = vld [vmem:[%s12391_s5 + $0x14] sm:$0xf] }
 0x205   : > { %v1386_v5 = vshll.u32 %v14255_v18, 16  ;;  %v1565_v28 = vld [vmem:[%s12391_s5 + $0x18] sm:$0xf]  ;;  %v1605_v29 = vrot.slane %v1564_v24, 5  ;;  %v11946_v30 = vld [vmem:[%s15731_s1 + $0x500] ss:$8 sps:$4 sm:$0xff]  }
 0x206   : > { %v3352_v25 = vrot.slane %v3351_v39, 4  ;;  %v3362_v26 = vrot.slane %v3361_v15, 4  ;;  %v1378_v31 = vrot.slane %v1376_v21, 5  ;;  %v1382_v23 = vrot.slane %v1380_v22, 4  ;;  %v3292_v34 = vld [vmem:[%s12391_s5 + $0x24] sm:$0xf] }
 0x207   : > { %v14264_v32 = vrot.slane %v1386_v5, 5  ;;  %v1608_v33 = vrot.slane %v1565_v28, 5  ;;  %v11951_v38 = vld [vmem:[%s15731_s1 + $0x514] ss:$8 sps:$4 sm:$0xff]   ;;  %v1374_v40 = vrot.slane %v1373_v27, 4  ;;  %v1606_v42 = vsel %vm12888_vm11, %v1604_v63, %v1605_v29 }
 0x208   : > { %v3357_v35 = vsel %vm12437_vm7, %v3352_v25, %v3356_v10  ;;  %v3367_v36 = vsel %vm12437_vm7, %v3362_v26, %v3366_v13  ;;  %v3293_v43 = vld [vmem:[%s12391_s5 + $0x28] sm:$0xf]  ;;  %3310 = vst [vmem:[#allocation2 + $0x118] sm:$0xf] %v3292_v34  ;;  %v11940_v44 = vld [vmem:[#allocation2 + $0x20] ss:$100 sps:$4 sm:$0xff]   ;;  %v1383_v47 = vor.u32 %v1382_v23, %v1378_v31 }
 0x209   : > { %v3329_v41 = vld [vmem:[%s12391_s5 + $0x28] sm:$0xf]  ;;  %3541 = vst [vmem:[#allocation2 + $0x54] sm:$0xf] %v3357_v35  ;;  %3542 = vst [vmem:[#allocation2 + $0xb8] sm:$0xf] %v3367_v36  ;;  %v1379_v49 = vsel %vm12437_vm7, %v1374_v40, %v1378_v31 }
 0x20a   : > { %v11942_v45 = vld [vmem:[#allocation2 + $0x24] ss:$100 sps:$4 sm:$0xff]   ;;  %v1607_v48 = vrot.slane %v1605_v29, 4  ;;  %1670 = vst [vmem:[#allocation2 + $0xec] sm:$0xf] %v1606_v42  ;;  %v3370_v46 = vrot.slane %v3368_v16, 4 }
 0x20b   : > { %3311 = vst [vmem:[#allocation2 + $0x17c] sm:$0xf] %v3293_v43  ;;  %v3330_v37 = vld [vmem:[%s12391_s5 + $0x2c] sm:$0xf]  ;;  %v3374_v50 = vshll.u32 %v3329_v41, 16  ;;  %v3378_v51 = vshrl.u32 %v3329_v41, 16  ;;  %8346 = vmatprep.mubr.bf16.mxu1 %v11942_v45 }
 0x20c   : > { %v1384_v52 = vrot.slane %v1383_v47, 4  ;;  %v1390_v53 = vshrl.u32 %v14255_v18, 16  ;;  %1545 = vst [vmem:[#allocation2 + $0xe8] sm:$0xf] %v1379_v49  ;;  %v1609_v55 = vsel %vm12888_vm11, %v1607_v48, %v1608_v33  ;;  %v3384_v54 = vshll.u32 %v3330_v37, 16  ;;  %8347 = vmatmul.mubr.bf16.vlgmr.msra.gmra.mrb[0].mxu1 %v11940_v44 }
 0x20d   : > { %1671 = vst [vmem:[#allocation2 + $0x150] sm:$0xf] %v1609_v55  ;;  %v3371_v57 = vor.u32 %v3370_v46, %v3366_v13  ;;  %v3376_v58 = vrot.slane %v3374_v50, 5  ;;  %v3380_v59 = vrot.slane %v3378_v51, 4  ;;  %v11960_v61 = vld [vmem:[%s15731_s1 + $0xb04] ss:$8 sps:$4 sm:$0xff]   ;;  %8438 = vmatpush1.bf16.msra.mxu1 %v11946_v30 }
 0x20e   : > { %v11949_v62 = vld [vmem:[%s15731_s1 + $0x510] ss:$8 sps:$4 sm:$0xff]   ;;  %v1389_v60 = vsel %vm12437_vm7, %v1384_v52, %v14264_v32  ;;  %8439 = vmatprep.subr.bf16.mxu1 %v11951_v38  ;;  %v3386_v4 = vrot.slane %v3384_v54, 5  ;;  %v3388_v6 = vshrl.u32 %v3330_v37, 16  ;;  %9175 = vmatprep.subr.bf16.mxu0 %v11960_v61  ;;  %v11963_v7 = vld [vmem:[%s15731_s1 + $0x524] ss:$8 sps:$4 sm:$0xff]  }
 0x20f   : > { %1546 = vst [vmem:[#allocation2 + $0x14c] sm:$0xf] %v1389_v60  ;;  %v3372_v0 = vrot.slane %v3371_v57, 4  ;;  %v3381_v1 = vor.u32 %v3380_v59, %v3376_v58  ;;  %v11958_v8 = vld [vmem:[%s15731_s1 + $0xb00] ss:$8 sps:$4 sm:$0xff]   ;;  %v1392_v10 = vrot.slane %v1390_v53, 4 }
 0x210   : > { %v11961_v9 = vld [vmem:[%s15731_s1 + $0x520] ss:$8 sps:$4 sm:$0xff]   ;;  %v11943_v11 = vld [vmem:[#allocation2 + $0x50] ss:$100 sps:$4 sm:$0xff]   ;;  %v1610_v17 = vrot.slane %v1608_v33, 4  ;;  %v3390_v23 = vrot.slane %v3388_v6, 4 }
 0x211   : > { %v3377_v12 = vsel %vm12437_vm7, %v3372_v0, %v3376_v58  ;;  %v3382_v13 = vrot.slane %v3381_v1, 4  ;;  %v11966_v39 = vld [vmem:[%s15731_s1 + $0xb14] ss:$8 sps:$4 sm:$0xff]   ;;  %8440 = vmatpush1.bf16.msra.mxu1 %v11949_v62  ;;  %v14312_v63 = vld [vmem:[%s12391_s5 + $0x20] sm:$0xf]  ;;  %v1393_v16 = vor.u32 %v1392_v10, %v14264_v32 }
 0x212   : > { %v11969_v15 = vld [vmem:[%s15731_s1 + $0x534] ss:$8 sps:$4 sm:$0xff]   ;;  %3543 = vst [vmem:[#allocation2 + $0x11c] sm:$0xf] %v3377_v12  ;;  %8441 = vmatprep.subr.bf16.mxu1 %v11963_v7  ;;  %v1406_v24 = vshll.u32 %v14312_v63, 16  ;;  %v1410_v29 = vshrl.u32 %v14312_v63, 16  ;;  %v3391_v41 = vor.u32 %v3390_v23, %v3386_v4 }
 0x213   : > { %v11945_v18 = vld [vmem:[#allocation2 + $0x54] ss:$100 sps:$4 sm:$0xff]   ;;  %v1333_v19 = vld [vmem:[%s12391_s5 + $0x1c] sm:$0xf]  ;;  %v3387_v21 = vsel %vm12437_vm7, %v3382_v13, %v3386_v4  ;;  %v1394_v28 = vrot.slane %v1393_v16, 4 }
 0x214   : > { %v1396_v22 = vshll.u32 %v1333_v19, 16  ;;  %v1400_v5 = vshrl.u32 %v1333_v19, 16  ;;  %v1566_v25 = vld [vmem:[%s12391_s5 + $0x1c] sm:$0xf]  ;;  %9084 = vmatprep.mubr.bf16.mxu0 %v11945_v18  ;;  %3544 = vst [vmem:[#allocation2 + $0x180] sm:$0xf] %v3387_v21 }
 0x215   : > { %v11964_v26 = vld [vmem:[%s15731_s1 + $0xb10] ss:$8 sps:$4 sm:$0xff]   ;;  %v14327_v30 = vld [vmem:[%s12391_s5 + $0x20] sm:$0xf]  ;;  %v1611_v31 = vrot.slane %v1566_v25, 5  ;;  %9085 = vmatmul.mubr.bf16.vlgmr.msra.gmra.mrb[0].mxu0 %v11943_v11  ;;  %v14329_v34 = vrot.slane %v1406_v24, 5  ;;  %8442 = vmatpush1.bf16.msra.mxu1 %v11961_v9 }
 0x216   : > { %v11967_v27 = vld [vmem:[%s15731_s1 + $0x530] ss:$8 sps:$4 sm:$0xff]   ;;  %v1398_v32 = vrot.slane %v1396_v22, 5  ;;  %v1402_v33 = vrot.slane %v1400_v5, 4  ;;  %v1614_v35 = vrot.slane %v14327_v30, 5  ;;  %9176 = vmatpush1.bf16.msra.mxu0 %v11958_v8  ;;  %8443 = vmatprep.subr.bf16.mxu1 %v11969_v15  ;;  %v3392_v46 = vrot.slane %v3391_v41, 4 }
 0x217   : > { %v3294_v36 = vld [vmem:[%s12391_s5 + $0x2c] sm:$0xf]  ;;  %v1612_v42 = vsel %vm12888_vm11, %v1610_v17, %v1611_v31  ;;  %v1613_v43 = vrot.slane %v1611_v31, 4  ;;  %9177 = vmatprep.subr.bf16.mxu0 %v11966_v39  ;;  %v3295_v47 = vld [vmem:[%s12391_s5 + $0x30] sm:$0xf]  ;;  %v1412_v8 = vrot.slane %v1410_v29, 4 }
 0x218   : > { %v11952_v38 = vld [vmem:[#allocation2 + $0xec] ss:$100 sps:$4 sm:$0xff]   ;;  %3312 = vst [vmem:[#allocation2 + $0x1e0] sm:$0xf] %v3294_v36  ;;  %v1399_v44 = vsel %vm12437_vm7, %v1394_v28, %v1398_v32  ;;  %v1403_v45 = vor.u32 %v1402_v33, %v1398_v32  ;;  %1672 = vst [vmem:[#allocation2 + $0x1b4] sm:$0xf] %v1612_v42 }
 0x219   : > { %v11956_v40 = vld [vmem:[#allocation2 + $0xe8] ss:$100 sps:$4 sm:$0xff]   ;;  %v3331_v48 = vld [vmem:[%s12391_s5 + $0x30] sm:$0xf]  ;;  %v3332_v49 = vld [vmem:[%s12391_s5 + $0x34] sm:$0xf]  ;;  %8356 = vmatprep.mubr.bf16.mxu1 %v11952_v38  ;;  %v1615_v37 = vsel %vm12888_vm11, %v1613_v43, %v1614_v35  ;;  %8444 = vmatpush1.bf16.msra.mxu1 %v11967_v27  ;;  %v1413_v39 = vor.u32 %v1412_v8, %v14329_v34 }
 0x21a   : > { %1547 = vst [vmem:[#allocation2 + $0x1b0] sm:$0xf] %v1399_v44  ;;  %3313 = vst [vmem:[#allocation2 + $0x244] sm:$0xf] %v3295_v47  ;;  %v3394_v50 = vshll.u32 %v3331_v48, 16  ;;  %v3398_v51 = vshrl.u32 %v3331_v48, 16  ;;  %8357 = vmatmul.mubr.bf16.gmra.mrb[4].mxu1 %v11956_v40  ;;  %9178 = vmatpush1.bf16.msra.mxu0 %v11964_v26 }
 0x21b   : > { %v1404_v52 = vrot.slane %v1403_v45, 4  ;;  %1673 = vst [vmem:[#allocation2 + $0x218] sm:$0xf] %v1615_v37  ;;  %v3404_v53 = vshll.u32 %v3332_v49, 16  ;;  %v3408_v55 = vshrl.u32 %v3332_v49, 16  ;;  %v1616_v16 = vrot.slane %v1614_v35, 4 }
 0x21c   : > { %v11976_v54 = vld [vmem:[%s15731_s1 + $0xb20] ss:$8 sps:$4 sm:$0xff]   ;;  %v3396_v57 = vrot.slane %v3394_v50, 5  ;;  %v3400_v58 = vrot.slane %v3398_v51, 4  ;;  %v11978_v59 = vld [vmem:[%s15731_s1 + $0xb24] ss:$8 sps:$4 sm:$0xff]  }
 0x21d   : > { %v11954_v61 = vld [vmem:[#allocation2 + $0x11c] ss:$100 sps:$4 sm:$0xff]   ;;  %v1409_v60 = vsel %vm12437_vm7, %v1404_v52, %v14329_v34  ;;  %v3406_v0 = vrot.slane %v3404_v53, 5  ;;  %9179 = vmatprep.subr.bf16.mxu0 %v11978_v59  ;;  %v11981_v7 = vld [vmem:[%s15731_s1 + $0x544] ss:$8 sps:$4 sm:$0xff]   ;;  %v1414_v22 = vrot.slane %v1413_v39, 4 }
 0x21e   : > { %v11957_v62 = vld [vmem:[#allocation2 + $0x118] ss:$100 sps:$4 sm:$0xff]   ;;  %1548 = vst [vmem:[#allocation2 + $0x214] sm:$0xf] %v1409_v60  ;;  %v3397_v1 = vsel %vm12437_vm7, %v3392_v46, %v3396_v57  ;;  %v3401_v4 = vor.u32 %v3400_v58, %v3396_v57  ;;  %v11979_v6 = vld [vmem:[%s15731_s1 + $0x540] ss:$8 sps:$4 sm:$0xff]   ;;  %9094 = vmatprep.mubr.bf16.mxu0 %v11954_v61  ;;  %8445 = vmatprep.subr.bf16.mxu1 %v11981_v7 }
 0x21f   : > { %3545 = vst [vmem:[#allocation2 + $0x1e4] sm:$0xf] %v3397_v1  ;;  %v11982_v9 = vld [vmem:[%s15731_s1 + $0xb30] ss:$8 sps:$4 sm:$0xff]   ;;  %v11984_v10 = vld [vmem:[%s15731_s1 + $0xb34] ss:$8 sps:$4 sm:$0xff]   ;;  %9095 = vmatmul.mubr.bf16.gmra.mrb[4].mxu0 %v11957_v62  ;;  %8446 = vmatpush1.bf16.msra.mxu1 %v11979_v6 }
 0x220   : > { %v1335_v11 = vld [vmem:[%s12391_s5 + $0x24] sm:$0xf]  ;;  %v3402_v12 = vrot.slane %v3401_v4, 4  ;;  %v14369_v13 = vld [vmem:[%s12391_s5 + $0x28] sm:$0xf]  ;;  %9180 = vmatpush1.bf16.msra.mxu0 %v11976_v54  ;;  %v3410_v30 = vrot.slane %v3408_v55, 4 }
 0x221   : > { %v1416_v15 = vshll.u32 %v1335_v11, 16  ;;  %v1420_v17 = vshrl.u32 %v1335_v11, 16  ;;  %v1426_v18 = vshll.u32 %v14369_v13, 16  ;;  %v1430_v19 = vshrl.u32 %v14369_v13, 16  ;;  %v1568_v63 = vld [vmem:[%s12391_s5 + $0x24] sm:$0xf]  ;;  %9181 = vmatprep.subr.bf16.mxu0 %v11984_v10 }
 0x222   : > { %v3407_v21 = vsel %vm12437_vm7, %v3402_v12, %v3406_v0  ;;  %v14380_v25 = vld [vmem:[%s12391_s5 + $0x28] sm:$0xf]  ;;  %v1617_v27 = vrot.slane %v1568_v63, 5  ;;  %v11987_v29 = vld [vmem:[%s15731_s1 + $0x550] ss:$8 sps:$4 sm:$0xff]   ;;  %v3411_v42 = vor.u32 %v3410_v30, %v3406_v0 }
 0x223   : > { %v1418_v5 = vrot.slane %v1416_v15, 5  ;;  %v1422_v24 = vrot.slane %v1420_v17, 4  ;;  %3546 = vst [vmem:[#allocation2 + $0x248] sm:$0xf] %v3407_v21  ;;  %v14382_v26 = vrot.slane %v1426_v18, 5  ;;  %v1620_v28 = vrot.slane %v14380_v25, 5 }
 0x224   : > { %v11989_v32 = vld [vmem:[%s15731_s1 + $0x554] ss:$8 sps:$4 sm:$0xff]   ;;  %v3297_v34 = vld [vmem:[%s12391_s5 + $0x38] sm:$0xf]  ;;  %9182 = vmatpush1.bf16.msra.mxu0 %v11982_v9  ;;  %v1618_v38 = vsel %vm12888_vm11, %v1616_v16, %v1617_v27  ;;  %v1619_v40 = vrot.slane %v1617_v27, 4  ;;  %v3412_v47 = vrot.slane %v3411_v42, 4 }
 0x225   : > { %v1419_v31 = vsel %vm12437_vm7, %v1414_v22, %v1418_v5  ;;  %v1423_v23 = vor.u32 %v1422_v24, %v1418_v5  ;;  %v3296_v33 = vld [vmem:[%s12391_s5 + $0x34] sm:$0xf]  ;;  %3315 = vst [vmem:[#allocation2 + $0x30c] sm:$0xf] %v3297_v34  ;;  %1674 = vst [vmem:[#allocation2 + $0x27c] sm:$0xf] %v1618_v38  ;;  %8447 = vmatprep.subr.bf16.mxu1 %v11989_v32 }
 0x226   : > { %v11970_v35 = vld [vmem:[#allocation2 + $0x1b4] ss:$100 sps:$4 sm:$0xff]   ;;  %1549 = vst [vmem:[#allocation2 + $0x278] sm:$0xf] %v1419_v31  ;;  %3314 = vst [vmem:[#allocation2 + $0x2a8] sm:$0xf] %v3296_v33  ;;  %v1621_v45 = vsel %vm12888_vm11, %v1619_v40, %v1620_v28  ;;  %8448 = vmatpush1.bf16.msra.mxu1 %v11987_v29 }
 0x227   : > { %v11974_v36 = vld [vmem:[#allocation2 + $0x1b0] ss:$100 sps:$4 sm:$0xff]   ;;  %v1424_v43 = vrot.slane %v1423_v23, 4  ;;  %v3333_v41 = vld [vmem:[%s12391_s5 + $0x38] sm:$0xf]  ;;  %8366 = vmatprep.mubr.bf16.mxu1 %v11970_v35  ;;  %v1432_v1 = vrot.slane %v1430_v19, 4 }
 0x228   : > { %v14399_v44 = vld [vmem:[%s12391_s5 + $0x3c] sm:$0xf]  ;;  %v3414_v48 = vshll.u32 %v3333_v41, 16  ;;  %v3418_v49 = vshrl.u32 %v3333_v41, 16  ;;  %8367 = vmatmul.mubr.bf16.gmra.mrb[8].mxu1 %v11974_v36  ;;  %1675 = vst [vmem:[#allocation2 + $0x2e0] sm:$0xf] %v1621_v45 }
 0x229   : > { %v1429_v37 = vsel %vm12437_vm7, %v1424_v43, %v14382_v26  ;;  %v3424_v46 = vshll.u32 %v14399_v44, 16  ;;  %v3428_v50 = vshrl.u32 %v14399_v44, 16  ;;  %v11994_v51 = vld [vmem:[%s15731_s1 + $0xb40] ss:$8 sps:$4 sm:$0xff]   ;;  %v11996_v52 = vld [vmem:[%s15731_s1 + $0xb44] ss:$8 sps:$4 sm:$0xff]   ;;  %v1433_v9 = vor.u32 %v1432_v1, %v14382_v26 }
 0x22a   : > { %1550 = vst [vmem:[#allocation2 + $0x2dc] sm:$0xf] %v1429_v37  ;;  %v3416_v53 = vrot.slane %v3414_v48, 5  ;;  %v3420_v55 = vrot.slane %v3418_v49, 4  ;;  %v11997_v54 = vld [vmem:[%s15731_s1 + $0x560] ss:$8 sps:$4 sm:$0xff]   ;;  %9183 = vmatprep.subr.bf16.mxu0 %v11996_v52 }
 0x22b   : > { %v11972_v57 = vld [vmem:[#allocation2 + $0x1e4] ss:$100 sps:$4 sm:$0xff]   ;;  %v14419_v59 = vrot.slane %v3424_v46, 5  ;;  %9184 = vmatpush1.bf16.msra.mxu0 %v11994_v51  ;;  %v12000_v0 = vld [vmem:[%s15731_s1 + $0xb50] ss:$8 sps:$4 sm:$0xff]   ;;  %v1622_v17 = vrot.slane %v1620_v28, 4 }
 0x22c   : > { %v11975_v58 = vld [vmem:[#allocation2 + $0x1e0] ss:$100 sps:$4 sm:$0xff]   ;;  %v3417_v61 = vsel %vm12437_vm7, %v3412_v47, %v3416_v53  ;;  %v3421_v62 = vor.u32 %v3420_v55, %v3416_v53  ;;  %9104 = vmatprep.mubr.bf16.mxu0 %v11972_v57  ;;  %v12002_v4 = vld [vmem:[%s15731_s1 + $0xb54] ss:$8 sps:$4 sm:$0xff]   ;;  %v1337_v6 = vld [vmem:[%s12391_s5 + $0x2c] sm:$0xf] }
 0x22d   : > { %v11999_v60 = vld [vmem:[%s15731_s1 + $0x564] ss:$8 sps:$4 sm:$0xff]   ;;  %3547 = vst [vmem:[#allocation2 + $0x2ac] sm:$0xf] %v3417_v61  ;;  %v14434_v7 = vld [vmem:[%s12391_s5 + $0x30] sm:$0xf]  ;;  %9105 = vmatmul.mubr.bf16.gmra.mrb[8].mxu0 %v11975_v58  ;;  %9185 = vmatprep.subr.bf16.mxu0 %v12002_v4 }
 0x22e   : > { %v3422_v8 = vrot.slane %v3421_v62, 4  ;;  %8449 = vmatprep.subr.bf16.mxu1 %v11999_v60  ;;  %v1436_v10 = vshll.u32 %v1337_v6, 16  ;;  %v1440_v11 = vshrl.u32 %v1337_v6, 16  ;;  %v1570_v12 = vld [vmem:[%s12391_s5 + $0x2c] sm:$0xf]  ;;  %v1446_v13 = vshll.u32 %v14434_v7, 16 }
 0x22f   : > { %8450 = vmatpush1.bf16.msra.mxu1 %v11997_v54  ;;  %v1450_v39 = vshrl.u32 %v14434_v7, 16  ;;  %v1571_v15 = vld [vmem:[%s12391_s5 + $0x30] sm:$0xf]  ;;  %v1623_v18 = vrot.slane %v1570_v12, 5  ;;  %9186 = vmatpush1.bf16.msra.mxu0 %v12000_v0  ;;  %v1434_v63 = vrot.slane %v1433_v9, 4  ;;  %v3430_v33 = vrot.slane %v3428_v50, 4 }
 0x230   : > { %v3427_v19 = vsel %vm12437_vm7, %v3422_v8, %v14419_v59  ;;  %v1438_v16 = vrot.slane %v1436_v10, 5  ;;  %v1442_v21 = vrot.slane %v1440_v11, 4  ;;  %v3298_v22 = vld [vmem:[%s12391_s5 + $0x3c] sm:$0xf]  ;;  %v14447_v26 = vrot.slane %v1446_v13, 5 }
 0x231   : > { %v11985_v5 = vld [vmem:[#allocation2 + $0x27c] ss:$100 sps:$4 sm:$0xff]   ;;  %3548 = vst [vmem:[#allocation2 + $0x310] sm:$0xf] %v3427_v19  ;;  %v1624_v25 = vsel %vm12888_vm11, %v1622_v17, %v1623_v18  ;;  %3316 = vst [vmem:[#allocation2 + $0x370] sm:$0xf] %v3298_v22  ;;  %v3431_v41 = vor.u32 %v3430_v33, %v14419_v59 }
 0x232   : > { %v11992_v24 = vld [vmem:[#allocation2 + $0x278] ss:$100 sps:$4 sm:$0xff]   ;;  %v1439_v27 = vsel %vm12437_vm7, %v1434_v63, %v1438_v16  ;;  %v1443_v28 = vor.u32 %v1442_v21, %v1438_v16  ;;  %v1625_v29 = vrot.slane %v1623_v18, 4  ;;  %v1626_v30 = vrot.slane %v1571_v15, 5  ;;  %1676 = vst [vmem:[#allocation2 + $0x344] sm:$0xf] %v1624_v25  ;;  %8376 = vmatprep.mubr.bf16.mxu1 %v11985_v5 }
 0x233   : > { %v3299_v31 = vld [vmem:[%s12391_s5 + $0x40] sm:$0xf]  ;;  %1551 = vst [vmem:[#allocation2 + $0x340] sm:$0xf] %v1439_v27  ;;  %v3336_v32 = vld [vmem:[%s12391_s5 + $0x44] sm:$0xf]  ;;  %8377 = vmatmul.mubr.bf16.gmra.mrb[12].mxu1 %v11992_v24 }
 0x234   : > { %v3335_v23 = vld [vmem:[%s12391_s5 + $0x40] sm:$0xf]  ;;  %3317 = vst [vmem:[#allocation2 + $0x3d4] sm:$0xf] %v3299_v31  ;;  %v1444_v36 = vrot.slane %v1443_v28, 4  ;;  %v1627_v38 = vsel %vm12888_vm11, %v1625_v29, %v1626_v30  ;;  %v3444_v40 = vshll.u32 %v3336_v32, 16 }
 0x235   : > { %v3434_v34 = vshll.u32 %v3335_v23, 16  ;;  %v3438_v35 = vshrl.u32 %v3335_v23, 16  ;;  %v3448_v42 = vshrl.u32 %v3336_v32, 16  ;;  %v12008_v43 = vld [vmem:[%s15731_s1 + $0x570] ss:$8 sps:$4 sm:$0xff]   ;;  %v3432_v50 = vrot.slane %v3431_v41, 4 }
 0x236   : > { %1677 = vst [vmem:[#allocation2 + $0x3a8] sm:$0xf] %v1627_v38  ;;  %v12010_v47 = vld [vmem:[%s15731_s1 + $0x574] ss:$8 sps:$4 sm:$0xff]   ;;  %v1449_v48 = vsel %vm12437_vm7, %v1444_v36, %v14447_v26  ;;  %v3446_v49 = vrot.slane %v3444_v40, 5  ;;  %v1452_v57 = vrot.slane %v1450_v39, 4 }
 0x237   : > { %v3436_v44 = vrot.slane %v3434_v34, 5  ;;  %v3440_v45 = vrot.slane %v3438_v35, 4  ;;  %v12012_v37 = vld [vmem:[%s15731_s1 + $0xb60] ss:$8 sps:$4 sm:$0xff]   ;;  %v12014_v46 = vld [vmem:[%s15731_s1 + $0xb64] ss:$8 sps:$4 sm:$0xff]   ;;  %8451 = vmatprep.subr.bf16.mxu1 %v12010_v47 }
 0x238   : > { %1552 = vst [vmem:[#allocation2 + $0x3a4] sm:$0xf] %v1449_v48  ;;  %v12015_v52 = vld [vmem:[%s15731_s1 + $0x580] ss:$8 sps:$4 sm:$0xff]   ;;  %v12017_v53 = vld [vmem:[%s15731_s1 + $0x584] ss:$8 sps:$4 sm:$0xff]   ;;  %9187 = vmatprep.subr.bf16.mxu0 %v12014_v46  ;;  %8452 = vmatpush1.bf16.msra.mxu1 %v12008_v43  ;;  %v1453_v1 = vor.u32 %v1452_v57, %v14447_v26 }
 0x239   : > { %v3441_v51 = vor.u32 %v3440_v45, %v3436_v44  ;;  %v11990_v55 = vld [vmem:[#allocation2 + $0x2ac] ss:$100 sps:$4 sm:$0xff]   ;;  %v3437_v58 = vsel %vm12437_vm7, %v3432_v50, %v3436_v44  ;;  %9188 = vmatpush1.bf16.msra.mxu0 %v12012_v37  ;;  %8453 = vmatprep.subr.bf16.mxu1 %v12017_v53  ;;  %v1628_v62 = vrot.slane %v1626_v30, 4  ;;  %v12020_v60 = vld [vmem:[%s15731_s1 + $0xb74] ss:$8 sps:$4 sm:$0xff]   ;;  %v3450_v4 = vrot.slane %v3448_v42, 4 }
 0x23a   : > { %v11993_v54 = vld [vmem:[#allocation2 + $0x2a8] ss:$100 sps:$4 sm:$0xff]   ;;  %v12018_v61 = vld [vmem:[%s15731_s1 + $0xb70] ss:$8 sps:$4 sm:$0xff]   ;;  %9114 = vmatprep.mubr.bf16.mxu0 %v11990_v55  ;;  %3549 = vst [vmem:[#allocation2 + $0x374] sm:$0xf] %v3437_v58  ;;  %9189 = vmatprep.subr.bf16.mxu0 %v12020_v60 }
 0x23b   : > { %v3442_v59 = vrot.slane %v3441_v51, 4  ;;  %v1339_v0 = vld [vmem:[%s12391_s5 + $0x34] sm:$0xf]  ;;  %9115 = vmatmul.mubr.bf16.gmra.mrb[12].mxu0 %v11993_v54  ;;  %v1340_v7 = vld [vmem:[%s12391_s5 + $0x38] sm:$0xf]  ;;  %v1454_v11 = vrot.slane %v1453_v1, 4  ;;  %v3451_v16 = vor.u32 %v3450_v4, %v3446_v49 }
 0x23c   : > { %v1456_v8 = vshll.u32 %v1339_v0, 16  ;;  %v1460_v9 = vshrl.u32 %v1339_v0, 16  ;;  %v1572_v10 = vld [vmem:[%s12391_s5 + $0x34] sm:$0xf]  ;;  %8454 = vmatpush1.bf16.msra.mxu1 %v12015_v52  ;;  %v1466_v12 = vshll.u32 %v1340_v7, 16  ;;  %v1470_v13 = vshrl.u32 %v1340_v7, 16 }
 0x23d   : > { %v3447_v6 = vsel %vm12437_vm7, %v3442_v59, %v3446_v49  ;;  %v1573_v39 = vld [vmem:[%s12391_s5 + $0x38] sm:$0xf]  ;;  %v1629_v15 = vrot.slane %v1572_v10, 5  ;;  %9190 = vmatpush1.bf16.msra.mxu0 %v12018_v61  ;;  %v3300_v63 = vld [vmem:[%s12391_s5 + $0x44] sm:$0xf]  ;;  %v3452_v30 = vrot.slane %v3451_v16, 4 }
 0x23e   : > { %3550 = vst [vmem:[#allocation2 + $0x3d8] sm:$0xf] %v3447_v6  ;;  %v1458_v17 = vrot.slane %v1456_v8, 5  ;;  %v1462_v18 = vrot.slane %v1460_v9, 4  ;;  %v1632_v19 = vrot.slane %v1573_v39, 5  ;;  %v1468_v5 = vrot.slane %v1466_v12, 5 }
 0x23f   : > { %v12003_v21 = vld [vmem:[#allocation2 + $0x344] ss:$100 sps:$4 sm:$0xff]   ;;  %v1630_v24 = vsel %vm12888_vm11, %v1628_v62, %v1629_v15  ;;  %3318 = vst [vmem:[#allocation2 + $0x438] sm:$0xf] %v3300_v63  ;;  %v1631_v27 = vrot.slane %v1629_v15, 4  ;;  %v1472_v50 = vrot.slane %v1470_v13, 4 }
 0x240   : > { %v12007_v22 = vld [vmem:[#allocation2 + $0x340] ss:$100 sps:$4 sm:$0xff]   ;;  %v1459_v26 = vsel %vm12437_vm7, %v1454_v11, %v1458_v17  ;;  %v1463_v25 = vor.u32 %v1462_v18, %v1458_v17  ;;  %1678 = vst [vmem:[#allocation2 + $0x40c] sm:$0xf] %v1630_v24  ;;  %v3301_v28 = vld [vmem:[%s12391_s5 + $0x48] sm:$0xf]  ;;  %8386 = vmatprep.mubr.bf16.mxu1 %v12003_v21 }
 0x241   : > { %v3337_v29 = vld [vmem:[%s12391_s5 + $0x48] sm:$0xf]  ;;  %1553 = vst [vmem:[#allocation2 + $0x408] sm:$0xf] %v1459_v26  ;;  %3319 = vst [vmem:[#allocation2 + $0x49c] sm:$0xf] %v3301_v28  ;;  %8387 = vmatmul.mubr.bf16.gmra.mrb[16].mxu1 %v12007_v22  ;;  %v1633_v34 = vsel %vm12888_vm11, %v1631_v27, %v1632_v19  ;;  %v1473_v58 = vor.u32 %v1472_v50, %v1468_v5 }
 0x242   : > { %v3338_v31 = vld [vmem:[%s12391_s5 + $0x4c] sm:$0xf]  ;;  %v3454_v23 = vshll.u32 %v3337_v29, 16  ;;  %v3458_v32 = vshrl.u32 %v3337_v29, 16  ;;  %v1464_v33 = vrot.slane %v1463_v25, 4  ;;  %v1634_v53 = vrot.slane %v1632_v19, 4 }
 0x243   : > { %v3464_v35 = vshll.u32 %v3338_v31, 16  ;;  %v3468_v36 = vshrl.u32 %v3338_v31, 16  ;;  %v12027_v38 = vld [vmem:[%s15731_s1 + $0xb80] ss:$8 sps:$4 sm:$0xff]   ;;  %1679 = vst [vmem:[#allocation2 + $0x470] sm:$0xf] %v1633_v34 }
 0x244   : > { %v3456_v40 = vrot.slane %v3454_v23, 5  ;;  %v3460_v42 = vrot.slane %v3458_v32, 4  ;;  %v12029_v43 = vld [vmem:[%s15731_s1 + $0xb84] ss:$8 sps:$4 sm:$0xff]   ;;  %v12011_v44 = vld [vmem:[#allocation2 + $0x370] ss:$100 sps:$4 sm:$0xff]   ;;  %v1469_v45 = vsel %vm12437_vm7, %v1464_v33, %v1468_v5 }
 0x245   : > { %v12005_v41 = vld [vmem:[#allocation2 + $0x374] ss:$100 sps:$4 sm:$0xff]   ;;  %v3466_v47 = vrot.slane %v3464_v35, 5  ;;  %1554 = vst [vmem:[#allocation2 + $0x46c] sm:$0xf] %v1469_v45  ;;  %9191 = vmatprep.subr.bf16.mxu0 %v12029_v43  ;;  %v3470_v62 = vrot.slane %v3468_v36, 4 }
 0x246   : > { %v3457_v48 = vsel %vm12437_vm7, %v3452_v30, %v3456_v40  ;;  %v3461_v49 = vor.u32 %v3460_v42, %v3456_v40  ;;  %v12030_v37 = vld [vmem:[%s15731_s1 + $0x590] ss:$8 sps:$4 sm:$0xff]   ;;  %v12032_v46 = vld [vmem:[%s15731_s1 + $0x594] ss:$8 sps:$4 sm:$0xff]   ;;  %9124 = vmatprep.mubr.bf16.mxu0 %v12005_v41  ;;  %9192 = vmatpush1.bf16.msra.mxu0 %v12027_v38  ;;  %v12036_v54 = vld [vmem:[%s15731_s1 + $0x5a0] ss:$8 sps:$4 sm:$0xff]  }
 0x247   : > { %3551 = vst [vmem:[#allocation2 + $0x43c] sm:$0xf] %v3457_v48  ;;  %v12033_v51 = vld [vmem:[%s15731_s1 + $0xb90] ss:$8 sps:$4 sm:$0xff]   ;;  %v12035_v52 = vld [vmem:[%s15731_s1 + $0xb94] ss:$8 sps:$4 sm:$0xff]   ;;  %9125 = vmatmul.mubr.bf16.gmra.mrb[16].mxu0 %v12011_v44  ;;  %8455 = vmatprep.subr.bf16.mxu1 %v12032_v46  ;;  %v3471_v11 = vor.u32 %v3470_v62, %v3466_v47 }
 0x248   : > { %v3462_v55 = vrot.slane %v3461_v49, 4  ;;  %v12038_v57 = vld [vmem:[%s15731_s1 + $0x5a4] ss:$8 sps:$4 sm:$0xff]   ;;  %8456 = vmatpush1.bf16.msra.mxu1 %v12030_v37  ;;  %9193 = vmatprep.subr.bf16.mxu0 %v12035_v52  ;;  %v1341_v59 = vld [vmem:[%s12391_s5 + $0x3c] sm:$0xf]  ;;  %v1474_v0 = vrot.slane %v1473_v58, 4 }
 0x249   : > { %v1342_v61 = vld [vmem:[%s12391_s5 + $0x40] sm:$0xf]  ;;  %8457 = vmatprep.subr.bf16.mxu1 %v12038_v57  ;;  %v1476_v1 = vshll.u32 %v1341_v59, 16  ;;  %v1480_v4 = vshrl.u32 %v1341_v59, 16  ;;  %v1574_v6 = vld [vmem:[%s12391_s5 + $0x3c] sm:$0xf] }
 0x24a   : > { %v3467_v60 = vsel %vm12437_vm7, %v3462_v55, %v3466_v47  ;;  %9194 = vmatpush1.bf16.msra.mxu0 %v12033_v51  ;;  %v1486_v7 = vshll.u32 %v1342_v61, 16  ;;  %v1490_v8 = vshrl.u32 %v1342_v61, 16  ;;  %v14539_v9 = vld [vmem:[%s12391_s5 + $0x40] sm:$0xf]  ;;  %v1635_v10 = vrot.slane %v1574_v6, 5 }
 0x24b   : > { %3552 = vst [vmem:[#allocation2 + $0x4a0] sm:$0xf] %v3467_v60  ;;  %v1478_v12 = vrot.slane %v1476_v1, 5  ;;  %v1482_v13 = vrot.slane %v1480_v4, 4  ;;  %v1638_v39 = vrot.slane %v14539_v9, 5  ;;  %v3472_v25 = vrot.slane %v3471_v11, 4 }
 0x24c   : > { %v3302_v15 = vld [vmem:[%s12391_s5 + $0x4c] sm:$0xf]  ;;  %8458 = vmatpush1.bf16.msra.mxu1 %v12036_v54  ;;  %v1488_v19 = vrot.slane %v1486_v7, 5  ;;  %v1636_v63 = vsel %vm12888_vm11, %v1634_v53, %v1635_v10  ;;  %v1637_v22 = vrot.slane %v1635_v10, 4  ;;  %v3303_v5 = vld [vmem:[%s12391_s5 + $0x50] sm:$0xf] }
 0x24d   : > { %v12021_v17 = vld [vmem:[#allocation2 + $0x40c] ss:$100 sps:$4 sm:$0xff]   ;;  %3320 = vst [vmem:[#allocation2 + $0x500] sm:$0xf] %v3302_v15  ;;  %v1479_v16 = vsel %vm12437_vm7, %v1474_v0, %v1478_v12  ;;  %v1483_v21 = vor.u32 %v1482_v13, %v1478_v12  ;;  %1680 = vst [vmem:[#allocation2 + $0x4d4] sm:$0xf] %v1636_v63 }
 0x24e   : > { %v12025_v18 = vld [vmem:[#allocation2 + $0x408] ss:$100 sps:$4 sm:$0xff]   ;;  %v3339_v24 = vld [vmem:[%s12391_s5 + $0x50] sm:$0xf]  ;;  %8396 = vmatprep.mubr.bf16.mxu1 %v12021_v17  ;;  %1555 = vst [vmem:[#allocation2 + $0x4d0] sm:$0xf] %v1479_v16  ;;  %v1639_v30 = vsel %vm12888_vm11, %v1637_v22, %v1638_v39 }
 0x24f   : > { %3321 = vst [vmem:[#allocation2 + $0x564] sm:$0xf] %v3303_v5  ;;  %v3340_v26 = vld [vmem:[%s12391_s5 + $0x54] sm:$0xf]  ;;  %v3474_v27 = vshll.u32 %v3339_v24, 16  ;;  %v3478_v28 = vshrl.u32 %v3339_v24, 16  ;;  %8397 = vmatmul.mubr.bf16.gmra.mrb[20].mxu1 %v12025_v18 }
 0x250   : > { %v1484_v29 = vrot.slane %v1483_v21, 4  ;;  %v3484_v31 = vshll.u32 %v3340_v26, 16  ;;  %v3488_v23 = vshrl.u32 %v3340_v26, 16  ;;  %v12045_v32 = vld [vmem:[%s15731_s1 + $0xba0] ss:$8 sps:$4 sm:$0xff]   ;;  %v1492_v48 = vrot.slane %v1490_v8, 4 }
 0x251   : > { %1681 = vst [vmem:[#allocation2 + $0x538] sm:$0xf] %v1639_v30  ;;  %v3476_v33 = vrot.slane %v3474_v27, 5  ;;  %v3480_v34 = vrot.slane %v3478_v28, 4  ;;  %v12047_v35 = vld [vmem:[%s15731_s1 + $0xba4] ss:$8 sps:$4 sm:$0xff]  }
 0x252   : > { %v12048_v36 = vld [vmem:[%s15731_s1 + $0x5b0] ss:$8 sps:$4 sm:$0xff]   ;;  %v12023_v38 = vld [vmem:[#allocation2 + $0x43c] ss:$100 sps:$4 sm:$0xff]   ;;  %v1489_v42 = vsel %vm12437_vm7, %v1484_v29, %v1488_v19  ;;  %v3486_v43 = vrot.slane %v3484_v31, 5  ;;  %9195 = vmatprep.subr.bf16.mxu0 %v12047_v35  ;;  %v3490_v37 = vrot.slane %v3488_v23, 4  ;;  %v1493_v52 = vor.u32 %v1492_v48, %v1488_v19 }
 0x253   : > { %v12026_v40 = vld [vmem:[#allocation2 + $0x438] ss:$100 sps:$4 sm:$0xff]   ;;  %1556 = vst [vmem:[#allocation2 + $0x534] sm:$0xf] %v1489_v42  ;;  %v3477_v41 = vsel %vm12437_vm7, %v3472_v25, %v3476_v33  ;;  %v3481_v44 = vor.u32 %v3480_v34, %v3476_v33  ;;  %9134 = vmatprep.mubr.bf16.mxu0 %v12023_v38  ;;  %9196 = vmatpush1.bf16.msra.mxu0 %v12045_v32  ;;  %v12054_v50 = vld [vmem:[%s15731_s1 + $0x5c0] ss:$8 sps:$4 sm:$0xff]  }
 0x254   : > { %v12050_v45 = vld [vmem:[%s15731_s1 + $0x5b4] ss:$8 sps:$4 sm:$0xff]   ;;  %v12051_v47 = vld [vmem:[%s15731_s1 + $0xbb0] ss:$8 sps:$4 sm:$0xff]   ;;  %3553 = vst [vmem:[#allocation2 + $0x504] sm:$0xf] %v3477_v41  ;;  %9135 = vmatmul.mubr.bf16.gmra.mrb[20].mxu0 %v12026_v40  ;;  %v3491_v57 = vor.u32 %v3490_v37, %v3486_v43 }
 0x255   : > { %v12053_v49 = vld [vmem:[%s15731_s1 + $0xbb4] ss:$8 sps:$4 sm:$0xff]   ;;  %v3482_v46 = vrot.slane %v3481_v44, 4  ;;  %8459 = vmatprep.subr.bf16.mxu1 %v12050_v45  ;;  %v12056_v51 = vld [vmem:[%s15731_s1 + $0x5c4] ss:$8 sps:$4 sm:$0xff]   ;;  %v1640_v54 = vrot.slane %v1638_v39, 4 }
 0x256   : > { %8460 = vmatpush1.bf16.msra.mxu1 %v12048_v36  ;;  %9197 = vmatprep.subr.bf16.mxu0 %v12053_v49  ;;  %v1343_v53 = vld [vmem:[%s12391_s5 + $0x44] sm:$0xf]  ;;  %v1344_v55 = vld [vmem:[%s12391_s5 + $0x48] sm:$0xf]  ;;  %v1494_v59 = vrot.slane %v1493_v52, 4  ;;  %v3492_v7 = vrot.slane %v3491_v57, 4 }
 0x257   : > { %v3487_v58 = vsel %vm12437_vm7, %v3482_v46, %v3486_v43  ;;  %8461 = vmatprep.subr.bf16.mxu1 %v12056_v51  ;;  %v1496_v61 = vshll.u32 %v1343_v53, 16  ;;  %v1500_v62 = vshrl.u32 %v1343_v53, 16  ;;  %v1576_v60 = vld [vmem:[%s12391_s5 + $0x44] sm:$0xf]  ;;  %9198 = vmatpush1.bf16.msra.mxu0 %v12051_v47  ;;  %v1506_v0 = vshll.u32 %v1344_v55, 16 }
 0x258   : > { %3554 = vst [vmem:[#allocation2 + $0x568] sm:$0xf] %v3487_v58  ;;  %v1510_v1 = vshrl.u32 %v1344_v55, 16  ;;  %v1577_v4 = vld [vmem:[%s12391_s5 + $0x48] sm:$0xf]  ;;  %v1641_v6 = vrot.slane %v1576_v60, 5 }
 0x259   : > { %v1498_v8 = vrot.slane %v1496_v61, 5  ;;  %v1502_v9 = vrot.slane %v1500_v62, 4  ;;  %v1644_v10 = vrot.slane %v1577_v4, 5  ;;  %v3304_v11 = vld [vmem:[%s12391_s5 + $0x54] sm:$0xf]  ;;  %v1508_v39 = vrot.slane %v1506_v0, 5 }
 0x25a   : > { %v12039_v12 = vld [vmem:[#allocation2 + $0x4d4] ss:$100 sps:$4 sm:$0xff]   ;;  %v1642_v15 = vsel %vm12888_vm11, %v1640_v54, %v1641_v6  ;;  %8462 = vmatpush1.bf16.msra.mxu1 %v12054_v50  ;;  %3322 = vst [vmem:[#allocation2 + $0x5c8] sm:$0xf] %v3304_v11  ;;  %v1643_v19 = vrot.slane %v1641_v6, 4  ;;  %v1512_v43 = vrot.slane %v1510_v1, 4 }
 0x25b   : > { %v12043_v13 = vld [vmem:[#allocation2 + $0x4d0] ss:$100 sps:$4 sm:$0xff]   ;;  %v1499_v17 = vsel %vm12437_vm7, %v1494_v59, %v1498_v8  ;;  %v1503_v18 = vor.u32 %v1502_v9, %v1498_v8  ;;  %1682 = vst [vmem:[#allocation2 + $0x59c] sm:$0xf] %v1642_v15  ;;  %v3305_v63 = vld [vmem:[%s12391_s5 + $0x58] sm:$0xf]  ;;  %8406 = vmatprep.mubr.bf16.mxu1 %v12039_v12 }
 0x25c   : > { %v3341_v16 = vld [vmem:[%s12391_s5 + $0x58] sm:$0xf]  ;;  %1557 = vst [vmem:[#allocation2 + $0x598] sm:$0xf] %v1499_v17  ;;  %3323 = vst [vmem:[#allocation2 + $0x62c] sm:$0xf] %v3305_v63  ;;  %8407 = vmatmul.mubr.bf16.gmra.mrb[24].mxu1 %v12043_v13  ;;  %v1645_v25 = vsel %vm12888_vm11, %v1643_v19, %v1644_v10  ;;  %v1513_v49 = vor.u32 %v1512_v43, %v1508_v39 }
 0x25d   : > { %v3342_v21 = vld [vmem:[%s12391_s5 + $0x5c] sm:$0xf]  ;;  %v3494_v22 = vshll.u32 %v3341_v16, 16  ;;  %v3498_v5 = vshrl.u32 %v3341_v16, 16  ;;  %v12063_v24 = vld [vmem:[%s15731_s1 + $0xbc0] ss:$8 sps:$4 sm:$0xff]  }
 0x25e   : > { %v1504_v26 = vrot.slane %v1503_v18, 4  ;;  %v3504_v27 = vshll.u32 %v3342_v21, 16  ;;  %v3508_v28 = vshrl.u32 %v3342_v21, 16  ;;  %v12065_v29 = vld [vmem:[%s15731_s1 + $0xbc4] ss:$8 sps:$4 sm:$0xff]   ;;  %v1646_v41 = vrot.slane %v1644_v10, 4 }
 0x25f   : > { %1683 = vst [vmem:[#allocation2 + $0x600] sm:$0xf] %v1645_v25  ;;  %v3496_v30 = vrot.slane %v3494_v22, 5  ;;  %v3500_v31 = vrot.slane %v3498_v5, 4  ;;  %v12066_v23 = vld [vmem:[%s15731_s1 + $0x5d0] ss:$8 sps:$4 sm:$0xff]   ;;  %9199 = vmatprep.subr.bf16.mxu0 %v12065_v29 }
 0x260   : > { %v12068_v32 = vld [vmem:[%s15731_s1 + $0x5d4] ss:$8 sps:$4 sm:$0xff]   ;;  %v12041_v33 = vld [vmem:[#allocation2 + $0x504] ss:$100 sps:$4 sm:$0xff]   ;;  %v1509_v35 = vsel %vm12437_vm7, %v1504_v26, %v1508_v39  ;;  %v3506_v36 = vrot.slane %v3504_v27, 5  ;;  %9200 = vmatpush1.bf16.msra.mxu0 %v12063_v24  ;;  %v1514_v55 = vrot.slane %v1513_v49, 4 }
 0x261   : > { %v12044_v34 = vld [vmem:[#allocation2 + $0x500] ss:$100 sps:$4 sm:$0xff]   ;;  %1558 = vst [vmem:[#allocation2 + $0x5fc] sm:$0xf] %v1509_v35  ;;  %v3497_v38 = vsel %vm12437_vm7, %v3492_v7, %v3496_v30  ;;  %v3501_v40 = vor.u32 %v3500_v31, %v3496_v30  ;;  %8463 = vmatprep.subr.bf16.mxu1 %v12068_v32  ;;  %v12069_v42 = vld [vmem:[%s15731_s1 + $0xbd0] ss:$8 sps:$4 sm:$0xff]   ;;  %9144 = vmatprep.mubr.bf16.mxu0 %v12041_v33 }
 0x262   : > { %3555 = vst [vmem:[#allocation2 + $0x5cc] sm:$0xf] %v3497_v38  ;;  %8464 = vmatpush1.bf16.msra.mxu1 %v12066_v23  ;;  %v12071_v44 = vld [vmem:[%s15731_s1 + $0xbd4] ss:$8 sps:$4 sm:$0xff]   ;;  %v1345_v45 = vld [vmem:[%s12391_s5 + $0x4c] sm:$0x7]  ;;  %9145 = vmatmul.mubr.bf16.gmra.mrb[24].mxu0 %v12044_v34 }
 0x263   : > { %v1578_v47 = vld [vmem:[%s12391_s5 + $0x4c] sm:$0x7]  ;;  %v3502_v48 = vrot.slane %v3501_v40, 4  ;;  %v1516_v37 = vshll.u32 %v1345_v45, 16  ;;  %v1520_v46 = vshrl.u32 %v1345_v45, 16  ;;  %9201 = vmatprep.subr.bf16.mxu0 %v12071_v44  ;;  %v3510_v0 = vrot.slane %v3508_v28, 4 }
 0x264   : > { %v1647_v50 = vrot.slane %v1578_v47, 5  ;;  %v12074_v51 = vld [vmem:[%s15731_s1 + $0x5e0] ss:$8 sps:$4 sm:$0xff]   ;;  %v12076_v52 = vld [vmem:[%s15731_s1 + $0x5e4] ss:$8 sps:$4 sm:$0xff]   ;;  %9202 = vmatpush1.bf16.msra.mxu0 %v12069_v42 }
 0x265   : > { %v3507_v53 = vsel %vm12437_vm7, %v3502_v48, %v3506_v36  ;;  %v1518_v54 = vrot.slane %v1516_v37, 5  ;;  %v1522_v57 = vrot.slane %v1520_v46, 4  ;;  %v3306_v58 = vld [vmem:[%s12391_s5 + $0x5c] sm:$0xf]  ;;  %8465 = vmatprep.subr.bf16.mxu1 %v12076_v52  ;;  %v3307_v62 = vld [vmem:[%s12391_s5 + $0x60] sm:$0x3]  ;;  %v3511_v12 = vor.u32 %v3510_v0, %v3506_v36 }
 0x266   : > { %3556 = vst [vmem:[#allocation2 + $0x630] sm:$0xf] %v3507_v53  ;;  %v1648_v59 = vsel %vm12888_vm11, %v1646_v41, %v1647_v50  ;;  %v1649_v61 = vrot.slane %v1647_v50, 4  ;;  %3324 = vst [vmem:[#allocation2 + $0x690] sm:$0xf] %v3306_v58  ;;  %8466 = vmatpush1.bf16.msra.mxu1 %v12074_v51 }
 0x267   : > { %v3343_v60 = vld [vmem:[%s12391_s5 + $0x60] sm:$0x7]  ;;  %v1519_v1 = vsel %vm12437_vm7, %v1514_v55, %v1518_v54  ;;  %v1523_v4 = vor.u32 %v1522_v57, %v1518_v54  ;;  %1684 = vst [vmem:[#allocation2 + $0x664] sm:$0xf] %v1648_v59  ;;  %3325 = vst [vmem:[#allocation2 + $0x6f4] sm:$0x3] %v3307_v62 }
 0x268   : > { %v3514_v6 = vshll.u32 %v3343_v60, 16  ;;  %v3518_v7 = vshrl.u32 %v3343_v60, 16  ;;  %v12081_v8 = vld [vmem:[%s15731_s1 + $0xbe0] ss:$8 sps:$4 sm:$0xff]   ;;  %v12083_v9 = vld [vmem:[%s15731_s1 + $0xbe4] ss:$8 sps:$4 sm:$0xff]  }
 0x269   : > { %v12057_v10 = vld [vmem:[#allocation2 + $0x59c] ss:$100 sps:$4 sm:$0xff]   ;;  %1559 = vst [vmem:[#allocation2 + $0x660] sm:$0xf] %v1519_v1  ;;  %1685 = vst [vmem:[#allocation2 + $0x6c8] sm:$0x3] %v1649_v61  ;;  %9203 = vmatprep.subr.bf16.mxu0 %v12083_v9 }
 0x26a   : > { %v12061_v11 = vld [vmem:[#allocation2 + $0x598] ss:$100 sps:$4 sm:$0xff]   ;;  %v1524_v13 = vrot.slane %v1523_v4, 4  ;;  %v3516_v39 = vrot.slane %v3514_v6, 5  ;;  %v3520_v15 = vrot.slane %v3518_v7, 4  ;;  %8416 = vmatprep.mubr.bf16.mxu1 %v12057_v10  ;;  %v3512_v17 = vrot.slane %v3511_v12, 4  ;;  %9204 = vmatpush1.bf16.msra.mxu0 %v12081_v8 }
 0x26b   : > { %v12084_v18 = vld [vmem:[%s15731_s1 + $0x5f0] ss:$8 sps:$4 sm:$0xff]   ;;  %v12086_v19 = vld [vmem:[%s15731_s1 + $0x5f4] ss:$8 sps:$4 sm:$0xff]   ;;  %8417 = vmatmul.mubr.bf16.gmra.mrb[28].mxu1 %v12061_v11  ;;  %v1686_v5 = vld [vmem:[%s12391_s5 + $0xc] sm:$0xc] }
 0x26c   : > { %1560 = vst [vmem:[#allocation2 + $0x6c4] sm:$0x3] %v1524_v13  ;;  %v3521_v63 = vor.u32 %v3520_v15, %v3516_v39  ;;  %v12087_v16 = vld [vmem:[%s15731_s1 + $0xbf0] ss:$8 sps:$4 sm:$0xff]   ;;  %v12089_v21 = vld [vmem:[%s15731_s1 + $0xbf4] ss:$8 sps:$4 sm:$0xff]   ;;  %v3517_v22 = vsel %vm12437_vm7, %v3512_v17, %v3516_v39  ;;  %8467 = vmatprep.subr.bf16.mxu1 %v12086_v19 }
 0x26d   : > { %v1687_v24 = vld [vmem:[%s12391_s5 + $0x10] sm:$0xf]  ;;  %v14658_v26 = vld [vmem:[%s12391_s5 + $0x14] sm:$0xf]  ;;  %v12062_v27 = vld [vmem:[#allocation2 + $0x5c8] ss:$100 sps:$4 sm:$0xff]   ;;  %9205 = vmatprep.subr.bf16.mxu0 %v12089_v21  ;;  %8468 = vmatpush1.bf16.msra.mxu1 %v12084_v18 }
 0x26e   : > { %v12059_v25 = vld [vmem:[#allocation2 + $0x5cc] ss:$100 sps:$4 sm:$0xff]   ;;  %v3522_v28 = vrot.slane %v3521_v63, 4  ;;  %3557 = vst [vmem:[#allocation2 + $0x694] sm:$0xf] %v3517_v22  ;;  %9206 = vmatpush1.bf16.msra.mxu0 %v12087_v16  ;;  %v10066_v29 = vrot.slane %v1686_v5, 10 }
 0x26f   : > { %v1724_v30 = vrot.slane %v1687_v24, 6  ;;  %v1727_v14 = vrot.slane %v14658_v26, 6  ;;  %v1811_v31 = vld [vmem:[%s12391_s5 + $0xc] sm:$0xc]  ;;  %9154 = vmatprep.mubr.bf16.mxu0 %v12059_v25  ;;  %v1812_v32 = vld [vmem:[%s12391_s5 + $0x10] sm:$0xf] }
 0x270   : > { %v12177_v23 = vld [vmem:[%s15731_s1 + $0xb04] ss:$8 sps:$4 sm:$0xff]   ;;  %3558 = vst [vmem:[#allocation2 + $0x6f8] sm:$0x3] %v3522_v28  ;;  %v1813_v33 = vld [vmem:[%s12391_s5 + $0x14] sm:$0xf]  ;;  %9155 = vmatmul.mubr.bf16.gmra.mrb[28].mxu0 %v12062_v27 }
 0x271   : > { %10734 = vmatprep.subr.bf16.mxu1 %v12177_v23  ;;  %v1834_v34 = vshrl.u32 %v1811_v31, 16  ;;  %v1725_v35 = vsel %vm13288_vm5, %v10066_v29, %v1724_v30  ;;  %v1726_v36 = vrot.slane %v1724_v30, 4  ;;  %v1837_v38 = vshll.u32 %v1811_v31, 16  ;;  %v3559_v42 = vld [vmem:[%s12391_s5 + $0x1c] sm:$0xe] }
 0x272   : > { %v1843_v40 = vshrl.u32 %v1812_v32, 16  ;;  %1793 = vst [vmem:[#allocation2 + $0x28] sm:$0xf] %v1725_v35  ;;  %v1846_v41 = vshll.u32 %v1812_v32, 16  ;;  %v1853_v44 = vshrl.u32 %v1813_v33, 16  ;;  %v1856_v45 = vshll.u32 %v1813_v33, 16 }
 0x273   : > { %v1836_v43 = vrot.slane %v1834_v34, 6  ;;  %v3560_v47 = vld [vmem:[%s12391_s5 + $0x20] sm:$0xf]  ;;  %v12072_v48 = vld [vmem:[#allocation2 + $0x664] ss:$100 sps:$4 sm:$0x3f]   ;;  %v1728_v49 = vsel %vm13288_vm5, %v1726_v36, %v1727_v14 }
 0x274   : > { %v1839_v37 = vrot.slane %v1837_v38, 7  ;;  %v12079_v46 = vld [vmem:[#allocation2 + $0x660] ss:$100 sps:$4 sm:$0x3f]   ;;  %1794 = vst [vmem:[#allocation2 + $0x8c] sm:$0xf] %v1728_v49  ;;  %8426 = vmatprep.mubr.bf16.mxu1 %v12072_v48 }
 0x275   : > { %v1845_v50 = vrot.slane %v1843_v40, 6  ;;  %v1848_v51 = vrot.slane %v1846_v41, 7  ;;  %v1855_v52 = vrot.slane %v1853_v44, 6  ;;  %v1858_v55 = vrot.slane %v1856_v45, 7  ;;  %v14676_v54 = vld [vmem:[%s12391_s5 + $0x24] sm:$0xf]  ;;  %8427 = vmatmul.mubr.bf16.gmra.mrb[32].mxu1 %v12079_v46 }
 0x276   : > { %v1840_v53 = vor.u32 %v1839_v37, %v1836_v43  ;;  %v10072_v57 = vrot.slane %v3559_v42, 9  ;;  %v3597_v58 = vrot.slane %v3560_v47, 5  ;;  %v3600_v61 = vrot.slane %v14676_v54, 5  ;;  %v3684_v62 = vld [vmem:[%s12391_s5 + $0x1c] sm:$0xe] }
 0x277   : > { %v1849_v59 = vor.u32 %v1848_v51, %v1845_v50  ;;  %v3685_v60 = vld [vmem:[%s12391_s5 + $0x20] sm:$0xf]  ;;  %v12077_v0 = vld [vmem:[#allocation2 + $0x694] ss:$100 sps:$4 sm:$0x3f]   ;;  %v14681_v4 = vor.u32 %v1858_v55, %v1855_v52  ;;  %v3703_v10 = vshrl.u32 %v3684_v62, 16 }
 0x278   : > { %v1841_v1 = vrot.slane %v1840_v53, 4  ;;  %v3598_v6 = vsel %vm12888_vm11, %v10072_v57, %v3597_v58  ;;  %v12080_v7 = vld [vmem:[#allocation2 + $0x690] ss:$100 sps:$4 sm:$0x3f]   ;;  %v3599_v9 = vrot.slane %v3597_v58, 4  ;;  %9164 = vmatprep.mubr.bf16.mxu0 %v12077_v0  ;;  %v3706_v13 = vshll.u32 %v3684_v62, 16 }
 0x279   : > { %v1851_v8 = vrot.slane %v1849_v59, 4  ;;  %3666 = vst [vmem:[#allocation2 + $0x58] sm:$0xf] %v3598_v6  ;;  %v3686_v12 = vld [vmem:[%s12391_s5 + $0x24] sm:$0xf]  ;;  %v3712_v39 = vshrl.u32 %v3685_v60, 16  ;;  %9165 = vmatmul.mubr.bf16.gmra.mrb[32].mxu0 %v12080_v7 }
 0x27a   : > { %v1850_v11 = vsel %vm13795_vm13, %v1841_v1, %v1849_v59  ;;  %v3715_v15 = vshll.u32 %v3685_v60, 16  ;;  %v3601_v18 = vsel %vm12888_vm11, %v3599_v9, %v3600_v61  ;;  %v3705_v19 = vrot.slane %v3703_v10, 5  ;;  %v12098_v16 = vld [vmem:[%s15731_s1 + $0xc04] ss:$8 sps:$4 sm:$0xff]   ;;  %v1689_v27 = vld [vmem:[%s12391_s5 + $0x18] sm:$0xf] }
 0x27b   : > { %v1860_v17 = vsel %vm13795_vm13, %v1851_v8, %v14681_v4  ;;  %2035 = vst [vmem:[#allocation2 + $0x2c] sm:$0xf] %v1850_v11  ;;  %v3722_v63 = vshrl.u32 %v3686_v12, 16  ;;  %3667 = vst [vmem:[#allocation2 + $0xbc] sm:$0xf] %v3601_v18  ;;  %v3708_v21 = vrot.slane %v3706_v13, 6  ;;  %9298 = vmatprep.subr.bf16.mxu0 %v12098_v16 }
 0x27c   : > { %2036 = vst [vmem:[#allocation2 + $0x90] sm:$0xf] %v1860_v17  ;;  %v3714_v22 = vrot.slane %v3712_v39, 5  ;;  %v3717_v5 = vrot.slane %v3715_v15, 6  ;;  %v3725_v24 = vshll.u32 %v3686_v12, 16  ;;  %v1729_v28 = vrot.slane %v1727_v14, 4 }
 0x27d   : > { %v3724_v25 = vrot.slane %v3722_v63, 5  ;;  %v3709_v29 = vor.u32 %v3708_v21, %v3705_v19  ;;  %v1690_v23 = vld [vmem:[%s12391_s5 + $0x1c] sm:$0xf]  ;;  %v1730_v32 = vrot.slane %v1689_v27, 6  ;;  %v1814_v33 = vld [vmem:[%s12391_s5 + $0x18] sm:$0xf] }
 0x27e   : > { %v3718_v30 = vor.u32 %v3717_v5, %v3714_v22  ;;  %v3727_v31 = vrot.slane %v3725_v24, 6  ;;  %v1733_v34 = vrot.slane %v1690_v23, 6  ;;  %v1815_v35 = vld [vmem:[%s12391_s5 + $0x1c] sm:$0xf]  ;;  %v1861_v36 = vrot.slane %v14681_v4, 4 }
 0x27f   : > { %v1863_v38 = vshrl.u32 %v1814_v33, 16  ;;  %v1866_v40 = vshll.u32 %v1814_v33, 16  ;;  %v3710_v42 = vrot.slane %v3709_v29, 4  ;;  %v1731_v14 = vsel %vm13288_vm5, %v1729_v28, %v1730_v32  ;;  %v3562_v41 = vld [vmem:[%s12391_s5 + $0x28] sm:$0xf] }
 0x280   : > { %v3720_v43 = vrot.slane %v3718_v30, 4  ;;  %v14703_v26 = vor.u32 %v3727_v31, %v3724_v25  ;;  %v14709_v44 = vld [vmem:[%s12391_s5 + $0x2c] sm:$0xf]  ;;  %v1732_v45 = vrot.slane %v1730_v32, 4  ;;  %1795 = vst [vmem:[#allocation2 + $0xf0] sm:$0xf] %v1731_v14 }
 0x281   : > { %v1865_v47 = vrot.slane %v1863_v38, 6  ;;  %v1868_v48 = vrot.slane %v1866_v40, 7  ;;  %v1873_v49 = vshrl.u32 %v1815_v35, 16  ;;  %v3687_v37 = vld [vmem:[%s12391_s5 + $0x28] sm:$0xf]  ;;  %v3719_v46 = vsel %vm12924_vm14, %v3710_v42, %v3718_v30 }
 0x282   : > { %v3729_v50 = vsel %vm12924_vm14, %v3720_v43, %v14703_v26  ;;  %v1876_v51 = vshll.u32 %v1815_v35, 16  ;;  %v3602_v52 = vrot.slane %v3600_v61, 4  ;;  %v3688_v53 = vld [vmem:[%s12391_s5 + $0x2c] sm:$0xf]  ;;  %3899 = vst [vmem:[#allocation2 + $0x5c] sm:$0xf] %v3719_v46  ;;  %v1734_v57 = vsel %vm13288_vm5, %v1732_v45, %v1733_v34 }
 0x283   : > { %v12090_v55 = vld [vmem:[#allocation2 + $0x28] ss:$100 sps:$4 sm:$0xff]   ;;  %3900 = vst [vmem:[#allocation2 + $0xc0] sm:$0xf] %v3729_v50  ;;  %v1869_v58 = vor.u32 %v1868_v48, %v1865_v47  ;;  %v1875_v59 = vrot.slane %v1873_v49, 6  ;;  %v3603_v60 = vrot.slane %v3562_v41, 5 }
 0x284   : > { %v12092_v54 = vld [vmem:[#allocation2 + $0x2c] ss:$100 sps:$4 sm:$0xff]   ;;  %1796 = vst [vmem:[#allocation2 + $0x154] sm:$0xf] %v1734_v57  ;;  %v1878_v62 = vrot.slane %v1876_v51, 7  ;;  %v3606_v0 = vrot.slane %v14709_v44, 5 }
 0x285   : > { %v3730_v1 = vrot.slane %v14703_v26, 4  ;;  %8469 = vmatprep.mubr.bf16.mxu1 %v12092_v54  ;;  %v1870_v61 = vsel %vm13795_vm13, %v1861_v36, %v1869_v58  ;;  %v1871_v4 = vrot.slane %v1869_v58, 4  ;;  %v3732_v6 = vshrl.u32 %v3687_v37, 16  ;;  %v12178_v12 = vld [vmem:[%s15731_s1 + $0xb00] ss:$8 sps:$4 sm:$0xff]  }
 0x286   : > { %v3735_v7 = vshll.u32 %v3687_v37, 16  ;;  %8470 = vmatmul.mubr.bf16.vlgmr.msra.gmra.mrb[0].mxu1 %v12090_v55  ;;  %v14724_v8 = vor.u32 %v1878_v62, %v1875_v59  ;;  %2037 = vst [vmem:[#allocation2 + $0xf4] sm:$0xf] %v1870_v61  ;;  %v3604_v9 = vsel %vm12888_vm11, %v3602_v52, %v3603_v60  ;;  %v3605_v10 = vrot.slane %v3603_v60, 4  ;;  %v12179_v18 = vld [vmem:[%s15731_s1 + $0xb14] ss:$8 sps:$4 sm:$0xff]  }
 0x287   : > { %v3742_v11 = vshrl.u32 %v3688_v53, 16  ;;  %10750 = vmatpush1.bf16.msra.mxu1 %v12178_v12  ;;  %3668 = vst [vmem:[#allocation2 + $0x120] sm:$0xf] %v3604_v9  ;;  %v3734_v13 = vrot.slane %v3732_v6, 5  ;;  %v3745_v15 = vshll.u32 %v3688_v53, 16  ;;  %v1735_v17 = vrot.slane %v1733_v34, 4 }
 0x288   : > { %v3737_v39 = vrot.slane %v3735_v7, 6  ;;  %10735 = vmatprep.subr.bf16.mxu1 %v12179_v18  ;;  %v1880_v19 = vsel %vm13795_vm13, %v1871_v4, %v14724_v8  ;;  %v3607_v63 = vsel %vm12888_vm11, %v3605_v10, %v3606_v0  ;;  %v1691_v21 = vld [vmem:[%s12391_s5 + $0x20] sm:$0xf]  ;;  %v14741_v22 = vld [vmem:[%s12391_s5 + $0x24] sm:$0xf]  ;;  %v1881_v5 = vrot.slane %v14724_v8, 4 }
 0x289   : > { %v3744_v16 = vrot.slane %v3742_v11, 5  ;;  %v12096_v24 = vld [vmem:[%s15731_s1 + $0xc00] ss:$8 sps:$4 sm:$0xff]   ;;  %2038 = vst [vmem:[#allocation2 + $0x158] sm:$0xf] %v1880_v19  ;;  %v3747_v27 = vrot.slane %v3745_v15, 6 }
 0x28a   : > { %3669 = vst [vmem:[#allocation2 + $0x184] sm:$0xf] %v3607_v63  ;;  %v3738_v25 = vor.u32 %v3737_v39, %v3734_v13  ;;  %v1736_v28 = vrot.slane %v1691_v21, 6  ;;  %v1739_v29 = vrot.slane %v14741_v22, 6  ;;  %v1816_v30 = vld [vmem:[%s12391_s5 + $0x20] sm:$0xf] }
 0x28b   : > { %v12093_v31 = vld [vmem:[#allocation2 + $0x58] ss:$100 sps:$4 sm:$0xff]   ;;  %v1883_v32 = vshrl.u32 %v1816_v30, 16  ;;  %v1886_v33 = vshll.u32 %v1816_v30, 16  ;;  %v14757_v40 = vor.u32 %v3747_v27, %v3744_v16  ;;  %v1817_v43 = vld [vmem:[%s12391_s5 + $0x24] sm:$0xf] }
 0x28c   : > { %v12101_v23 = vld [vmem:[%s15731_s1 + $0xc14] ss:$8 sps:$4 sm:$0xff]   ;;  %v12180_v35 = vld [vmem:[%s15731_s1 + $0xb10] ss:$8 sps:$4 sm:$0xff]   ;;  %v3739_v36 = vsel %vm12924_vm14, %v3730_v1, %v3738_v25  ;;  %v3740_v38 = vrot.slane %v3738_v25, 4  ;;  %v1737_v42 = vsel %vm13288_vm5, %v1735_v17, %v1736_v28  ;;  %v1738_v14 = vrot.slane %v1736_v28, 4 }
 0x28d   : > { %v12095_v34 = vld [vmem:[#allocation2 + $0x5c] ss:$100 sps:$4 sm:$0xff]   ;;  %10751 = vmatpush1.bf16.msra.mxu1 %v12180_v35  ;;  %3901 = vst [vmem:[#allocation2 + $0x124] sm:$0xf] %v3739_v36  ;;  %v12181_v26 = vld [vmem:[%s15731_s1 + $0xb24] ss:$8 sps:$4 sm:$0xff]  }
 0x28e   : > { %10736 = vmatprep.subr.bf16.mxu1 %v12181_v26  ;;  %1797 = vst [vmem:[#allocation2 + $0x1b8] sm:$0xf] %v1737_v42  ;;  %v1885_v41 = vrot.slane %v1883_v32, 6  ;;  %v1888_v44 = vrot.slane %v1886_v33, 7  ;;  %v1893_v45 = vshrl.u32 %v1817_v43, 16  ;;  %9207 = vmatprep.mubr.bf16.mxu0 %v12095_v34  ;;  %v3749_v49 = vsel %vm12924_vm14, %v3740_v38, %v14757_v40 }
 0x28f   : > { %v3564_v47 = vld [vmem:[%s12391_s5 + $0x30] sm:$0xf]  ;;  %v1896_v37 = vshll.u32 %v1817_v43, 16  ;;  %v14773_v46 = vld [vmem:[%s12391_s5 + $0x34] sm:$0xf]  ;;  %v3608_v50 = vrot.slane %v3606_v0, 4  ;;  %9208 = vmatmul.mubr.bf16.vlgmr.msra.gmra.mrb[0].mxu0 %v12093_v31  ;;  %v1740_v53 = vsel %vm13288_vm5, %v1738_v14, %v1739_v29 }
 0x290   : > { %v12099_v48 = vld [vmem:[%s15731_s1 + $0xc10] ss:$8 sps:$4 sm:$0xff]   ;;  %v3609_v51 = vrot.slane %v3564_v47, 5  ;;  %3902 = vst [vmem:[#allocation2 + $0x188] sm:$0xf] %v3749_v49  ;;  %v1889_v55 = vor.u32 %v1888_v44, %v1885_v41  ;;  %v1895_v54 = vrot.slane %v1893_v45, 6  ;;  %9299 = vmatpush1.bf16.msra.mxu0 %v12096_v24 }
 0x291   : > { %v12110_v52 = vld [vmem:[%s15731_s1 + $0xc24] ss:$8 sps:$4 sm:$0xff]   ;;  %v3612_v57 = vrot.slane %v14773_v46, 5  ;;  %v3689_v58 = vld [vmem:[%s12391_s5 + $0x30] sm:$0xf]  ;;  %v1898_v62 = vrot.slane %v1896_v37, 7  ;;  %9300 = vmatprep.subr.bf16.mxu0 %v12101_v23 }
 0x292   : > { %v12182_v59 = vld [vmem:[%s15731_s1 + $0xb20] ss:$8 sps:$4 sm:$0xff]   ;;  %1798 = vst [vmem:[#allocation2 + $0x21c] sm:$0xf] %v1740_v53  ;;  %v3610_v60 = vsel %vm12888_vm11, %v3608_v50, %v3609_v51  ;;  %v3611_v0 = vrot.slane %v3609_v51, 4  ;;  %v1890_v7 = vsel %vm13795_vm13, %v1881_v5, %v1889_v55  ;;  %v1891_v8 = vrot.slane %v1889_v55, 4 }
 0x293   : > { %10752 = vmatpush1.bf16.msra.mxu1 %v12182_v59  ;;  %v3690_v1 = vld [vmem:[%s12391_s5 + $0x34] sm:$0xf]  ;;  %3670 = vst [vmem:[#allocation2 + $0x1e8] sm:$0xf] %v3610_v60  ;;  %v12108_v9 = vld [vmem:[%s15731_s1 + $0xc20] ss:$8 sps:$4 sm:$0xff]   ;;  %v14798_v10 = vor.u32 %v1898_v62, %v1895_v54 }
 0x294   : > { %v12102_v61 = vld [vmem:[#allocation2 + $0xf4] ss:$100 sps:$4 sm:$0xff]   ;;  %2039 = vst [vmem:[#allocation2 + $0x1bc] sm:$0xf] %v1890_v7  ;;  %v3613_v11 = vsel %vm12888_vm11, %v3611_v0, %v3612_v57  ;;  %v3752_v12 = vshrl.u32 %v3689_v58, 16  ;;  %v3755_v13 = vshll.u32 %v3689_v58, 16  ;;  %9301 = vmatpush1.bf16.msra.mxu0 %v12099_v48 }
 0x295   : > { %v12106_v4 = vld [vmem:[#allocation2 + $0xf0] ss:$100 sps:$4 sm:$0xff]   ;;  %8479 = vmatprep.mubr.bf16.mxu1 %v12102_v61  ;;  %3671 = vst [vmem:[#allocation2 + $0x24c] sm:$0xf] %v3613_v11  ;;  %v3750_v15 = vrot.slane %v14757_v40, 4  ;;  %v3762_v17 = vshrl.u32 %v3690_v1, 16  ;;  %v1900_v19 = vsel %vm13795_vm13, %v1891_v8, %v14798_v10  ;;  %9302 = vmatprep.subr.bf16.mxu0 %v12110_v52 }
 0x296   : > { %v12183_v6 = vld [vmem:[%s15731_s1 + $0xb34] ss:$8 sps:$4 sm:$0xff]   ;;  %v3765_v18 = vshll.u32 %v3690_v1, 16  ;;  %8480 = vmatmul.mubr.bf16.gmra.mrb[4].mxu1 %v12106_v4  ;;  %v3754_v63 = vrot.slane %v3752_v12, 5  ;;  %v3757_v16 = vrot.slane %v3755_v13, 6  ;;  %v1741_v5 = vrot.slane %v1739_v29, 4 }
 0x297   : > { %10737 = vmatprep.subr.bf16.mxu1 %v12183_v6  ;;  %v12113_v39 = vld [vmem:[%s15731_s1 + $0xc34] ss:$8 sps:$4 sm:$0xff]   ;;  %v1693_v21 = vld [vmem:[%s12391_s5 + $0x28] sm:$0xf]  ;;  %2040 = vst [vmem:[#allocation2 + $0x220] sm:$0xf] %v1900_v19 }
 0x298   : > { %v12184_v24 = vld [vmem:[%s15731_s1 + $0xb30] ss:$8 sps:$4 sm:$0xff]   ;;  %v3764_v25 = vrot.slane %v3762_v17, 5  ;;  %v3767_v27 = vrot.slane %v3765_v18, 6  ;;  %v14816_v28 = vld [vmem:[%s12391_s5 + $0x2c] sm:$0xf]  ;;  %v3758_v29 = vor.u32 %v3757_v16, %v3754_v63  ;;  %9303 = vmatpush1.bf16.msra.mxu0 %v12108_v9 }
 0x299   : > { %10753 = vmatpush1.bf16.msra.mxu1 %v12184_v24  ;;  %v1742_v30 = vrot.slane %v1693_v21, 6  ;;  %v1901_v31 = vrot.slane %v14798_v10, 4  ;;  %v12104_v23 = vld [vmem:[#allocation2 + $0x124] ss:$100 sps:$4 sm:$0xff]   ;;  %v12111_v22 = vld [vmem:[%s15731_s1 + $0xc30] ss:$8 sps:$4 sm:$0xff]   ;;  %9304 = vmatprep.subr.bf16.mxu0 %v12113_v39 }
 0x29a   : > { %v12107_v32 = vld [vmem:[#allocation2 + $0x120] ss:$100 sps:$4 sm:$0xff]   ;;  %v1745_v34 = vrot.slane %v14816_v28, 6  ;;  %v14826_v35 = vor.u32 %v3767_v27, %v3764_v25  ;;  %v1818_v42 = vld [vmem:[%s12391_s5 + $0x28] sm:$0xf]  ;;  %v3614_v26 = vrot.slane %v3612_v57, 4  ;;  %9217 = vmatprep.mubr.bf16.mxu0 %v12104_v23  ;;  %v3759_v14 = vsel %vm12924_vm14, %v3750_v15, %v3758_v29 }
 0x29b   : > { %v12185_v33 = vld [vmem:[%s15731_s1 + $0xb44] ss:$8 sps:$4 sm:$0xff]   ;;  %v1743_v38 = vsel %vm13288_vm5, %v1741_v5, %v1742_v30  ;;  %v1744_v40 = vrot.slane %v1742_v30, 4  ;;  %v3760_v41 = vrot.slane %v3758_v29, 4  ;;  %v1903_v44 = vshrl.u32 %v1818_v42, 16  ;;  %9218 = vmatmul.mubr.bf16.gmra.mrb[4].mxu0 %v12107_v32 }
 0x29c   : > { %10738 = vmatprep.subr.bf16.mxu1 %v12185_v33  ;;  %v12122_v36 = vld [vmem:[%s15731_s1 + $0xc44] ss:$8 sps:$4 sm:$0xff]   ;;  %1799 = vst [vmem:[#allocation2 + $0x280] sm:$0xf] %v1743_v38  ;;  %v1906_v45 = vshll.u32 %v1818_v42, 16  ;;  %9305 = vmatpush1.bf16.msra.mxu0 %v12111_v22  ;;  %v3770_v8 = vrot.slane %v14826_v35, 4 }
 0x29d   : > { %v1819_v43 = vld [vmem:[%s12391_s5 + $0x2c] sm:$0xf]  ;;  %v3566_v47 = vld [vmem:[%s12391_s5 + $0x38] sm:$0xf]  ;;  %3903 = vst [vmem:[#allocation2 + $0x1ec] sm:$0xf] %v3759_v14  ;;  %v1746_v48 = vsel %vm13288_vm5, %v1744_v40, %v1745_v34  ;;  %v3769_v51 = vsel %vm12924_vm14, %v3760_v41, %v14826_v35  ;;  %9306 = vmatprep.subr.bf16.mxu0 %v12122_v36 }
 0x29e   : > { %v1913_v49 = vshrl.u32 %v1819_v43, 16  ;;  %v1916_v37 = vshll.u32 %v1819_v43, 16  ;;  %v14843_v46 = vld [vmem:[%s12391_s5 + $0x3c] sm:$0xf]  ;;  %v3615_v50 = vrot.slane %v3566_v47, 5  ;;  %v1905_v55 = vrot.slane %v1903_v44, 6 }
 0x29f   : > { %v12120_v52 = vld [vmem:[%s15731_s1 + $0xc40] ss:$8 sps:$4 sm:$0xff]   ;;  %1800 = vst [vmem:[#allocation2 + $0x2e4] sm:$0xf] %v1746_v48  ;;  %v1908_v54 = vrot.slane %v1906_v45, 7  ;;  %v3618_v57 = vrot.slane %v14843_v46, 5 }
 0x2a0   : > { %v12186_v53 = vld [vmem:[%s15731_s1 + $0xb40] ss:$8 sps:$4 sm:$0xff]   ;;  %v3691_v58 = vld [vmem:[%s12391_s5 + $0x38] sm:$0xf]  ;;  %3904 = vst [vmem:[#allocation2 + $0x250] sm:$0xf] %v3769_v51  ;;  %v3616_v0 = vsel %vm12888_vm11, %v3614_v26, %v3615_v50  ;;  %9307 = vmatpush1.bf16.msra.mxu0 %v12120_v52 }
 0x2a1   : > { %10754 = vmatpush1.bf16.msra.mxu1 %v12186_v53  ;;  %v1915_v59 = vrot.slane %v1913_v49, 6  ;;  %v1918_v62 = vrot.slane %v1916_v37, 7  ;;  %v12187_v60 = vld [vmem:[%s15731_s1 + $0xb54] ss:$8 sps:$4 sm:$0xff]   ;;  %v3617_v1 = vrot.slane %v3615_v50, 4  ;;  %v1909_v7 = vor.u32 %v1908_v54, %v1905_v55 }
 0x2a2   : > { %10739 = vmatprep.subr.bf16.mxu1 %v12187_v60  ;;  %v3692_v61 = vld [vmem:[%s12391_s5 + $0x3c] sm:$0xf]  ;;  %3672 = vst [vmem:[#allocation2 + $0x2b0] sm:$0xf] %v3616_v0  ;;  %v3772_v13 = vshrl.u32 %v3691_v58, 16  ;;  %v3775_v39 = vshll.u32 %v3691_v58, 16 }
 0x2a3   : > { %v12114_v4 = vld [vmem:[#allocation2 + $0x1bc] ss:$100 sps:$4 sm:$0xff]   ;;  %v14866_v11 = vor.u32 %v1918_v62, %v1915_v59  ;;  %v3619_v12 = vsel %vm12888_vm11, %v3617_v1, %v3618_v57  ;;  %v12123_v15 = vld [vmem:[%s15731_s1 + $0xc50] ss:$8 sps:$4 sm:$0xff]   ;;  %v1910_v17 = vsel %vm13795_vm13, %v1901_v31, %v1909_v7  ;;  %v1911_v18 = vrot.slane %v1909_v7, 4 }
 0x2a4   : > { %v12118_v6 = vld [vmem:[#allocation2 + $0x1b8] ss:$100 sps:$4 sm:$0xff]   ;;  %8489 = vmatprep.mubr.bf16.mxu1 %v12114_v4  ;;  %3673 = vst [vmem:[#allocation2 + $0x314] sm:$0xf] %v3619_v12  ;;  %v3782_v19 = vshrl.u32 %v3692_v61, 16  ;;  %v3785_v63 = vshll.u32 %v3692_v61, 16 }
 0x2a5   : > { %v12125_v9 = vld [vmem:[%s15731_s1 + $0xc54] ss:$8 sps:$4 sm:$0xff]   ;;  %v12188_v16 = vld [vmem:[%s15731_s1 + $0xb50] ss:$8 sps:$4 sm:$0xff]   ;;  %8490 = vmatmul.mubr.bf16.gmra.mrb[8].mxu1 %v12118_v6  ;;  %2041 = vst [vmem:[#allocation2 + $0x284] sm:$0xf] %v1910_v17  ;;  %v1920_v27 = vsel %vm13795_vm13, %v1911_v18, %v14866_v11 }
 0x2a6   : > { %10755 = vmatpush1.bf16.msra.mxu1 %v12188_v16  ;;  %v3774_v21 = vrot.slane %v3772_v13, 5  ;;  %v3777_v5 = vrot.slane %v3775_v39, 6  ;;  %v12134_v10 = vld [vmem:[%s15731_s1 + $0xc64] ss:$8 sps:$4 sm:$0xff]   ;;  %v1695_v25 = vld [vmem:[%s12391_s5 + $0x30] sm:$0xf]  ;;  %9308 = vmatprep.subr.bf16.mxu0 %v12125_v9 }
 0x2a7   : > { %v12189_v24 = vld [vmem:[%s15731_s1 + $0xb64] ss:$8 sps:$4 sm:$0xff]   ;;  %v3784_v30 = vrot.slane %v3782_v19, 5  ;;  %v3787_v31 = vrot.slane %v3785_v63, 6  ;;  %v1696_v23 = vld [vmem:[%s12391_s5 + $0x34] sm:$0xf]  ;;  %9309 = vmatpush1.bf16.msra.mxu0 %v12123_v15 }
 0x2a8   : > { %10740 = vmatprep.subr.bf16.mxu1 %v12189_v24  ;;  %v1747_v32 = vrot.slane %v1745_v34, 4  ;;  %2042 = vst [vmem:[#allocation2 + $0x2e8] sm:$0xf] %v1920_v27  ;;  %v3778_v22 = vor.u32 %v3777_v5, %v3774_v21  ;;  %v1748_v29 = vrot.slane %v1695_v25, 6  ;;  %v1751_v33 = vrot.slane %v1696_v23, 6  ;;  %9310 = vmatprep.subr.bf16.mxu0 %v12134_v10 }
 0x2a9   : > { %v1820_v35 = vld [vmem:[%s12391_s5 + $0x30] sm:$0xf]  ;;  %v1821_v36 = vld [vmem:[%s12391_s5 + $0x34] sm:$0xf]  ;;  %v12119_v40 = vld [vmem:[#allocation2 + $0x1e8] ss:$100 sps:$4 sm:$0xff]   ;;  %v14897_v42 = vor.u32 %v3787_v31, %v3784_v30 }
 0x2aa   : > { %v12116_v38 = vld [vmem:[#allocation2 + $0x1ec] ss:$100 sps:$4 sm:$0xff]   ;;  %v12132_v43 = vld [vmem:[%s15731_s1 + $0xc60] ss:$8 sps:$4 sm:$0xff]   ;;  %v1921_v34 = vrot.slane %v14866_v11, 4  ;;  %v3779_v26 = vsel %vm12924_vm14, %v3770_v8, %v3778_v22  ;;  %v3780_v14 = vrot.slane %v3778_v22, 4  ;;  %v1749_v44 = vsel %vm13288_vm5, %v1747_v32, %v1748_v29 }
 0x2ab   : > { %v12190_v28 = vld [vmem:[%s15731_s1 + $0xb60] ss:$8 sps:$4 sm:$0xff]   ;;  %v12137_v41 = vld [vmem:[%s15731_s1 + $0xc74] ss:$8 sps:$4 sm:$0xff]   ;;  %v1750_v45 = vrot.slane %v1748_v29, 4  ;;  %9227 = vmatprep.mubr.bf16.mxu0 %v12116_v38  ;;  %v1923_v37 = vshrl.u32 %v1820_v35, 16  ;;  %9311 = vmatpush1.bf16.msra.mxu0 %v12132_v43 }
 0x2ac   : > { %10756 = vmatpush1.bf16.msra.mxu1 %v12190_v28  ;;  %v12191_v47 = vld [vmem:[%s15731_s1 + $0xb74] ss:$8 sps:$4 sm:$0xff]   ;;  %v3918_v49 = vld [vmem:[%s12391_s5 + $0x20] sm:$0xf]  ;;  %3905 = vst [vmem:[#allocation2 + $0x2b4] sm:$0xf] %v3779_v26  ;;  %9228 = vmatmul.mubr.bf16.gmra.mrb[8].mxu0 %v12119_v40  ;;  %v3789_v55 = vsel %vm12924_vm14, %v3780_v14, %v14897_v42 }
 0x2ad   : > { %10741 = vmatprep.subr.bf16.mxu1 %v12191_v47  ;;  %v3917_v48 = vld [vmem:[%s12391_s5 + $0x1c] sm:$0xc]  ;;  %1801 = vst [vmem:[#allocation2 + $0x348] sm:$0xf] %v1749_v44  ;;  %v1926_v50 = vshll.u32 %v1820_v35, 16  ;;  %v1933_v51 = vshrl.u32 %v1821_v36, 16  ;;  %v1752_v54 = vsel %vm13288_vm5, %v1750_v45, %v1751_v33  ;;  %9312 = vmatprep.subr.bf16.mxu0 %v12137_v41 }
 0x2ae   : > { %v1936_v52 = vshll.u32 %v1821_v36, 16  ;;  %v3919_v53 = vld [vmem:[%s12391_s5 + $0x24] sm:$0xf]  ;;  %v10073_v58 = vrot.slane %v3917_v48, 10  ;;  %v3955_v59 = vrot.slane %v3918_v49, 6  ;;  %v1925_v1 = vrot.slane %v1923_v37, 6 }
 0x2af   : > { %v1697_v62 = vld [vmem:[%s12391_s5 + $0x38] sm:$0xf]  ;;  %v14926_v60 = vld [vmem:[%s12391_s5 + $0x3c] sm:$0xf]  ;;  %3906 = vst [vmem:[#allocation2 + $0x318] sm:$0xf] %v3789_v55 }
 0x2b0   : > { %v12135_v0 = vld [vmem:[%s15731_s1 + $0xc70] ss:$8 sps:$4 sm:$0xff]   ;;  %1802 = vst [vmem:[#allocation2 + $0x3ac] sm:$0xf] %v1752_v54  ;;  %v1928_v61 = vrot.slane %v1926_v50, 7  ;;  %v1935_v4 = vrot.slane %v1933_v51, 6  ;;  %v3956_v8 = vsel %vm13288_vm5, %v10073_v58, %v3955_v59 }
 0x2b1   : > { %v1938_v6 = vrot.slane %v1936_v52, 7  ;;  %v12192_v7 = vld [vmem:[%s15731_s1 + $0xb70] ss:$8 sps:$4 sm:$0xff]   ;;  %v3957_v9 = vrot.slane %v3955_v59, 4  ;;  %v3958_v11 = vrot.slane %v3919_v53, 6  ;;  %v1753_v13 = vrot.slane %v1751_v33, 4  ;;  %9313 = vmatpush1.bf16.msra.mxu0 %v12135_v0 }
 0x2b2   : > { %10757 = vmatpush1.bf16.msra.mxu1 %v12192_v7  ;;  %v12193_v12 = vld [vmem:[%s15731_s1 + $0xb84] ss:$8 sps:$4 sm:$0xff]   ;;  %v1822_v39 = vld [vmem:[%s12391_s5 + $0x38] sm:$0xf]  ;;  %v1929_v18 = vor.u32 %v1928_v61, %v1925_v1  ;;  %4024 = vst [vmem:[#allocation2 + $0x60] sm:$0xf] %v3956_v8 }
 0x2b3   : > { %10742 = vmatprep.subr.bf16.mxu1 %v12193_v12  ;;  %v12126_v15 = vld [vmem:[#allocation2 + $0x284] ss:$100 sps:$4 sm:$0xff]   ;;  %v1939_v19 = vor.u32 %v1938_v6, %v1935_v4  ;;  %v1754_v63 = vrot.slane %v1697_v62, 6  ;;  %v3959_v16 = vsel %vm13288_vm5, %v3957_v9, %v3958_v11  ;;  %v1757_v21 = vrot.slane %v14926_v60, 6  ;;  %v1823_v5 = vld [vmem:[%s12391_s5 + $0x3c] sm:$0xf] }
 0x2b4   : > { %v12130_v17 = vld [vmem:[#allocation2 + $0x280] ss:$100 sps:$4 sm:$0xff]   ;;  %v1943_v10 = vshrl.u32 %v1822_v39, 16  ;;  %v1946_v24 = vshll.u32 %v1822_v39, 16  ;;  %8499 = vmatprep.mubr.bf16.mxu1 %v12126_v15  ;;  %v1930_v25 = vsel %vm13795_vm13, %v1921_v34, %v1929_v18  ;;  %v1931_v27 = vrot.slane %v1929_v18, 4 }
 0x2b5   : > { %4025 = vst [vmem:[#allocation2 + $0xc4] sm:$0xf] %v3959_v16  ;;  %v12194_v30 = vld [vmem:[%s15731_s1 + $0xb80] ss:$8 sps:$4 sm:$0xff]   ;;  %v1755_v31 = vsel %vm13288_vm5, %v1753_v13, %v1754_v63  ;;  %v1756_v23 = vrot.slane %v1754_v63, 4  ;;  %8500 = vmatmul.mubr.bf16.gmra.mrb[12].mxu1 %v12130_v17  ;;  %v1941_v29 = vrot.slane %v1939_v19, 4 }
 0x2b6   : > { %10758 = vmatpush1.bf16.msra.mxu1 %v12194_v30  ;;  %v3920_v32 = vld [vmem:[%s12391_s5 + $0x28] sm:$0xf]  ;;  %v14953_v22 = vld [vmem:[%s12391_s5 + $0x2c] sm:$0xf]  ;;  %2043 = vst [vmem:[#allocation2 + $0x34c] sm:$0xf] %v1930_v25  ;;  %v1940_v40 = vsel %vm13795_vm13, %v1931_v27, %v1939_v19 }
 0x2b7   : > { %1803 = vst [vmem:[#allocation2 + $0x410] sm:$0xf] %v1755_v31  ;;  %v1945_v33 = vrot.slane %v1943_v10, 6  ;;  %v1948_v35 = vrot.slane %v1946_v24, 7  ;;  %v1953_v36 = vshrl.u32 %v1823_v5, 16  ;;  %v1758_v43 = vsel %vm13288_vm5, %v1756_v23, %v1757_v21 }
 0x2b8   : > { %v12195_v38 = vld [vmem:[%s15731_s1 + $0xb94] ss:$8 sps:$4 sm:$0xff]   ;;  %v1956_v28 = vshll.u32 %v1823_v5, 16  ;;  %v3960_v34 = vrot.slane %v3958_v11, 4  ;;  %v1699_v26 = vld [vmem:[%s12391_s5 + $0x40] sm:$0xf] }
 0x2b9   : > { %10743 = vmatprep.subr.bf16.mxu1 %v12195_v38  ;;  %v14964_v14 = vld [vmem:[%s12391_s5 + $0x44] sm:$0xf]  ;;  %v12128_v41 = vld [vmem:[#allocation2 + $0x2b4] ss:$100 sps:$4 sm:$0xff]   ;;  %2044 = vst [vmem:[#allocation2 + $0x3b0] sm:$0xf] %v1940_v40  ;;  %v1949_v45 = vor.u32 %v1948_v35, %v1945_v33 }
 0x2ba   : > { %v12131_v44 = vld [vmem:[#allocation2 + $0x2b0] ss:$100 sps:$4 sm:$0xff]   ;;  %1804 = vst [vmem:[#allocation2 + $0x474] sm:$0xf] %v1758_v43  ;;  %v1955_v47 = vrot.slane %v1953_v36, 6  ;;  %v1958_v48 = vrot.slane %v1956_v28, 7  ;;  %9237 = vmatprep.mubr.bf16.mxu0 %v12128_v41 }
 0x2bb   : > { %v3961_v49 = vrot.slane %v3920_v32, 6  ;;  %v3964_v37 = vrot.slane %v14953_v22, 6  ;;  %v12196_v50 = vld [vmem:[%s15731_s1 + $0xb90] ss:$8 sps:$4 sm:$0xff]   ;;  %v1759_v51 = vrot.slane %v1757_v21, 4  ;;  %v1950_v53 = vsel %vm13795_vm13, %v1941_v29, %v1949_v45  ;;  %9238 = vmatmul.mubr.bf16.gmra.mrb[12].mxu0 %v12131_v44 }
 0x2bc   : > { %10759 = vmatpush1.bf16.msra.mxu1 %v12196_v50  ;;  %v1824_v52 = vld [vmem:[%s12391_s5 + $0x40] sm:$0xf]  ;;  %v1951_v55 = vrot.slane %v1949_v45, 4  ;;  %v12197_v54 = vld [vmem:[%s15731_s1 + $0xba4] ss:$8 sps:$4 sm:$0xff]   ;;  %v1760_v58 = vrot.slane %v1699_v26, 6  ;;  %v1959_v62 = vor.u32 %v1958_v48, %v1955_v47 }
 0x2bd   : > { %10744 = vmatprep.subr.bf16.mxu1 %v12197_v54  ;;  %v1763_v59 = vrot.slane %v14964_v14, 6  ;;  %2045 = vst [vmem:[#allocation2 + $0x414] sm:$0xf] %v1950_v53  ;;  %v3962_v60 = vsel %vm13288_vm5, %v3960_v34, %v3961_v49  ;;  %v3963_v0 = vrot.slane %v3961_v49, 4  ;;  %v1825_v1 = vld [vmem:[%s12391_s5 + $0x44] sm:$0xf] }
 0x2be   : > { %v1963_v61 = vshrl.u32 %v1824_v52, 16  ;;  %v12217_v4 = vmov 0   ;;  %4026 = vst [vmem:[#allocation2 + $0x128] sm:$0xf] %v3962_v60  ;;  %v1761_v6 = vsel %vm13288_vm5, %v1759_v51, %v1760_v58  ;;  %v1762_v7 = vrot.slane %v1760_v58, 4 }
 0x2bf   : > { %9330 = vmatprep.mubr.bf16.mxu0 %v12217_v4  ;;  %v1966_v8 = vshll.u32 %v1824_v52, 16  ;;  %v3922_v9 = vld [vmem:[%s12391_s5 + $0x30] sm:$0xf]  ;;  %v12141_v11 = vld [vmem:[#allocation2 + $0x60] ss:$100 sps:$4 sm:$0xff]   ;;  %v1960_v12 = vsel %vm13795_vm13, %v1951_v55, %v1959_v62  ;;  %v3965_v13 = vsel %vm13288_vm5, %v3963_v0, %v3964_v37  ;;  %v1961_v15 = vrot.slane %v1959_v62, 4 }
 0x2c0   : > { %v12198_v39 = vld [vmem:[%s15731_s1 + $0xba0] ss:$8 sps:$4 sm:$0xff]   ;;  %1805 = vst [vmem:[#allocation2 + $0x4d8] sm:$0xf] %v1761_v6  ;;  %v1965_v17 = vrot.slane %v1963_v61, 6  ;;  %v1764_v19 = vsel %vm13288_vm5, %v1762_v7, %v1763_v59  ;;  %v1973_v16 = vshrl.u32 %v1825_v1, 16 }
 0x2c1   : > { %10760 = vmatpush1.bf16.msra.mxu1 %v12198_v39  ;;  %v14992_v18 = vld [vmem:[%s12391_s5 + $0x34] sm:$0xf]  ;;  %2046 = vst [vmem:[#allocation2 + $0x478] sm:$0xf] %v1960_v12  ;;  %4027 = vst [vmem:[#allocation2 + $0x18c] sm:$0xf] %v3965_v13 }
 0x2c2   : > { %v1968_v63 = vrot.slane %v1966_v8, 7  ;;  %v1976_v21 = vshll.u32 %v1825_v1, 16  ;;  %v12199_v5 = vld [vmem:[%s15731_s1 + $0xbb4] ss:$8 sps:$4 sm:$0xff]   ;;  %v1701_v10 = vld [vmem:[%s12391_s5 + $0x48] sm:$0xf] }
 0x2c3   : > { %10745 = vmatprep.subr.bf16.mxu1 %v12199_v5  ;;  %v12138_v24 = vld [vmem:[#allocation2 + $0x34c] ss:$100 sps:$4 sm:$0xff]   ;;  %1806 = vst [vmem:[#allocation2 + $0x53c] sm:$0xf] %v1764_v19  ;;  %v3966_v27 = vrot.slane %v3964_v37, 4  ;;  %v1975_v31 = vrot.slane %v1973_v16, 6  ;;  %9331 = vmatmul.mubr.bf16.vlgmr.msra.gmra.mrb[0].mxu0 %v12141_v11 }
 0x2c4   : > { %v12140_v25 = vld [vmem:[#allocation2 + $0x348] ss:$100 sps:$4 sm:$0xff]   ;;  %v1969_v30 = vor.u32 %v1968_v63, %v1965_v17  ;;  %v1978_v23 = vrot.slane %v1976_v21, 7  ;;  %v3967_v32 = vrot.slane %v3922_v9, 6  ;;  %8509 = vmatprep.mubr.bf16.mxu1 %v12138_v24  ;;  %v3970_v29 = vrot.slane %v14992_v18, 6  ;;  %9340 = vmatprep.mubr.bf16.mxu0 %v12217_v4 }
 0x2c5   : > { %v1702_v22 = vld [vmem:[%s12391_s5 + $0x4c] sm:$0xf]  ;;  %v12200_v33 = vld [vmem:[%s15731_s1 + $0xbb0] ss:$8 sps:$4 sm:$0xff]   ;;  %v1765_v35 = vrot.slane %v1763_v59, 4  ;;  %v1766_v36 = vrot.slane %v1701_v10, 6  ;;  %8510 = vmatmul.mubr.bf16.gmra.mrb[16].mxu1 %v12140_v25 }
 0x2c6   : > { %10761 = vmatpush1.bf16.msra.mxu1 %v12200_v33  ;;  %v1769_v38 = vrot.slane %v1702_v22, 6  ;;  %v1826_v40 = vld [vmem:[%s12391_s5 + $0x48] sm:$0xf]  ;;  %v1970_v43 = vsel %vm13795_vm13, %v1961_v15, %v1969_v30  ;;  %v1971_v28 = vrot.slane %v1969_v30, 4  ;;  %v1979_v34 = vor.u32 %v1978_v23, %v1975_v31  ;;  %v12201_v14 = vld [vmem:[%s15731_s1 + $0xbc4] ss:$8 sps:$4 sm:$0xff]  }
 0x2c7   : > { %v3968_v26 = vsel %vm13288_vm5, %v3966_v27, %v3967_v32  ;;  %10746 = vmatprep.subr.bf16.mxu1 %v12201_v14  ;;  %v1827_v41 = vld [vmem:[%s12391_s5 + $0x4c] sm:$0xf]  ;;  %v3924_v44 = vld [vmem:[%s12391_s5 + $0x38] sm:$0xf]  ;;  %2047 = vst [vmem:[#allocation2 + $0x4dc] sm:$0xf] %v1970_v43  ;;  %v1767_v47 = vsel %vm13288_vm5, %v1765_v35, %v1766_v36 }
 0x2c8   : > { %v3969_v45 = vrot.slane %v3967_v32, 4  ;;  %4028 = vst [vmem:[#allocation2 + $0x1f0] sm:$0xf] %v3968_v26  ;;  %v1768_v48 = vrot.slane %v1766_v36, 4  ;;  %v1983_v49 = vshrl.u32 %v1826_v40, 16  ;;  %v1980_v37 = vsel %vm13795_vm13, %v1971_v28, %v1979_v34 }
 0x2c9   : > { %1807 = vst [vmem:[#allocation2 + $0x5a0] sm:$0xf] %v1767_v47  ;;  %v1981_v50 = vrot.slane %v1979_v34, 4  ;;  %v1986_v51 = vshll.u32 %v1826_v40, 16  ;;  %v1993_v52 = vshrl.u32 %v1827_v41, 16  ;;  %v1996_v7 = vshll.u32 %v1827_v41, 16 }
 0x2ca   : > { %v15021_v53 = vld [vmem:[%s12391_s5 + $0x3c] sm:$0xf]  ;;  %v12142_v55 = vld [vmem:[#allocation2 + $0x414] ss:$100 sps:$4 sm:$0xff]   ;;  %2048 = vst [vmem:[#allocation2 + $0x540] sm:$0xf] %v1980_v37  ;;  %v3971_v58 = vsel %vm13288_vm5, %v3969_v45, %v3970_v29  ;;  %v1770_v59 = vsel %vm13288_vm5, %v1768_v48, %v1769_v38 }
 0x2cb   : > { %v12144_v54 = vld [vmem:[#allocation2 + $0x410] ss:$100 sps:$4 sm:$0xff]   ;;  %v1985_v62 = vrot.slane %v1983_v49, 6  ;;  %v12202_v60 = vld [vmem:[%s15731_s1 + $0xbc0] ss:$8 sps:$4 sm:$0xff]   ;;  %v1988_v1 = vrot.slane %v1986_v51, 7  ;;  %8519 = vmatprep.mubr.bf16.mxu1 %v12142_v55 }
 0x2cc   : > { %10762 = vmatpush1.bf16.msra.mxu1 %v12202_v60  ;;  %v12145_v0 = vld [vmem:[#allocation2 + $0x128] ss:$100 sps:$4 sm:$0xff]   ;;  %4029 = vst [vmem:[#allocation2 + $0x254] sm:$0xf] %v3971_v58  ;;  %1808 = vst [vmem:[#allocation2 + $0x604] sm:$0xf] %v1770_v59 }
 0x2cd   : > { %v1995_v61 = vrot.slane %v1993_v52, 6  ;;  %v12203_v6 = vld [vmem:[%s15731_s1 + $0xbd4] ss:$8 sps:$4 sm:$0xff]   ;;  %v3972_v8 = vrot.slane %v3970_v29, 4  ;;  %v3973_v9 = vrot.slane %v3924_v44, 6  ;;  %v3976_v11 = vrot.slane %v15021_v53, 6  ;;  %8520 = vmatmul.mubr.bf16.gmra.mrb[20].mxu1 %v12144_v54  ;;  %9341 = vmatmul.mubr.bf16.gmra.mrb[4].mxu0 %v12145_v0 }
 0x2ce   : > { %10747 = vmatprep.subr.bf16.mxu1 %v12203_v6  ;;  %v1703_v12 = vld [vmem:[%s12391_s5 + $0x50] sm:$0xf]  ;;  %v1989_v13 = vor.u32 %v1988_v1, %v1985_v62  ;;  %v1771_v39 = vrot.slane %v1769_v38, 4  ;;  %v1829_v18 = vld [vmem:[%s12391_s5 + $0x54] sm:$0x1]  ;;  %v1998_v19 = vrot.slane %v1996_v7, 7  ;;  %9350 = vmatprep.mubr.bf16.mxu0 %v12217_v4 }
 0x2cf   : > { %v1772_v15 = vrot.slane %v1703_v12, 6  ;;  %v1828_v17 = vld [vmem:[%s12391_s5 + $0x50] sm:$0xf]  ;;  %v3974_v63 = vsel %vm13288_vm5, %v3972_v8, %v3973_v9  ;;  %v3975_v16 = vrot.slane %v3973_v9, 4  ;;  %v3568_v10 = vld [vmem:[%s12391_s5 + $0x40] sm:$0xf] }
 0x2d0   : > { %v12204_v21 = vld [vmem:[%s15731_s1 + $0xbd0] ss:$8 sps:$4 sm:$0xff]   ;;  %v2003_v5 = vshrl.u32 %v1828_v17, 16  ;;  %v1990_v24 = vsel %vm13795_vm13, %v1981_v50, %v1989_v13  ;;  %v1991_v25 = vrot.slane %v1989_v13, 4  ;;  %4030 = vst [vmem:[#allocation2 + $0x2b8] sm:$0xf] %v3974_v63  ;;  %v1999_v23 = vor.u32 %v1998_v19, %v1995_v61 }
 0x2d1   : > { %10763 = vmatpush1.bf16.msra.mxu1 %v12204_v21  ;;  %v1773_v27 = vsel %vm13288_vm5, %v1771_v39, %v1772_v15  ;;  %v1774_v30 = vrot.slane %v1772_v15, 4  ;;  %v12205_v31 = vld [vmem:[%s15731_s1 + $0xbe4] ss:$8 sps:$4 sm:$0xff]   ;;  %2049 = vst [vmem:[#allocation2 + $0x5a4] sm:$0xf] %v1990_v24  ;;  %v3977_v32 = vsel %vm13288_vm5, %v3975_v16, %v3976_v11  ;;  %v2006_v29 = vshll.u32 %v1828_v17, 16 }
 0x2d2   : > { %10748 = vmatprep.subr.bf16.mxu1 %v12205_v31  ;;  %1809 = vst [vmem:[#allocation2 + $0x668] sm:$0xf] %v1773_v27  ;;  %v2005_v22 = vrot.slane %v2003_v5, 6  ;;  %v3569_v33 = vld [vmem:[%s12391_s5 + $0x44] sm:$0xf]  ;;  %v2013_v40 = vshll.u32 %v1829_v18, 16  ;;  %v2000_v28 = vsel %vm13795_vm13, %v1991_v25, %v1999_v23 }
 0x2d3   : > { %v3693_v35 = vld [vmem:[%s12391_s5 + $0x40] sm:$0xf]  ;;  %v12148_v38 = vld [vmem:[#allocation2 + $0x4d8] ss:$100 sps:$4 sm:$0xff]   ;;  %4031 = vst [vmem:[#allocation2 + $0x31c] sm:$0xf] %v3977_v32 }
 0x2d4   : > { %v12146_v36 = vld [vmem:[#allocation2 + $0x4dc] ss:$100 sps:$4 sm:$0xff]   ;;  %1810 = vst [vmem:[#allocation2 + $0x6cc] sm:$0x3] %v1774_v30  ;;  %v12149_v43 = vld [vmem:[#allocation2 + $0x1f0] ss:$100 sps:$4 sm:$0xff]  }
 0x2d5   : > { %v2001_v34 = vrot.slane %v1999_v23, 4  ;;  %v2008_v26 = vrot.slane %v2006_v29, 7  ;;  %v12206_v14 = vld [vmem:[%s15731_s1 + $0xbe0] ss:$8 sps:$4 sm:$0xff]   ;;  %8529 = vmatprep.mubr.bf16.mxu1 %v12146_v36  ;;  %2050 = vst [vmem:[#allocation2 + $0x608] sm:$0xf] %v2000_v28  ;;  %9351 = vmatmul.mubr.bf16.gmra.mrb[8].mxu0 %v12149_v43 }
 0x2d6   : > { %10764 = vmatpush1.bf16.msra.mxu1 %v12206_v14  ;;  %v2015_v41 = vrot.slane %v2013_v40, 7  ;;  %v12207_v44 = vld [vmem:[%s15731_s1 + $0xbf4] ss:$8 sps:$4 sm:$0xff]   ;;  %v3620_v45 = vrot.slane %v3618_v57, 4  ;;  %v3621_v47 = vrot.slane %v3568_v10, 5  ;;  %v3624_v48 = vrot.slane %v3569_v33, 5  ;;  %9360 = vmatprep.mubr.bf16.mxu0 %v12217_v4 }
 0x2d7   : > { %10749 = vmatprep.subr.bf16.mxu1 %v12207_v44  ;;  %v3694_v49 = vld [vmem:[%s12391_s5 + $0x44] sm:$0xf]  ;;  %v2009_v37 = vor.u32 %v2008_v26, %v2005_v22  ;;  %v3790_v50 = vrot.slane %v14897_v42, 4  ;;  %v3792_v51 = vshrl.u32 %v3693_v35, 16  ;;  %v3795_v52 = vshll.u32 %v3693_v35, 16  ;;  %8530 = vmatmul.mubr.bf16.gmra.mrb[24].mxu1 %v12148_v38 }
 0x2d8   : > { %v3926_v55 = vld [vmem:[%s12391_s5 + $0x40] sm:$0xf]  ;;  %v3622_v54 = vsel %vm12888_vm11, %v3620_v45, %v3621_v47  ;;  %v3623_v58 = vrot.slane %v3621_v47, 4  ;;  %v3802_v59 = vshrl.u32 %v3694_v49, 16  ;;  %v3805_v62 = vshll.u32 %v3694_v49, 16 }
 0x2d9   : > { %v3927_v60 = vld [vmem:[%s12391_s5 + $0x44] sm:$0xf]  ;;  %v2010_v46 = vsel %vm13795_vm13, %v2001_v34, %v2009_v37  ;;  %v2011_v57 = vrot.slane %v2009_v37, 4  ;;  %v12208_v0 = vld [vmem:[%s15731_s1 + $0xbf0] ss:$8 sps:$4 sm:$0xff]   ;;  %v3794_v42 = vrot.slane %v3792_v51, 5 }
 0x2da   : > { %10765 = vmatpush1.bf16.msra.mxu1 %v12208_v0  ;;  %3674 = vst [vmem:[#allocation2 + $0x378] sm:$0xf] %v3622_v54  ;;  %v3797_v1 = vrot.slane %v3795_v52, 6  ;;  %2051 = vst [vmem:[#allocation2 + $0x66c] sm:$0xf] %v2010_v46  ;;  %v3625_v61 = vsel %vm12888_vm11, %v3623_v58, %v3624_v48  ;;  %v3804_v6 = vrot.slane %v3802_v59, 5 }
 0x2db   : > { %v3807_v7 = vrot.slane %v3805_v62, 6  ;;  %v3978_v8 = vrot.slane %v3976_v11, 4  ;;  %v3570_v9 = vld [vmem:[%s12391_s5 + $0x48] sm:$0xf]  ;;  %v2016_v12 = vsel %vm13795_vm13, %v2011_v57, %v2015_v41  ;;  %3675 = vst [vmem:[#allocation2 + $0x3dc] sm:$0xf] %v3625_v61 }
 0x2dc   : > { %v3798_v13 = vor.u32 %v3797_v1, %v3794_v42  ;;  %v3979_v39 = vrot.slane %v3926_v55, 6  ;;  %v3982_v15 = vrot.slane %v3927_v60, 6  ;;  %2052 = vst [vmem:[#allocation2 + $0x6d0] sm:$0x3] %v2016_v12  ;;  %v3571_v18 = vld [vmem:[%s12391_s5 + $0x4c] sm:$0xf] }
 0x2dd   : > { %v3808_v17 = vor.u32 %v3807_v7, %v3804_v6  ;;  %v3626_v19 = vrot.slane %v3624_v48, 4  ;;  %v3627_v63 = vrot.slane %v3570_v9, 5  ;;  %v3695_v16 = vld [vmem:[%s12391_s5 + $0x48] sm:$0xf]  ;;  %v12152_v11 = vld [vmem:[#allocation2 + $0x5a0] ss:$100 sps:$4 sm:$0xff]  }
 0x2de   : > { %v12150_v53 = vld [vmem:[#allocation2 + $0x5a4] ss:$100 sps:$4 sm:$0xff]   ;;  %v12153_v21 = vld [vmem:[#allocation2 + $0x2b8] ss:$100 sps:$4 sm:$0xff]   ;;  %v3799_v56 = vsel %vm12924_vm14, %v3790_v50, %v3798_v13  ;;  %v3800_v5 = vrot.slane %v3798_v13, 4  ;;  %v3980_v10 = vsel %vm13288_vm5, %v3978_v8, %v3979_v39  ;;  %v3981_v24 = vrot.slane %v3979_v39, 4 }
 0x2df   : > { %3907 = vst [vmem:[#allocation2 + $0x37c] sm:$0xf] %v3799_v56  ;;  %4032 = vst [vmem:[#allocation2 + $0x380] sm:$0xf] %v3980_v10  ;;  %v3628_v25 = vsel %vm12888_vm11, %v3626_v19, %v3627_v63  ;;  %v3629_v27 = vrot.slane %v3627_v63, 4  ;;  %v3630_v30 = vrot.slane %v3571_v18, 5  ;;  %8539 = vmatprep.mubr.bf16.mxu1 %v12150_v53  ;;  %9361 = vmatmul.mubr.bf16.gmra.mrb[12].mxu0 %v12153_v21 }
 0x2e0   : > { %v3696_v31 = vld [vmem:[%s12391_s5 + $0x4c] sm:$0xf]  ;;  %v3809_v23 = vsel %vm12924_vm14, %v3800_v5, %v3808_v17  ;;  %3676 = vst [vmem:[#allocation2 + $0x440] sm:$0xf] %v3628_v25  ;;  %v3810_v32 = vrot.slane %v3808_v17, 4  ;;  %v3812_v22 = vshrl.u32 %v3695_v16, 16  ;;  %v3983_v35 = vsel %vm13288_vm5, %v3981_v24, %v3982_v15  ;;  %8540 = vmatmul.mubr.bf16.gmra.mrb[28].mxu1 %v12152_v11  ;;  %9370 = vmatprep.mubr.bf16.mxu0 %v12217_v4 }
 0x2e1   : > { %v3815_v29 = vshll.u32 %v3695_v16, 16  ;;  %v3928_v33 = vld [vmem:[%s12391_s5 + $0x48] sm:$0xf]  ;;  %3908 = vst [vmem:[#allocation2 + $0x3e0] sm:$0xf] %v3809_v23  ;;  %v3631_v36 = vsel %vm12888_vm11, %v3629_v27, %v3630_v30  ;;  %v3822_v38 = vshrl.u32 %v3696_v31, 16 }
 0x2e2   : > { %v3825_v40 = vshll.u32 %v3696_v31, 16  ;;  %v3929_v43 = vld [vmem:[%s12391_s5 + $0x4c] sm:$0xf]  ;;  %v3572_v28 = vld [vmem:[%s12391_s5 + $0x50] sm:$0xf]  ;;  %v3814_v34 = vrot.slane %v3812_v22, 5 }
 0x2e3   : > { %4033 = vst [vmem:[#allocation2 + $0x3e4] sm:$0xf] %v3983_v35  ;;  %3677 = vst [vmem:[#allocation2 + $0x4a4] sm:$0xf] %v3631_v36  ;;  %v3817_v26 = vrot.slane %v3815_v29, 6  ;;  %v3984_v14 = vrot.slane %v3982_v15, 4 }
 0x2e4   : > { %v3985_v41 = vrot.slane %v3928_v33, 6  ;;  %v3824_v44 = vrot.slane %v3822_v38, 5  ;;  %v3827_v45 = vrot.slane %v3825_v40, 6  ;;  %v3988_v47 = vrot.slane %v3929_v43, 6  ;;  %v3573_v48 = vld [vmem:[%s12391_s5 + $0x54] sm:$0xf] }
 0x2e5   : > { %v3632_v49 = vrot.slane %v3630_v30, 4  ;;  %v12154_v37 = vld [vmem:[#allocation2 + $0x66c] ss:$100 sps:$4 sm:$0x3f]   ;;  %v3818_v50 = vor.u32 %v3817_v26, %v3814_v34  ;;  %v3633_v58 = vrot.slane %v3572_v28, 5  ;;  %v3636_v59 = vrot.slane %v3573_v48, 5 }
 0x2e6   : > { %v3986_v51 = vsel %vm13288_vm5, %v3984_v14, %v3985_v41  ;;  %v3987_v52 = vrot.slane %v3985_v41, 4  ;;  %v12156_v55 = vld [vmem:[#allocation2 + $0x668] ss:$100 sps:$4 sm:$0x3f]   ;;  %v3828_v54 = vor.u32 %v3827_v45, %v3824_v44  ;;  %8549 = vmatprep.mubr.bf16.mxu1 %v12154_v37  ;;  %v3697_v57 = vld [vmem:[%s12391_s5 + $0x50] sm:$0xf] }
 0x2e7   : > { %4034 = vst [vmem:[#allocation2 + $0x448] sm:$0xf] %v3986_v51  ;;  %v3819_v62 = vsel %vm12924_vm14, %v3810_v32, %v3818_v50  ;;  %v3820_v60 = vrot.slane %v3818_v50, 4  ;;  %v3634_v0 = vsel %vm12888_vm11, %v3632_v49, %v3633_v58  ;;  %v3635_v42 = vrot.slane %v3633_v58, 4  ;;  %v3698_v1 = vld [vmem:[%s12391_s5 + $0x54] sm:$0xf] }
 0x2e8   : > { %v3989_v46 = vsel %vm13288_vm5, %v3987_v52, %v3988_v47  ;;  %3909 = vst [vmem:[#allocation2 + $0x444] sm:$0xf] %v3819_v62  ;;  %v3832_v61 = vshrl.u32 %v3697_v57, 16  ;;  %v12159_v6 = vld [vmem:[#allocation2 + $0x37c] ss:$100 sps:$4 sm:$0xff]   ;;  %v3830_v8 = vrot.slane %v3828_v54, 4  ;;  %8550 = vmatmul.mubr.bf16.gmra.mrb[32].mxu1 %v12156_v55 }
 0x2e9   : > { %4035 = vst [vmem:[#allocation2 + $0x4ac] sm:$0xf] %v3989_v46  ;;  %v3829_v7 = vsel %vm12924_vm14, %v3820_v60, %v3828_v54  ;;  %3678 = vst [vmem:[#allocation2 + $0x508] sm:$0xf] %v3634_v0  ;;  %v3835_v9 = vshll.u32 %v3697_v57, 16  ;;  %v3990_v12 = vrot.slane %v3988_v47, 4  ;;  %v3637_v39 = vsel %vm12888_vm11, %v3635_v42, %v3636_v59  ;;  %9247 = vmatprep.mubr.bf16.mxu1 %v12159_v6 }
 0x2ea   : > { %v12160_v13 = vld [vmem:[#allocation2 + $0x380] ss:$100 sps:$4 sm:$0xff]   ;;  %3910 = vst [vmem:[#allocation2 + $0x4a8] sm:$0xf] %v3829_v7  ;;  %v3834_v15 = vrot.slane %v3832_v61, 5  ;;  %v3842_v17 = vshrl.u32 %v3698_v1, 16 }
 0x2eb   : > { %3679 = vst [vmem:[#allocation2 + $0x56c] sm:$0xf] %v3637_v39  ;;  %v3837_v18 = vrot.slane %v3835_v9, 6  ;;  %v3845_v19 = vshll.u32 %v3698_v1, 16  ;;  %v3930_v63 = vld [vmem:[%s12391_s5 + $0x50] sm:$0xf]  ;;  %9371 = vmatmul.mubr.bf16.gmra.mrb[36].mxu0 %v12160_v13 }
 0x2ec   : > { %v3931_v16 = vld [vmem:[%s12391_s5 + $0x54] sm:$0xf]  ;;  %v3844_v53 = vrot.slane %v3842_v17, 5  ;;  %v3991_v11 = vrot.slane %v3930_v63, 6  ;;  %v3574_v56 = vld [vmem:[%s12391_s5 + $0x58] sm:$0xf]  ;;  %9380 = vmatprep.mubr.bf16.mxu0 %v12217_v4 }
 0x2ed   : > { %v3994_v21 = vrot.slane %v3931_v16, 6  ;;  %v3638_v5 = vrot.slane %v3636_v59, 4  ;;  %v3838_v10 = vor.u32 %v3837_v18, %v3834_v15  ;;  %v3847_v24 = vrot.slane %v3845_v19, 6  ;;  %v3575_v25 = vld [vmem:[%s12391_s5 + $0x5c] sm:$0xf] }
 0x2ee   : > { %v3639_v27 = vrot.slane %v3574_v56, 5  ;;  %v12157_v30 = vld [vmem:[#allocation2 + $0x378] ss:$100 sps:$4 sm:$0xff]   ;;  %v3992_v31 = vsel %vm13288_vm5, %v3990_v12, %v3991_v11  ;;  %v3993_v23 = vrot.slane %v3991_v11, 4  ;;  %v3642_v32 = vrot.slane %v3575_v25, 5 }
 0x2ef   : > { %v3699_v22 = vld [vmem:[%s12391_s5 + $0x58] sm:$0xf]  ;;  %v3839_v29 = vsel %vm12924_vm14, %v3830_v8, %v3838_v10  ;;  %v3840_v33 = vrot.slane %v3838_v10, 4  ;;  %v3848_v35 = vor.u32 %v3847_v24, %v3844_v53  ;;  %4036 = vst [vmem:[#allocation2 + $0x510] sm:$0xf] %v3992_v31  ;;  %v3996_v52 = vrot.slane %v3994_v21, 4 }
 0x2f0   : > { %v3640_v36 = vsel %vm12888_vm11, %v3638_v5, %v3639_v27  ;;  %v3700_v38 = vld [vmem:[%s12391_s5 + $0x5c] sm:$0xf]  ;;  %3911 = vst [vmem:[#allocation2 + $0x50c] sm:$0xf] %v3839_v29  ;;  %v3995_v40 = vsel %vm13288_vm5, %v3993_v23, %v3994_v21  ;;  %v3641_v43 = vrot.slane %v3639_v27, 4  ;;  %v3852_v28 = vshrl.u32 %v3699_v22, 16  ;;  %9248 = vmatmul.mubr.bf16.vlgmr.msra.gmra.mrb[36].mxu1 %v12157_v30 }
 0x2f1   : > { %3680 = vst [vmem:[#allocation2 + $0x5d0] sm:$0xf] %v3640_v36  ;;  %v3855_v34 = vshll.u32 %v3699_v22, 16  ;;  %v3932_v26 = vld [vmem:[%s12391_s5 + $0x58] sm:$0xf]  ;;  %v3849_v44 = vsel %vm12924_vm14, %v3840_v33, %v3848_v35  ;;  %v3850_v45 = vrot.slane %v3848_v35, 4 }
 0x2f2   : > { %v12161_v14 = vld [vmem:[#allocation2 + $0x444] ss:$100 sps:$4 sm:$0xff]   ;;  %4037 = vst [vmem:[#allocation2 + $0x574] sm:$0xf] %v3995_v40  ;;  %3912 = vst [vmem:[#allocation2 + $0x570] sm:$0xf] %v3849_v44  ;;  %v3643_v47 = vsel %vm12888_vm11, %v3641_v43, %v3642_v32 }
 0x2f3   : > { %v12164_v41 = vld [vmem:[#allocation2 + $0x448] ss:$100 sps:$4 sm:$0xff]   ;;  %v3854_v48 = vrot.slane %v3852_v28, 5  ;;  %v3857_v49 = vrot.slane %v3855_v34, 6  ;;  %v3862_v37 = vshrl.u32 %v3700_v38, 16  ;;  %v3865_v51 = vshll.u32 %v3700_v38, 16  ;;  %9257 = vmatprep.mubr.bf16.mxu1 %v12161_v14 }
 0x2f4   : > { %v3933_v50 = vld [vmem:[%s12391_s5 + $0x5c] sm:$0xf]  ;;  %3681 = vst [vmem:[#allocation2 + $0x634] sm:$0xf] %v3643_v47  ;;  %v3997_v55 = vrot.slane %v3932_v26, 6  ;;  %v3644_v60 = vrot.slane %v3642_v32, 4  ;;  %9381 = vmatmul.mubr.bf16.gmra.mrb[40].mxu0 %v12164_v41 }
 0x2f5   : > { %v4000_v54 = vrot.slane %v3933_v50, 6  ;;  %v3576_v58 = vld [vmem:[%s12391_s5 + $0x60] sm:$0x7]  ;;  %v3858_v59 = vor.u32 %v3857_v49, %v3854_v48  ;;  %v3864_v62 = vrot.slane %v3862_v37, 5  ;;  %v3867_v0 = vrot.slane %v3865_v51, 6  ;;  %9390 = vmatprep.mubr.bf16.mxu0 %v12217_v4 }
 0x2f6   : > { %v3645_v46 = vrot.slane %v3576_v58, 5  ;;  %v3701_v57 = vld [vmem:[%s12391_s5 + $0x60] sm:$0xf]  ;;  %v3998_v42 = vsel %vm13288_vm5, %v3996_v52, %v3997_v55  ;;  %v3999_v1 = vrot.slane %v3997_v55, 4  ;;  %v12167_v27 = vld [vmem:[#allocation2 + $0x508] ss:$100 sps:$4 sm:$0xff]  }
 0x2f7   : > { %v3872_v61 = vshrl.u32 %v3701_v57, 16  ;;  %v3934_v6 = vld [vmem:[%s12391_s5 + $0x60] sm:$0xf]  ;;  %v3859_v7 = vsel %vm12924_vm14, %v3850_v45, %v3858_v59  ;;  %v3860_v8 = vrot.slane %v3858_v59, 4  ;;  %4038 = vst [vmem:[#allocation2 + $0x5d8] sm:$0xf] %v3998_v42  ;;  %v3868_v39 = vor.u32 %v3867_v0, %v3864_v62 }
 0x2f8   : > { %v3646_v9 = vsel %vm12888_vm11, %v3644_v60, %v3645_v46  ;;  %v3647_v12 = vrot.slane %v3645_v46, 4  ;;  %v12163_v13 = vld [vmem:[#allocation2 + $0x440] ss:$100 sps:$4 sm:$0xff]   ;;  %3913 = vst [vmem:[#allocation2 + $0x5d4] sm:$0xf] %v3859_v7  ;;  %v4001_v15 = vsel %vm13288_vm5, %v3999_v1, %v4000_v54  ;;  %v3875_v17 = vshll.u32 %v3701_v57, 16 }
 0x2f9   : > { %3682 = vst [vmem:[#allocation2 + $0x698] sm:$0xf] %v3646_v9  ;;  %4039 = vst [vmem:[#allocation2 + $0x63c] sm:$0xf] %v4001_v15  ;;  %v3874_v18 = vrot.slane %v3872_v61, 5  ;;  %v4002_v19 = vrot.slane %v4000_v54, 4  ;;  %v3869_v20 = vsel %vm12924_vm14, %v3860_v8, %v3868_v39  ;;  %9258 = vmatmul.mubr.bf16.gmra.mrb[40].mxu1 %v12163_v13  ;;  %v4678_v42 = vlaneseq }
 0x2fa   : > { %3683 = vst [vmem:[#allocation2 + $0x6fc] sm:$0x3] %v3647_v12  ;;  %v4003_v63 = vrot.slane %v3934_v6, 6  ;;  %v12165_v16 = vld [vmem:[#allocation2 + $0x50c] ss:$100 sps:$4 sm:$0xff]   ;;  %v3870_v11 = vrot.slane %v3868_v39, 4 }
 0x2fb   : > { %v12168_v53 = vld [vmem:[#allocation2 + $0x510] ss:$100 sps:$4 sm:$0xff]   ;;  %3914 = vst [vmem:[#allocation2 + $0x638] sm:$0xf] %v3869_v20  ;;  %v3877_v21 = vrot.slane %v3875_v17, 6  ;;  %9267 = vmatprep.mubr.bf16.mxu1 %v12165_v16  ;;  %v4679_v1 = vshrl.u32 %v4678_v42, 7 }
 0x2fc   : > { %v4004_v56 = vsel %vm13288_vm5, %v4002_v19, %v4003_v63  ;;  %v4005_v5 = vrot.slane %v4003_v63, 4  ;;  %9391 = vmatmul.mubr.bf16.gmra.mrb[44].mxu0 %v12168_v53  ;;  %v12171_v3 = vld [vmem:[#allocation2 + $0x5d0] ss:$100 sps:$4 sm:$0xff]   ;;  %v4676_v12 = vld [vmem:[%s15732_s2] sm:$0x3]  ;;  %vm9585_vm7 = vcmask 1045509  }
 0x2fd   : > { %4040 = vst [vmem:[#allocation2 + $0x6a0] sm:$0xf] %v4004_v56  ;;  %v3878_v10 = vor.u32 %v3877_v21, %v3874_v18  ;;  %9400 = vmatprep.mubr.bf16.mxu0 %v12217_v4  ;;  %v4680_v9 = vsub.s32 0, %v4679_v1  ;;  %v4684_v13 = vsub.s32 1, %v4679_v1  ;;  %vm9586_vm8 = vsmask.f32 5376 }
 0x2fe   : > { %4041 = vst [vmem:[#allocation2 + $0x704] sm:$0x3] %v4005_v5  ;;  %vm9545_vm11 = vsmask.f32 4352  ;;  %vm9570_vm5 = vsmask.f32 7938  ;;  %vm15340_vm0 = vmand %vm9585_vm7, %vm9586_vm8 }
 0x2ff   : > { %v3879_v24 = vsel %vm12924_vm14, %v3870_v11, %v3878_v10  ;;  %v3880_v25 = vrot.slane %v3878_v10, 4  ;;  %v15218_v39 = vrot.slane %v4676_v12, %v4680_v9  ;;  %v15220_v15 = vrot.slane %v4676_v12, %v4684_v13  ;;  %vm15357_vm8 = vmand %vm974_vm2, %vm1087_vm4 }
 0x300   : > { %3915 = vst [vmem:[#allocation2 + $0x69c] sm:$0xf] %v3879_v24  ;;  %v12172_v31 = vld [vmem:[#allocation2 + $0x5d8] ss:$100 sps:$4 sm:$0xff]   ;;  %vm9612_vm14 = vsmask.f32 7942  ;;  %vm15367_vm12 = vmand %vm975_vm3, %vm9545_vm11 }
 0x301   : > { %3916 = vst [vmem:[#allocation2 + $0x700] sm:$0x3] %v3880_v25  ;;  %9268 = vmatmul.mubr.bf16.gmra.mrb[44].mxu1 %v12167_v27  ;;  %v12175_v22 = vld [vmem:[#allocation2 + $0x698] ss:$100 sps:$4 sm:$0x3f]   ;;  %vm9685_vm13 = vcmask 1042434   ;;  %vm15736_vm4 = vmor %vm15340_vm0, %vm15332_vm10 }
 0x302   : > { %v12169_v30 = vld [vmem:[#allocation2 + $0x5d4] ss:$100 sps:$4 sm:$0xff]   ;;  %vm15377_vm9 = vmand %vm9583_vm6, %vm9612_vm14 }
 0x303   : > { %9277 = vmatprep.mubr.bf16.mxu1 %v12169_v30  ;;  %vm15383_vm11 = vmand %vm9585_vm7, %vm9614_vm1  ;;  %vm15777_vm1 = vsmask.f32 2304 }
 0x304   : > { %9401 = vmatmul.mubr.bf16.gmra.mrb[48].mxu0 %v12172_v31  ;;  %vm15737_vm6 = vmor %vm15367_vm12, %vm15357_vm8 }
 0x305   : > { %9410 = vmatprep.mubr.bf16.mxu0 %v12217_v4  ;;  %v12176_v32 = vld [vmem:[#allocation2 + $0x6a0] ss:$100 sps:$4 sm:$0x3f]   ;;  %vm15740_vm7 = vmor %vm15383_vm11, %vm15377_vm9 }
 0x306   : > { %vm15432_vm14 = vmand %vm974_vm2, %vm9570_vm5  ;;  %vm15780_vm2 = vsmask.f32 6400  ;;  %vm15781_vm5 = vcmask 1046534  }
 0x308   : > { %v12173_v23 = vld [vmem:[#allocation2 + $0x69c] ss:$100 sps:$4 sm:$0x3f]  }
 0x309   : > { %9278 = vmatmul.mubr.bf16.gmra.mrb[48].mxu1 %v12171_v3 }
 0x30a   : > { %9287 = vmatprep.mubr.bf16.mxu1 %v12173_v23 }
 0x30c   : > { %9411 = vmatmul.mubr.bf16.gmra.mrb[52].mxu0 %v12176_v32 }
 0x311   : > { %9288 = vmatmul.mubr.bf16.gmra.mrb[52].mxu1 %v12175_v22 }
 0x31a   : > { %v9126_v2 = vpop.f32.mrb[16].mxu0 }
 0x31b   : > { %v15161_v29 = vpop.f32.mrb[17].mxu0 }
 0x31c   : > { %v15163_v33 = vpop.f32.mrb[18].mxu0 }
 0x31d   : > { %v15165_v35 = vpop.f32.mrb[19].mxu0 }
 0x327   : > { %v15167_v36 = vpop.f32.mrb[20].mxu0 }
 0x328   : > { %v15169_v38 = vpop.f32.mrb[21].mxu0 }
 0x329   : > { %v15171_v4 = vpop.f32.mrb[22].mxu0 }
 0x32a   : > { %v15173_v40 = vpop.f32.mrb[23].mxu0 }
 0x335   : > { %v15175_v43 = vpop.f32.mrb[24].mxu0 }
 0x336   : > { %v15177_v28 = vpop.f32.mrb[25].mxu0 }
 0x337   : > { %v15179_v34 = vpop.f32.mrb[26].mxu0 }
 0x338   : > { %v15181_v26 = vpop.f32.mrb[27].mxu0 }
 0x343   : > { %v15183_v14 = vpop.f32.mrb[28].mxu0 }
 0x344   : > { %v15185_v41 = vpop.f32.mrb[29].mxu0 }
 0x345   : > { %v15187_v44 = vpop.f32.mrb[30].mxu0 }
 0x346   : > { %v15189_v45 = vpop.f32.mrb[31].mxu0 }
 0x34c   : > { %v15191_v47 = vpop.f32.mrb[32].mxu0 }
 0x34d   : > { %v15193_v48 = vpop.f32.mrb[33].mxu0 }
 0x34e   : > { %v15195_v49 = vpop.f32.mrb[34].mxu0 }
 0x34f   : > { %v15197_v37 = vpop.f32.mrb[35].mxu0 }
 0x359   : > { %v8471_v50 = vpop.f32.mrb[0].mxu1 }
 0x35a   : > { %v8473_v51 = vpop.f32.mrb[1].mxu1  ;;  %v10766_v17 = vadd.f32 %v8471_v50, %v15218_v39 }
 0x35b   : > { %v8475_v52 = vpop.f32.mrb[2].mxu1  ;;  %v10768_v19 = vadd.f32 %v8473_v51, %v15220_v15 }
 0x35c   : > { %v8477_v55 = vpop.f32.mrb[3].mxu1  ;;  %v10770_v20 = vadd.f32 %v8475_v52, %v15218_v39 }
 0x35d   : > { %v10772_v10 = vadd.f32 %v8477_v55, %v15220_v15 }
 0x369   : > { %v8481_v54 = vpop.f32.mrb[4].mxu1 }
 0x36a   : > { %v8483_v58 = vpop.f32.mrb[5].mxu1  ;;  %v10774_v9 = vadd.f32 %v8481_v54, %v15218_v39 }
 0x36b   : > { %v8485_v59 = vpop.f32.mrb[6].mxu1  ;;  %v10776_v13 = vadd.f32 %v8483_v58, %v15220_v15 }
 0x36c   : > { %v8487_v62 = vpop.f32.mrb[7].mxu1 }
 0x378   : > { %v15199_v60 = vpop.f32.mrb[8].mxu1 }
 0x379   : > { %v15201_v46 = vpop.f32.mrb[9].mxu1 }
 0x37a   : > { %v15203_v57 = vpop.f32.mrb[10].mxu1 }
 0x37b   : > { %v15205_v0 = vpop.f32.mrb[11].mxu1 }
 0x388   : > { %v15207_v61 = vpop.f32.mrb[12].mxu1 }
 0x389   : > { %v15209_v6 = vpop.f32.mrb[13].mxu1 }
 0x38a   : > { %v15211_v7 = vpop.f32.mrb[14].mxu1 }
 0x38b   : > { %v15213_v8 = vpop.f32.mrb[15].mxu1 }
 0x396   : > { %v9332_v16 = vpop.f32.mrb[0].mxu0 }
 0x397   : > { %v15226_v11 = vadd.f32 %v10766_v17, %v9332_v16  ;;  %v9334_v56 = vpop.f32.mrb[1].mxu0 }
 0x398   : > { %v8511_v18 = vpop.f32.mrb[16].mxu1  ;;  %v15230_v24 = vadd.f32 %v10768_v19, %v9334_v56  ;;  %v9336_v27 = vpop.f32.mrb[2].mxu0  ;;  %v10778_v19 = vadd.f32 %v8485_v59, %v15218_v39 }
 0x399   : > { %v10798_v63 = vadd.f32 %v8511_v18, %v15218_v39  ;;  %v8513_v53 = vpop.f32.mrb[17].mxu1  ;;  %v9421_v3 = vmax.f32 %v15226_v11, 0.0  ;;  %v10771_v23 = vadd.f32 %v10770_v20, %v9336_v27  ;;  %v9338_v22 = vpop.f32.mrb[3].mxu0 }
 0x39a   : > { %v10802_v21 = vadd.f32 %v8513_v53, %v15220_v15  ;;  %v8515_v5 = vpop.f32.mrb[18].mxu1  ;;  %v9422_v51 = vmax.f32 %v15230_v24, 0.0  ;;  %v10773_v52 = vadd.f32 %v10772_v10, %v9338_v22  ;;  %v10780_v53 = vadd.f32 %v8487_v62, %v15220_v15 }
 0x39b   : > { %v10806_v25 = vadd.f32 %v8515_v5, %v15218_v39  ;;  %v8517_v30 = vpop.f32.mrb[19].mxu1  ;;  %v15233_v31 = vadd.f32 %v10798_v63, %v9126_v2  ;;  %v9423_v42 = vmax.f32 %v10771_v23, 0.0 }
 0x39c   : > { %v10810_v32 = vadd.f32 %v8517_v30, %v15220_v15  ;;  %v15238_v50 = vadd.f32 %v10802_v21, %v15161_v29  ;;  %v9424_v2 = vmax.f32 %v10773_v52, 0.0 }
 0x39d   : > { %v15242_v55 = vadd.f32 %v10806_v25, %v15163_v33  ;;  %9459 = vst [vmem:[#allocation3 + $0x10] sm:$0xff] %v9423_v42  ;;  %v10782_v42 = vadd.f32 %v15199_v60, %v15218_v39 }
 0x39e   : > { %v15245_v1 = vadd.f32 %v10810_v32, %v15165_v35  ;;  %9460 = vst [vmem:[#allocation3 + $0x18] sm:$0xff] %v9424_v2  ;;  %v10784_v2 = vadd.f32 %v15201_v46, %v15220_v15 }
 0x3a0   : > { %v8521_v12 = vpop.f32.mrb[20].mxu1  ;;  %v9342_v17 = vpop.f32.mrb[4].mxu0 }
 0x3a1   : > { %v10814_v29 = vadd.f32 %v8521_v12, %v15218_v39  ;;  %v8523_v18 = vpop.f32.mrb[21].mxu1  ;;  %v10775_v33 = vadd.f32 %v10774_v9, %v9342_v17  ;;  %v9344_v16 = vpop.f32.mrb[5].mxu0 }
 0x3a2   : > { %v10818_v63 = vadd.f32 %v8523_v18, %v15220_v15  ;;  %v8525_v35 = vpop.f32.mrb[22].mxu1  ;;  %v10777_v20 = vadd.f32 %v10776_v13, %v9344_v16  ;;  %v9346_v21 = vpop.f32.mrb[6].mxu0  ;;  %v10786_v13 = vadd.f32 %v15203_v57, %v15218_v39 }
 0x3a3   : > { %v10822_v54 = vadd.f32 %v8525_v35, %v15218_v39  ;;  %v8527_v56 = vpop.f32.mrb[23].mxu1  ;;  %v15255_v58 = vadd.f32 %v10814_v29, %v15167_v36  ;;  %v9425_v5 = vmax.f32 %v10775_v33, 0.0  ;;  %v10779_v10 = vadd.f32 %v10778_v19, %v9346_v21  ;;  %v9348_v59 = vpop.f32.mrb[7].mxu0 }
 0x3a4   : > { %v10826_v25 = vadd.f32 %v8527_v56, %v15220_v15  ;;  %v15259_v27 = vadd.f32 %v10818_v63, %v15169_v38  ;;  %v9426_v30 = vmax.f32 %v10777_v20, 0.0  ;;  %v10781_v23 = vadd.f32 %v10780_v53, %v9348_v59  ;;  %v9497_v52 = vld [vmem:[#allocation3 + $0x10] sm:$0xc0] }
 0x3a5   : > { %v15262_v62 = vadd.f32 %v10822_v54, %v15171_v4  ;;  %v9427_v32 = vmax.f32 %v10779_v10, 0.0  ;;  %v9510_v9 = vrot.slane %v9497_v52, 6  ;;  %v9498_v38 = vld [vmem:[#allocation3 + $0x18] sm:$0xc0]  ;;  %v15271_v12 = vrot.slane %v9425_v5, 6 }
 0x3a6   : > { %v15265_v22 = vadd.f32 %v10826_v25, %v15173_v40  ;;  %v9428_v36 = vmax.f32 %v10781_v23, 0.0  ;;  %v10788_v40 = vadd.f32 %v15205_v0, %v15220_v15  ;;  %v9513_v29 = vrot.slane %v9498_v38, 6 }
 0x3a7   : > { %9463 = vst [vmem:[#allocation3 + $0x30] sm:$0xff] %v9427_v32  ;;  %v15277_v17 = vrot.slane %v9426_v30, 6  ;;  %v9512_v18 = vsel %vm15738_vm15, %v9510_v9, %v15271_v12 }
 0x3a8   : > { %9464 = vst [vmem:[#allocation3 + $0x38] sm:$0xff] %v9428_v36  ;;  %v9352_v60 = vpop.f32.mrb[8].mxu0  ;;  %v9524_v0 = vmax.f32 %v9421_v3, %v9512_v18  ;;  %v10790_v3 = vadd.f32 %v15207_v61, %v15218_v39 }
 0x3a9   : > { %v15282_v33 = vadd.f32 %v10782_v42, %v9352_v60  ;;  %v9354_v63 = vpop.f32.mrb[9].mxu0  ;;  %v9515_v35 = vsel %vm15738_vm15, %v9513_v29, %v15277_v17  ;;  %v10792_v60 = vadd.f32 %v15209_v6, %v15220_v15 }
 0x3aa   : > { %v8531_v4 = vpop.f32.mrb[24].mxu1  ;;  %v15289_v53 = vadd.f32 %v10784_v2, %v9354_v63  ;;  %v9356_v54 = vpop.f32.mrb[10].mxu0  ;;  %v9525_v56 = vmax.f32 %v9422_v51, %v9515_v35  ;;  %v9530_v59 = vrot.slane %v9524_v0, 1  ;;  %v9551_v32 = vrot.slane %v9524_v0, 2 }
 0x3ab   : > { %v8533_v46 = vpop.f32.mrb[25].mxu1  ;;  %v10830_v19 = vadd.f32 %v8531_v4, %v15218_v39  ;;  %v9429_v5 = vmax.f32 %v15282_v33, 0.0  ;;  %v10787_v10 = vadd.f32 %v10786_v13, %v9356_v54  ;;  %v9358_v11 = vpop.f32.mrb[11].mxu0 }
 0x3ac   : > { %v10834_v57 = vadd.f32 %v8533_v46, %v15220_v15  ;;  %v8535_v16 = vpop.f32.mrb[26].mxu1  ;;  %v9430_v30 = vmax.f32 %v15289_v53, 0.0  ;;  %v10789_v23 = vadd.f32 %v10788_v40, %v9358_v11  ;;  %v9531_v52 = vrot.slane %v9525_v56, 1 }
 0x3ad   : > { %v10838_v20 = vadd.f32 %v8535_v16, %v15218_v39  ;;  %v8537_v21 = vpop.f32.mrb[27].mxu1  ;;  %v9431_v36 = vmax.f32 %v10787_v10, 0.0  ;;  %v15300_v24 = vadd.f32 %v10830_v19, %v15175_v43  ;;  %v15302_v51 = vmax.f32 %v9524_v0, %v9530_v59 }
 0x3ae   : > { %v10842_v25 = vadd.f32 %v8537_v21, %v15220_v15  ;;  %v9501_v42 = vld [vmem:[#allocation3 + $0x30] sm:$0xf]  ;;  %v9432_v2 = vmax.f32 %v10789_v23, 0.0  ;;  %v15305_v9 = vadd.f32 %v10834_v57, %v15177_v28  ;;  %v15310_v38 = vmax.f32 %v9525_v56, %v9531_v52 }
 0x3af   : > { %v15308_v61 = vadd.f32 %v10838_v20, %v15179_v34  ;;  %v9552_v4 = vrot.slane %v9525_v56, 2  ;;  %v9516_v13 = vrot.slane %v9501_v42, 6  ;;  %v9502_v40 = vld [vmem:[#allocation3 + $0x38] sm:$0xf]  ;;  %9467 = vst [vmem:[#allocation3 + $0x50] sm:$0xff] %v9431_v36  ;;  %v10794_v28 = vadd.f32 %v15211_v7, %v15218_v39 }
 0x3b0   : > { %v15313_v43 = vadd.f32 %v10842_v25, %v15181_v26  ;;  %v9555_v34 = vmax.f32 %v15302_v51, %v9551_v32  ;;  %v9518_v46 = vrot.slane %v9502_v40, 6  ;;  %9468 = vst [vmem:[#allocation3 + $0x58] sm:$0xff] %v9432_v2  ;;  %v9495_v57 = vld [vmem:[#allocation3 + $0x10] sm:$0x3f]  ;;  %v10721_v63 = vpack.c.bf16 %v15310_v38, %v15302_v51  ;;  %v9496_v20 = vld [vmem:[#allocation3 + $0x18] sm:$0x3f] }
 0x3b1   : > { %v9556_v16 = vmax.f32 %v15310_v38, %v9552_v4  ;;  %v9517_v26 = vsel %vm15738_vm15, %v15271_v12, %v9516_v13  ;;  %v10796_v7 = vadd.f32 %v15213_v8, %v15220_v15  ;;  %v9589_v13 = vld [vmem:[%s15350_s17] sm:$0x22] }
 0x3b2   : > { %v9362_v18 = vpop.f32.mrb[12].mxu0  ;;  %v9526_v54 = vmax.f32 %v9495_v57, %v9517_v26  ;;  %v9519_v21 = vsel %vm15738_vm15, %v15277_v17, %v9518_v46  ;;  %v9620_v46 = vld [vmem:[#allocation3 + $0x30] sm:$0xf0] }
 0x3b3   : > { %v8541_v29 = vpop.f32.mrb[28].mxu1  ;;  %v10791_v6 = vadd.f32 %v10790_v3, %v9362_v18  ;;  %v9364_v0 = vpop.f32.mrb[13].mxu0  ;;  %v15336_v11 = vpack.c.bf16 %v9556_v16, %v9555_v34  ;;  %v9527_v3 = vmax.f32 %v9496_v20, %v9519_v21 }
 0x3b4   : > { %v8543_v19 = vpop.f32.mrb[29].mxu1  ;;  %v10793_v12 = vadd.f32 %v10792_v60, %v9364_v0  ;;  %v9366_v10 = vpop.f32.mrb[14].mxu0  ;;  %v15345_v17 = vadd.f32 %v8541_v29, %v15218_v39  ;;  %v9594_v32 = vrot.slane %v9526_v54, 1  ;;  %v9972_v0 = vld [vmem:[%s15350_s17 + $0x8] sm:$0x88] }
 0x3b5   : > { %v8545_v35 = vpop.f32.mrb[30].mxu1  ;;  %v9433_v59 = vmax.f32 %v10791_v6, 0.0  ;;  %v9368_v23 = vpop.f32.mrb[15].mxu0  ;;  %v15353_v52 = vadd.f32 %v8543_v19, %v15220_v15  ;;  %v10795_v42 = vadd.f32 %v10794_v28, %v9366_v10  ;;  %v9578_v4 = vshrl.u32 %v15336_v11, 16 }
 0x3b6   : > { %v8547_v25 = vpop.f32.mrb[31].mxu1  ;;  %v9434_v36 = vmax.f32 %v10793_v12, 0.0  ;;  %v9595_v40 = vrot.slane %v9527_v3, 1  ;;  %v10854_v29 = vadd.f32 %v8545_v35, %v15218_v39  ;;  %v9598_v28 = vmax.f32 %v9526_v54, %v9594_v32  ;;  %v9624_v18 = vld [vmem:[#allocation3 + $0x50] sm:$0xfc] }
 0x3b7   : > { %v10858_v60 = vadd.f32 %v8547_v25, %v15220_v15  ;;  %v9634_v19 = vrot.slane %v9433_v59, 6  ;;  %v9435_v57 = vmax.f32 %v10795_v42, 0.0  ;;  %v10797_v16 = vadd.f32 %v10796_v7, %v9368_v23  ;;  %v9625_v20 = vld [vmem:[#allocation3 + $0x58] sm:$0xfc] }
 0x3b8   : > { %v10702_v26 = vrot.slane %v9578_v4, 9  ;;  %v9599_v6 = vmax.f32 %v9527_v3, %v9595_v40  ;;  %v9632_v35 = vrot.slane %v9624_v18, 6  ;;  %v9636_v54 = vrot.slane %v9434_v36, 6  ;;  %v9621_v42 = vld [vmem:[#allocation3 + $0x38] sm:$0xf0] }
 0x3b9   : > { %v9633_v7 = vrot.slane %v9625_v20, 6  ;;  %v15387_v10 = vrot.slane %v9435_v57, 4  ;;  %v9436_v25 = vmax.f32 %v10797_v16, 0.0  ;;  %v9548_v57 = vld [vmem:[%s15350_s17] sm:$0x11]  ;;  %v15446_v51 = vadd.f32 %v15345_v17, %v15183_v14 }
 0x3ba   : > { %v9590_v32 = vsel %vm15736_vm4, %v10702_v26, %v9589_v13  ;;  %v10723_v36 = vpack.c.bf16 %v9599_v6, %v9598_v28  ;;  %v9642_v4 = vmax.f32 %v9620_v46, %v9632_v35  ;;  %v9635_v40 = vsel %vm15738_vm15, %v9632_v35, %v9634_v19  ;;  %vm15439_vm4 = vmand %vm9685_vm13, %vm15777_vm1 }
 0x3bb   : > { %v8551_v21 = vpop.f32.mrb[32].mxu1  ;;  %9591 = vst [vmem:[%s15350_s17] sm:$0x22] %v9590_v32  ;;  %v9643_v16 = vmax.f32 %v9621_v42, %v9633_v7  ;;  %v9637_v13 = vsel %vm15738_vm15, %v9633_v7, %v9636_v54  ;;  %v15407_v28 = vrot.slane %v9436_v25, 4  ;;  %v9549_v53 = vsel %vm15737_vm6, %v10721_v63, %v9548_v57  ;;  %vm15454_vm6 = vmand %vm15781_vm5, %vm15780_vm2 }
 0x3bc   : > { %v10862_v3 = vadd.f32 %v8551_v21, %v15218_v39  ;;  %v8553_v59 = vpop.f32.mrb[33].mxu1  ;;  %v15404_v21 = vmax.f32 %v9429_v5, %v9635_v40  ;;  %v9608_v26 = vshll.u32 %v10723_v36, 16  ;;  %v15415_v6 = vmax.f32 %v9430_v30, %v9637_v13  ;;  %9550 = vst [vmem:[%s15350_s17] sm:$0x11] %v9549_v53 }
 0x3bd   : > { %v8555_v18 = vpop.f32.mrb[34].mxu1  ;;  %v9665_v33 = vmax.f32 %v9642_v4, %v15387_v10  ;;  %v10866_v5 = vadd.f32 %v8553_v59, %v15220_v15  ;;  %v9666_v54 = vmax.f32 %v9643_v16, %v15407_v28  ;;  %v9565_v59 = vshll.u32 %v15336_v11, 16 }
 0x3be   : > { %v9372_v23 = vpop.f32.mrb[36].mxu0  ;;  %v8557_v46 = vpop.f32.mrb[35].mxu1  ;;  %v10870_v7 = vadd.f32 %v8555_v18, %v15218_v39  ;;  %v15450_v38 = vadd.f32 %v15353_v52, %v15185_v41  ;;  %v15459_v32 = vadd.f32 %v10854_v29, %v15187_v44  ;;  %v15462_v36 = vadd.f32 %v10858_v60, %v15189_v45 }
 0x3bf   : > { %v9374_v20 = vpop.f32.mrb[37].mxu0  ;;  %v10874_v25 = vadd.f32 %v8557_v46, %v15220_v15  ;;  %v9671_v39 = vrot.slane %v9665_v33, 1  ;;  %v15778_v15 = vmov 0  ;;  %v9672_v63 = vrot.slane %v9666_v54, 1 }
 0x3c0   : > { %v9376_v19 = vpop.f32.mrb[38].mxu0  ;;  %v15779_v15 = vsel %vm15439_vm4, 4294967295, %v15778_v15  ;;  %v15465_v14 = vadd.f32 %v10862_v3, %v15191_v47  ;;  %vm15784_vm1 = vsmask.f32 7954  ;;  %v15476_v42 = vadd.f32 %v10866_v5, %v15193_v48  ;;  %v9691_v48 = vld [vmem:[%s15350_s17] sm:$0x44] }
 0x3c1   : > { %v9378_v35 = vpop.f32.mrb[39].mxu0  ;;  %v15467_v41 = vmax.f32 %v9665_v33, %v9671_v39  ;;  %vm15471_vm15 = vmand %vm975_vm3, %vm15784_vm1  ;;  %v15479_v44 = vadd.f32 %v10870_v7, %v15195_v49  ;;  %v15482_v45 = vadd.f32 %v10874_v25, %v15197_v37  ;;  %v9610_v47 = vrot.slane %v9608_v26, 7 }
 0x3c2   : > { %v15484_v29 = vmax.f32 %v9666_v54, %v9672_v63  ;;  %v9617_v40 = vld [vmem:[%s15350_s17] sm:$0x22]  ;;  %vm15739_vm3 = vmor %vm15454_vm6, %vm15439_vm4  ;;  %vm15742_vm5 = vcmask 1043456   ;;  %vm9715_vm1 = vsmask.f32 7946 }
 0x3c3   : > { %v9249_v17 = vpop.f32.mrb[36].mxu1  ;;  %vm15741_vm2 = vmor %vm15471_vm15, %vm15432_vm14  ;;  %v9575_v25 = vld [vmem:[%s15350_s17] sm:$0x11] }
 0x3c4   : > { %v10800_v60 = vadd.f32 %v15233_v31, %v9249_v17  ;;  %v9251_v3 = vpop.f32.mrb[37].mxu1  ;;  %v9618_v31 = vsel %vm15740_vm7, %v9610_v47, %v9617_v40  ;;  %v10724_v57 = vpack.c.bf16 %v15484_v29, %v15467_v41 }
 0x3c5   : > { %v10804_v49 = vadd.f32 %v15238_v50, %v9251_v3  ;;  %v9253_v18 = vpop.f32.mrb[38].mxu1  ;;  %v10701_v50 = vrot.slane %v9565_v59, 9  ;;  %9619 = vst [vmem:[%s15350_s17] sm:$0x22] %v9618_v31 }
 0x3c6   : > { %v10801_v16 = vadd.f32 %v10800_v60, %v9372_v23  ;;  %v10808_v13 = vadd.f32 %v15242_v55, %v9253_v18  ;;  %v9255_v46 = vpop.f32.mrb[39].mxu1  ;;  %v9692_v55 = vsel %vm15739_vm3, %v10724_v57, %v9691_v48  ;;  %vm9717_vm3 = vsmask.f32 7962 }
 0x3c7   : > { %v9382_v4 = vpop.f32.mrb[40].mxu0  ;;  %v10805_v33 = vadd.f32 %v10804_v49, %v9374_v20  ;;  %v10812_v5 = vadd.f32 %v15245_v1, %v9255_v46  ;;  %9693 = vst [vmem:[%s15350_s17] sm:$0x44] %v9692_v55  ;;  %v9576_v1 = vsel %vm15741_vm2, %v10701_v50, %v9575_v25  ;;  %vm15557_vm2 = vmand %vm9685_vm13, %vm9715_vm1  ;;  %vm15792_vm1 = vcmask 1041408  }
 0x3c8   : > { %v9384_v37 = vpop.f32.mrb[41].mxu0  ;;  %v9437_v23 = vmax.f32 %v10801_v16, 0.0  ;;  %v15513_v7 = vadd.f32 %v10808_v13, %v9376_v19  ;;  %9577 = vst [vmem:[%s15350_s17] sm:$0x11] %v9576_v1  ;;  %vm15793_vm4 = vmmov %vm15792_vm1 }
 0x3c9   : > { %v9386_v26 = vpop.f32.mrb[42].mxu0  ;;  %v9438_v53 = vmax.f32 %v10805_v33, 0.0  ;;  %v15517_v39 = vadd.f32 %v10812_v5, %v9378_v35 }
 0x3ca   : > { %v9388_v54 = vpop.f32.mrb[43].mxu0  ;;  %9473 = vst [vmem:[#allocation3 + $0x80] sm:$0xff] %v9437_v23  ;;  %v9439_v20 = vmax.f32 %v15513_v7, 0.0 }
 0x3cb   : > { %9474 = vst [vmem:[#allocation3 + $0x88] sm:$0xff] %v9438_v53  ;;  %v9440_v59 = vmax.f32 %v15517_v39, 0.0 }
 0x3cc   : > { %v9259_v19 = vpop.f32.mrb[40].mxu1 }
 0x3cd   : > { %v10816_v63 = vadd.f32 %v15255_v58, %v9259_v19  ;;  %v9261_v17 = vpop.f32.mrb[41].mxu1 }
 0x3ce   : > { %v10820_v35 = vadd.f32 %v15259_v27, %v9261_v17  ;;  %v9263_v60 = vpop.f32.mrb[42].mxu1 }
 0x3cf   : > { %v9392_v47 = vpop.f32.mrb[44].mxu0  ;;  %v10817_v40 = vadd.f32 %v10816_v63, %v9382_v4  ;;  %v10824_v48 = vadd.f32 %v15262_v62, %v9263_v60  ;;  %v9265_v49 = vpop.f32.mrb[43].mxu1 }
 0x3d0   : > { %v9394_v3 = vpop.f32.mrb[45].mxu0  ;;  %v10821_v31 = vadd.f32 %v10820_v35, %v9384_v37  ;;  %v10828_v57 = vadd.f32 %v15265_v22, %v9265_v49 }
 0x3d1   : > { %v9396_v18 = vpop.f32.mrb[46].mxu0  ;;  %v9441_v13 = vmax.f32 %v10817_v40, 0.0  ;;  %v10825_v46 = vadd.f32 %v10824_v48, %v9386_v26  ;;  %v9648_v50 = vld [vmem:[#allocation3 + $0x80] sm:$0x3f] }
 0x3d2   : > { %v9398_v16 = vpop.f32.mrb[47].mxu0  ;;  %v9442_v58 = vmax.f32 %v10821_v31, 0.0  ;;  %v10829_v33 = vadd.f32 %v10828_v57, %v9388_v54  ;;  %v9657_v5 = vrot.slane %v9648_v50, 4  ;;  %v9649_v55 = vld [vmem:[#allocation3 + $0x88] sm:$0x3f] }
 0x3d3   : > { %9477 = vst [vmem:[#allocation3 + $0xa0] sm:$0xff] %v9441_v13  ;;  %v9443_v27 = vmax.f32 %v10825_v46, 0.0  ;;  %v9659_v23 = vrot.slane %v9649_v55, 4 }
 0x3d4   : > { %9478 = vst [vmem:[#allocation3 + $0xa8] sm:$0xff] %v9442_v58  ;;  %v9444_v4 = vmax.f32 %v10829_v33, 0.0  ;;  %v9269_v62 = vpop.f32.mrb[44].mxu1  ;;  %v9658_v37 = vsel %vm15742_vm5, %v15387_v10, %v9657_v5 }
 0x3d5   : > { %v10832_v22 = vadd.f32 %v15300_v24, %v9269_v62  ;;  %v9271_v25 = vpop.f32.mrb[45].mxu1  ;;  %v9667_v54 = vmax.f32 %v15404_v21, %v9658_v37  ;;  %v9660_v53 = vsel %vm15742_vm5, %v15407_v28, %v9659_v23  ;;  %v9786_v35 = vrot.slane %v9443_v27, 6 }
 0x3d6   : > { %v10836_v1 = vadd.f32 %v15305_v9, %v9271_v25  ;;  %v9273_v19 = vpop.f32.mrb[46].mxu1  ;;  %v9668_v17 = vmax.f32 %v15415_v6, %v9660_v53  ;;  %v9788_v23 = vrot.slane %v9444_v4, 6  ;;  %vm15789_vm5 = vcmask 1046534  }
 0x3d7   : > { %v15534_v26 = vpop.f32.mrb[48].mxu0  ;;  %v10833_v10 = vadd.f32 %v10832_v22, %v9392_v47  ;;  %v10840_v24 = vadd.f32 %v15308_v61, %v9273_v19  ;;  %v9275_v60 = vpop.f32.mrb[47].mxu1  ;;  %v9696_v48 = vrot.slane %v9667_v54, 2  ;;  %v9723_v49 = vrot.slane %v9667_v54, 1  ;;  %vm15564_vm7 = vmand %vm15789_vm5, %vm9717_vm3 }
 0x3d8   : > { %v15540_v63 = vpop.f32.mrb[49].mxu0  ;;  %v10837_v21 = vadd.f32 %v10836_v1, %v9394_v3  ;;  %v10844_v31 = vadd.f32 %v15313_v43, %v9275_v60  ;;  %v9697_v9 = vrot.slane %v9668_v17, 2  ;;  %v9724_v57 = vrot.slane %v9668_v17, 1  ;;  %v9772_v1 = vld [vmem:[#allocation3 + $0x80] sm:$0xc0]  ;;  %vm15744_vm5 = vmor %vm15564_vm7, %vm15557_vm2 }
 0x3d9   : > { %v15544_v40 = vpop.f32.mrb[50].mxu0  ;;  %v9445_v13 = vmax.f32 %v10833_v10, 0.0  ;;  %v10841_v46 = vadd.f32 %v10840_v24, %v9396_v18  ;;  %v9700_v6 = vmax.f32 %v15467_v41, %v9696_v48  ;;  %v15550_v47 = vmax.f32 %v9667_v54, %v9723_v49 }
 0x3da   : > { %v15547_v28 = vpop.f32.mrb[51].mxu0  ;;  %v9776_v61 = vld [vmem:[#allocation3 + $0xa0] sm:$0xf0]  ;;  %v9446_v50 = vmax.f32 %v10837_v21, 0.0  ;;  %v10845_v58 = vadd.f32 %v10844_v31, %v9398_v16  ;;  %v9701_v33 = vmax.f32 %v15484_v29, %v9697_v9  ;;  %v15553_v5 = vmax.f32 %v9668_v17, %v9724_v57 }
 0x3db   : > { %v9784_v3 = vrot.slane %v9776_v61, 6  ;;  %v9777_v43 = vld [vmem:[#allocation3 + $0xa8] sm:$0xf0]  ;;  %9481 = vst [vmem:[#allocation3 + $0xc0] sm:$0xff] %v9445_v13  ;;  %v9447_v55 = vmax.f32 %v10841_v46, 0.0  ;;  %v15787_v18 = vmov 0  ;;  %v9729_v41 = vmax.f32 %v15550_v47, %v9696_v48 }
 0x3dc   : > { %v15788_v18 = vsel %vm15557_vm2, 4294967295, %v15787_v18  ;;  %v9785_v27 = vrot.slane %v9777_v43, 6  ;;  %9482 = vst [vmem:[#allocation3 + $0xc8] sm:$0xff] %v9446_v50  ;;  %v9448_v16 = vmax.f32 %v10845_v58, 0.0  ;;  %v9279_v62 = vpop.f32.mrb[48].mxu1  ;;  %v15790_v29 = vmov 0 }
 0x3dd   : > { %v15791_v29 = vsel %vm15564_vm7, 4294967295, %v15790_v29  ;;  %v10725_v37 = vpack.c.bf16 %v9701_v33, %v9700_v6  ;;  %v9730_v22 = vmax.f32 %v15553_v5, %v9697_v9  ;;  %v10727_v25 = vpack.c.bf16 %v15553_v5, %v15550_v47  ;;  %v9281_v54 = vpop.f32.mrb[49].mxu1  ;;  %v9773_v48 = vld [vmem:[#allocation3 + $0x88] sm:$0xc0]  ;;  %v9720_v58 = vld [vmem:[%s15350_s17] sm:$0x44] }
 0x3de   : > { %v9787_v4 = vsel %vm15792_vm1, %v9784_v3, %v9786_v35  ;;  %v9789_v19 = vsel %vm15793_vm4, %v9785_v27, %v9788_v23  ;;  %v9283_v17 = vpop.f32.mrb[50].mxu1  ;;  %vm9746_vm3 = vsmask.f32 7424  ;;  %v9794_v49 = vmax.f32 %v9772_v1, %v9784_v3  ;;  %v9874_v5 = vld [vmem:[%s15350_s17 + $0x8] sm:$0x22] }
 0x3df   : > { %v9412_v53 = vpop.f32.mrb[52].mxu0  ;;  %v9710_v24 = vshll.u32 %v10725_v37, 16  ;;  %v10726_v60 = vpack.c.bf16 %v9730_v22, %v9729_v41  ;;  %v9796_v21 = vmax.f32 %v9439_v20, %v9787_v4  ;;  %v9285_v31 = vpop.f32.mrb[51].mxu1  ;;  %v9795_v35 = vmax.f32 %v9773_v48, %v9785_v27 }
 0x3e0   : > { %v15573_v10 = vpop.f32.mrb[53].mxu0  ;;  %v9797_v57 = vmax.f32 %v9440_v59, %v9789_v19  ;;  %v10848_v13 = vadd.f32 %v15446_v51, %v9279_v62  ;;  %v10852_v46 = vadd.f32 %v15450_v38, %v9281_v54  ;;  %v9808_v20 = vrot.slane %v9447_v55, 4 }
 0x3e1   : > { %v9416_v9 = vpop.f32.mrb[54].mxu0  ;;  %v10706_v61 = vrot.slane %v9710_v24, 9  ;;  %v9739_v7 = vshrl.u32 %v10726_v60, 16  ;;  %v10856_v50 = vadd.f32 %v15459_v32, %v9283_v17  ;;  %v9810_v3 = vrot.slane %v9448_v16, 4 }
 0x3e2   : > { %v15585_v6 = vpop.f32.mrb[55].mxu0  ;;  %v9798_v33 = vld [vmem:[#allocation3 + $0xc0] sm:$0xfc]  ;;  %v15590_v43 = vadd.f32 %v10848_v13, %v15534_v26  ;;  %v15593_v39 = vadd.f32 %v10852_v46, %v15540_v63  ;;  %v10860_v51 = vadd.f32 %v15462_v36, %v9285_v31  ;;  %vm15794_vm1 = vsmask.f32 3328 }
 0x3e3   : > { %v9721_v38 = vsel %vm15744_vm5, %v10706_v61, %v9720_v58  ;;  %v9741_v59 = vrot.slane %v9739_v7, 5  ;;  %v9806_v32 = vrot.slane %v9798_v33, 4  ;;  %v9799_v55 = vld [vmem:[#allocation3 + $0xc8] sm:$0xfc]  ;;  %v10857_v41 = vadd.f32 %v10856_v50, %v15544_v40 }
 0x3e4   : > { %9722 = vst [vmem:[%s15350_s17] sm:$0x44] %v9721_v38  ;;  %v9807_v26 = vrot.slane %v9799_v55, 4  ;;  %v9449_v27 = vmax.f32 %v15590_v43, 0.0  ;;  %v9450_v63 = vmax.f32 %v15593_v39, 0.0  ;;  %v10861_v36 = vadd.f32 %v10860_v51, %v15547_v28  ;;  %v9289_v23 = vpop.f32.mrb[52].mxu1 }
 0x3e5   : > { %vm15795_vm4 = vcmask 1043459   ;;  %v15796_v16 = vmov 0  ;;  %v9816_v62 = vmax.f32 %v9794_v49, %v9806_v32  ;;  %vm15798_vm5 = vcmask 1043456   ;;  %v9291_v54 = vpop.f32.mrb[53].mxu1 }
 0x3e6   : > { %vm15608_vm13 = vmand %vm15795_vm4, %vm15794_vm1  ;;  %v9809_v37 = vsel %vm15798_vm5, %v9806_v32, %v9808_v20  ;;  %v9451_v22 = vmax.f32 %v10857_v41, 0.0  ;;  %v10864_v40 = vadd.f32 %v15465_v14, %v9289_v23  ;;  %vm15799_vm2 = vcmask 1047559   ;;  %v9293_v24 = vpop.f32.mrb[54].mxu1 }
 0x3e7   : > { %v15797_v16 = vsel %vm15608_vm13, 4294967295, %v15796_v16  ;;  %vm15616_vm7 = vmand %vm15799_vm2, %vm9746_vm3  ;;  %v9817_v28 = vmax.f32 %v9795_v35, %v9807_v26  ;;  %v9818_v4 = vmax.f32 %v9796_v21, %v9809_v37  ;;  %v9452_v17 = vmax.f32 %v10861_v36, 0.0  ;;  %v9295_v31 = vpop.f32.mrb[55].mxu1  ;;  %v9749_v21 = vld [vmem:[%s15350_s17] sm:$0x88] }
 0x3e8   : > { %vm15802_vm4 = vmmov %vm15798_vm5  ;;  %v9822_v60 = vrot.slane %v9816_v62, 1  ;;  %9487 = vst [vmem:[#allocation3 + $0xf0] sm:$0xff] %v9451_v22  ;;  %v10865_v49 = vadd.f32 %v10864_v40, %v9412_v53  ;;  %v10868_v14 = vadd.f32 %v15476_v42, %v9291_v54  ;;  %v10872_v61 = vadd.f32 %v15479_v44, %v9293_v24 }
 0x3e9   : > { %v9811_v19 = vsel %vm15802_vm4, %v9807_v26, %v9810_v3  ;;  %v9823_v13 = vrot.slane %v9817_v28, 1  ;;  %v9843_v46 = vrot.slane %v9818_v4, 1  ;;  %9488 = vst [vmem:[#allocation3 + $0xf8] sm:$0xff] %v9452_v17  ;;  %vm15747_vm2 = vmor %vm15616_vm7, %vm15608_vm13  ;;  %vm9766_vm3 = vsmask.f32 7966 }
 0x3ea   : > { %v9819_v48 = vmax.f32 %v9797_v57, %v9811_v19  ;;  %v9826_v35 = vmax.f32 %v9816_v62, %v9822_v60  ;;  %v9849_v57 = vrot.slane %v9818_v4, 2  ;;  %v9453_v7 = vmax.f32 %v10865_v49, 0.0  ;;  %v9838_v26 = vld [vmem:[%s15350_s17 + $0x8] sm:$0x11] }
 0x3eb   : > { %v9827_v42 = vmax.f32 %v9817_v28, %v9823_v13  ;;  %v9847_v20 = vmax.f32 %v9818_v4, %v9843_v46  ;;  %v10869_v50 = vadd.f32 %v10868_v14, %v15573_v10  ;;  %v10873_v58 = vadd.f32 %v10872_v61, %v9416_v9 }
 0x3ec   : > { %v9844_v53 = vrot.slane %v9819_v48, 1  ;;  %v9850_v44 = vrot.slane %v9819_v48, 2  ;;  %v10876_v3 = vadd.f32 %v15482_v45, %v9295_v31  ;;  %v9750_v51 = vsel %vm15747_vm2, %v9741_v59, %v9749_v21 }
 0x3ed   : > { %v10728_v38 = vpack.c.bf16 %v9827_v42, %v9826_v35  ;;  %v9853_v32 = vmax.f32 %v9847_v20, %v9849_v57  ;;  %v9454_v55 = vmax.f32 %v10869_v50, 0.0  ;;  %v9455_v41 = vmax.f32 %v10873_v58, 0.0  ;;  %9751 = vst [vmem:[%s15350_s17] sm:$0x88] %v9750_v51 }
 0x3ee   : > { %v9848_v33 = vmax.f32 %v9819_v48, %v9844_v53  ;;  %v10877_v9 = vadd.f32 %v10876_v3, %v15585_v6  ;;  %vm15803_vm5 = vsmask.f32 7950  ;;  %vm15804_vm1 = vcmask 1043459  }
 0x3ef   : > { %vm15640_vm4 = vmand %vm15804_vm1, %vm15803_vm5  ;;  %v9760_v59 = vshll.u32 %v10727_v25, 16  ;;  %v10710_v23 = vrot.slane %v10728_v38, 11  ;;  %v9897_v62 = vld [vmem:[#allocation3 + $0xf0] sm:$0xc0]  ;;  %9491 = vst [vmem:[#allocation3 + $0x110] sm:$0xf] %v9455_v41  ;;  %vm15818_vm1 = vnez %v15779_v15 }
 0x3f0   : > { %v9854_v36 = vmax.f32 %v9848_v33, %v9850_v44  ;;  %v10730_v10 = vpack.c.bf16 %v9848_v33, %v9847_v20  ;;  %vm15807_vm2 = vcmask 1047559   ;;  %v9909_v22 = vrot.slane %v9897_v62, 6  ;;  %v9898_v40 = vld [vmem:[#allocation3 + $0xf8] sm:$0xc0]  ;;  %vm15810_vm5 = vmor %vm15367_vm12, %vm15357_vm8  ;;  %v9895_v35 = vld [vmem:[#allocation3 + $0xf0] sm:$0x3f] }
 0x3f1   : > { %vm15649_vm13 = vmand %vm15807_vm2, %vm9766_vm3  ;;  %v9910_v54 = vrot.slane %v9453_v7, 6  ;;  %v9839_v47 = vsel %vm15810_vm5, %v10710_v23, %v9838_v26  ;;  %v9912_v25 = vrot.slane %v9898_v40, 6  ;;  %v9913_v28 = vrot.slane %v9454_v55, 6  ;;  %v9944_v44 = vld [vmem:[%s15350_s17 + $0x8] sm:$0x44] }
 0x3f2   : > { %v10729_v6 = vpack.c.bf16 %v9854_v36, %v9853_v32  ;;  %v9456_v4 = vmax.f32 %v10877_v9, 0.0  ;;  %9840 = vst [vmem:[%s15350_s17 + $0x8] sm:$0x11] %v9839_v47  ;;  %vm15811_vm2 = vcmask 1041408   ;;  %vm9768_vm3 = vmor %vm15649_vm13, %vm15640_vm4  ;;  %v9762_v34 = vrot.slane %v9760_v59, 7 }
 0x3f3   : > { %v9911_v17 = vsel %vm15811_vm2, %v9909_v22, %v9910_v54  ;;  %vm15812_vm12 = vmmov %vm15811_vm2  ;;  %v9885_v8 = vshll.u32 %v10730_v10, 16  ;;  %v9896_v41 = vld [vmem:[#allocation3 + $0xf8] sm:$0x3f] }
 0x3f4   : > { %v9869_v19 = vshrl.u32 %v10729_v6, 16  ;;  %v9923_v2 = vmax.f32 %v9449_v27, %v9911_v17  ;;  %v9914_v24 = vsel %vm15812_vm12, %v9912_v25, %v9913_v28  ;;  %9492 = vst [vmem:[#allocation3 + $0x118] sm:$0xf] %v9456_v4  ;;  %vm15813_vm8 = vmor %vm15340_vm0, %vm15332_vm10  ;;  %v9769_v49 = vld [vmem:[%s15350_s17] sm:$0x88]  ;;  %v9863_v46 = vshll.u32 %v10729_v6, 16 }
 0x3f5   : > { %v9924_v48 = vmax.f32 %v9450_v63, %v9914_v24  ;;  %v9770_v43 = vsel %vm9768_vm3, %v9762_v34, %v9769_v49  ;;  %vm15814_vm0 = vmmov %vm15811_vm2  ;;  %v10714_v33 = vrot.slane %v9885_v8, 10  ;;  %vm15823_vm2 = vnez %v15788_v18 }
 0x3f6   : > { %v9875_v60 = vsel %vm15813_vm8, %v9869_v19, %v9874_v5  ;;  %v9929_v14 = vrot.slane %v9923_v2, 1  ;;  %v9901_v31 = vld [vmem:[#allocation3 + $0x110] sm:$0xf]  ;;  %9771 = vst [vmem:[%s15350_s17] sm:$0x88] %v9770_v43  ;;  %v9947_v13 = vrot.slane %v9923_v2, 2  ;;  %vm15815_vm10 = vmor %vm15471_vm15, %vm15432_vm14 }
 0x3f7   : > { %9876 = vst [vmem:[%s15350_s17 + $0x8] sm:$0x22] %v9875_v60  ;;  %v9930_v27 = vrot.slane %v9924_v48, 1  ;;  %v9915_v39 = vrot.slane %v9901_v31, 6  ;;  %v9948_v61 = vrot.slane %v9924_v48, 2  ;;  %vm15816_vm15 = vmor %vm15383_vm11, %vm15377_vm9  ;;  %vm15820_vm9 = vnez %v15797_v16 }
 0x3f8   : > { %v9933_v56 = vmax.f32 %v9923_v2, %v9929_v14  ;;  %vm15817_vm14 = vmmov %vm15814_vm0 }
 0x3f9   : > { %v9934_v63 = vmax.f32 %v9924_v48, %v9930_v27  ;;  %v9866_v21 = vld [vmem:[%s15350_s17 + $0x8] sm:$0x11]  ;;  %v9916_v53 = vsel %vm15814_vm0, %v9910_v54, %v9915_v39  ;;  %vm15819_vm5 = vmor %vm15454_vm6, %vm15818_vm1  ;;  %vm15822_vm6 = vnez %v15791_v29 }
 0x3fa   : > { %v9951_v57 = vmax.f32 %v9933_v56, %v9947_v13  ;;  %v9867_v7 = vsel %vm15815_vm10, %v9863_v46, %v9866_v21  ;;  %v9925_v50 = vmax.f32 %v9895_v35, %v9916_v53  ;;  %vm15821_vm11 = vmor %vm15616_vm7, %vm15820_vm9 }
 0x3fb   : > { %v10731_v42 = vpack.c.bf16 %v9934_v63, %v9933_v56  ;;  %v9952_v20 = vmax.f32 %v9934_v63, %v9948_v61  ;;  %v9902_v58 = vld [vmem:[#allocation3 + $0x118] sm:$0xf]  ;;  %9868 = vst [vmem:[%s15350_s17 + $0x8] sm:$0x11] %v9867_v7  ;;  %vm15824_vm12 = vmor %vm15822_vm6, %vm15823_vm2 }
 0x3fc   : > { %v9917_v3 = vrot.slane %v9902_v58, 6  ;;  %v9977_v52 = vrot.slane %v9925_v50, 1 }
 0x3fd   : > { %v9942_v38 = vrot.slane %v10731_v42, 6  ;;  %v10732_v32 = vpack.c.bf16 %v9952_v20, %v9951_v57 }
 0x3fe   : > { %v9890_v51 = vld [vmem:[%s15350_s17 + $0x8] sm:$0x22]  ;;  %v9918_v55 = vsel %vm15817_vm14, %v9913_v28, %v9917_v3  ;;  %v9981_v59 = vmax.f32 %v9925_v50, %v9977_v52 }
 0x3ff   : > { %v9891_v30 = vsel %vm15816_vm15, %v10714_v33, %v9890_v51  ;;  %v9945_v26 = vsel %vm15819_vm5, %v9942_v38, %v9944_v44  ;;  %v9968_v36 = vshrl.u32 %v10732_v32, 16  ;;  %v9926_v12 = vmax.f32 %v9896_v41, %v9918_v55 }
 0x400   : > { %9892 = vst [vmem:[%s15350_s17 + $0x8] sm:$0x22] %v9891_v30  ;;  %9946 = vst [vmem:[%s15350_s17 + $0x8] sm:$0x44] %v9945_v26  ;;  %v9961_v9 = vshll.u32 %v10732_v32, 16 }
 0x401   : > { %v9970_v10 = vrot.slane %v9968_v36, 7  ;;  %v9978_v23 = vrot.slane %v9926_v12, 1 }
 0x402   : > { %v9963_v62 = vrot.slane %v9961_v9, 7 }
 0x403   : > { %v9973_v11 = vsel %vm15821_vm11, %v9970_v10, %v9972_v0  ;;  %v9982_v15 = vmax.f32 %v9926_v12, %v9978_v23 }
 0x404   : > { %9974 = vst [vmem:[%s15350_s17 + $0x8] sm:$0x88] %v9973_v11 }
 0x405   : > { %v10733_v6 = vpack.c.bf16 %v9982_v15, %v9981_v59 }
 0x407   : > { %v9965_v22 = vld [vmem:[%s15350_s17 + $0x8] sm:$0x44]  ;;  %v9991_v54 = vshll.u32 %v10733_v6, 16 }
 0x408   : > { %v9966_v40 = vsel %vm15824_vm12, %v9963_v62, %v9965_v22 }
 0x409   : > { %9967 = vst [vmem:[%s15350_s17 + $0x8] sm:$0x44] %v9966_v40  ;;  %v9993_v47 = vrot.slane %v9991_v54, 5 }
 0x40b   : > { %v9995_v5 = vld [vmem:[%s15350_s17 + $0x8] sm:$0x88] }
 0x40c   : > { %v9996_v16 = vsel %vm9768_vm3, %v9993_v47, %v9995_v5 }
 0x40d   : > { %9997 = vst [vmem:[%s15350_s17 + $0x8] sm:$0x88] %v9996_v16 }
 0x40e PF: > { %s13_s12 = sadd.s32 1, %s12215_s12  }
 0x40f   : > { %p10_p4 = scmp.ge.s32.totalorder %s13_s12, 4  }
 0x411   :  { %12 = sbr.rel (!%p10_p4) target bundleno = 1 (0x1), region = 62 }

</bundles_post_ra>
